<compile_context>
chip_gen: v6e
topology: v6e:2x2x1
jax: 0.10.0
libtpu: 0.0.40
codegen_flags: <defaults>
</compile_context>

<pallas_src>
import jax
import jax.numpy as jnp
from jax.experimental import pallas as pl
from jax.experimental.pallas import tpu as pltpu


# ------------------------------ fused kernel -------------------------------- #

def _cnn_fused_kernel(a1_ref, w1_ref, b1_ref, w2_ref, b2_ref,
                      wfc1_ref, bfc1_ref, wfc2_ref, bfc2_ref,
                      o_ref, h1_ref):
    """Whole CNN forward for one sample, entirely in VMEM.

    a1_ref:   (1, 576, 32)  bf16  conv1 im2col (quadrant-major rows, K padded 25->32)
    w1_ref:   (32, 128)     bf16  conv1 weights (rows >=25 and cols >=65 zero)
    b1_ref:   (1, 128)      f32
    w2_ref:   (9, 128, 128) bf16  conv2 weights per 3x3 tap (cin/cout padded to 128)
    b2_ref:   (1, 128)      f32
    wfc1_ref: (3200, 1024)  bf16  FC1, row = (h*5+w)*128 + c (zero rows for c >= 64)
    bfc1_ref: (1, 1024)     f32
    wfc2_ref: (1024, 128)   bf16  FC2 (cols >= 10 zero)
    bfc2_ref: (1, 128)      f32   (lanes >= 10 = -1e30)
    o_ref:    (1, 1, 128)   f32   softmax probabilities (padded lanes ~ 0)
    h1_ref:   (152, 128)    f32   scratch: pooled conv1 output, raster rows + pad rows
    """
    # ---- conv1 (matmul over im2col) + bias + ReLU + 2x2 maxpool (quadrant max) ----
    acc1 = jnp.dot(a1_ref[0], w1_ref[...], preferred_element_type=jnp.float32)
    acc1 = jnp.maximum(acc1 + b1_ref[...], 0.0)                       # (576, 128)
    PP = 144                                                          # 12*12 pooled positions
    h1 = jnp.maximum(jnp.maximum(acc1[0 * PP:1 * PP], acc1[1 * PP:2 * PP]),
                     jnp.maximum(acc1[2 * PP:3 * PP], acc1[3 * PP:4 * PP]))
    h1_ref[0:PP, :] = h1                                              # row r = oh*12 + ow
    h1_ref[PP:PP + 8, :] = jnp.zeros((8, 128), jnp.float32)           # pad rows for slab over-read

    # ---- conv2 via shifted-slab matmuls: acc2[r] = sum_t h1[r + off_t] @ W2_t ----
    acc2 = jnp.zeros((120, 128), jnp.float32)
    for t in range(9):
        di, dj = divmod(t, 3)
        off = di * 12 + dj
        slab = h1_ref[off:off + 120, :].astype(jnp.bfloat16)          # contiguous VMEM read
        acc2 = acc2 + jnp.dot(slab, w2_ref[t], preferred_element_type=jnp.float32)
    acc2 = jnp.maximum(acc2 + b2_ref[...], 0.0)                       # valid rows: oh, ow <= 9

    # ---- 2x2 maxpool of conv2 + flatten: 25 pooled (1,128) rows -> lane-aligned (1,3200) ----
    pieces = []
    for i in range(5):
        for j in range(5):
            r = 24 * i + 2 * j                                        # = (2i)*12 + 2j
            pr = jnp.maximum(jnp.maximum(acc2[r:r + 1, :], acc2[r + 1:r + 2, :]),
                             jnp.maximum(acc2[r + 12:r + 13, :], acc2[r + 13:r + 14, :]))
            pieces.append(pr)
    flat = jnp.concatenate(pieces, axis=1).astype(jnp.bfloat16)       # (1, 3200)

    # ---- FC1 + ReLU + dropout(eval identity) + FC2 + softmax (f32 epilogue math) ----
    h = jnp.dot(flat, wfc1_ref[...], preferred_element_type=jnp.float32) + bfc1_ref[...]
    h = jnp.maximum(h, 0.0)
    # TODO(synk): training-mode dropout (p=0.1) not implemented (eval identity).
    logits = jnp.dot(h.astype(jnp.bfloat16), wfc2_ref[...],
                     preferred_element_type=jnp.float32) + bfc2_ref[...]
    m = jnp.max(logits, axis=-1, keepdims=True)
    e = jnp.exp(logits - m)
    o_ref[0] = (e / jnp.sum(e, axis=-1, keepdims=True)).astype(o_ref.dtype)


def cnn_fused_call(a1, w1, b1, w2, b2, wfc1, bfc1, wfc2, bfc2):
    N = a1.shape[0]
    return pl.pallas_call(
        _cnn_fused_kernel,
        out_shape=jax.ShapeDtypeStruct((N, 1, 128), jnp.float32),
        grid=(N,),
        in_specs=[
            pl.BlockSpec((1, 576, 32), lambda n: (n, 0, 0)),      # per-sample im2col
            pl.BlockSpec((32, 128), lambda n: (0, 0)),            # weights: constant index ->
            pl.BlockSpec((1, 128), lambda n: (0, 0)),             #   fetched once, reused
            pl.BlockSpec((9, 128, 128), lambda n: (0, 0, 0)),
            pl.BlockSpec((1, 128), lambda n: (0, 0)),
            pl.BlockSpec((3200, 1024), lambda n: (0, 0)),
            pl.BlockSpec((1, 1024), lambda n: (0, 0)),
            pl.BlockSpec((1024, 128), lambda n: (0, 0)),
            pl.BlockSpec((1, 128), lambda n: (0, 0)),
        ],
        out_specs=pl.BlockSpec((1, 1, 128), lambda n: (n, 0, 0)),
        scratch_shapes=[pltpu.VMEM((152, 128), jnp.float32)],
        compiler_params=pltpu.CompilerParams(
            dimension_semantics=("parallel",),            # v7x: one sample per TensorCore
            vmem_limit_bytes=32 * 1024 * 1024),           # ~16 MiB actual; fits v7x 64 MiB
    )(a1, w1, b1, w2, b2, wfc1, bfc1, wfc2, bfc2)


# ------------------------------- JAX glue ------------------------------------ #

def conv1_im2col(x_nhw):
    """(N, 28, 28) f32 -> (N, 576, 32) bf16 quadrant-major im2col for the 5x5 conv.

    Quadrant s = p*2+q (p, q = parities of the conv-output row/col) occupies rows
    [s*144, (s+1)*144) in (i*12 + j) raster order, so the 2x2 maxpool in the kernel is
    an elementwise max of four 144-row slabs. K is padded 25 -> 32 for clean DMA.
    """
    N = x_nhw.shape[0]
    cols = [x_nhw[:, di:di + 24, dj:dj + 24] for di in range(5) for dj in range(5)]
    p = jnp.stack(cols, axis=-1)                      # (N, 24, 24, 25), feature = di*5+dj
    p = p.reshape(N, 12, 2, 12, 2, 25)                # oh = 2i+p, ow = 2j+q
    p = jnp.transpose(p, (0, 2, 4, 1, 3, 5))          # (N, p, q, i, j, 25)
    p = p.reshape(N, 576, 25)
    p = jnp.pad(p, ((0, 0), (0, 0), (0, 7)))          # K: 25 -> 32
    return p.astype(jnp.bfloat16)


def init_params(key):
    """Raw parameters in PyTorch layout."""
    ks = jax.random.split(key, 8)
    return dict(
        w1=jax.random.normal(ks[0], (65, 1, 5, 5), jnp.float32) * 0.05,
        b1=jax.random.normal(ks[1], (65,), jnp.float32) * 0.05,
        w2=jax.random.normal(ks[2], (64, 65, 3, 3), jnp.float32) * 0.05,
        b2=jax.random.normal(ks[3], (64,), jnp.float32) * 0.05,
        wfc1=jax.random.normal(ks[4], (1024, 5 * 5 * 64), jnp.float32) * 0.02,
        bfc1=jax.random.normal(ks[5], (1024,), jnp.float32) * 0.02,
        wfc2=jax.random.normal(ks[6], (10, 1024), jnp.float32) * 0.02,
        bfc2=jax.random.normal(ks[7], (10,), jnp.float32) * 0.02,
    )


def prepare_params(p):
    """One-time (outside jit) weight reshaping / padding / bf16 casting."""
    # conv1: (65,1,5,5) -> (kh*kw, cout), pad K 25->32, cout 65->128
    w1 = jnp.transpose(p["w1"], (2, 3, 1, 0)).reshape(25, 65)
    w1 = jnp.pad(w1, ((0, 7), (0, 128 - 65)))
    b1 = jnp.pad(p["b1"], (0, 128 - 65)).reshape(1, 128)
    # conv2: (64,65,3,3) -> (kh,kw,cin,cout), pad cin 65->128, cout 64->128 -> (9,128,128)
    w2 = jnp.transpose(p["w2"], (2, 3, 1, 0))
    w2 = jnp.pad(w2, ((0, 0), (0, 0), (0, 128 - 65), (0, 128 - 64))).reshape(9, 128, 128)
    b2 = jnp.pad(p["b2"], (0, 128 - 64)).reshape(1, 128)
    # fc1: PyTorch (1024, 1600), cols in (c,h,w) order -> rows (h*5+w)*128 + c, zero c>=64
    wfc1 = jnp.transpose(p["wfc1"].reshape(1024, 64, 5, 5), (2, 3, 1, 0))   # (5,5,64,1024)
    wfc1 = jnp.pad(wfc1, ((0, 0), (0, 0), (0, 128 - 64), (0, 0))).reshape(3200, 1024)
    bfc1 = p["bfc1"].reshape(1, 1024)
    # fc2: (10, 1024) -> (1024, 10) -> pad cols to 128; padded bias lanes = -1e30
    wfc2 = jnp.pad(p["wfc2"].T, ((0, 0), (0, 128 - 10)))
    bfc2 = jnp.pad(p["bfc2"], (0, 128 - 10), constant_values=-1e30).reshape(1, 128)
    return dict(
        w1=w1.astype(jnp.bfloat16), b1=b1.astype(jnp.float32),
        w2=w2.astype(jnp.bfloat16), b2=b2.astype(jnp.float32),
        wfc1=wfc1.astype(jnp.bfloat16), bfc1=bfc1.astype(jnp.float32),
        wfc2=wfc2.astype(jnp.bfloat16), bfc2=bfc2.astype(jnp.float32),
    )


def cnn_forward(kp, x_nchw):
    N = x_nchw.shape[0]
    a1 = conv1_im2col(x_nchw[:, 0, :, :].astype(jnp.float32))     # (N, 576, 32) bf16
    probs = cnn_fused_call(a1, kp["w1"], kp["b1"], kp["w2"], kp["b2"],
                           kp["wfc1"], kp["bfc1"], kp["wfc2"], kp["bfc2"])  # (N, 1, 128)
    return probs.reshape(N, 128)[:, :10]


if __name__ == "__main__":
    key = jax.random.PRNGKey(0)
    pkey, xkey = jax.random.split(key)
    kparams = prepare_params(init_params(pkey))   # one-time weight prep, outside jit
    # Shapes implied by the module: 1 input channel, 28x28 spatial (-> 5*5*64 after convs).
    x = jax.random.normal(xkey, (2, 1, 28, 28), jnp.float32)

    out = jax.jit(cnn_forward)(kparams, x)
    out = jax.block_until_ready(out)

    assert out.shape == (2, 10), out.shape
    assert bool(jnp.all(jnp.isfinite(out)))
    assert bool(jnp.allclose(jnp.sum(out, axis=-1), 1.0, atol=1e-4))
    print("KERNEL_OK")
</pallas_src>

<mosaic_0001>
module attributes {stable_mosaic.version = 11 : i64} {
  func.func @_cnn_fused_kernel(%arg0: i32, %arg1: memref<1x576x32xbf16, #tpu.memory_space<vmem>>, %arg2: memref<32x128xbf16, #tpu.memory_space<vmem>>, %arg3: memref<1x128xf32, #tpu.memory_space<vmem>>, %arg4: memref<9x128x128xbf16, #tpu.memory_space<vmem>>, %arg5: memref<1x128xf32, #tpu.memory_space<vmem>>, %arg6: memref<3200x1024xbf16, #tpu.memory_space<vmem>>, %arg7: memref<1x1024xf32, #tpu.memory_space<vmem>>, %arg8: memref<1024x128xbf16, #tpu.memory_space<vmem>>, %arg9: memref<1x128xf32, #tpu.memory_space<vmem>>, %arg10: memref<1x1x128xf32, #tpu.memory_space<vmem>>, %arg11: memref<152x128xf32, #tpu.memory_space<vmem>>) attributes {dimension_semantics = [#tpu.dimension_semantics<parallel>], iteration_bounds = array<i64: 2>, scalar_prefetch = 0 : i64, scratch_operands = 1 : i64, tpu.core_type = #tpu.core_type<tc>, window_params = [{transform_indices = @transform_0, window_bounds = array<i64: 1, 576, 32>}, {pipeline_mode = #tpu.pipeline_mode<synchronous>, transform_indices = @transform_1, window_bounds = array<i64: 32, 128>}, {pipeline_mode = #tpu.pipeline_mode<synchronous>, transform_indices = @transform_2, window_bounds = array<i64: 1, 128>}, {pipeline_mode = #tpu.pipeline_mode<synchronous>, transform_indices = @transform_3, window_bounds = array<i64: 9, 128, 128>}, {pipeline_mode = #tpu.pipeline_mode<synchronous>, transform_indices = @transform_4, window_bounds = array<i64: 1, 128>}, {pipeline_mode = #tpu.pipeline_mode<synchronous>, transform_indices = @transform_5, window_bounds = array<i64: 3200, 1024>}, {pipeline_mode = #tpu.pipeline_mode<synchronous>, transform_indices = @transform_6, window_bounds = array<i64: 1, 1024>}, {pipeline_mode = #tpu.pipeline_mode<synchronous>, transform_indices = @transform_7, window_bounds = array<i64: 1024, 128>}, {pipeline_mode = #tpu.pipeline_mode<synchronous>, transform_indices = @transform_8, window_bounds = array<i64: 1, 128>}, {transform_indices = @transform_9, window_bounds = array<i64: 1, 1, 128>}]} {
    %c0 = arith.constant 0 : index
    %c0_0 = arith.constant 0 : index
    %c0_1 = arith.constant 0 : index
    %0 = vector.load %arg1[%c0, %c0_0, %c0_1] : memref<1x576x32xbf16, #tpu.memory_space<vmem>>, vector<1x576x32xbf16>
    %1 = vector.shape_cast %0 : vector<1x576x32xbf16> to vector<576x32xbf16>
    %c0_2 = arith.constant 0 : index
    %c0_3 = arith.constant 0 : index
    %2 = vector.load %arg2[%c0_2, %c0_3] : memref<32x128xbf16, #tpu.memory_space<vmem>>, vector<32x128xbf16>
    %cst = arith.constant dense<0.000000e+00> : vector<576x128xf32>
    %3 = tpu.matmul %1, %2, %cst {dimension_numbers = #tpu.dot_dimension_numbers<[1], [0], [0], [1], [0, 0, 1, 1], [], []>} : vector<576x32xbf16>, vector<32x128xbf16>, vector<576x128xf32> -> vector<576x128xf32>
    %c0_4 = arith.constant 0 : index
    %c0_5 = arith.constant 0 : index
    %4 = vector.load %arg3[%c0_4, %c0_5] : memref<1x128xf32, #tpu.memory_space<vmem>>, vector<1x128xf32>
    %5 = vector.broadcast %4 : vector<1x128xf32> to vector<576x128xf32>
    %6 = arith.addf %3, %5 : vector<576x128xf32>
    %cst_6 = arith.constant 0.000000e+00 : f32
    %7 = vector.broadcast %cst_6 : f32 to vector<576x128xf32>
    %8 = arith.maximumf %6, %7 : vector<576x128xf32>
    %9 = vector.extract_strided_slice %8 {offsets = [0, 0], sizes = [144, 128], strides = [1, 1]} : vector<576x128xf32> to vector<144x128xf32>
    %10 = vector.extract_strided_slice %8 {offsets = [144, 0], sizes = [144, 128], strides = [1, 1]} : vector<576x128xf32> to vector<144x128xf32>
    %11 = arith.maximumf %9, %10 : vector<144x128xf32>
    %12 = vector.extract_strided_slice %8 {offsets = [288, 0], sizes = [144, 128], strides = [1, 1]} : vector<576x128xf32> to vector<144x128xf32>
    %13 = vector.extract_strided_slice %8 {offsets = [432, 0], sizes = [144, 128], strides = [1, 1]} : vector<576x128xf32> to vector<144x128xf32>
    %14 = arith.maximumf %12, %13 : vector<144x128xf32>
    %15 = arith.maximumf %11, %14 : vector<144x128xf32>
    %c0_7 = arith.constant 0 : index
    %c0_8 = arith.constant 0 : index
    %16 = vector.load %arg11[%c0_7, %c0_8] : memref<152x128xf32, #tpu.memory_space<vmem>>, vector<144x128xf32>
    tpu.vector_store %arg11[%c0_7, %c0_8], %15 {strides = array<i32>} : memref<152x128xf32, #tpu.memory_space<vmem>>, vector<144x128xf32>,
    %cst_9 = arith.constant 0.000000e+00 : f32
    %17 = vector.broadcast %cst_9 : f32 to vector<8x128xf32>
    %c144 = arith.constant 144 : index
    %c0_10 = arith.constant 0 : index
    %18 = vector.load %arg11[%c144, %c0_10] : memref<152x128xf32, #tpu.memory_space<vmem>>, vector<8x128xf32>
    tpu.vector_store %arg11[%c144, %c0_10], %17 {strides = array<i32>} : memref<152x128xf32, #tpu.memory_space<vmem>>, vector<8x128xf32>,
    %cst_11 = arith.constant 0.000000e+00 : f32
    %19 = vector.broadcast %cst_11 : f32 to vector<120x128xf32>
    %c0_12 = arith.constant 0 : index
    %c0_13 = arith.constant 0 : index
    %20 = vector.load %arg11[%c0_12, %c0_13] : memref<152x128xf32, #tpu.memory_space<vmem>>, vector<120x128xf32>
    %21 = arith.truncf %20 : vector<120x128xf32> to vector<120x128xbf16>
    %c0_14 = arith.constant 0 : index
    %c0_15 = arith.constant 0 : index
    %c0_16 = arith.constant 0 : index
    %22 = vector.load %arg4[%c0_14, %c0_15, %c0_16] : memref<9x128x128xbf16, #tpu.memory_space<vmem>>, vector<1x128x128xbf16>
    %23 = vector.shape_cast %22 : vector<1x128x128xbf16> to vector<128x128xbf16>
    %cst_17 = arith.constant dense<0.000000e+00> : vector<120x128xf32>
    %24 = tpu.matmul %21, %23, %cst_17 {dimension_numbers = #tpu.dot_dimension_numbers<[1], [0], [0], [1], [0, 0, 1, 1], [], []>} : vector<120x128xbf16>, vector<128x128xbf16>, vector<120x128xf32> -> vector<120x128xf32>
    %25 = arith.addf %19, %24 : vector<120x128xf32>
    %c1 = arith.constant 1 : index
    %c0_18 = arith.constant 0 : index
    %26 = vector.load %arg11[%c1, %c0_18] : memref<152x128xf32, #tpu.memory_space<vmem>>, vector<120x128xf32>
    %27 = arith.truncf %26 : vector<120x128xf32> to vector<120x128xbf16>
    %c1_19 = arith.constant 1 : index
    %c0_20 = arith.constant 0 : index
    %c0_21 = arith.constant 0 : index
    %28 = vector.load %arg4[%c1_19, %c0_20, %c0_21] : memref<9x128x128xbf16, #tpu.memory_space<vmem>>, vector<1x128x128xbf16>
    %29 = vector.shape_cast %28 : vector<1x128x128xbf16> to vector<128x128xbf16>
    %cst_22 = arith.constant dense<0.000000e+00> : vector<120x128xf32>
    %30 = tpu.matmul %27, %29, %cst_22 {dimension_numbers = #tpu.dot_dimension_numbers<[1], [0], [0], [1], [0, 0, 1, 1], [], []>} : vector<120x128xbf16>, vector<128x128xbf16>, vector<120x128xf32> -> vector<120x128xf32>
    %31 = arith.addf %25, %30 : vector<120x128xf32>
    %c2 = arith.constant 2 : index
    %c0_23 = arith.constant 0 : index
    %32 = vector.load %arg11[%c2, %c0_23] : memref<152x128xf32, #tpu.memory_space<vmem>>, vector<120x128xf32>
    %33 = arith.truncf %32 : vector<120x128xf32> to vector<120x128xbf16>
    %c2_24 = arith.constant 2 : index
    %c0_25 = arith.constant 0 : index
    %c0_26 = arith.constant 0 : index
    %34 = vector.load %arg4[%c2_24, %c0_25, %c0_26] : memref<9x128x128xbf16, #tpu.memory_space<vmem>>, vector<1x128x128xbf16>
    %35 = vector.shape_cast %34 : vector<1x128x128xbf16> to vector<128x128xbf16>
    %cst_27 = arith.constant dense<0.000000e+00> : vector<120x128xf32>
    %36 = tpu.matmul %33, %35, %cst_27 {dimension_numbers = #tpu.dot_dimension_numbers<[1], [0], [0], [1], [0, 0, 1, 1], [], []>} : vector<120x128xbf16>, vector<128x128xbf16>, vector<120x128xf32> -> vector<120x128xf32>
    %37 = arith.addf %31, %36 : vector<120x128xf32>
    %c12 = arith.constant 12 : index
    %c0_28 = arith.constant 0 : index
    %38 = vector.load %arg11[%c12, %c0_28] : memref<152x128xf32, #tpu.memory_space<vmem>>, vector<120x128xf32>
    %39 = arith.truncf %38 : vector<120x128xf32> to vector<120x128xbf16>
    %c3 = arith.constant 3 : index
    %c0_29 = arith.constant 0 : index
    %c0_30 = arith.constant 0 : index
    %40 = vector.load %arg4[%c3, %c0_29, %c0_30] : memref<9x128x128xbf16, #tpu.memory_space<vmem>>, vector<1x128x128xbf16>
    %41 = vector.shape_cast %40 : vector<1x128x128xbf16> to vector<128x128xbf16>
    %cst_31 = arith.constant dense<0.000000e+00> : vector<120x128xf32>
    %42 = tpu.matmul %39, %41, %cst_31 {dimension_numbers = #tpu.dot_dimension_numbers<[1], [0], [0], [1], [0, 0, 1, 1], [], []>} : vector<120x128xbf16>, vector<128x128xbf16>, vector<120x128xf32> -> vector<120x128xf32>
    %43 = arith.addf %37, %42 : vector<120x128xf32>
    %c13 = arith.constant 13 : index
    %c0_32 = arith.constant 0 : index
    %44 = vector.load %arg11[%c13, %c0_32] : memref<152x128xf32, #tpu.memory_space<vmem>>, vector<120x128xf32>
    %45 = arith.truncf %44 : vector<120x128xf32> to vector<120x128xbf16>
    %c4 = arith.constant 4 : index
    %c0_33 = arith.constant 0 : index
    %c0_34 = arith.constant 0 : index
    %46 = vector.load %arg4[%c4, %c0_33, %c0_34] : memref<9x128x128xbf16, #tpu.memory_space<vmem>>, vector<1x128x128xbf16>
    %47 = vector.shape_cast %46 : vector<1x128x128xbf16> to vector<128x128xbf16>
    %cst_35 = arith.constant dense<0.000000e+00> : vector<120x128xf32>
    %48 = tpu.matmul %45, %47, %cst_35 {dimension_numbers = #tpu.dot_dimension_numbers<[1], [0], [0], [1], [0, 0, 1, 1], [], []>} : vector<120x128xbf16>, vector<128x128xbf16>, vector<120x128xf32> -> vector<120x128xf32>
    %49 = arith.addf %43, %48 : vector<120x128xf32>
    %c14 = arith.constant 14 : index
    %c0_36 = arith.constant 0 : index
    %50 = vector.load %arg11[%c14, %c0_36] : memref<152x128xf32, #tpu.memory_space<vmem>>, vector<120x128xf32>
    %51 = arith.truncf %50 : vector<120x128xf32> to vector<120x128xbf16>
    %c5 = arith.constant 5 : index
    %c0_37 = arith.constant 0 : index
    %c0_38 = arith.constant 0 : index
    %52 = vector.load %arg4[%c5, %c0_37, %c0_38] : memref<9x128x128xbf16, #tpu.memory_space<vmem>>, vector<1x128x128xbf16>
    %53 = vector.shape_cast %52 : vector<1x128x128xbf16> to vector<128x128xbf16>
    %cst_39 = arith.constant dense<0.000000e+00> : vector<120x128xf32>
    %54 = tpu.matmul %51, %53, %cst_39 {dimension_numbers = #tpu.dot_dimension_numbers<[1], [0], [0], [1], [0, 0, 1, 1], [], []>} : vector<120x128xbf16>, vector<128x128xbf16>, vector<120x128xf32> -> vector<120x128xf32>
    %55 = arith.addf %49, %54 : vector<120x128xf32>
    %c24 = arith.constant 24 : index
    %c0_40 = arith.constant 0 : index
    %56 = vector.load %arg11[%c24, %c0_40] : memref<152x128xf32, #tpu.memory_space<vmem>>, vector<120x128xf32>
    %57 = arith.truncf %56 : vector<120x128xf32> to vector<120x128xbf16>
    %c6 = arith.constant 6 : index
    %c0_41 = arith.constant 0 : index
    %c0_42 = arith.constant 0 : index
    %58 = vector.load %arg4[%c6, %c0_41, %c0_42] : memref<9x128x128xbf16, #tpu.memory_space<vmem>>, vector<1x128x128xbf16>
    %59 = vector.shape_cast %58 : vector<1x128x128xbf16> to vector<128x128xbf16>
    %cst_43 = arith.constant dense<0.000000e+00> : vector<120x128xf32>
    %60 = tpu.matmul %57, %59, %cst_43 {dimension_numbers = #tpu.dot_dimension_numbers<[1], [0], [0], [1], [0, 0, 1, 1], [], []>} : vector<120x128xbf16>, vector<128x128xbf16>, vector<120x128xf32> -> vector<120x128xf32>
    %61 = arith.addf %55, %60 : vector<120x128xf32>
    %c25 = arith.constant 25 : index
    %c0_44 = arith.constant 0 : index
    %62 = vector.load %arg11[%c25, %c0_44] : memref<152x128xf32, #tpu.memory_space<vmem>>, vector<120x128xf32>
    %63 = arith.truncf %62 : vector<120x128xf32> to vector<120x128xbf16>
    %c7 = arith.constant 7 : index
    %c0_45 = arith.constant 0 : index
    %c0_46 = arith.constant 0 : index
    %64 = vector.load %arg4[%c7, %c0_45, %c0_46] : memref<9x128x128xbf16, #tpu.memory_space<vmem>>, vector<1x128x128xbf16>
    %65 = vector.shape_cast %64 : vector<1x128x128xbf16> to vector<128x128xbf16>
    %cst_47 = arith.constant dense<0.000000e+00> : vector<120x128xf32>
    %66 = tpu.matmul %63, %65, %cst_47 {dimension_numbers = #tpu.dot_dimension_numbers<[1], [0], [0], [1], [0, 0, 1, 1], [], []>} : vector<120x128xbf16>, vector<128x128xbf16>, vector<120x128xf32> -> vector<120x128xf32>
    %67 = arith.addf %61, %66 : vector<120x128xf32>
    %c26 = arith.constant 26 : index
    %c0_48 = arith.constant 0 : index
    %68 = vector.load %arg11[%c26, %c0_48] : memref<152x128xf32, #tpu.memory_space<vmem>>, vector<120x128xf32>
    %69 = arith.truncf %68 : vector<120x128xf32> to vector<120x128xbf16>
    %c8 = arith.constant 8 : index
    %c0_49 = arith.constant 0 : index
    %c0_50 = arith.constant 0 : index
    %70 = vector.load %arg4[%c8, %c0_49, %c0_50] : memref<9x128x128xbf16, #tpu.memory_space<vmem>>, vector<1x128x128xbf16>
    %71 = vector.shape_cast %70 : vector<1x128x128xbf16> to vector<128x128xbf16>
    %cst_51 = arith.constant dense<0.000000e+00> : vector<120x128xf32>
    %72 = tpu.matmul %69, %71, %cst_51 {dimension_numbers = #tpu.dot_dimension_numbers<[1], [0], [0], [1], [0, 0, 1, 1], [], []>} : vector<120x128xbf16>, vector<128x128xbf16>, vector<120x128xf32> -> vector<120x128xf32>
    %73 = arith.addf %67, %72 : vector<120x128xf32>
    %c0_52 = arith.constant 0 : index
    %c0_53 = arith.constant 0 : index
    %74 = vector.load %arg5[%c0_52, %c0_53] : memref<1x128xf32, #tpu.memory_space<vmem>>, vector<1x128xf32>
    %75 = vector.broadcast %74 : vector<1x128xf32> to vector<120x128xf32>
    %76 = arith.addf %73, %75 : vector<120x128xf32>
    %cst_54 = arith.constant 0.000000e+00 : f32
    %77 = vector.broadcast %cst_54 : f32 to vector<120x128xf32>
    %78 = arith.maximumf %76, %77 : vector<120x128xf32>
    %79 = vector.extract_strided_slice %78 {offsets = [0, 0], sizes = [1, 128], strides = [1, 1]} : vector<120x128xf32> to vector<1x128xf32>
    %80 = vector.extract_strided_slice %78 {offsets = [1, 0], sizes = [1, 128], strides = [1, 1]} : vector<120x128xf32> to vector<1x128xf32>
    %81 = arith.maximumf %79, %80 : vector<1x128xf32>
    %82 = vector.extract_strided_slice %78 {offsets = [12, 0], sizes = [1, 128], strides = [1, 1]} : vector<120x128xf32> to vector<1x128xf32>
    %83 = vector.extract_strided_slice %78 {offsets = [13, 0], sizes = [1, 128], strides = [1, 1]} : vector<120x128xf32> to vector<1x128xf32>
    %84 = arith.maximumf %82, %83 : vector<1x128xf32>
    %85 = arith.maximumf %81, %84 : vector<1x128xf32>
    %86 = vector.extract_strided_slice %78 {offsets = [2, 0], sizes = [1, 128], strides = [1, 1]} : vector<120x128xf32> to vector<1x128xf32>
    %87 = vector.extract_strided_slice %78 {offsets = [3, 0], sizes = [1, 128], strides = [1, 1]} : vector<120x128xf32> to vector<1x128xf32>
    %88 = arith.maximumf %86, %87 : vector<1x128xf32>
    %89 = vector.extract_strided_slice %78 {offsets = [14, 0], sizes = [1, 128], strides = [1, 1]} : vector<120x128xf32> to vector<1x128xf32>
    %90 = vector.extract_strided_slice %78 {offsets = [15, 0], sizes = [1, 128], strides = [1, 1]} : vector<120x128xf32> to vector<1x128xf32>
    %91 = arith.maximumf %89, %90 : vector<1x128xf32>
    %92 = arith.maximumf %88, %91 : vector<1x128xf32>
    %93 = vector.extract_strided_slice %78 {offsets = [4, 0], sizes = [1, 128], strides = [1, 1]} : vector<120x128xf32> to vector<1x128xf32>
    %94 = vector.extract_strided_slice %78 {offsets = [5, 0], sizes = [1, 128], strides = [1, 1]} : vector<120x128xf32> to vector<1x128xf32>
    %95 = arith.maximumf %93, %94 : vector<1x128xf32>
    %96 = vector.extract_strided_slice %78 {offsets = [16, 0], sizes = [1, 128], strides = [1, 1]} : vector<120x128xf32> to vector<1x128xf32>
    %97 = vector.extract_strided_slice %78 {offsets = [17, 0], sizes = [1, 128], strides = [1, 1]} : vector<120x128xf32> to vector<1x128xf32>
    %98 = arith.maximumf %96, %97 : vector<1x128xf32>
    %99 = arith.maximumf %95, %98 : vector<1x128xf32>
    %100 = vector.extract_strided_slice %78 {offsets = [6, 0], sizes = [1, 128], strides = [1, 1]} : vector<120x128xf32> to vector<1x128xf32>
    %101 = vector.extract_strided_slice %78 {offsets = [7, 0], sizes = [1, 128], strides = [1, 1]} : vector<120x128xf32> to vector<1x128xf32>
    %102 = arith.maximumf %100, %101 : vector<1x128xf32>
    %103 = vector.extract_strided_slice %78 {offsets = [18, 0], sizes = [1, 128], strides = [1, 1]} : vector<120x128xf32> to vector<1x128xf32>
    %104 = vector.extract_strided_slice %78 {offsets = [19, 0], sizes = [1, 128], strides = [1, 1]} : vector<120x128xf32> to vector<1x128xf32>
    %105 = arith.maximumf %103, %104 : vector<1x128xf32>
    %106 = arith.maximumf %102, %105 : vector<1x128xf32>
    %107 = vector.extract_strided_slice %78 {offsets = [8, 0], sizes = [1, 128], strides = [1, 1]} : vector<120x128xf32> to vector<1x128xf32>
    %108 = vector.extract_strided_slice %78 {offsets = [9, 0], sizes = [1, 128], strides = [1, 1]} : vector<120x128xf32> to vector<1x128xf32>
    %109 = arith.maximumf %107, %108 : vector<1x128xf32>
    %110 = vector.extract_strided_slice %78 {offsets = [20, 0], sizes = [1, 128], strides = [1, 1]} : vector<120x128xf32> to vector<1x128xf32>
    %111 = vector.extract_strided_slice %78 {offsets = [21, 0], sizes = [1, 128], strides = [1, 1]} : vector<120x128xf32> to vector<1x128xf32>
    %112 = arith.maximumf %110, %111 : vector<1x128xf32>
    %113 = arith.maximumf %109, %112 : vector<1x128xf32>
    %114 = vector.extract_strided_slice %78 {offsets = [24, 0], sizes = [1, 128], strides = [1, 1]} : vector<120x128xf32> to vector<1x128xf32>
    %115 = vector.extract_strided_slice %78 {offsets = [25, 0], sizes = [1, 128], strides = [1, 1]} : vector<120x128xf32> to vector<1x128xf32>
    %116 = arith.maximumf %114, %115 : vector<1x128xf32>
    %117 = vector.extract_strided_slice %78 {offsets = [36, 0], sizes = [1, 128], strides = [1, 1]} : vector<120x128xf32> to vector<1x128xf32>
    %118 = vector.extract_strided_slice %78 {offsets = [37, 0], sizes = [1, 128], strides = [1, 1]} : vector<120x128xf32> to vector<1x128xf32>
    %119 = arith.maximumf %117, %118 : vector<1x128xf32>
    %120 = arith.maximumf %116, %119 : vector<1x128xf32>
    %121 = vector.extract_strided_slice %78 {offsets = [26, 0], sizes = [1, 128], strides = [1, 1]} : vector<120x128xf32> to vector<1x128xf32>
    %122 = vector.extract_strided_slice %78 {offsets = [27, 0], sizes = [1, 128], strides = [1, 1]} : vector<120x128xf32> to vector<1x128xf32>
    %123 = arith.maximumf %121, %122 : vector<1x128xf32>
    %124 = vector.extract_strided_slice %78 {offsets = [38, 0], sizes = [1, 128], strides = [1, 1]} : vector<120x128xf32> to vector<1x128xf32>
    %125 = vector.extract_strided_slice %78 {offsets = [39, 0], sizes = [1, 128], strides = [1, 1]} : vector<120x128xf32> to vector<1x128xf32>
    %126 = arith.maximumf %124, %125 : vector<1x128xf32>
    %127 = arith.maximumf %123, %126 : vector<1x128xf32>
    %128 = vector.extract_strided_slice %78 {offsets = [28, 0], sizes = [1, 128], strides = [1, 1]} : vector<120x128xf32> to vector<1x128xf32>
    %129 = vector.extract_strided_slice %78 {offsets = [29, 0], sizes = [1, 128], strides = [1, 1]} : vector<120x128xf32> to vector<1x128xf32>
    %130 = arith.maximumf %128, %129 : vector<1x128xf32>
    %131 = vector.extract_strided_slice %78 {offsets = [40, 0], sizes = [1, 128], strides = [1, 1]} : vector<120x128xf32> to vector<1x128xf32>
    %132 = vector.extract_strided_slice %78 {offsets = [41, 0], sizes = [1, 128], strides = [1, 1]} : vector<120x128xf32> to vector<1x128xf32>
    %133 = arith.maximumf %131, %132 : vector<1x128xf32>
    %134 = arith.maximumf %130, %133 : vector<1x128xf32>
    %135 = vector.extract_strided_slice %78 {offsets = [30, 0], sizes = [1, 128], strides = [1, 1]} : vector<120x128xf32> to vector<1x128xf32>
    %136 = vector.extract_strided_slice %78 {offsets = [31, 0], sizes = [1, 128], strides = [1, 1]} : vector<120x128xf32> to vector<1x128xf32>
    %137 = arith.maximumf %135, %136 : vector<1x128xf32>
    %138 = vector.extract_strided_slice %78 {offsets = [42, 0], sizes = [1, 128], strides = [1, 1]} : vector<120x128xf32> to vector<1x128xf32>
    %139 = vector.extract_strided_slice %78 {offsets = [43, 0], sizes = [1, 128], strides = [1, 1]} : vector<120x128xf32> to vector<1x128xf32>
    %140 = arith.maximumf %138, %139 : vector<1x128xf32>
    %141 = arith.maximumf %137, %140 : vector<1x128xf32>
    %142 = vector.extract_strided_slice %78 {offsets = [32, 0], sizes = [1, 128], strides = [1, 1]} : vector<120x128xf32> to vector<1x128xf32>
    %143 = vector.extract_strided_slice %78 {offsets = [33, 0], sizes = [1, 128], strides = [1, 1]} : vector<120x128xf32> to vector<1x128xf32>
    %144 = arith.maximumf %142, %143 : vector<1x128xf32>
    %145 = vector.extract_strided_slice %78 {offsets = [44, 0], sizes = [1, 128], strides = [1, 1]} : vector<120x128xf32> to vector<1x128xf32>
    %146 = vector.extract_strided_slice %78 {offsets = [45, 0], sizes = [1, 128], strides = [1, 1]} : vector<120x128xf32> to vector<1x128xf32>
    %147 = arith.maximumf %145, %146 : vector<1x128xf32>
    %148 = arith.maximumf %144, %147 : vector<1x128xf32>
    %149 = vector.extract_strided_slice %78 {offsets = [48, 0], sizes = [1, 128], strides = [1, 1]} : vector<120x128xf32> to vector<1x128xf32>
    %150 = vector.extract_strided_slice %78 {offsets = [49, 0], sizes = [1, 128], strides = [1, 1]} : vector<120x128xf32> to vector<1x128xf32>
    %151 = arith.maximumf %149, %150 : vector<1x128xf32>
    %152 = vector.extract_strided_slice %78 {offsets = [60, 0], sizes = [1, 128], strides = [1, 1]} : vector<120x128xf32> to vector<1x128xf32>
    %153 = vector.extract_strided_slice %78 {offsets = [61, 0], sizes = [1, 128], strides = [1, 1]} : vector<120x128xf32> to vector<1x128xf32>
    %154 = arith.maximumf %152, %153 : vector<1x128xf32>
    %155 = arith.maximumf %151, %154 : vector<1x128xf32>
    %156 = vector.extract_strided_slice %78 {offsets = [50, 0], sizes = [1, 128], strides = [1, 1]} : vector<120x128xf32> to vector<1x128xf32>
    %157 = vector.extract_strided_slice %78 {offsets = [51, 0], sizes = [1, 128], strides = [1, 1]} : vector<120x128xf32> to vector<1x128xf32>
    %158 = arith.maximumf %156, %157 : vector<1x128xf32>
    %159 = vector.extract_strided_slice %78 {offsets = [62, 0], sizes = [1, 128], strides = [1, 1]} : vector<120x128xf32> to vector<1x128xf32>
    %160 = vector.extract_strided_slice %78 {offsets = [63, 0], sizes = [1, 128], strides = [1, 1]} : vector<120x128xf32> to vector<1x128xf32>
    %161 = arith.maximumf %159, %160 : vector<1x128xf32>
    %162 = arith.maximumf %158, %161 : vector<1x128xf32>
    %163 = vector.extract_strided_slice %78 {offsets = [52, 0], sizes = [1, 128], strides = [1, 1]} : vector<120x128xf32> to vector<1x128xf32>
    %164 = vector.extract_strided_slice %78 {offsets = [53, 0], sizes = [1, 128], strides = [1, 1]} : vector<120x128xf32> to vector<1x128xf32>
    %165 = arith.maximumf %163, %164 : vector<1x128xf32>
    %166 = vector.extract_strided_slice %78 {offsets = [64, 0], sizes = [1, 128], strides = [1, 1]} : vector<120x128xf32> to vector<1x128xf32>
    %167 = vector.extract_strided_slice %78 {offsets = [65, 0], sizes = [1, 128], strides = [1, 1]} : vector<120x128xf32> to vector<1x128xf32>
    %168 = arith.maximumf %166, %167 : vector<1x128xf32>
    %169 = arith.maximumf %165, %168 : vector<1x128xf32>
    %170 = vector.extract_strided_slice %78 {offsets = [54, 0], sizes = [1, 128], strides = [1, 1]} : vector<120x128xf32> to vector<1x128xf32>
    %171 = vector.extract_strided_slice %78 {offsets = [55, 0], sizes = [1, 128], strides = [1, 1]} : vector<120x128xf32> to vector<1x128xf32>
    %172 = arith.maximumf %170, %171 : vector<1x128xf32>
    %173 = vector.extract_strided_slice %78 {offsets = [66, 0], sizes = [1, 128], strides = [1, 1]} : vector<120x128xf32> to vector<1x128xf32>
    %174 = vector.extract_strided_slice %78 {offsets = [67, 0], sizes = [1, 128], strides = [1, 1]} : vector<120x128xf32> to vector<1x128xf32>
    %175 = arith.maximumf %173, %174 : vector<1x128xf32>
    %176 = arith.maximumf %172, %175 : vector<1x128xf32>
    %177 = vector.extract_strided_slice %78 {offsets = [56, 0], sizes = [1, 128], strides = [1, 1]} : vector<120x128xf32> to vector<1x128xf32>
    %178 = vector.extract_strided_slice %78 {offsets = [57, 0], sizes = [1, 128], strides = [1, 1]} : vector<120x128xf32> to vector<1x128xf32>
    %179 = arith.maximumf %177, %178 : vector<1x128xf32>
    %180 = vector.extract_strided_slice %78 {offsets = [68, 0], sizes = [1, 128], strides = [1, 1]} : vector<120x128xf32> to vector<1x128xf32>
    %181 = vector.extract_strided_slice %78 {offsets = [69, 0], sizes = [1, 128], strides = [1, 1]} : vector<120x128xf32> to vector<1x128xf32>
    %182 = arith.maximumf %180, %181 : vector<1x128xf32>
    %183 = arith.maximumf %179, %182 : vector<1x128xf32>
    %184 = vector.extract_strided_slice %78 {offsets = [72, 0], sizes = [1, 128], strides = [1, 1]} : vector<120x128xf32> to vector<1x128xf32>
    %185 = vector.extract_strided_slice %78 {offsets = [73, 0], sizes = [1, 128], strides = [1, 1]} : vector<120x128xf32> to vector<1x128xf32>
    %186 = arith.maximumf %184, %185 : vector<1x128xf32>
    %187 = vector.extract_strided_slice %78 {offsets = [84, 0], sizes = [1, 128], strides = [1, 1]} : vector<120x128xf32> to vector<1x128xf32>
    %188 = vector.extract_strided_slice %78 {offsets = [85, 0], sizes = [1, 128], strides = [1, 1]} : vector<120x128xf32> to vector<1x128xf32>
    %189 = arith.maximumf %187, %188 : vector<1x128xf32>
    %190 = arith.maximumf %186, %189 : vector<1x128xf32>
    %191 = vector.extract_strided_slice %78 {offsets = [74, 0], sizes = [1, 128], strides = [1, 1]} : vector<120x128xf32> to vector<1x128xf32>
    %192 = vector.extract_strided_slice %78 {offsets = [75, 0], sizes = [1, 128], strides = [1, 1]} : vector<120x128xf32> to vector<1x128xf32>
    %193 = arith.maximumf %191, %192 : vector<1x128xf32>
    %194 = vector.extract_strided_slice %78 {offsets = [86, 0], sizes = [1, 128], strides = [1, 1]} : vector<120x128xf32> to vector<1x128xf32>
    %195 = vector.extract_strided_slice %78 {offsets = [87, 0], sizes = [1, 128], strides = [1, 1]} : vector<120x128xf32> to vector<1x128xf32>
    %196 = arith.maximumf %194, %195 : vector<1x128xf32>
    %197 = arith.maximumf %193, %196 : vector<1x128xf32>
    %198 = vector.extract_strided_slice %78 {offsets = [76, 0], sizes = [1, 128], strides = [1, 1]} : vector<120x128xf32> to vector<1x128xf32>
    %199 = vector.extract_strided_slice %78 {offsets = [77, 0], sizes = [1, 128], strides = [1, 1]} : vector<120x128xf32> to vector<1x128xf32>
    %200 = arith.maximumf %198, %199 : vector<1x128xf32>
    %201 = vector.extract_strided_slice %78 {offsets = [88, 0], sizes = [1, 128], strides = [1, 1]} : vector<120x128xf32> to vector<1x128xf32>
    %202 = vector.extract_strided_slice %78 {offsets = [89, 0], sizes = [1, 128], strides = [1, 1]} : vector<120x128xf32> to vector<1x128xf32>
    %203 = arith.maximumf %201, %202 : vector<1x128xf32>
    %204 = arith.maximumf %200, %203 : vector<1x128xf32>
    %205 = vector.extract_strided_slice %78 {offsets = [78, 0], sizes = [1, 128], strides = [1, 1]} : vector<120x128xf32> to vector<1x128xf32>
    %206 = vector.extract_strided_slice %78 {offsets = [79, 0], sizes = [1, 128], strides = [1, 1]} : vector<120x128xf32> to vector<1x128xf32>
    %207 = arith.maximumf %205, %206 : vector<1x128xf32>
    %208 = vector.extract_strided_slice %78 {offsets = [90, 0], sizes = [1, 128], strides = [1, 1]} : vector<120x128xf32> to vector<1x128xf32>
    %209 = vector.extract_strided_slice %78 {offsets = [91, 0], sizes = [1, 128], strides = [1, 1]} : vector<120x128xf32> to vector<1x128xf32>
    %210 = arith.maximumf %208, %209 : vector<1x128xf32>
    %211 = arith.maximumf %207, %210 : vector<1x128xf32>
    %212 = vector.extract_strided_slice %78 {offsets = [80, 0], sizes = [1, 128], strides = [1, 1]} : vector<120x128xf32> to vector<1x128xf32>
    %213 = vector.extract_strided_slice %78 {offsets = [81, 0], sizes = [1, 128], strides = [1, 1]} : vector<120x128xf32> to vector<1x128xf32>
    %214 = arith.maximumf %212, %213 : vector<1x128xf32>
    %215 = vector.extract_strided_slice %78 {offsets = [92, 0], sizes = [1, 128], strides = [1, 1]} : vector<120x128xf32> to vector<1x128xf32>
    %216 = vector.extract_strided_slice %78 {offsets = [93, 0], sizes = [1, 128], strides = [1, 1]} : vector<120x128xf32> to vector<1x128xf32>
    %217 = arith.maximumf %215, %216 : vector<1x128xf32>
    %218 = arith.maximumf %214, %217 : vector<1x128xf32>
    %219 = vector.extract_strided_slice %78 {offsets = [96, 0], sizes = [1, 128], strides = [1, 1]} : vector<120x128xf32> to vector<1x128xf32>
    %220 = vector.extract_strided_slice %78 {offsets = [97, 0], sizes = [1, 128], strides = [1, 1]} : vector<120x128xf32> to vector<1x128xf32>
    %221 = arith.maximumf %219, %220 : vector<1x128xf32>
    %222 = vector.extract_strided_slice %78 {offsets = [108, 0], sizes = [1, 128], strides = [1, 1]} : vector<120x128xf32> to vector<1x128xf32>
    %223 = vector.extract_strided_slice %78 {offsets = [109, 0], sizes = [1, 128], strides = [1, 1]} : vector<120x128xf32> to vector<1x128xf32>
    %224 = arith.maximumf %222, %223 : vector<1x128xf32>
    %225 = arith.maximumf %221, %224 : vector<1x128xf32>
    %226 = vector.extract_strided_slice %78 {offsets = [98, 0], sizes = [1, 128], strides = [1, 1]} : vector<120x128xf32> to vector<1x128xf32>
    %227 = vector.extract_strided_slice %78 {offsets = [99, 0], sizes = [1, 128], strides = [1, 1]} : vector<120x128xf32> to vector<1x128xf32>
    %228 = arith.maximumf %226, %227 : vector<1x128xf32>
    %229 = vector.extract_strided_slice %78 {offsets = [110, 0], sizes = [1, 128], strides = [1, 1]} : vector<120x128xf32> to vector<1x128xf32>
    %230 = vector.extract_strided_slice %78 {offsets = [111, 0], sizes = [1, 128], strides = [1, 1]} : vector<120x128xf32> to vector<1x128xf32>
    %231 = arith.maximumf %229, %230 : vector<1x128xf32>
    %232 = arith.maximumf %228, %231 : vector<1x128xf32>
    %233 = vector.extract_strided_slice %78 {offsets = [100, 0], sizes = [1, 128], strides = [1, 1]} : vector<120x128xf32> to vector<1x128xf32>
    %234 = vector.extract_strided_slice %78 {offsets = [101, 0], sizes = [1, 128], strides = [1, 1]} : vector<120x128xf32> to vector<1x128xf32>
    %235 = arith.maximumf %233, %234 : vector<1x128xf32>
    %236 = vector.extract_strided_slice %78 {offsets = [112, 0], sizes = [1, 128], strides = [1, 1]} : vector<120x128xf32> to vector<1x128xf32>
    %237 = vector.extract_strided_slice %78 {offsets = [113, 0], sizes = [1, 128], strides = [1, 1]} : vector<120x128xf32> to vector<1x128xf32>
    %238 = arith.maximumf %236, %237 : vector<1x128xf32>
    %239 = arith.maximumf %235, %238 : vector<1x128xf32>
    %240 = vector.extract_strided_slice %78 {offsets = [102, 0], sizes = [1, 128], strides = [1, 1]} : vector<120x128xf32> to vector<1x128xf32>
    %241 = vector.extract_strided_slice %78 {offsets = [103, 0], sizes = [1, 128], strides = [1, 1]} : vector<120x128xf32> to vector<1x128xf32>
    %242 = arith.maximumf %240, %241 : vector<1x128xf32>
    %243 = vector.extract_strided_slice %78 {offsets = [114, 0], sizes = [1, 128], strides = [1, 1]} : vector<120x128xf32> to vector<1x128xf32>
    %244 = vector.extract_strided_slice %78 {offsets = [115, 0], sizes = [1, 128], strides = [1, 1]} : vector<120x128xf32> to vector<1x128xf32>
    %245 = arith.maximumf %243, %244 : vector<1x128xf32>
    %246 = arith.maximumf %242, %245 : vector<1x128xf32>
    %247 = vector.extract_strided_slice %78 {offsets = [104, 0], sizes = [1, 128], strides = [1, 1]} : vector<120x128xf32> to vector<1x128xf32>
    %248 = vector.extract_strided_slice %78 {offsets = [105, 0], sizes = [1, 128], strides = [1, 1]} : vector<120x128xf32> to vector<1x128xf32>
    %249 = arith.maximumf %247, %248 : vector<1x128xf32>
    %250 = vector.extract_strided_slice %78 {offsets = [116, 0], sizes = [1, 128], strides = [1, 1]} : vector<120x128xf32> to vector<1x128xf32>
    %251 = vector.extract_strided_slice %78 {offsets = [117, 0], sizes = [1, 128], strides = [1, 1]} : vector<120x128xf32> to vector<1x128xf32>
    %252 = arith.maximumf %250, %251 : vector<1x128xf32>
    %253 = arith.maximumf %249, %252 : vector<1x128xf32>
    %254 = tpu.concatenate %85, %92, %99, %106, %113, %120, %127, %134, %141, %148, %155, %162, %169, %176, %183, %190 in 1 : vector<1x128xf32>, vector<1x128xf32>, vector<1x128xf32>, vector<1x128xf32>, vector<1x128xf32>, vector<1x128xf32>, vector<1x128xf32>, vector<1x128xf32>, vector<1x128xf32>, vector<1x128xf32>, vector<1x128xf32>, vector<1x128xf32>, vector<1x128xf32>, vector<1x128xf32>, vector<1x128xf32>, vector<1x128xf32> -> vector<1x2048xf32>
    %255 = tpu.concatenate %197, %204, %211, %218, %225, %232, %239, %246, %253 in 1 : vector<1x128xf32>, vector<1x128xf32>, vector<1x128xf32>, vector<1x128xf32>, vector<1x128xf32>, vector<1x128xf32>, vector<1x128xf32>, vector<1x128xf32>, vector<1x128xf32> -> vector<1x1152xf32>
    %256 = tpu.concatenate %254, %255 in 1 : vector<1x2048xf32>, vector<1x1152xf32> -> vector<1x3200xf32>
    %257 = arith.truncf %256 : vector<1x3200xf32> to vector<1x3200xbf16>
    %c0_55 = arith.constant 0 : index
    %c0_56 = arith.constant 0 : index
    %258 = vector.load %arg6[%c0_55, %c0_56] : memref<3200x1024xbf16, #tpu.memory_space<vmem>>, vector<3200x1024xbf16>
    %cst_57 = arith.constant dense<0.000000e+00> : vector<1x1024xf32>
    %259 = tpu.matmul %257, %258, %cst_57 {dimension_numbers = #tpu.dot_dimension_numbers<[1], [0], [0], [1], [0, 0, 1, 1], [], []>} : vector<1x3200xbf16>, vector<3200x1024xbf16>, vector<1x1024xf32> -> vector<1x1024xf32>
    %c0_58 = arith.constant 0 : index
    %c0_59 = arith.constant 0 : index
    %260 = vector.load %arg7[%c0_58, %c0_59] : memref<1x1024xf32, #tpu.memory_space<vmem>>, vector<1x1024xf32>
    %261 = arith.addf %259, %260 : vector<1x1024xf32>
    %cst_60 = arith.constant 0.000000e+00 : f32
    %262 = vector.broadcast %cst_60 : f32 to vector<1x1024xf32>
    %263 = arith.maximumf %261, %262 : vector<1x1024xf32>
    %264 = arith.truncf %263 : vector<1x1024xf32> to vector<1x1024xbf16>
    %c0_61 = arith.constant 0 : index
    %c0_62 = arith.constant 0 : index
    %265 = vector.load %arg8[%c0_61, %c0_62] : memref<1024x128xbf16, #tpu.memory_space<vmem>>, vector<1024x128xbf16>
    %cst_63 = arith.constant dense<0.000000e+00> : vector<1x128xf32>
    %266 = tpu.matmul %264, %265, %cst_63 {dimension_numbers = #tpu.dot_dimension_numbers<[1], [0], [0], [1], [0, 0, 1, 1], [], []>} : vector<1x1024xbf16>, vector<1024x128xbf16>, vector<1x128xf32> -> vector<1x128xf32>
    %c0_64 = arith.constant 0 : index
    %c0_65 = arith.constant 0 : index
    %267 = vector.load %arg9[%c0_64, %c0_65] : memref<1x128xf32, #tpu.memory_space<vmem>>, vector<1x128xf32>
    %268 = arith.addf %266, %267 : vector<1x128xf32>
    %cst_66 = arith.constant dense<0xFF800000> : vector<1xf32>
    %269 = vector.multi_reduction <maximumf>, %268, %cst_66 [1] : vector<1x128xf32> to vector<1xf32>
    %270 = vector.shape_cast %269 : vector<1xf32> to vector<1x1xf32>
    %271 = vector.broadcast %270 : vector<1x1xf32> to vector<1x128xf32>
    %272 = arith.subf %268, %271 : vector<1x128xf32>
    %273 = math.exp %272 : vector<1x128xf32>
    %cst_67 = arith.constant dense<0.000000e+00> : vector<1xf32>
    %274 = vector.multi_reduction <add>, %273, %cst_67 [1] : vector<1x128xf32> to vector<1xf32>
    %275 = vector.shape_cast %274 : vector<1xf32> to vector<1x1xf32>
    %276 = vector.broadcast %275 : vector<1x1xf32> to vector<1x128xf32>
    %277 = arith.divf %273, %276 : vector<1x128xf32>
    %c0_68 = arith.constant 0 : index
    %c0_69 = arith.constant 0 : index
    %c0_70 = arith.constant 0 : index
    %278 = vector.load %arg10[%c0_68, %c0_69, %c0_70] : memref<1x1x128xf32, #tpu.memory_space<vmem>>, vector<1x1x128xf32>
    %279 = vector.shape_cast %278 : vector<1x1x128xf32> to vector<1x128xf32>
    %280 = vector.shape_cast %277 : vector<1x128xf32> to vector<1x1x128xf32>
    tpu.vector_store %arg10[%c0_68, %c0_69, %c0_70], %280 {strides = array<i32>} : memref<1x1x128xf32, #tpu.memory_space<vmem>>, vector<1x1x128xf32>,
    return
  }
  func.func @transform_0(%arg0: i32) -> (i32, i32, i32) {
    %c0_i32 = arith.constant 0 : i32
    %c0_i32_0 = arith.constant 0 : i32
    %c0_i32_1 = arith.constant 0 : i32
    return %arg0, %c0_i32, %c0_i32_0 : i32, i32, i32
  }
  func.func @transform_1(%arg0: i32) -> (i32, i32) {
    %c0_i32 = arith.constant 0 : i32
    %c0_i32_0 = arith.constant 0 : i32
    %c0_i32_1 = arith.constant 0 : i32
    return %c0_i32, %c0_i32_0 : i32, i32
  }
  func.func @transform_2(%arg0: i32) -> (i32, i32) {
    %c0_i32 = arith.constant 0 : i32
    %c0_i32_0 = arith.constant 0 : i32
    %c0_i32_1 = arith.constant 0 : i32
    return %c0_i32, %c0_i32_0 : i32, i32
  }
  func.func @transform_3(%arg0: i32) -> (i32, i32, i32) {
    %c0_i32 = arith.constant 0 : i32
    %c0_i32_0 = arith.constant 0 : i32
    %c0_i32_1 = arith.constant 0 : i32
    %c0_i32_2 = arith.constant 0 : i32
    return %c0_i32, %c0_i32_0, %c0_i32_1 : i32, i32, i32
  }
  func.func @transform_4(%arg0: i32) -> (i32, i32) {
    %c0_i32 = arith.constant 0 : i32
    %c0_i32_0 = arith.constant 0 : i32
    %c0_i32_1 = arith.constant 0 : i32
    return %c0_i32, %c0_i32_0 : i32, i32
  }
  func.func @transform_5(%arg0: i32) -> (i32, i32) {
    %c0_i32 = arith.constant 0 : i32
    %c0_i32_0 = arith.constant 0 : i32
    %c0_i32_1 = arith.constant 0 : i32
    return %c0_i32, %c0_i32_0 : i32, i32
  }
  func.func @transform_6(%arg0: i32) -> (i32, i32) {
    %c0_i32 = arith.constant 0 : i32
    %c0_i32_0 = arith.constant 0 : i32
    %c0_i32_1 = arith.constant 0 : i32
    return %c0_i32, %c0_i32_0 : i32, i32
  }
  func.func @transform_7(%arg0: i32) -> (i32, i32) {
    %c0_i32 = arith.constant 0 : i32
    %c0_i32_0 = arith.constant 0 : i32
    %c0_i32_1 = arith.constant 0 : i32
    return %c0_i32, %c0_i32_0 : i32, i32
  }
  func.func @transform_8(%arg0: i32) -> (i32, i32) {
    %c0_i32 = arith.constant 0 : i32
    %c0_i32_0 = arith.constant 0 : i32
    %c0_i32_1 = arith.constant 0 : i32
    return %c0_i32, %c0_i32_0 : i32, i32
  }
  func.func @transform_9(%arg0: i32) -> (i32, i32, i32) {
    %c0_i32 = arith.constant 0 : i32
    %c0_i32_0 = arith.constant 0 : i32
    %c0_i32_1 = arith.constant 0 : i32
    return %arg0, %c0_i32, %c0_i32_0 : i32, i32, i32
  }
}

</mosaic_0001>

<bundles_post_ra>
// kernel: cnn_forward.1
= control target key start
LH: loop header
LB: loop body
LE: loop exit
PB: predicated region body
PF: predicated region fallthrough
CT: control target
= control target key end

     0   :  { %14 = vsyncpa [#allocation4], 0  ;;  %s25315_s0 = inlined_call_operand.vmem [shape: bf16[2,576,32], index: 0, kind: input, shape index: {}]   ;;  %s25316_s1 = inlined_call_operand.vmem [shape: bf16[32,128], index: 1, kind: input, shape index: {}]   ;;  %s25317_s2 = inlined_call_operand.vmem [shape: f32[1,128], index: 2, kind: input, shape index: {}]   ;;  %s25318_s3 = inlined_call_operand.vmem [shape: bf16[9,128,128], index: 3, kind: input, shape index: {}]   ;;  %s25319_s4 = inlined_call_operand.vmem [shape: f32[1,128], index: 4, kind: input, shape index: {}]   ;;  %s25320_s5 = inlined_call_operand.vmem [shape: bf16[3200,1024], index: 5, kind: input, shape index: {}]   ;;  %s25321_s6 = inlined_call_operand.vmem [shape: f32[1,1024], index: 6, kind: input, shape index: {}]   ;;  %s25322_s7 = inlined_call_operand.vmem [shape: bf16[1024,128], index: 7, kind: input, shape index: {}]   ;;  %s25323_s8 = inlined_call_operand.vmem [shape: f32[1,128], index: 8, kind: input, shape index: {}]   ;;  %s25324_s9 = inlined_call_operand.hbm [shape: f32[2,1,128], index: 9, kind: output, shape index: {}]  }
   0x1   :  { %16 = vsyncpa [#allocation4 + $0x1], 0  ;;  %s18627_s30 = smov 0   ;;  %s18629_s10 = smov 0  }
   0x2   :  { %s18631_s11 = smov 0   ;;  %s18633_s12 = smov 0  }
   0x3 LB: > { %s18648_s13 = sadd.s32 4294967295, %s18572_s12   ;;  %s15707_s14 = sadd.s32 4294967294, %s18572_s12   ;;  %s18572_s12 = sphi %s18633_s12, %s25396_s12   ;;  %s18568_s11 = sphi %s18631_s11, %s25395_s11   ;;  %s18564_s10 = sphi %s18629_s10, %s25394_s10   ;;  %s18560_s30 = sphi %s18627_s30, %s25393_s30  }
   0x4   : > { %s18652_s15 = sadd.s32 1, %s18572_s12   ;;  %s223_s16 = sadd.s32 1, %s18568_s11 }
   0x5   : > { %s220_s17 = ssub.s32 %s18572_s12, %s18652_s15  ;;  %p233_p0 = scmp.ne.s32.totalorder %s18568_s11, %s18564_s10 }
   0x6   : > { %p221_p1 = scmp.eq.s32.totalorder %s220_s17, 0  ;;  %p234_p2 = scmp.eq.s32.totalorder %s18648_s13, 1 }
   0x7   : > { %p239_p3 = scmp.ne.s32.totalorder %s18564_s10, %s18560_s30  ;;  %p240_p4 = scmp.eq.s32.totalorder %s15707_s14, 1 }
   0x8   : > { %s18663_s18 = scalar_select %p221_p1, %s18568_s11, %s223_s16  }
   0x9   : > { %p18665_p5 = por %p234_p2, %p233_p0  ;;  %p18669_p6 = por %p240_p4, %p239_p3 }
   0xa   : > { %p15710_p7 = scmp.ge.s32.totalorder %s18572_s12, 1  ;;  %p290_p8 = scmp.lt.s32.totalorder %s18572_s12, 3 }
   0xc   : > { %p291_p9 = pnand %p15710_p7, %p290_p8 }
   0xe   : > { %294 = sbr.rel (%p291_p9) target bundleno = 3006 (0xbbe), region = 56 }
  0x13   : > { %v18331_v0 = vld [vmem:[%s25316_s1 + $0x8] sm:$0xff]   ;;  %p325_p10 = scmp.lt.s32.totalorder %s18648_s13, 1  ;;  %v18332_v1 = vld [vmem:[%s25316_s1] sm:$0xff]   ;;  %vm606_vm0 = vcmask 261120   ;;  %v18369_v38 = vld [vmem:[%s25318_s3 + $0x138] sm:$0xff]   ;;  %vm15626_vm1 = vcmask 1040384  }
  0x14   : > { %17925 = vmatprep.subr.bf16.mxu0 %v18331_v0  ;;  %v18370_v39 = vld [vmem:[%s25318_s3 + $0x78] sm:$0xff]   ;;  %v18371_v40 = vld [vmem:[%s25318_s3 + $0x70] sm:$0xff]   ;;  %v18373_v42 = vld [vmem:[%s25318_s3 + $0x68] sm:$0xff]   ;;  %s323_s24 = sand.u32 1, %s18564_s10   ;;  %s18576_s21 = smov [#allocation3]  }
  0x15   : > { %s326_s25 = scalar_select %p325_p10, %s18648_s13, 1  ;;  %17926 = vmatpush3.bf16.msra.mxu0 %v18331_v0  ;;  %18001 = vmatprep.subr.bf16.mxu1 %v18370_v39  ;;  %v18372_v41 = vld [vmem:[%s25318_s3 + $0x130] sm:$0xff]   ;;  %v18374_v43 = vld [vmem:[%s25318_s3 + $0x128] sm:$0xff]   ;;  %v18375_v44 = vld [vmem:[%s25318_s3 + $0x60] sm:$0xff]  }
  0x16   : > { %17927 = vmatprep.subr.bf16.mxu0 %v18332_v1  ;;  %18002 = vmatpush3.bf16.msra.mxu1 %v18370_v39  ;;  %v18376_v45 = vld [vmem:[%s25318_s3 + $0x120] sm:$0xff]   ;;  %v18377_v46 = vld [vmem:[%s25318_s3 + $0x58] sm:$0xff]   ;;  %v18379_v48 = vld [vmem:[%s25318_s3 + $0x50] sm:$0xff]   ;;  %s15640_s16 = scalar_lea.sflag [#allocation4], %s323_s24  ;;  %s18516_s22 = sshll.u32 %s18576_s21, 4  ;;  %s18517_s22 = int_to_ptr.vmem [resolvable:$false] %s18516_s22 }
  0x17   : > { %s18289_s26 = smul.u32 288, %s326_s25  ;;  %18003 = vmatprep.subr.bf16.mxu1 %v18371_v40  ;;  %v18378_v47 = vld [vmem:[%s25318_s3 + $0x118] sm:$0xff]   ;;  %v18380_v49 = vld [vmem:[%s25318_s3 + $0x110] sm:$0xff]   ;;  %v18381_v50 = vld [vmem:[%s25318_s3 + $0x48] sm:$0xff]   ;;  %s17652_s25 = sshll.u32 %s18648_s13, 4 }
  0x18   : > { %v18382_v52 = vld [vmem:[%s25318_s3 + $0x108] sm:$0xff]   ;;  %v18383_v54 = vld [vmem:[%s25318_s3 + $0x40] sm:$0xff]   ;;  %v18815_v59 = vld [vmem:[%s25318_s3 + $0x38] sm:$0xff]   ;;  %s15650_s14 = scalar_lea.hbm %s25324_s9, %s17652_s25  ;;  %s18518_s13 = scalar_lea.vmem %s18517_s22, 32 }
  0x19   : > { %s18686_s29 = scalar_lea.vmem %s25315_s0, %s18289_s26  ;;  %17928 = vmatpush3.bf16.msra.mxu0 %v18332_v1  ;;  %v18384_v56 = vld [vmem:[%s25318_s3 + $0x100] sm:$0xff]   ;;  %v18820_v60 = vld [vmem:[%s25318_s3 + $0x1b8] sm:$0xff]   ;;  %s324_s26 = scalar_lea.vmem [#allocation3], %s323_s24 }
  0x1a   : > { %v18333_v2 = vld [vmem:[%s18686_s29] sm:$0xff]   ;;  %v18334_v3 = vld [vmem:[%s18686_s29 + $0x8] sm:$0xff]   ;;  %v18335_v4 = vld [vmem:[%s18686_s29 + $0x10] sm:$0xff]   ;;  %18129 = vmatprep.subr.bf16.mxu0 %v18369_v38  ;;  %18004 = vmatpush3.bf16.msra.mxu1 %v18371_v40  ;;  %s15652_s27 = sshll.u32 %s324_s26, 4  ;;  %s15653_s27 = int_to_ptr.vmem [resolvable:$true] %s15652_s27 }
  0x1b   : > { %17929 = vmatprep.mubr.msk.bf16.mxu0 %vm606_vm0, %v18333_v2  ;;  %v18336_v5 = vld [vmem:[%s18686_s29 + $0x18] sm:$0xff]   ;;  %v18337_v6 = vld [vmem:[%s18686_s29 + $0x20] sm:$0xff]   ;;  %v18338_v7 = vld [vmem:[%s18686_s29 + $0x28] sm:$0xff]   ;;  %18005 = vmatprep.subr.bf16.mxu1 %v18373_v42  ;;  %s18512_s17 = scalar_lea.vmem %s15653_s27, 16  ;;  %p18519_p0 = scmp.lt.s32.totalorder %s15653_s27, %s18517_s22 }
  0x1c   : > { %17930 = vmatmul.mubr.msk.bf16.vlgmr.msra.gmra.mxu0 %vm606_vm0, %v18334_v3  ;;  %v18339_v8 = vld [vmem:[%s18686_s29 + $0x30] sm:$0xff]   ;;  %v18340_v9 = vld [vmem:[%s18686_s29 + $0x38] sm:$0xff]   ;;  %v18341_v10 = vld [vmem:[%s18686_s29 + $0x40] sm:$0xff]   ;;  %p18513_p11 = scmp.ne.s32.totalorder %s15653_s27, %s18512_s17  ;;  %p18520_p1 = scmp.lt.s32.totalorder %s18518_s13, %s18512_s17 }
  0x1d   : > { %17933 = vmatprep.mubr.msk.bf16.mxu0 %vm606_vm0, %v18335_v4  ;;  %v18342_v11 = vld [vmem:[%s18686_s29 + $0x48] sm:$0xff]   ;;  %v18343_v12 = vld [vmem:[%s18686_s29 + $0x50] sm:$0xff]   ;;  %v18344_v13 = vld [vmem:[%s18686_s29 + $0x58] sm:$0xff]   ;;  %18130 = vmatpush3.bf16.msra.mxu0 %v18369_v38 }
  0x1e   : > { %v18345_v14 = vld [vmem:[%s18686_s29 + $0x60] sm:$0xff]   ;;  %v18346_v15 = vld [vmem:[%s18686_s29 + $0x68] sm:$0xff]   ;;  %v18347_v16 = vld [vmem:[%s18686_s29 + $0x70] sm:$0xff]   ;;  %18131 = vmatprep.subr.bf16.mxu0 %v18372_v41  ;;  %18006 = vmatpush3.bf16.msra.mxu1 %v18373_v42  ;;  %p18514_p12 = pnand %p18513_p11, %p18665_p5  ;;  %p18521_p2 = por %p18520_p1, %p18519_p0 }
  0x1f   : > { %v18348_v17 = vld [vmem:[%s18686_s29 + $0x78] sm:$0xff]   ;;  %v18349_v18 = vld [vmem:[%s18686_s29 + $0x80] sm:$0xff]   ;;  %v18350_v19 = vld [vmem:[%s18686_s29 + $0x88] sm:$0xff]   ;;  %18007 = vmatprep.subr.bf16.mxu1 %v18375_v44 }
  0x20   : > { %v18351_v20 = vld [vmem:[%s18686_s29 + $0x90] sm:$0xff]   ;;  %v18352_v21 = vld [vmem:[%s18686_s29 + $0x98] sm:$0xff]   ;;  %v18353_v22 = vld [vmem:[%s18686_s29 + $0xa0] sm:$0xff]   ;;  %p18515_p13 = pneg %p18514_p12 }
  0x21   : > { %v18354_v23 = vld [vmem:[%s18686_s29 + $0xa8] sm:$0xff]   ;;  %v18355_v24 = vld [vmem:[%s18686_s29 + $0xb0] sm:$0xff]   ;;  %v18356_v25 = vld [vmem:[%s18686_s29 + $0xb8] sm:$0xff]   ;;  %18132 = vmatpush3.bf16.msra.mxu0 %v18372_v41 }
  0x22   : > { %v18357_v26 = vld [vmem:[%s18686_s29 + $0xc0] sm:$0xff]   ;;  %v18358_v27 = vld [vmem:[%s18686_s29 + $0xc8] sm:$0xff]   ;;  %v18359_v28 = vld [vmem:[%s18686_s29 + $0xd0] sm:$0xff]   ;;  %18133 = vmatprep.subr.bf16.mxu0 %v18374_v43  ;;  %18008 = vmatpush3.bf16.msra.mxu1 %v18375_v44  ;;  %p18522_p3 = pnand %p18521_p2, %p18515_p13 }
  0x23   : > { %v18360_v29 = vld [vmem:[%s18686_s29 + $0xd8] sm:$0xff]   ;;  %v18361_v30 = vld [vmem:[%s18686_s29 + $0xe0] sm:$0xff]   ;;  %v18362_v31 = vld [vmem:[%s18686_s29 + $0xe8] sm:$0xff]   ;;  %18009 = vmatprep.subr.bf16.mxu1 %v18377_v46 }
  0x24   : > { %17934 = vmatmul.mubr.msk.bf16.gmra.mxu0 %vm606_vm0, %v18336_v5  ;;  %v18363_v32 = vld [vmem:[%s18686_s29 + $0xf0] sm:$0xff]   ;;  %v18364_v33 = vld [vmem:[%s18686_s29 + $0xf8] sm:$0xff]   ;;  %v18365_v34 = vld [vmem:[%s18686_s29 + $0x100] sm:$0xff]  }
  0x25   : > { %17937 = vmatprep.mubr.msk.bf16.mxu0 %vm606_vm0, %v18337_v6  ;;  %v18366_v35 = vld [vmem:[%s18686_s29 + $0x108] sm:$0xff]   ;;  %v18367_v36 = vld [vmem:[%s18686_s29 + $0x110] sm:$0xff]   ;;  %v18368_v37 = vld [vmem:[%s18686_s29 + $0x118] sm:$0xff]   ;;  %18134 = vmatpush3.bf16.msra.mxu0 %v18374_v43 }
  0x26   : > { %18135 = vmatprep.subr.bf16.mxu0 %v18376_v45  ;;  %18010 = vmatpush3.bf16.msra.mxu1 %v18377_v46 }
  0x27   : > { %18011 = vmatprep.subr.bf16.mxu1 %v18379_v48 }
  0x29   : > { %18136 = vmatpush3.bf16.msra.mxu0 %v18376_v45 }
  0x2a   : > { %18137 = vmatprep.subr.bf16.mxu0 %v18378_v47  ;;  %18012 = vmatpush3.bf16.msra.mxu1 %v18379_v48 }
  0x2b   : > { %18013 = vmatprep.subr.bf16.mxu1 %v18381_v50 }
  0x2c   : > { %17938 = vmatmul.mubr.msk.bf16.gmra.mxu0 %vm606_vm0, %v18338_v7  ;;  %v18574_v7 = vmov 0.0  }
  0x2d   : > { %17941 = vmatprep.mubr.msk.bf16.mxu0 %vm606_vm0, %v18339_v8  ;;  %18138 = vmatpush3.bf16.msra.mxu0 %v18378_v47  ;;  %1180 = vst [vmem:[#allocation2 + $0x90] sm:$0xff] %v18574_v7  ;;  %v18837_v8 = vld [vmem:[%s25317_s2] ss:$0 sm:$0xff] }
  0x2e   : > { %18139 = vmatprep.subr.bf16.mxu0 %v18380_v49  ;;  %18014 = vmatpush3.bf16.msra.mxu1 %v18381_v50 }
  0x2f   : > { %18015 = vmatprep.subr.bf16.mxu1 %v18383_v54 }
  0x31   : > { %18140 = vmatpush3.bf16.msra.mxu0 %v18380_v49 }
  0x32   : > { %18141 = vmatprep.subr.bf16.mxu0 %v18382_v52  ;;  %18016 = vmatpush3.bf16.msra.mxu1 %v18383_v54 }
  0x33   : > { %18033 = vmatprep.subr.bf16.mxu1 %v18815_v59 }
  0x34   : > { %17942 = vmatmul.mubr.msk.bf16.gmra.mxu0 %vm606_vm0, %v18340_v9 }
  0x35   : > { %17945 = vmatprep.mubr.msk.bf16.mxu0 %vm606_vm0, %v18341_v10  ;;  %18142 = vmatpush3.bf16.msra.mxu0 %v18382_v52 }
  0x36   : > { %18143 = vmatprep.subr.bf16.mxu0 %v18384_v56 }
  0x39   : > { %18144 = vmatpush3.bf16.msra.mxu0 %v18384_v56 }
  0x3a   : > { %18193 = vmatprep.subr.bf16.mxu0 %v18820_v60 }
  0x3c   : > { %17946 = vmatmul.mubr.msk.bf16.gmra.mxu0 %vm606_vm0, %v18342_v11 }
  0x3d   : > { %17949 = vmatprep.mubr.msk.bf16.mxu0 %vm606_vm0, %v18343_v12 }
  0x44   : > { %17950 = vmatmul.mubr.msk.bf16.gmra.mxu0 %vm606_vm0, %v18344_v13 }
  0x45   : > { %17953 = vmatprep.mubr.msk.bf16.mxu0 %vm606_vm0, %v18345_v14 }
  0x4c   : > { %17954 = vmatmul.mubr.msk.bf16.gmra.mxu0 %vm606_vm0, %v18346_v15 }
  0x4d   : > { %17957 = vmatprep.mubr.msk.bf16.mxu0 %vm606_vm0, %v18347_v16 }
  0x54   : > { %17958 = vmatmul.mubr.msk.bf16.gmra.mxu0 %vm606_vm0, %v18348_v17 }
  0x55   : > { %17961 = vmatprep.mubr.msk.bf16.mxu0 %vm606_vm0, %v18349_v18 }
  0x5c   : > { %17962 = vmatmul.mubr.msk.bf16.gmra.mxu0 %vm606_vm0, %v18350_v19 }
  0x5d   : > { %17965 = vmatprep.mubr.msk.bf16.mxu0 %vm606_vm0, %v18351_v20 }
  0x64   : > { %17966 = vmatmul.mubr.msk.bf16.gmra.mxu0 %vm606_vm0, %v18352_v21 }
  0x65   : > { %17969 = vmatprep.mubr.msk.bf16.mxu0 %vm606_vm0, %v18353_v22 }
  0x6c   : > { %17970 = vmatmul.mubr.msk.bf16.gmra.mxu0 %vm606_vm0, %v18354_v23 }
  0x6d   : > { %17973 = vmatprep.mubr.msk.bf16.mxu0 %vm606_vm0, %v18355_v24 }
  0x74   : > { %17974 = vmatmul.mubr.msk.bf16.gmra.mxu0 %vm606_vm0, %v18356_v25 }
  0x75   : > { %17977 = vmatprep.mubr.msk.bf16.mxu0 %vm606_vm0, %v18357_v26 }
  0x7c   : > { %17978 = vmatmul.mubr.msk.bf16.gmra.mxu0 %vm606_vm0, %v18358_v27 }
  0x7d   : > { %17981 = vmatprep.mubr.msk.bf16.mxu0 %vm606_vm0, %v18359_v28 }
  0x84   : > { %17982 = vmatmul.mubr.msk.bf16.gmra.mxu0 %vm606_vm0, %v18360_v29 }
  0x85   : > { %17985 = vmatprep.mubr.msk.bf16.mxu0 %vm606_vm0, %v18361_v30 }
  0x8c   : > { %17986 = vmatmul.mubr.msk.bf16.gmra.mxu0 %vm606_vm0, %v18362_v31 }
  0x8d   : > { %17989 = vmatprep.mubr.msk.bf16.mxu0 %vm606_vm0, %v18363_v32 }
  0x94   : > { %17990 = vmatmul.mubr.msk.bf16.gmra.mxu0 %vm606_vm0, %v18364_v33 }
  0x95   : > { %17993 = vmatprep.mubr.msk.bf16.mxu0 %vm606_vm0, %v18365_v34 }
  0x9c   : > { %17994 = vmatmul.mubr.msk.bf16.gmra.mxu0 %vm606_vm0, %v18366_v35 }
  0x9d   : > { %17997 = vmatprep.mubr.msk.bf16.mxu0 %vm606_vm0, %v18367_v36 }
  0xa4   : > { %17998 = vmatmul.mubr.msk.bf16.gmra.mxu0 %vm606_vm0, %v18368_v37 }
  0xdc   : > { %v17931_v51 = vpop.f32.mrf.mxu0 }
  0xdd   : > { %v758_v21 = vadd.f32 %v17931_v51, %v18837_v8 }
  0xde   : > { %v749_v53 = vpop.f32.mrf.mxu0 }
  0xdf   : > { %v750_v10 = vadd.f32 %v18837_v8, %v749_v53  ;;  %v1038_v28 = vmax.f32 %v758_v21, 0.0 }
  0xe0   : > { %v18805_v55 = vpop.f32.mrf.mxu0 }
  0xe1   : > { %v1036_v14 = vmax.f32 %v750_v10, 0.0 }
  0xe2   : > { %v18810_v57 = vpop.f32.mrf.mxu0 }
  0xe4   : > { %v17935_v58 = vpop.f32.mrf.mxu0 }
  0xe5   : > { %v774_v35 = vadd.f32 %v17935_v58, %v18837_v8 }
  0xe6   : > { %v765_v61 = vpop.f32.mrf.mxu0 }
  0xe7   : > { %v766_v19 = vadd.f32 %v18837_v8, %v765_v61  ;;  %v1042_v42 = vmax.f32 %v774_v35, 0.0 }
  0xe8   : > { %v18824_v62 = vpop.f32.mrf.mxu0 }
  0xe9   : > { %v1040_v24 = vmax.f32 %v766_v19, 0.0 }
  0xea   : > { %v18826_v63 = vpop.f32.mrf.mxu0 }
  0xec   : > { %v17939_v0 = vpop.f32.mrf.mxu0 }
  0xed   : > { %v790_v49 = vadd.f32 %v17939_v0, %v18837_v8 }
  0xee   : > { %v781_v1 = vpop.f32.mrf.mxu0 }
  0xef   : > { %v782_v32 = vadd.f32 %v18837_v8, %v781_v1  ;;  %v1046_v58 = vmax.f32 %v790_v49, 0.0  ;;  %v753_v49 = vadd.f32 %v18837_v8, %v18810_v57 }
  0xf0   : > { %v18828_v2 = vpop.f32.mrf.mxu0 }
  0xf1   : > { %v1044_v38 = vmax.f32 %v782_v32, 0.0  ;;  %v18935_v57 = vadd.f32 %v18828_v2, %v18837_v8 }
  0xf2   : > { %v18830_v3 = vpop.f32.mrf.mxu0 }
  0xf4   : > { %v17943_v4 = vpop.f32.mrf.mxu0 }
  0xf6   : > { %v797_v5 = vpop.f32.mrf.mxu0 }
  0xf7   : > { %v798_v46 = vadd.f32 %v18837_v8, %v797_v5 }
  0xf8   : > { %v18832_v6 = vpop.f32.mrf.mxu0 }
  0xf9   : > { %v1048_v52 = vmax.f32 %v798_v46, 0.0 }
  0xfa   : > { %v18839_v9 = vpop.f32.mrf.mxu0 }
  0xfb   : > { %v18951_v2 = vadd.f32 %v18837_v8, %v18839_v9 }
  0xfc   : > { %v17947_v11 = vpop.f32.mrf.mxu0 }
  0xfd   : > { %v822_v12 = vadd.f32 %v17947_v11, %v18837_v8  ;;  %v806_v11 = vadd.f32 %v17943_v4, %v18837_v8 }
  0xfe   : > { %v813_v13 = vpop.f32.mrf.mxu0 }
  0xff   : > { %v1054_v15 = vmax.f32 %v822_v12, 0.0  ;;  %v814_v5 = vadd.f32 %v18837_v8, %v813_v13 }
 0x100   : > { %v18843_v16 = vpop.f32.mrf.mxu0 }
 0x101   : > { %v18845_v17 = vmax.f32 %v1036_v14, %v1054_v15  ;;  %v1052_v15 = vmax.f32 %v814_v5, 0.0  ;;  %v1037_v5 = vmax.f32 %v753_v49, 0.0 }
 0x102   : > { %v18847_v18 = vpop.f32.mrf.mxu0 }
 0x104   : > { %v17951_v20 = vpop.f32.mrf.mxu0 }
 0x105   : > { %v838_v22 = vadd.f32 %v17951_v20, %v18837_v8 }
 0x106   : > { %v829_v23 = vpop.f32.mrf.mxu0 }
 0x107   : > { %v1058_v25 = vmax.f32 %v838_v22, 0.0  ;;  %v830_v26 = vadd.f32 %v18837_v8, %v829_v23  ;;  %v1050_v22 = vmax.f32 %v806_v11, 0.0 }
 0x108   : > { %v18853_v27 = vpop.f32.mrf.mxu0 }
 0x109   : > { %v18855_v29 = vmax.f32 %v1040_v24, %v1058_v25  ;;  %v1056_v30 = vmax.f32 %v830_v26, 0.0 }
 0x10a   : > { %v18857_v31 = vpop.f32.mrf.mxu0 }
 0x10b   : > { %v18860_v33 = vmax.f32 %v1038_v28, %v1056_v30 }
 0x10c   : > { %v17955_v34 = vpop.f32.mrf.mxu0 }
 0x10d   : > { %v854_v36 = vadd.f32 %v17955_v34, %v18837_v8 }
 0x10e   : > { %v845_v37 = vpop.f32.mrf.mxu0 }
 0x10f   : > { %v1062_v39 = vmax.f32 %v854_v36, 0.0  ;;  %v846_v40 = vadd.f32 %v18837_v8, %v845_v37 }
 0x110   : > { %v18865_v41 = vpop.f32.mrf.mxu0 }
 0x111   : > { %v18867_v43 = vmax.f32 %v1044_v38, %v1062_v39  ;;  %v1060_v44 = vmax.f32 %v846_v40, 0.0  ;;  %v857_v9 = vadd.f32 %v18865_v41, %v18837_v8 }
 0x112   : > { %v18869_v45 = vpop.f32.mrf.mxu0 }
 0x113   : > { %v18872_v47 = vmax.f32 %v1042_v42, %v1060_v44 }
 0x114   : > { %v17959_v48 = vpop.f32.mrf.mxu0 }
 0x115   : > { %v870_v50 = vadd.f32 %v17959_v48, %v18837_v8  ;;  %v761_v48 = vadd.f32 %v18805_v55, %v18837_v8 }
 0x116   : > { %v861_v51 = vpop.f32.mrf.mxu0 }
 0x117   : > { %v1066_v53 = vmax.f32 %v870_v50, 0.0  ;;  %v862_v54 = vadd.f32 %v18837_v8, %v861_v51  ;;  %v18925_v51 = vadd.f32 %v18824_v62, %v18837_v8  ;;  %v785_v62 = vadd.f32 %v18837_v8, %v18830_v3 }
 0x118   : > { %v18877_v56 = vpop.f32.mrf.mxu0  ;;  %v833_v3 = vadd.f32 %v18837_v8, %v18857_v31 }
 0x119   : > { %v18879_v61 = vmax.f32 %v1048_v52, %v1066_v53  ;;  %v1064_v1 = vmax.f32 %v862_v54, 0.0  ;;  %v769_v53 = vadd.f32 %v18837_v8, %v18826_v63  ;;  %v1043_v63 = vmax.f32 %v18925_v51, 0.0 }
 0x11a   : > { %v18881_v7 = vpop.f32.mrf.mxu0 }
 0x11b   : > { %v18884_v10 = vmax.f32 %v1046_v58, %v1064_v1  ;;  %v1039_v58 = vmax.f32 %v761_v48, 0.0  ;;  %v825_v1 = vadd.f32 %v18843_v16, %v18837_v8 }
 0x11c   : > { %v17963_v0 = vpop.f32.mrf.mxu0 }
 0x11d   : > { %v886_v12 = vadd.f32 %v17963_v0, %v18837_v8  ;;  %v841_v0 = vadd.f32 %v18853_v27, %v18837_v8 }
 0x11e   : > { %v877_v14 = vpop.f32.mrf.mxu0 }
 0x11f   : > { %v1070_v19 = vmax.f32 %v886_v12, 0.0  ;;  %v878_v20 = vadd.f32 %v18837_v8, %v877_v14  ;;  %v1059_v48 = vmax.f32 %v841_v0, 0.0 }
 0x120   : > { %v18889_v21 = vpop.f32.mrf.mxu0 }
 0x121   : > { %v18891_v23 = vmax.f32 %v1052_v15, %v1070_v19  ;;  %v1068_v24 = vmax.f32 %v878_v20, 0.0  ;;  %v1041_v15 = vmax.f32 %v769_v53, 0.0  ;;  %v18947_v19 = vadd.f32 %v18832_v6, %v18837_v8 }
 0x122   : > { %v18893_v25 = vpop.f32.mrf.mxu0  ;;  %v1055_v20 = vmax.f32 %v825_v1, 0.0  ;;  %v1045_v6 = vmax.f32 %v785_v62, 0.0  ;;  %v1049_v1 = vmax.f32 %v18951_v2, 0.0 }
 0x123   : > { %v18895_v13 = vmax.f32 %v1050_v22, %v1068_v24  ;;  %v18957_v22 = vadd.f32 %v18837_v8, %v18847_v18 }
 0x124   : > { %v17967_v26 = vpop.f32.mrf.mxu0 }
 0x125   : > { %v902_v62 = vadd.f32 %v17967_v26, %v18837_v8  ;;  %v1053_v41 = vmax.f32 %v18957_v22, 0.0 }
 0x126   : > { %v893_v28 = vpop.f32.mrf.mxu0 }
 0x127   : > { %v894_v52 = vadd.f32 %v18837_v8, %v893_v28 }
 0x128   : > { %v18897_v4 = vpop.f32.mrf.mxu0 }
 0x129   : > { %v1072_v12 = vmax.f32 %v894_v52, 0.0 }
 0x12a   : > { %v896_v30 = vpop.f32.mrf.mxu0 }
 0x12b   : > { %v897_v16 = vadd.f32 %v18837_v8, %v896_v30  ;;  %v1047_v30 = vmax.f32 %v18935_v57, 0.0 }
 0x12c   : > { %v18899_v32 = vpop.f32.mrf.mxu0 }
 0x12d   : > { %v1073_v52 = vmax.f32 %v897_v16, 0.0 }
 0x12e   : > { %v909_v34 = vpop.f32.mrf.mxu0 }
 0x12f   : > { %v910_v31 = vadd.f32 %v18837_v8, %v909_v34 }
 0x130   : > { %v18901_v35 = vpop.f32.mrf.mxu0 }
 0x132   : > { %v912_v36 = vpop.f32.mrf.mxu0 }
 0x134   : > { %v18903_v37 = vpop.f32.mrf.mxu0 }
 0x136   : > { %v18905_v38 = vpop.f32.mrf.mxu0 }
 0x138   : > { %v18907_v39 = vpop.f32.mrf.mxu0 }
 0x13a   : > { %v18909_v40 = vpop.f32.mrf.mxu0 }
 0x13c   : > { %v18911_v42 = vpop.f32.mrf.mxu0 }
 0x13e   : > { %v18913_v44 = vpop.f32.mrf.mxu0 }
 0x140   : > { %v18915_v46 = vpop.f32.mrf.mxu0 }
 0x142   : > { %v18921_v50 = vpop.f32.mrf.mxu0 }
 0x144   : > { %v17983_v54 = vpop.f32.mrf.mxu0 }
 0x145   : > { %v966_v55 = vadd.f32 %v17983_v54, %v18837_v8  ;;  %v1051_v54 = vmax.f32 %v18947_v19, 0.0 }
 0x146   : > { %v18941_v11 = vpop.f32.mrf.mxu0 }
 0x147   : > { %v1090_v14 = vmax.f32 %v966_v55, 0.0  ;;  %v1057_v55 = vmax.f32 %v833_v3, 0.0  ;;  %v1076_v3 = vmax.f32 %v910_v31, 0.0 }
 0x148   : > { %v17984_v27 = vpop.f32.mrf.mxu0 }
 0x149   : > { %v1126_v24 = vmax.f32 %v1072_v12, %v1090_v14  ;;  %v969_v28 = vadd.f32 %v17984_v27, %v18837_v8  ;;  %v1109_v12 = vmax.f32 %v1037_v5, %v1055_v20  ;;  %v1113_v14 = vmax.f32 %v1041_v15, %v1059_v48 }
 0x14a   : > { %v18963_v49 = vpop.f32.mrf.mxu0  ;;  %v849_v27 = vadd.f32 %v18837_v8, %v18869_v45  ;;  %v1111_v20 = vmax.f32 %v1039_v58, %v1057_v55  ;;  %v905_v15 = vadd.f32 %v18897_v4, %v18837_v8 }
 0x14b   : > { %v18967_v53 = vmax.f32 %v18845_v17, %v1126_v24  ;;  %v1091_v18 = vmax.f32 %v969_v28, 0.0  ;;  %v1063_v17 = vmax.f32 %v857_v9, 0.0  ;;  %v913_v24 = vadd.f32 %v18837_v8, %v912_v36 }
 0x14c   : > { %v17987_v0 = vpop.f32.mrf.mxu0  ;;  %v1061_v58 = vmax.f32 %v849_v27, 0.0 }
 0x14d   : > { %1162 = vst [vmem:[#allocation2] sm:$0xff] %v18967_v53  ;;  %v1127_v16 = vmax.f32 %v1073_v52, %v1091_v18  ;;  %v982_v34 = vadd.f32 %v17987_v0, %v18837_v8  ;;  %v873_v52 = vadd.f32 %v18877_v56, %v18837_v8  ;;  %v1074_v18 = vmax.f32 %v902_v62, 0.0 }
 0x14e   : > { %v973_v2 = vpop.f32.mrf.mxu0  ;;  %v18989_v0 = vmax.f32 %v1045_v6, %v1063_v17  ;;  %v1077_v55 = vmax.f32 %v913_v24, 0.0  ;;  %v926_v56 = vadd.f32 %v18837_v8, %v18905_v38  ;;  %v918_v6 = vadd.f32 %v18899_v32, %v18837_v8 }
 0x14f   : > { %v18978_v28 = vmax.f32 %v1109_v12, %v1127_v16  ;;  %v1094_v26 = vmax.f32 %v982_v34, 0.0  ;;  %v974_v5 = vadd.f32 %v18837_v8, %v973_v2  ;;  %v1067_v2 = vmax.f32 %v873_v52, 0.0 }
 0x150   : > { %v17988_v48 = vpop.f32.mrf.mxu0  ;;  %v1080_v52 = vmax.f32 %v926_v56, 0.0  ;;  %v929_v32 = vadd.f32 %v18837_v8, %v18909_v40 }
 0x151   : > { %1163 = vst [vmem:[#allocation2 + $0x8] sm:$0xff] %v18978_v28  ;;  %v1130_v45 = vmax.f32 %v1076_v3, %v1094_v26  ;;  %v1092_v36 = vmax.f32 %v974_v5, 0.0  ;;  %v985_v9 = vadd.f32 %v17988_v48, %v18837_v8  ;;  %v1196_v31 = vpack.c.bf16 %v18978_v28, %v18967_v53  ;;  %v18403_v53 = vld [vmem:[%s25318_s3 + $0xb0] sm:$0xff]  }
 0x152   : > { %v976_v62 = vpop.f32.mrf.mxu0  ;;  %v865_v3 = vadd.f32 %v18837_v8, %v18881_v7  ;;  %v1075_v26 = vmax.f32 %v905_v15, 0.0  ;;  %v1115_v5 = vmax.f32 %v1043_v63, %v1061_v58  ;;  %v921_v7 = vadd.f32 %v18901_v35, %v18837_v8  ;;  %v18404_v28 = vld [vmem:[%s25318_s3 + $0x230] sm:$0xff]  }
 0x153   : > { %v18994_v4 = vmax.f32 %v18855_v29, %v1130_v45  ;;  %v1128_v12 = vmax.f32 %v1074_v18, %v1092_v36  ;;  %v1095_v16 = vmax.f32 %v985_v9, 0.0  ;;  %v977_v34 = vadd.f32 %v18837_v8, %v976_v62 }
 0x154   : > { %v17991_v17 = vpop.f32.mrf.mxu0  ;;  %v19016_v36 = vmax.f32 %v1049_v1, %v1067_v2  ;;  %v1065_v51 = vmax.f32 %v865_v3, 0.0  ;;  %v19020_v63 = vadd.f32 %v18889_v21, %v18837_v8  ;;  %v1078_v35 = vmax.f32 %v918_v6, 0.0 }
 0x155   : > { %1166 = vst [vmem:[#allocation2 + $0x20] sm:$0xff] %v18994_v4  ;;  %v19003_v38 = vmax.f32 %v18860_v33, %v1128_v12  ;;  %v1131_v29 = vmax.f32 %v1077_v55, %v1095_v16  ;;  %v1093_v27 = vmax.f32 %v977_v34, 0.0  ;;  %v998_v24 = vadd.f32 %v17991_v17, %v18837_v8 }
 0x156   : > { %v989_v18 = vpop.f32.mrf.mxu0  ;;  %v1079_v56 = vmax.f32 %v921_v7, 0.0  ;;  %v1081_v62 = vmax.f32 %v929_v32, 0.0  ;;  %v942_v1 = vadd.f32 %v18837_v8, %v18913_v44  ;;  %v934_v3 = vadd.f32 %v18903_v37, %v18837_v8 }
 0x157   : > { %1164 = vst [vmem:[#allocation2 + $0x10] sm:$0xff] %v19003_v38  ;;  %v19013_v15 = vmax.f32 %v1113_v14, %v1131_v29  ;;  %v1129_v33 = vmax.f32 %v1075_v26, %v1093_v27  ;;  %v1098_v48 = vmax.f32 %v998_v24, 0.0  ;;  %v990_v45 = vadd.f32 %v18837_v8, %v989_v18 }
 0x158   : > { %v17992_v9 = vpop.f32.mrf.mxu0  ;;  %v19039_v26 = vadd.f32 %v18907_v39, %v18837_v8  ;;  %v19052_v39 = vmax.f32 %v1047_v30, %v1065_v51  ;;  %v1071_v24 = vmax.f32 %v19020_v63, 0.0  ;;  %v1084_v7 = vmax.f32 %v942_v1, 0.0  ;;  %v1220_v57 = vld [vmem:[#allocation2 + $0x1] sm:$0xff] }
 0x159   : > { %1167 = vst [vmem:[#allocation2 + $0x28] sm:$0xff] %v19013_v15  ;;  %v19023_v40 = vmax.f32 %v1111_v20, %v1129_v33  ;;  %v1134_v58 = vmax.f32 %v1080_v52, %v1098_v48  ;;  %v1096_v14 = vmax.f32 %v990_v45, 0.0  ;;  %v1001_v55 = vadd.f32 %v17992_v9, %v18837_v8 }
 0x15a   : > { %v992_v12 = vpop.f32.mrf.mxu0  ;;  %v1198_v21 = vpack.c.bf16 %v19013_v15, %v18994_v4  ;;  %v945_v52 = vadd.f32 %v18837_v8, %v18921_v50  ;;  %v1082_v30 = vmax.f32 %v934_v3, 0.0  ;;  %v1083_v51 = vmax.f32 %v19039_v26, 0.0 }
 0x15b   : > { %1165 = vst [vmem:[#allocation2 + $0x18] sm:$0xff] %v19023_v40  ;;  %v19032_v16 = vmax.f32 %v18867_v43, %v1134_v58  ;;  %v1132_v20 = vmax.f32 %v1078_v35, %v1096_v14  ;;  %v1099_v34 = vmax.f32 %v1001_v55, 0.0  ;;  %v993_v2 = vadd.f32 %v18837_v8, %v992_v12 }
 0x15c   : > { %v17995_v44 = vpop.f32.mrf.mxu0  ;;  %v2359_v6 = vpack.c.bf16 %v18994_v4, %v19023_v40  ;;  %v1197_v17 = vpack.c.bf16 %v19023_v40, %v19003_v38  ;;  %v958_v1 = vadd.f32 %v18837_v8, %v18941_v11  ;;  %v18406_v4 = vld [vmem:[%s25318_s3 + $0x228] sm:$0xff]   ;;  %v18407_v38 = vld [vmem:[%s25318_s3 + $0xa0] sm:$0xff]   ;;  %v18409_v40 = vld [vmem:[%s25318_s3 + $0x98] sm:$0xff]  }
 0x15d   : > { %1170 = vst [vmem:[#allocation2 + $0x40] sm:$0xff] %v19032_v16  ;;  %v19047_v43 = vmax.f32 %v18872_v47, %v1132_v20  ;;  %v1135_v29 = vmax.f32 %v1081_v62, %v1099_v34  ;;  %v1097_v27 = vmax.f32 %v993_v2, 0.0  ;;  %v1014_v37 = vadd.f32 %v17995_v44, %v18837_v8 }
 0x15e   : > { %v1005_v32 = vpop.f32.mrf.mxu0  ;;  %v1221_v18 = vld [vmem:[#allocation2 + $0x9] sm:$0xff]  ;;  %v1085_v62 = vmax.f32 %v945_v52, 0.0 }
 0x15f   : > { %1168 = vst [vmem:[#allocation2 + $0x30] sm:$0xff] %v19047_v43  ;;  %v19059_v47 = vmax.f32 %v18989_v0, %v1135_v29  ;;  %v1133_v33 = vmax.f32 %v1079_v56, %v1097_v27  ;;  %v1102_v48 = vmax.f32 %v1014_v37, 0.0  ;;  %v1006_v45 = vadd.f32 %v18837_v8, %v1005_v32  ;;  %v1946_v29 = vld [vmem:[#allocation2 + $0xd] sm:$0xff] }
 0x160   : > { %v17996_v35 = vpop.f32.mrf.mxu0  ;;  %v1235_v9 = vpack.c.bf16 %v1221_v18, %v1220_v57  ;;  %v2360_v50 = vpack.c.bf16 %v19047_v43, %v19013_v15  ;;  %v19071_v56 = vadd.f32 %v18911_v42, %v18837_v8  ;;  %v1949_v11 = vld [vmem:[#allocation2 + $0x25] sm:$0xff]  ;;  %v18387_v18 = vld [vmem:[%s25318_s3 + $0x30] sm:$0xff]  }
 0x161   : > { %1171 = vst [vmem:[#allocation2 + $0x48] sm:$0xff] %v19059_v47  ;;  %v19066_v58 = vmax.f32 %v1115_v5, %v1133_v33  ;;  %v1138_v14 = vmax.f32 %v1084_v7, %v1102_v48  ;;  %v1100_v0 = vmax.f32 %v1006_v45, 0.0  ;;  %v1017_v55 = vadd.f32 %v17996_v35, %v18837_v8  ;;  %v18408_v15 = vld [vmem:[%s25318_s3 + $0x220] sm:$0xff]  }
 0x162   : > { %18017 = vmatprep.mubr.bf16.mxu1 %v1235_v9  ;;  %v1008_v12 = vpop.f32.mrf.mxu0  ;;  %v1222_v20 = vld [vmem:[#allocation2 + $0x11] sm:$0xff]  ;;  %v1223_v34 = vld [vmem:[#allocation2 + $0x19] sm:$0xff]  ;;  %v1200_v5 = vpack.c.bf16 %v19059_v47, %v19032_v16  ;;  %v19097_v35 = vadd.f32 %v18837_v8, %v18893_v25  ;;  %v1088_v9 = vmax.f32 %v958_v1, 0.0 }
 0x163   : > { %v1947_v2 = vld [vmem:[#allocation2 + $0x15] sm:$0xff]  ;;  %1169 = vst [vmem:[#allocation2 + $0x38] sm:$0xff] %v19066_v58  ;;  %v19079_v3 = vmax.f32 %v18879_v61, %v1138_v14  ;;  %v1136_v26 = vmax.f32 %v1082_v30, %v1100_v0  ;;  %v1103_v42 = vmax.f32 %v1017_v55, 0.0  ;;  %v1009_v44 = vadd.f32 %v18837_v8, %v1008_v12  ;;  %v1948_v27 = vld [vmem:[#allocation2 + $0x1d] sm:$0xff] }
 0x164   : > { %v17999_v37 = vpop.f32.mrf.mxu0  ;;  %v1236_v7 = vpack.c.bf16 %v1223_v34, %v1222_v20  ;;  %v1961_v52 = vpack.c.bf16 %v1947_v2, %v1946_v29  ;;  %v1962_v32 = vpack.c.bf16 %v1949_v11, %v1948_v27  ;;  %v2361_v33 = vpack.c.bf16 %v19032_v16, %v19066_v58  ;;  %v18388_v30 = vld [vmem:[%s25318_s3 + $0x1b0] sm:$0xff]  }
 0x165   : > { %1174 = vst [vmem:[#allocation2 + $0x60] sm:$0xff] %v19079_v3  ;;  %v19089_v61 = vmax.f32 %v18884_v10, %v1136_v26  ;;  %v1139_v48 = vmax.f32 %v1085_v62, %v1103_v42  ;;  %v1101_v45 = vmax.f32 %v1009_v44, 0.0  ;;  %v1030_v57 = vadd.f32 %v17999_v37, %v18837_v8  ;;  %v18390_v42 = vld [vmem:[%s25318_s3 + $0x1a8] sm:$0xff]   ;;  %v18411_v16 = vld [vmem:[%s25318_s3 + $0x90] sm:$0xff]  }
 0x166   : > { %v961_v14 = vadd.f32 %v18837_v8, %v18963_v49  ;;  %18018 = vmatmul.mubr.bf16.vlgmr.msra.gmra.mxu1 %v1236_v7  ;;  %18145 = vmatprep.mubr.bf16.mxu0 %v1961_v52  ;;  %v1021_v10 = vpop.f32.mrf.mxu0  ;;  %v19101_v0 = vld [vmem:[#allocation2 + $0x29] sm:$0xff]  ;;  %v1199_v55 = vpack.c.bf16 %v19066_v58, %v19047_v43  ;;  %v19111_v49 = vld [vmem:[#allocation2 + $0x21] sm:$0xff]  ;;  %v1086_v20 = vmax.f32 %v19071_v56, 0.0  ;;  %v953_v34 = vadd.f32 %v18915_v46, %v18837_v8 }
 0x167   : > { %1172 = vst [vmem:[#allocation2 + $0x50] sm:$0xff] %v19089_v61  ;;  %v19107_v62 = vmax.f32 %v19016_v36, %v1139_v48  ;;  %v1137_v12 = vmax.f32 %v1083_v51, %v1101_v45  ;;  %v1106_v25 = vmax.f32 %v1030_v57, 0.0  ;;  %18034 = vmatpush3.bf16.msra.mxu1 %v18815_v59  ;;  %v1022_v1 = vadd.f32 %v18837_v8, %v1021_v10  ;;  %v18389_v59 = vld [vmem:[%s25318_s3 + $0x28] sm:$0xff]  }
 0x168   : > { %18146 = vmatmul.mubr.bf16.vlgmr.msra.gmra.mxu0 %v1962_v32  ;;  %v18000_v2 = vpop.f32.mrf.mxu0  ;;  %18035 = vmatprep.subr.bf16.mxu1 %v18387_v18  ;;  %v1237_v36 = vpack.c.bf16 %v19101_v0, %v19111_v49  ;;  %v2362_v51 = vpack.c.bf16 %v19089_v61, %v19059_v47  ;;  %v1125_v44 = vmax.f32 %v1053_v41, %v1071_v24  ;;  %v1069_v29 = vmax.f32 %v19097_v35, 0.0  ;;  %v1950_v32 = vld [vmem:[#allocation2 + $0x2d] sm:$0xff]  ;;  %v1953_v45 = vld [vmem:[#allocation2 + $0x45] sm:$0xff] }
 0x169   : > { %18194 = vmatpush3.bf16.msra.mxu0 %v18820_v60  ;;  %1175 = vst [vmem:[#allocation2 + $0x68] sm:$0xff] %v19107_v62  ;;  %v19126_v56 = vmax.f32 %v19052_v39, %v1137_v12  ;;  %v1142_v46 = vmax.f32 %v1088_v9, %v1106_v25  ;;  %v1104_v26 = vmax.f32 %v1022_v1, 0.0  ;;  %v1033_v60 = vadd.f32 %v18000_v2, %v18837_v8  ;;  %v19164_v1 = vld [vmem:[#allocation2 + $0x41] sm:$0xff]  ;;  %v1549_v43 = vld [vmem:[#allocation2 + $0xa] sm:$0xff] }
 0x16a   : > { %18195 = vmatprep.subr.bf16.mxu0 %v18388_v30  ;;  %v1089_v27 = vmax.f32 %v961_v14, 0.0  ;;  %18021 = vmatprep.mubr.bf16.mxu1 %v1237_v36  ;;  %v1024_v39 = vpop.f32.mrf.mxu0  ;;  %v19137_v11 = vld [vmem:[#allocation2 + $0x31] sm:$0xff]  ;;  %v19139_v37 = vld [vmem:[#allocation2 + $0x39] sm:$0xff]  ;;  %v1202_v52 = vpack.c.bf16 %v19107_v62, %v19079_v3  ;;  %v1087_v57 = vmax.f32 %v953_v34, 0.0  ;;  %v1123_v25 = vmax.f32 %v1051_v54, %v1069_v29  ;;  %v18414_v47 = vld [vmem:[%s25318_s3 + $0x208] sm:$0xff]  }
 0x16b   : > { %v1951_v7 = vld [vmem:[#allocation2 + $0x35] sm:$0xff]  ;;  %1173 = vst [vmem:[#allocation2 + $0x58] sm:$0xff] %v19126_v56  ;;  %v19145_v63 = vmax.f32 %v18891_v23, %v1142_v46  ;;  %v1140_v22 = vmax.f32 %v1086_v20, %v1104_v26  ;;  %v1107_v41 = vmax.f32 %v1033_v60, 0.0  ;;  %18036 = vmatpush3.bf16.msra.mxu1 %v18387_v18  ;;  %v1025_v24 = vadd.f32 %v18837_v8, %v1024_v39  ;;  %v1952_v48 = vld [vmem:[#allocation2 + $0x3d] sm:$0xff] }
 0x16c   : > { %18037 = vmatprep.subr.bf16.mxu1 %v18389_v59  ;;  %v1238_v35 = vpack.c.bf16 %v19139_v37, %v19137_v11  ;;  %v1963_v9 = vpack.c.bf16 %v1951_v7, %v1950_v32  ;;  %v1964_v14 = vpack.c.bf16 %v1953_v45, %v1952_v48  ;;  %v18391_v23 = vld [vmem:[%s25318_s3 + $0x20] sm:$0xff]   ;;  %v2363_v12 = vpack.c.bf16 %v19079_v3, %v19126_v56  ;;  %v18393_v54 = vld [vmem:[%s25318_s3 + $0x18] sm:$0xff]   ;;  %v18396_v32 = vld [vmem:[%s25318_s3 + $0x190] sm:$0xff]  }
 0x16d   : > { %18196 = vmatpush3.bf16.msra.mxu0 %v18388_v30  ;;  %1178 = vst [vmem:[#allocation2 + $0x80] sm:$0xff] %v19145_v63  ;;  %v19155_v18 = vmax.f32 %v18895_v13, %v1140_v22  ;;  %v1143_v8 = vmax.f32 %v1089_v27, %v1107_v41  ;;  %v1105_v10 = vmax.f32 %v1025_v24, 0.0  ;;  %v18392_v30 = vld [vmem:[%s25318_s3 + $0x1a0] sm:$0xff]   ;;  %v1201_v13 = vpack.c.bf16 %v19126_v56, %v19089_v61  ;;  %v18394_v26 = vld [vmem:[%s25318_s3 + $0x198] sm:$0xff]   ;;  %v18395_v24 = vld [vmem:[%s25318_s3 + $0x10] sm:$0xff]  }
 0x16e   : > { %18197 = vmatprep.subr.bf16.mxu0 %v18390_v42  ;;  %18022 = vmatmul.mubr.bf16.gmra.mxu1 %v1238_v35  ;;  %v19166_v20 = vld [vmem:[#allocation2 + $0x49] sm:$0xff]  ;;  %v18415_v3 = vld [vmem:[%s25318_s3 + $0x80] sm:$0xff]   ;;  %v18417_v56 = vld [vmem:[%s25318_s3 + $0xf8] sm:$0xff]  }
 0x16f   : > { %18149 = vmatprep.mubr.bf16.mxu0 %v1963_v9  ;;  %1176 = vst [vmem:[#allocation2 + $0x70] sm:$0xff] %v19155_v18  ;;  %v19171_v34 = vmax.f32 %v1125_v44, %v1143_v8  ;;  %v1141_v2 = vmax.f32 %v1087_v57, %v1105_v10  ;;  %18038 = vmatpush3.bf16.msra.mxu1 %v18389_v59  ;;  %v1954_v59 = vld [vmem:[#allocation2 + $0x4d] sm:$0xff]  ;;  %v1548_v58 = vld [vmem:[#allocation2 + $0x2] sm:$0xff] }
 0x170   : > { %18150 = vmatmul.mubr.bf16.gmra.mxu0 %v1964_v14  ;;  %v1239_v19 = vpack.c.bf16 %v19166_v20, %v19164_v1  ;;  %18039 = vmatprep.subr.bf16.mxu1 %v18391_v23  ;;  %v2364_v36 = vpack.c.bf16 %v19155_v18, %v19107_v62  ;;  %v1957_v7 = vld [vmem:[#allocation2 + $0x65] sm:$0xff]  ;;  %v2559_v57 = vpack.c.bf16 %v19137_v11, %v19101_v0 }
 0x171   : > { %18198 = vmatpush3.bf16.msra.mxu0 %v18390_v42  ;;  %1179 = vst [vmem:[#allocation2 + $0x88] sm:$0xff] %v19171_v34  ;;  %v19181_v46 = vmax.f32 %v1123_v25, %v1141_v2  ;;  %v19201_v48 = vld [vmem:[#allocation2 + $0x61] sm:$0xff]  ;;  %v2560_v9 = vpack.c.bf16 %v19164_v1, %v19139_v37  ;;  %v2366_v61 = vpack.c.bf16 %v19171_v34, %v19171_v34  ;;  %v18418_v34 = vld [vmem:[%s25318_s3 + $0xf0] sm:$0xff]  }
 0x172   : > { %18025 = vmatprep.mubr.bf16.mxu1 %v1239_v19  ;;  %18199 = vmatprep.subr.bf16.mxu0 %v18392_v30  ;;  %v19186_v60 = vld [vmem:[#allocation2 + $0x51] sm:$0xff]  ;;  %v19188_v42 = vld [vmem:[#allocation2 + $0x59] sm:$0xff]  ;;  %v18397_v14 = vld [vmem:[%s25318_s3 + $0x8] sm:$0xff]  }
 0x173   : > { %v1955_v44 = vld [vmem:[#allocation2 + $0x55] sm:$0xff]  ;;  %1177 = vst [vmem:[#allocation2 + $0x78] sm:$0xff] %v19181_v46  ;;  %18040 = vmatpush3.bf16.msra.mxu1 %v18391_v23  ;;  %v1240_v29 = vpack.c.bf16 %v19188_v42, %v19186_v60  ;;  %v1956_v39 = vld [vmem:[#allocation2 + $0x5d] sm:$0xff]  ;;  %v2365_v22 = vpack.c.bf16 %v19145_v63, %v19181_v46  ;;  %v2561_v23 = vpack.c.bf16 %v19186_v60, %v19166_v20  ;;  %v1553_v63 = vld [vmem:[#allocation2 + $0x2a] sm:$0xff] }
 0x174   : > { %v1965_v27 = vpack.c.bf16 %v1955_v44, %v1954_v59  ;;  %18041 = vmatprep.subr.bf16.mxu1 %v18393_v54  ;;  %v1966_v41 = vpack.c.bf16 %v1957_v7, %v1956_v39  ;;  %v2562_v8 = vpack.c.bf16 %v19201_v48, %v19188_v42  ;;  %v18401_v39 = vld [vmem:[%s25318_s3 + $0xb8] sm:$0xff]   ;;  %v18416_v62 = vld [vmem:[%s25318_s3 + $0x200] sm:$0xff]  }
 0x175   : > { %18200 = vmatpush3.bf16.msra.mxu0 %v18392_v30  ;;  %v18398_v30 = vld [vmem:[%s25318_s3 + $0x188] sm:$0xff]   ;;  %v18402_v7 = vld [vmem:[%s25318_s3 + $0x238] sm:$0xff]   ;;  %v3347_v11 = vld [vmem:[%s25320_s5 + $0x5c0] sm:$0xff] }
 0x176   : > { %18153 = vmatprep.mubr.bf16.mxu0 %v1965_v27  ;;  %18201 = vmatprep.subr.bf16.mxu0 %v18394_v26  ;;  %v19203_v45 = vld [vmem:[#allocation2 + $0x69] sm:$0xff]  ;;  %v18400_v27 = vld [vmem:[%s25318_s3 + $0x180] sm:$0xff]  }
 0x177   : > { %18026 = vmatmul.mubr.bf16.gmra.mxu1 %v1240_v29  ;;  %v1241_v35 = vpack.c.bf16 %v19203_v45, %v19201_v48  ;;  %v1958_v10 = vld [vmem:[#allocation2 + $0x6d] sm:$0xff]  ;;  %v18399_v29 = vld [vmem:[%s25318_s3] sm:$0xff]  }
 0x178   : > { %18042 = vmatpush3.bf16.msra.mxu1 %v18393_v54  ;;  %18154 = vmatmul.mubr.bf16.gmra.mxu0 %v1966_v41  ;;  %v2557_v0 = vld [vmem:[#allocation2 + $0x89] sm:$0xff]  ;;  %v3351_v37 = vld [vmem:[%s25320_s5 + $0x5e0] sm:$0xff] }
 0x179   : > { %18202 = vmatpush3.bf16.msra.mxu0 %v18394_v26  ;;  %18043 = vmatprep.subr.bf16.mxu1 %v18395_v24  ;;  %v2565_v1 = vpack.c.bf16 %v2557_v0, %v2557_v0  ;;  %v16172_v20 = vcombine.low %v3347_v11, %v3351_v37  ;;  %v16173_v60 = vcombine.high %v3347_v11, %v3351_v37  ;;  %v3339_v42 = vld [vmem:[%s25320_s5 + $0x580] sm:$0xff] }
 0x17a   : > { %18029 = vmatprep.mubr.bf16.mxu1 %v1241_v35  ;;  %18203 = vmatprep.subr.bf16.mxu0 %v18396_v32  ;;  %v19221_v25 = vld [vmem:[#allocation2 + $0x71] sm:$0xff]  ;;  %v1960_v19 = vld [vmem:[#allocation2 + $0x7d] sm:$0xff] }
 0x17b   : > { %v1959_v2 = vld [vmem:[#allocation2 + $0x75] sm:$0xff]  ;;  %v1242_v54 = vpack.c.bf16 %v19221_v25, %v19221_v25  ;;  %v2563_v26 = vpack.c.bf16 %v19221_v25, %v19203_v45  ;;  %v1968_v44 = vpack.c.bf16 %v1960_v19, %v1960_v19  ;;  %v3343_v48 = vld [vmem:[%s25320_s5 + $0x5a0] sm:$0xff] }
 0x17c   : > { %18044 = vmatpush3.bf16.msra.mxu1 %v18395_v24  ;;  %v1967_v59 = vpack.c.bf16 %v1959_v2, %v1958_v10  ;;  %v18419_v24 = vld [vmem:[%s25318_s3 + $0xe8] sm:$0xff]   ;;  %v2749_v35 = vld [vmem:[#allocation2 + $0x52] sm:$0xff]  ;;  %v2750_v10 = vld [vmem:[#allocation2 + $0x5a] sm:$0xff]  ;;  %v16164_v45 = vcombine.low %v3339_v42, %v3343_v48 }
 0x17d   : > { %18204 = vmatpush3.bf16.msra.mxu0 %v18396_v32  ;;  %18045 = vmatprep.subr.bf16.mxu1 %v18397_v14  ;;  %v1557_v32 = vld [vmem:[#allocation2 + $0x4a] sm:$0xff]  ;;  %v3179_v37 = vld [vmem:[%s25320_s5 + $0x80] sm:$0xff] }
 0x17e   : > { %18157 = vmatprep.mubr.bf16.mxu0 %v1967_v59  ;;  %18205 = vmatprep.subr.bf16.mxu0 %v18398_v30  ;;  %v2760_v19 = vpack.c.bf16 %v2749_v35, %v1557_v32 }
 0x17f   : > { %18030 = vmatmul.mubr.bf16.gmra.mxu1 %v1242_v54  ;;  %v2751_v54 = vld [vmem:[#allocation2 + $0x62] sm:$0xff] }
 0x180   : > { %18046 = vmatpush3.bf16.msra.mxu1 %v18397_v14  ;;  %18049 = vmatprep.mubr.bf16.mxu1 %v1196_v31  ;;  %v18405_v31 = vld [vmem:[%s25318_s3 + $0xa8] sm:$0xff]   ;;  %v2761_v59 = vpack.c.bf16 %v2751_v54, %v2750_v10 }
 0x181   : > { %18158 = vmatmul.mubr.bf16.gmra.mxu0 %v1968_v44  ;;  %18047 = vmatprep.subr.bf16.mxu1 %v18399_v29  ;;  %v18421_v44 = vld [vmem:[%s25318_s3 + $0xd8] sm:$0xff]  }
 0x182   : > { %18206 = vmatpush3.bf16.msra.mxu0 %v18398_v30  ;;  %18209 = vmatprep.mubr.bf16.mxu0 %v2359_v6  ;;  %v18412_v6 = vld [vmem:[%s25318_s3 + $0x210] sm:$0xff]   ;;  %v18420_v30 = vld [vmem:[%s25318_s3 + $0xe0] sm:$0xff]  }
 0x183   : > { %18207 = vmatprep.subr.bf16.mxu0 %v18400_v27 }
 0x184   : > { %18048 = vmatpush3.bf16.msra.mxu1 %v18399_v29  ;;  %v1561_v29 = vld [vmem:[#allocation2 + $0x6a] sm:$0xff] }
 0x185   : > { %18065 = vmatprep.subr.bf16.mxu1 %v18401_v39 }
 0x186   : > { %18208 = vmatpush3.bf16.msra.mxu0 %v18400_v27  ;;  %v2753_v27 = vld [vmem:[#allocation2 + $0x72] sm:$0xff] }
 0x187   : > { %18050 = vmatmul.mubr.bf16.vlgmr.msra.gmra.mxu1 %v1197_v17  ;;  %18257 = vmatprep.subr.bf16.mxu0 %v18402_v7  ;;  %v18413_v17 = vld [vmem:[%s25318_s3 + $0x88] sm:$0xff]  }
 0x188   : > { %18066 = vmatpush3.bf16.msra.mxu1 %v18401_v39  ;;  %18053 = vmatprep.mubr.bf16.mxu1 %v1198_v21  ;;  %v18410_v21 = vld [vmem:[%s25318_s3 + $0x218] sm:$0xff]   ;;  %v1568_v39 = vpack.c.bf16 %v2750_v10, %v2749_v35  ;;  %v18430_v35 = vld [vmem:[%s25318_s3 + $0x150] sm:$0xff]   ;;  %v18431_v10 = vld [vmem:[%s25318_s3 + $0x148] sm:$0xff]  }
 0x189   : > { %18210 = vmatmul.mubr.bf16.vlgmr.msra.gmra.mxu0 %v2360_v50  ;;  %18067 = vmatprep.subr.bf16.mxu1 %v18403_v53  ;;  %v1203_v50 = vpack.c.bf16 %v19155_v18, %v19155_v18  ;;  %v2745_v18 = vld [vmem:[#allocation2 + $0x32] sm:$0xff] }
 0x18a   : > { %18213 = vmatprep.mubr.bf16.mxu0 %v2361_v33  ;;  %18258 = vmatpush3.bf16.msra.mxu0 %v18402_v7  ;;  %v1563_v33 = vpack.c.bf16 %v1549_v43, %v1548_v58  ;;  %v2758_v46 = vpack.c.bf16 %v2745_v18, %v1553_v63  ;;  %v2754_v7 = vld [vmem:[#allocation2 + $0x7a] sm:$0xff] }
 0x18b   : > { %18259 = vmatprep.subr.bf16.mxu0 %v18404_v28  ;;  %v1749_v58 = vld [vmem:[#allocation2 + $0x1c] sm:$0xff] }
 0x18c   : > { %18068 = vmatpush3.bf16.msra.mxu1 %v18403_v53  ;;  %v18422_v53 = vld [vmem:[%s25318_s3 + $0xd0] sm:$0xff]  }
 0x18d   : > { %18069 = vmatprep.subr.bf16.mxu1 %v18405_v31 }
 0x18e   : > { %18260 = vmatpush3.bf16.msra.mxu0 %v18404_v28  ;;  %v1569_v28 = vpack.c.bf16 %v1561_v29, %v2751_v54  ;;  %v2145_v54 = vld [vmem:[#allocation2 + $0xe] sm:$0xff] }
 0x18f   : > { %18054 = vmatmul.mubr.bf16.gmra.mxu1 %v1199_v55  ;;  %18261 = vmatprep.subr.bf16.mxu0 %v18406_v4  ;;  %v2743_v55 = vld [vmem:[#allocation2 + $0x22] sm:$0xff] }
 0x190   : > { %18070 = vmatpush3.bf16.msra.mxu1 %v18405_v31  ;;  %18057 = vmatprep.mubr.bf16.mxu1 %v1200_v5  ;;  %v2742_v5 = vld [vmem:[#allocation2 + $0x1a] sm:$0xff]  ;;  %v2762_v31 = vpack.c.bf16 %v2753_v27, %v1561_v29 }
 0x191   : > { %18214 = vmatmul.mubr.bf16.gmra.mxu0 %v2362_v51  ;;  %18071 = vmatprep.subr.bf16.mxu1 %v18407_v38  ;;  %v2757_v51 = vpack.c.bf16 %v2743_v55, %v2742_v5  ;;  %v18433_v29 = vld [vmem:[%s25318_s3 + $0x1f8] sm:$0xff]  }
 0x192   : > { %18217 = vmatprep.mubr.bf16.mxu0 %v2363_v12  ;;  %18262 = vmatpush3.bf16.msra.mxu0 %v18406_v4  ;;  %v2755_v4 = vld [vmem:[#allocation2 + $0x82] sm:$0xff] }
 0x193   : > { %18263 = vmatprep.subr.bf16.mxu0 %v18408_v15 }
 0x194   : > { %18072 = vmatpush3.bf16.msra.mxu1 %v18407_v38  ;;  %v2763_v38 = vpack.c.bf16 %v2755_v4, %v2754_v7  ;;  %v2148_v7 = vld [vmem:[#allocation2 + $0x26] sm:$0xff] }
 0x195   : > { %18073 = vmatprep.subr.bf16.mxu1 %v18409_v40 }
 0x196   : > { %18264 = vmatpush3.bf16.msra.mxu0 %v18408_v15  ;;  %v18423_v15 = vld [vmem:[%s25318_s3 + $0xc8] sm:$0xff]  }
 0x197   : > { %18058 = vmatmul.mubr.bf16.gmra.mxu1 %v1201_v13  ;;  %18265 = vmatprep.subr.bf16.mxu0 %v18410_v21  ;;  %v2746_v13 = vld [vmem:[#allocation2 + $0x3a] sm:$0xff] }
 0x198   : > { %18074 = vmatpush3.bf16.msra.mxu1 %v18409_v40  ;;  %18061 = vmatprep.mubr.bf16.mxu1 %v1202_v52  ;;  %v1550_v52 = vld [vmem:[#allocation2 + $0x12] sm:$0xff]  ;;  %v1566_v14 = vpack.c.bf16 %v2746_v13, %v2745_v18 }
 0x199   : > { %18218 = vmatmul.mubr.bf16.gmra.mxu0 %v2364_v36  ;;  %18075 = vmatprep.subr.bf16.mxu1 %v18411_v16  ;;  %v1564_v12 = vpack.c.bf16 %v2742_v5, %v1550_v52  ;;  %v1565_v36 = vpack.c.bf16 %v1553_v63, %v2743_v55  ;;  %v1748_v40 = vld [vmem:[#allocation2 + $0x14] sm:$0xff]  ;;  %v1754_v63 = vld [vmem:[#allocation2 + $0x44] sm:$0xff] }
 0x19a   : > { %18221 = vmatprep.mubr.bf16.mxu0 %v2365_v22  ;;  %18266 = vmatpush3.bf16.msra.mxu0 %v18410_v21  ;;  %v2747_v22 = vld [vmem:[#allocation2 + $0x42] sm:$0xff]  ;;  %v2756_v21 = vld [vmem:[#allocation2 + $0x8a] sm:$0xff]  ;;  %v1752_v5 = vld [vmem:[#allocation2 + $0x34] sm:$0xff] }
 0x19b   : > { %18267 = vmatprep.subr.bf16.mxu0 %v18412_v6  ;;  %v2759_v41 = vpack.c.bf16 %v2747_v22, %v2746_v13  ;;  %v1567_v2 = vpack.c.bf16 %v1557_v32, %v2747_v22  ;;  %v18426_v55 = vld [vmem:[%s25318_s3 + $0x170] sm:$0xff]   ;;  %v18428_v13 = vld [vmem:[%s25318_s3 + $0x160] sm:$0xff]  }
 0x19c   : > { %18076 = vmatpush3.bf16.msra.mxu1 %v18411_v16  ;;  %v1570_v16 = vpack.c.bf16 %v2753_v27, %v2753_v27  ;;  %v1756_v52 = vld [vmem:[#allocation2 + $0x54] sm:$0xff]  ;;  %v1759_v32 = vld [vmem:[#allocation2 + $0x6c] sm:$0xff]  ;;  %v2147_v27 = vld [vmem:[#allocation2 + $0x1e] sm:$0xff] }
 0x19d   : > { %18077 = vmatprep.subr.bf16.mxu1 %v18413_v17  ;;  %v1760_v22 = vld [vmem:[#allocation2 + $0x74] sm:$0xff] }
 0x19e   : > { %18268 = vmatpush3.bf16.msra.mxu0 %v18412_v6  ;;  %v1747_v6 = vld [vmem:[#allocation2 + $0xc] sm:$0xff] }
 0x19f   : > { %18062 = vmatmul.mubr.bf16.gmra.mxu1 %v1203_v50  ;;  %18269 = vmatprep.subr.bf16.mxu0 %v18414_v47  ;;  %v1762_v43 = vpack.c.bf16 %v1748_v40, %v1747_v6  ;;  %v18425_v50 = vld [vmem:[%s25318_s3 + $0x178] sm:$0xff]   ;;  %v2153_v6 = vld [vmem:[#allocation2 + $0x4e] sm:$0xff] }
 0x1a0   : > { %18078 = vmatpush3.bf16.msra.mxu1 %v18413_v17  ;;  %18081 = vmatprep.mubr.bf16.mxu1 %v1563_v33  ;;  %v18424_v17 = vld [vmem:[%s25318_s3 + $0xc0] sm:$0xff]   ;;  %v2154_v40 = vld [vmem:[#allocation2 + $0x56] sm:$0xff] }
 0x1a1   : > { %18222 = vmatmul.mubr.bf16.gmra.mxu0 %v2366_v61  ;;  %18079 = vmatprep.subr.bf16.mxu1 %v18415_v3  ;;  %v1751_v61 = vld [vmem:[#allocation2 + $0x2c] sm:$0xff] }
 0x1a2   : > { %18270 = vmatpush3.bf16.msra.mxu0 %v18414_v47  ;;  %18273 = vmatprep.mubr.bf16.mxu0 %v2757_v51  ;;  %v2764_v47 = vpack.c.bf16 %v2756_v21, %v2756_v21  ;;  %v18427_v51 = vld [vmem:[%s25318_s3 + $0x168] sm:$0xff]  }
 0x1a3   : > { %18271 = vmatprep.subr.bf16.mxu0 %v18416_v62  ;;  %v2152_v21 = vld [vmem:[#allocation2 + $0x46] sm:$0xff] }
 0x1a4   : > { %18080 = vmatpush3.bf16.msra.mxu1 %v18415_v3  ;;  %v1750_v3 = vld [vmem:[#allocation2 + $0x24] sm:$0xff] }
 0x1a5   : > { %18097 = vmatprep.subr.bf16.mxu1 %v18417_v56  ;;  %v1763_v33 = vpack.c.bf16 %v1750_v3, %v1749_v58  ;;  %v2158_v58 = vld [vmem:[#allocation2 + $0x76] sm:$0xff] }
 0x1a6   : > { %18272 = vmatpush3.bf16.msra.mxu0 %v18416_v62  ;;  %v1764_v62 = vpack.c.bf16 %v1752_v5, %v1751_v61  ;;  %v2156_v5 = vld [vmem:[#allocation2 + $0x66] sm:$0xff]  ;;  %v18438_v61 = vld [vmem:[%s25318_s3 + $0x1d0] sm:$0xff]  }
 0x1a7   : > { %18082 = vmatmul.mubr.bf16.vlgmr.msra.gmra.mxu1 %v1564_v12  ;;  %v1755_v12 = vld [vmem:[#allocation2 + $0x4c] sm:$0xff]  ;;  %12846 = vmatprep.subr.bf16.mxu0 %v16173_v60 }
 0x1a8   : > { %18098 = vmatpush3.bf16.msra.mxu1 %v18417_v56  ;;  %18085 = vmatprep.mubr.bf16.mxu1 %v1565_v36  ;;  %v1753_v56 = vld [vmem:[#allocation2 + $0x3c] sm:$0xff] }
 0x1a9   : > { %18274 = vmatmul.mubr.bf16.vlgmr.msra.gmra.mxu0 %v2758_v46  ;;  %18099 = vmatprep.subr.bf16.mxu1 %v18418_v34  ;;  %v1765_v18 = vpack.c.bf16 %v1754_v63, %v1753_v56  ;;  %v18429_v36 = vld [vmem:[%s25318_s3 + $0x158] sm:$0xff]   ;;  %v18440_v63 = vld [vmem:[%s25318_s3 + $0x1c0] sm:$0xff]  }
 0x1aa   : > { %18277 = vmatprep.mubr.bf16.mxu0 %v2759_v41  ;;  %v1757_v46 = vld [vmem:[#allocation2 + $0x5c] sm:$0xff]  ;;  %v1758_v41 = vld [vmem:[#allocation2 + $0x64] sm:$0xff]  ;;  %12847 = vmatpush1.bf16.msra.mxu0 %v16172_v20 }
 0x1ab   : > { %v2543_v56 = vld [vmem:[#allocation2 + $0x19] sm:$0xff] }
 0x1ac   : > { %18100 = vmatpush3.bf16.msra.mxu1 %v18418_v34  ;;  %v1766_v34 = vpack.c.bf16 %v1756_v52, %v1755_v12  ;;  %v2556_v12 = vld [vmem:[#allocation2 + $0x81] sm:$0xff] }
 0x1ad   : > { %18101 = vmatprep.subr.bf16.mxu1 %v18419_v24 }
 0x1af   : > { %18086 = vmatmul.mubr.bf16.gmra.mxu1 %v1566_v14  ;;  %v1768_v14 = vpack.c.bf16 %v1760_v22, %v1759_v32  ;;  %v3211_v22 = vld [vmem:[%s25320_s5 + $0x180] sm:$0xff] }
 0x1b0   : > { %18102 = vmatpush3.bf16.msra.mxu1 %v18419_v24  ;;  %18089 = vmatprep.mubr.bf16.mxu1 %v1567_v2  ;;  %v1767_v24 = vpack.c.bf16 %v1758_v41, %v1757_v46  ;;  %v2146_v2 = vld [vmem:[#allocation2 + $0x16] sm:$0xff]  ;;  %v3215_v41 = vld [vmem:[%s25320_s5 + $0x1a0] sm:$0xff] }
 0x1b1   : > { %18278 = vmatmul.mubr.bf16.gmra.mxu0 %v2760_v19  ;;  %18103 = vmatprep.subr.bf16.mxu1 %v18420_v30  ;;  %v16036_v32 = vcombine.low %v3211_v22, %v3215_v41 }
 0x1b2   : > { %18281 = vmatprep.mubr.bf16.mxu0 %v2761_v59  ;;  %v18432_v59 = vld [vmem:[%s25318_s3 + $0x140] sm:$0xff]  }
 0x1b4   : > { %18104 = vmatpush3.bf16.msra.mxu1 %v18420_v30  ;;  %v1761_v30 = vld [vmem:[#allocation2 + $0x7c] sm:$0xff] }
 0x1b5   : > { %18105 = vmatprep.subr.bf16.mxu1 %v18421_v44  ;;  %v1769_v19 = vpack.c.bf16 %v1761_v30, %v1761_v30  ;;  %v3327_v30 = vld [vmem:[%s25320_s5 + $0x520] sm:$0xff] }
 0x1b7   : > { %18090 = vmatmul.mubr.bf16.gmra.mxu1 %v1568_v39  ;;  %v2150_v39 = vld [vmem:[#allocation2 + $0x36] sm:$0xff] }
 0x1b8   : > { %18106 = vmatpush3.bf16.msra.mxu1 %v18421_v44  ;;  %18093 = vmatprep.mubr.bf16.mxu1 %v1569_v28  ;;  %v2160_v44 = vpack.c.bf16 %v2146_v2, %v2145_v54  ;;  %v2149_v28 = vld [vmem:[#allocation2 + $0x2e] sm:$0xff] }
 0x1b9   : > { %18282 = vmatmul.mubr.bf16.gmra.mxu0 %v2762_v31  ;;  %18107 = vmatprep.subr.bf16.mxu1 %v18422_v53  ;;  %v18434_v31 = vld [vmem:[%s25318_s3 + $0x1f0] sm:$0xff]   ;;  %v2162_v4 = vpack.c.bf16 %v2150_v39, %v2149_v28  ;;  %v3315_v28 = vld [vmem:[%s25320_s5 + $0x4c0] sm:$0xff] }
 0x1ba   : > { %18285 = vmatprep.mubr.bf16.mxu0 %v2763_v38  ;;  %v18435_v38 = vld [vmem:[%s25318_s3 + $0x1e8] sm:$0xff]  }
 0x1bc   : > { %18108 = vmatpush3.bf16.msra.mxu1 %v18422_v53  ;;  %v2161_v53 = vpack.c.bf16 %v2148_v7, %v2147_v27 }
 0x1bd   : > { %18109 = vmatprep.subr.bf16.mxu1 %v18423_v15 }
 0x1bf   : > { %18094 = vmatmul.mubr.bf16.gmra.mxu1 %v1570_v16 }
 0x1c0   : > { %18110 = vmatpush3.bf16.msra.mxu1 %v18423_v15  ;;  %18113 = vmatprep.mubr.bf16.mxu1 %v1762_v43  ;;  %v2151_v15 = vld [vmem:[#allocation2 + $0x3e] sm:$0xff]  ;;  %v2164_v43 = vpack.c.bf16 %v2154_v40, %v2153_v6 }
 0x1c1   : > { %18286 = vmatmul.mubr.bf16.gmra.mxu0 %v2764_v47  ;;  %18111 = vmatprep.subr.bf16.mxu1 %v18424_v17  ;;  %v2163_v16 = vpack.c.bf16 %v2152_v21, %v2151_v15  ;;  %v18437_v47 = vld [vmem:[%s25318_s3 + $0x1d8] sm:$0xff]   ;;  %v3195_v21 = vld [vmem:[%s25320_s5 + $0x100] sm:$0xff] }
 0x1c4   : > { %18112 = vmatpush3.bf16.msra.mxu1 %v18424_v17  ;;  %v18436_v17 = vld [vmem:[%s25318_s3 + $0x1e0] sm:$0xff]  }
 0x1c5   : > { %18161 = vmatprep.subr.bf16.mxu1 %v18425_v50 }
 0x1c7   : > { %18114 = vmatmul.mubr.bf16.vlgmr.msra.gmra.mxu1 %v1763_v33  ;;  %v2157_v33 = vld [vmem:[#allocation2 + $0x6e] sm:$0xff] }
 0x1c8   : > { %18162 = vmatpush3.bf16.msra.mxu1 %v18425_v50  ;;  %18117 = vmatprep.mubr.bf16.mxu1 %v1764_v62  ;;  %v2155_v50 = vld [vmem:[#allocation2 + $0x5e] sm:$0xff]  ;;  %v18439_v62 = vld [vmem:[%s25318_s3 + $0x1c8] sm:$0xff]  }
 0x1c9   : > { %18163 = vmatprep.subr.bf16.mxu1 %v18426_v55  ;;  %v2165_v3 = vpack.c.bf16 %v2156_v5, %v2155_v50  ;;  %v3307_v50 = vld [vmem:[%s25320_s5 + $0x480] sm:$0xff] }
 0x1cc   : > { %18164 = vmatpush3.bf16.msra.mxu1 %v18426_v55  ;;  %v2166_v55 = vpack.c.bf16 %v2158_v58, %v2157_v33  ;;  %v3311_v58 = vld [vmem:[%s25320_s5 + $0x4a0] sm:$0xff] }
 0x1cd   : > { %18165 = vmatprep.subr.bf16.mxu1 %v18427_v51  ;;  %v16133_v33 = vcombine.high %v3307_v50, %v3311_v58 }
 0x1cf   : > { %18118 = vmatmul.mubr.bf16.gmra.mxu1 %v1765_v18  ;;  %v2558_v18 = vpack.c.bf16 %v19111_v49, %v2543_v56  ;;  %v2555_v49 = vld [vmem:[#allocation2 + $0x79] sm:$0xff] }
 0x1d0   : > { %18166 = vmatpush3.bf16.msra.mxu1 %v18427_v51  ;;  %18121 = vmatprep.mubr.bf16.mxu1 %v1766_v34  ;;  %v2159_v51 = vld [vmem:[#allocation2 + $0x7e] sm:$0xff] }
 0x1d1   : > { %18167 = vmatprep.subr.bf16.mxu1 %v18428_v13  ;;  %v2167_v52 = vpack.c.bf16 %v2159_v51, %v2159_v51  ;;  %v3335_v34 = vld [vmem:[%s25320_s5 + $0x560] sm:$0xff] }
 0x1d4   : > { %18168 = vmatpush3.bf16.msra.mxu1 %v18428_v13  ;;  %v2564_v13 = vpack.c.bf16 %v2556_v12, %v2555_v49  ;;  %v3303_v49 = vld [vmem:[%s25320_s5 + $0x460] sm:$0xff] }
 0x1d5   : > { %18169 = vmatprep.subr.bf16.mxu1 %v18429_v36 }
 0x1d7   : > { %18122 = vmatmul.mubr.bf16.gmra.mxu1 %v1767_v24 }
 0x1d8   : > { %18170 = vmatpush3.bf16.msra.mxu1 %v18429_v36  ;;  %18125 = vmatprep.mubr.bf16.mxu1 %v1768_v14 }
 0x1d9   : > { %18171 = vmatprep.subr.bf16.mxu1 %v18430_v35 }
 0x1dc   : > { %18172 = vmatpush3.bf16.msra.mxu1 %v18430_v35  ;;  %v16037_v35 = vcombine.high %v3211_v22, %v3215_v41 }
 0x1dd   : > { %18173 = vmatprep.subr.bf16.mxu1 %v18431_v10 }
 0x1df   : > { %18126 = vmatmul.mubr.bf16.gmra.mxu1 %v1769_v19 }
 0x1e0   : > { %18174 = vmatpush3.bf16.msra.mxu1 %v18431_v10  ;;  %18177 = vmatprep.mubr.bf16.mxu1 %v2160_v44  ;;  %v3323_v10 = vld [vmem:[%s25320_s5 + $0x500] sm:$0xff] }
 0x1e1   : > { %18175 = vmatprep.subr.bf16.mxu1 %v18432_v59  ;;  %v16148_v19 = vcombine.low %v3323_v10, %v3327_v30  ;;  %v16149_v54 = vcombine.high %v3323_v10, %v3327_v30  ;;  %v3203_v44 = vld [vmem:[%s25320_s5 + $0x140] sm:$0xff] }
 0x1e4   : > { %18176 = vmatpush3.bf16.msra.mxu1 %v18432_v59 }
 0x1e5   : > { %18225 = vmatprep.subr.bf16.mxu1 %v18433_v29 }
 0x1e7   : > { %18178 = vmatmul.mubr.bf16.vlgmr.msra.gmra.mxu1 %v2161_v53 }
 0x1e8   : > { %18226 = vmatpush3.bf16.msra.mxu1 %v18433_v29  ;;  %18181 = vmatprep.mubr.bf16.mxu1 %v2162_v4  ;;  %v3207_v29 = vld [vmem:[%s25320_s5 + $0x160] sm:$0xff] }
 0x1e9   : > { %18227 = vmatprep.subr.bf16.mxu1 %v18434_v31  ;;  %v16028_v39 = vcombine.low %v3203_v44, %v3207_v29  ;;  %v16029_v7 = vcombine.high %v3203_v44, %v3207_v29  ;;  %v3163_v44 = vld [vmem:[%s25320_s5] sm:$0xff] }
 0x1ea   : > { %v3167_v29 = vld [vmem:[%s25320_s5 + $0x20] sm:$0xff] }
 0x1ec   : > { %18228 = vmatpush3.bf16.msra.mxu1 %v18434_v31  ;;  %v3319_v31 = vld [vmem:[%s25320_s5 + $0x4e0] sm:$0xff] }
 0x1ed   : > { %18229 = vmatprep.subr.bf16.mxu1 %v18435_v38  ;;  %v16141_v15 = vcombine.high %v3315_v28, %v3319_v31 }
 0x1ef   : > { %18182 = vmatmul.mubr.bf16.gmra.mxu1 %v2163_v16  ;;  %v3199_v16 = vld [vmem:[%s25320_s5 + $0x120] sm:$0xff] }
 0x1f0   : > { %18230 = vmatpush3.bf16.msra.mxu1 %v18435_v38  ;;  %18185 = vmatprep.mubr.bf16.mxu1 %v2164_v43  ;;  %v16140_v38 = vcombine.low %v3315_v28, %v3319_v31  ;;  %v16021_v43 = vcombine.high %v3195_v21, %v3199_v16  ;;  %v15989_v28 = vcombine.high %v3163_v44, %v3167_v29  ;;  %v3403_v31 = vld [vmem:[%s25320_s5 + $0x780] sm:$0xff] }
 0x1f1   : > { %18231 = vmatprep.subr.bf16.mxu1 %v18436_v17 }
 0x1f4   : > { %18232 = vmatpush3.bf16.msra.mxu1 %v18436_v17  ;;  %v16020_v17 = vcombine.low %v3195_v21, %v3199_v16 }
 0x1f5   : > { %18233 = vmatprep.subr.bf16.mxu1 %v18437_v47 }
 0x1f7   : > { %18186 = vmatmul.mubr.bf16.gmra.mxu1 %v2165_v3  ;;  %v16132_v3 = vcombine.low %v3307_v50, %v3311_v58  ;;  %v3287_v50 = vld [vmem:[%s25320_s5 + $0x3e0] sm:$0xff] }
 0x1f8   : > { %18234 = vmatpush3.bf16.msra.mxu1 %v18437_v47  ;;  %18189 = vmatprep.mubr.bf16.mxu1 %v2166_v55  ;;  %v3187_v55 = vld [vmem:[%s25320_s5 + $0xc0] sm:$0xff] }
 0x1f9   : > { %18235 = vmatprep.subr.bf16.mxu1 %v18438_v61 }
 0x1fc   : > { %18236 = vmatpush3.bf16.msra.mxu1 %v18438_v61 }
 0x1fd   : > { %18237 = vmatprep.subr.bf16.mxu1 %v18439_v62 }
 0x1ff   : > { %18190 = vmatmul.mubr.bf16.gmra.mxu1 %v2167_v52 }
 0x200   : > { %18238 = vmatpush3.bf16.msra.mxu1 %v18439_v62  ;;  %18241 = vmatprep.mubr.bf16.mxu1 %v2558_v18  ;;  %v3191_v62 = vld [vmem:[%s25320_s5 + $0xe0] sm:$0xff] }
 0x201   : > { %18239 = vmatprep.subr.bf16.mxu1 %v18440_v63  ;;  %v16012_v56 = vcombine.low %v3187_v55, %v3191_v62  ;;  %v16013_v52 = vcombine.high %v3187_v55, %v3191_v62  ;;  %v3299_v18 = vld [vmem:[%s25320_s5 + $0x440] sm:$0xff] }
 0x202   : > { %v16125_v0 = vcombine.high %v3299_v18, %v3303_v49  ;;  %v3395_v62 = vld [vmem:[%s25320_s5 + $0x740] sm:$0xff] }
 0x204   : > { %18240 = vmatpush3.bf16.msra.mxu1 %v18440_v63 }
 0x207   : > { %18242 = vmatmul.mubr.bf16.vlgmr.msra.gmra.mxu1 %v2559_v57  ;;  %v16165_v57 = vcombine.high %v3339_v42, %v3343_v48 }
 0x208   : > { %18245 = vmatprep.mubr.bf16.mxu1 %v2560_v9  ;;  %v3219_v9 = vld [vmem:[%s25320_s5 + $0x1c0] sm:$0xff] }
 0x209   : > { %12848 = vmatprep.subr.bf16.mxu0 %v16165_v57  ;;  %v3295_v57 = vld [vmem:[%s25320_s5 + $0x420] sm:$0xff] }
 0x20a   : > { %12849 = vmatpush1.bf16.msra.mxu0 %v16164_v45  ;;  %v3291_v45 = vld [vmem:[%s25320_s5 + $0x400] sm:$0xff] }
 0x20f   : > { %18246 = vmatmul.mubr.bf16.gmra.mxu1 %v2561_v23  ;;  %v3223_v23 = vld [vmem:[%s25320_s5 + $0x1e0] sm:$0xff] }
 0x210   : > { %18249 = vmatprep.mubr.bf16.mxu1 %v2562_v8  ;;  %v16044_v8 = vcombine.low %v3219_v9, %v3223_v23  ;;  %v16045_v25 = vcombine.high %v3219_v9, %v3223_v23  ;;  %v16116_v23 = vcombine.low %v3291_v45, %v3295_v57 }
 0x212   : > { %12805 = vmatprep.subr.bf16.mxu1 %v16045_v25 }
 0x213   : > { %12806 = vmatpush1.bf16.msra.mxu1 %v16044_v8  ;;  %v16117_v8 = vcombine.high %v3291_v45, %v3295_v57 }
 0x214   : > { %12807 = vmatprep.subr.bf16.mxu1 %v16037_v35  ;;  %v3415_v35 = vld [vmem:[%s25320_s5 + $0x7e0] sm:$0xff] }
 0x217   : > { %18250 = vmatmul.mubr.bf16.gmra.mxu1 %v2563_v26  ;;  %v3331_v26 = vld [vmem:[%s25320_s5 + $0x540] sm:$0xff] }
 0x218   : > { %18253 = vmatprep.mubr.bf16.mxu1 %v2564_v13  ;;  %v16156_v36 = vcombine.low %v3331_v26, %v3335_v34  ;;  %v16157_v46 = vcombine.high %v3331_v26, %v3335_v34  ;;  %12808 = vmatpush1.bf16.msra.mxu1 %v16036_v32  ;;  %v16124_v13 = vcombine.low %v3299_v18, %v3303_v49  ;;  %v3171_v26 = vld [vmem:[%s25320_s5 + $0x40] sm:$0xff] }
 0x219   : > { %12809 = vmatprep.subr.bf16.mxu1 %v16029_v7  ;;  %v3175_v34 = vld [vmem:[%s25320_s5 + $0x60] sm:$0xff]  ;;  %v15988_v7 = vcombine.low %v3163_v44, %v3167_v29 }
 0x21a   : > { %12850 = vmatprep.subr.bf16.mxu0 %v16157_v46  ;;  %v15996_v46 = vcombine.low %v3171_v26, %v3175_v34  ;;  %v15997_v22 = vcombine.high %v3171_v26, %v3175_v34  ;;  %v3411_v32 = vld [vmem:[%s25320_s5 + $0x7c0] sm:$0xff] }
 0x21b   : > { %12851 = vmatpush1.bf16.msra.mxu0 %v16156_v36  ;;  %v16236_v30 = vcombine.low %v3411_v32, %v3415_v35 }
 0x21c   : > { %12852 = vmatprep.subr.bf16.mxu0 %v16149_v54  ;;  %12810 = vmatpush1.bf16.msra.mxu1 %v16028_v39 }
 0x21d   : > { %12811 = vmatprep.subr.bf16.mxu1 %v16021_v43  ;;  %v3283_v43 = vld [vmem:[%s25320_s5 + $0x3c0] sm:$0xff] }
 0x21e   : > { %v16109_v55 = vcombine.high %v3283_v43, %v3287_v50 }
 0x21f   : > { %18254 = vmatmul.mubr.bf16.gmra.mxu1 %v2565_v1  ;;  %12853 = vmatpush1.bf16.msra.mxu0 %v16148_v19  ;;  %v3183_v1 = vld [vmem:[%s25320_s5 + $0xa0] sm:$0xff]  ;;  %v16237_v19 = vcombine.high %v3411_v32, %v3415_v35 }
 0x220   : > { %12854 = vmatprep.subr.bf16.mxu0 %v16141_v15  ;;  %12812 = vmatpush1.bf16.msra.mxu1 %v16020_v17  ;;  %v16004_v60 = vcombine.low %v3179_v37, %v3183_v1  ;;  %v16005_v42 = vcombine.high %v3179_v37, %v3183_v1  ;;  %v3279_v37 = vld [vmem:[%s25320_s5 + $0x3a0] sm:$0xff] }
 0x221   : > { %12813 = vmatprep.subr.bf16.mxu1 %v16013_v52 }
 0x223   : > { %12855 = vmatpush1.bf16.msra.mxu0 %v16140_v38  ;;  %v3407_v38 = vld [vmem:[%s25320_s5 + $0x7a0] sm:$0xff] }
 0x224   : > { %12856 = vmatprep.subr.bf16.mxu0 %v16133_v33  ;;  %12814 = vmatpush1.bf16.msra.mxu1 %v16012_v56  ;;  %v16228_v16 = vcombine.low %v3403_v31, %v3407_v38  ;;  %v16229_v17 = vcombine.high %v3403_v31, %v3407_v38  ;;  %v16108_v33 = vcombine.low %v3283_v43, %v3287_v50  ;;  %v3399_v56 = vld [vmem:[%s25320_s5 + $0x760] sm:$0xff] }
 0x225   : > { %12815 = vmatprep.subr.bf16.mxu1 %v16005_v42  ;;  %v16220_v52 = vcombine.low %v3395_v62, %v3399_v56  ;;  %v16221_v18 = vcombine.high %v3395_v62, %v3399_v56  ;;  %v3387_v31 = vld [vmem:[%s25320_s5 + $0x700] sm:$0xff] }
 0x226   : > { %v19445_v24 = vpop.f32.mrf.mxu1  ;;  %v3271_v62 = vld [vmem:[%s25320_s5 + $0x360] sm:$0xff] }
 0x227   : > { %12857 = vmatpush1.bf16.msra.mxu0 %v16132_v3 }
 0x228   : > { %v19447_v14 = vpop.f32.mrf.mxu0  ;;  %v19455_v2 = vpop.f32.mrf.mxu1  ;;  %12858 = vmatprep.subr.bf16.mxu0 %v16125_v0  ;;  %12816 = vmatpush1.bf16.msra.mxu1 %v16004_v60  ;;  %v3275_v0 = vld [vmem:[%s25320_s5 + $0x380] sm:$0xff] }
 0x229   : > { %12817 = vmatprep.subr.bf16.mxu1 %v15997_v22  ;;  %v16100_v42 = vcombine.low %v3275_v0, %v3279_v37  ;;  %v16101_v45 = vcombine.high %v3275_v0, %v3279_v37  ;;  %v3259_v0 = vld [vmem:[%s25320_s5 + $0x300] sm:$0xff] }
 0x22a   : > { %v19457_v59 = vpop.f32.mrf.mxu0  ;;  %v19465_v27 = vpop.f32.mrf.mxu1 }
 0x22b   : > { %12859 = vmatpush1.bf16.msra.mxu0 %v16124_v13 }
 0x22c   : > { %v19467_v53 = vpop.f32.mrf.mxu0  ;;  %v19475_v4 = vpop.f32.mrf.mxu1  ;;  %12860 = vmatprep.subr.bf16.mxu0 %v16117_v8  ;;  %12818 = vmatpush1.bf16.msra.mxu1 %v15996_v46 }
 0x22d   : > { %12819 = vmatprep.subr.bf16.mxu1 %v15989_v28 }
 0x22e   : > { %v19477_v40 = vpop.f32.mrf.mxu0  ;;  %v19485_v6 = vpop.f32.mrf.mxu1 }
 0x22f   : > { %12861 = vmatpush1.bf16.msra.mxu0 %v16116_v23 }
 0x230   : > { %v19487_v47 = vpop.f32.mrf.mxu0  ;;  %v19495_v5 = vpop.f32.mrf.mxu1  ;;  %12862 = vmatprep.subr.bf16.mxu0 %v16237_v19  ;;  %12820 = vmatpush1.bf16.msra.mxu1 %v15988_v7 }
 0x231   : > { %12821 = vmatprep.subr.bf16.mxu1 %v16109_v55  ;;  %v3267_v55 = vld [vmem:[%s25320_s5 + $0x340] sm:$0xff] }
 0x232   : > { %v19497_v61 = vpop.f32.mrf.mxu0  ;;  %v19505_v51 = vpop.f32.mrf.mxu1 }
 0x233   : > { %12863 = vmatpush2.bf16.msra.mxu0 %v16236_v30 }
 0x234   : > { %v19507_v63 = vpop.f32.mrf.mxu0  ;;  %v19515_v12 = vpop.f32.mrf.mxu1  ;;  %12864 = vmatprep.subr.bf16.mxu0 %v16229_v17  ;;  %12822 = vmatpush2.bf16.msra.mxu1 %v16108_v33 }
 0x235   : > { %12823 = vmatprep.subr.bf16.mxu1 %v16101_v45  ;;  %v3263_v45 = vld [vmem:[%s25320_s5 + $0x320] sm:$0xff] }
 0x236   : > { %v19517_v11 = vpop.f32.mrf.mxu0 }
 0x237   : > { %v19525_v20 = vpop.f32.mrf.mxu1  ;;  %12865 = vmatpush2.bf16.msra.mxu0 %v16228_v16 }
 0x238   : > { %v19527_v48 = vpop.f32.mrf.mxu0  ;;  %12866 = vmatprep.subr.bf16.mxu0 %v16221_v18  ;;  %12824 = vmatpush2.bf16.msra.mxu1 %v16100_v42  ;;  %v16093_v18 = vcombine.high %v3267_v55, %v3271_v62 }
 0x239   : > { %v19535_v9 = vpop.f32.mrf.mxu1 }
 0x23a   : > { %v19537_v25 = vpop.f32.mrf.mxu0  ;;  %12825 = vmatprep.subr.bf16.mxu1 %v16093_v18 }
 0x23b   : > { %v19545_v36 = vpop.f32.mrf.mxu1  ;;  %12867 = vmatpush2.bf16.msra.mxu0 %v16220_v52  ;;  %v16092_v52 = vcombine.low %v3267_v55, %v3271_v62  ;;  %v3255_v55 = vld [vmem:[%s25320_s5 + $0x2e0] sm:$0xff] }
 0x23c   : > { %v19547_v41 = vpop.f32.mrf.mxu0 }
 0x23d   : > { %v19555_v10 = vpop.f32.mrf.mxu1  ;;  %12826 = vmatpush2.bf16.msra.mxu1 %v16092_v52 }
 0x23e   : > { %v19557_v54 = vpop.f32.mrf.mxu0 }
 0x23f   : > { %25331 = vst [vmem:[#allocation6_spill] sm:$0xff] %v19557_v54  ;;  %v19565_v39 = vpop.f32.mrf.mxu1 }
 0x241   : > { %v19573_v15 = vpop.f32.mrf.mxu0  ;;  %v19575_v21 = vpop.f32.mrf.mxu1 }
 0x243   : > { %v19583_v58 = vpop.f32.mrf.mxu0  ;;  %v18032_v3 = vpop.f32.mrf.mxu1 }
 0x245   : > { %v18160_v49 = vpop.f32.mrf.mxu0  ;;  %v19591_v13 = vpop.f32.mrf.mxu1 }
 0x246   : > { %v3383_v49 = vld [vmem:[%s25320_s5 + $0x6e0] sm:$0xff] }
 0x247   : > { %v19599_v1 = vpop.f32.mrf.mxu0  ;;  %v18051_v60 = vpop.f32.mrf.mxu1 }
 0x248   : > { %25332 = vst [vmem:[#allocation7_spill] sm:$0xff] %v19599_v1  ;;  %v19602_v57 = vadd.f32 %v18051_v60, %v19445_v24 }
 0x249   : > { %v19604_v23 = vpop.f32.mrf.mxu0  ;;  %v1486_v8 = vpop.f32.mrf.mxu1 }
 0x24a   : > { %v19607_v26 = vadd.f32 %v1486_v8, %v19455_v2  ;;  %v3371_v8 = vld [vmem:[%s25320_s5 + $0x680] sm:$0xff] }
 0x24b   : > { %v19609_v34 = vpop.f32.mrf.mxu0  ;;  %v18052_v46 = vpop.f32.mrf.mxu1 }
 0x24c   : > { %v19612_v22 = vadd.f32 %v18052_v46, %v19465_v27  ;;  %v3375_v46 = vld [vmem:[%s25320_s5 + $0x6a0] sm:$0xff] }
 0x24d   : > { %v19614_v32 = vpop.f32.mrf.mxu0  ;;  %v19616_v35 = vpop.f32.mrf.mxu1 }
 0x24f   : > { %v19618_v24 = vpop.f32.mrf.mxu0  ;;  %v18055_v30 = vpop.f32.mrf.mxu1 }
 0x250   : > { %25333 = vst [vmem:[#allocation8_spill] sm:$0xff] %v19618_v24  ;;  %v19621_v19 = vadd.f32 %v18055_v30, %v19485_v6  ;;  %v3391_v6 = vld [vmem:[%s25320_s5 + $0x720] sm:$0xff] }
 0x251   : > { %v19623_v44 = vpop.f32.mrf.mxu0  ;;  %v1502_v2 = vpop.f32.mrf.mxu1  ;;  %v16213_v17 = vcombine.high %v3387_v31, %v3391_v6 }
 0x252   : > { %25334 = vst [vmem:[#allocation9_spill] sm:$0xff] %v19623_v44  ;;  %v19626_v29 = vadd.f32 %v1502_v2, %v19495_v5  ;;  %v16212_v5 = vcombine.low %v3387_v31, %v3391_v6  ;;  %v16085_v2 = vcombine.high %v3259_v0, %v3263_v45  ;;  %v16084_v6 = vcombine.low %v3259_v0, %v3263_v45  ;;  %v3363_v0 = vld [vmem:[%s25320_s5 + $0x640] sm:$0xff] }
 0x253   : > { %v19628_v7 = vpop.f32.mrf.mxu0  ;;  %v18056_v27 = vpop.f32.mrf.mxu1  ;;  %12868 = vmatprep.subr.bf16.mxu0 %v16213_v17  ;;  %v16196_v17 = vcombine.low %v3371_v8, %v3375_v46  ;;  %v3243_v45 = vld [vmem:[%s25320_s5 + $0x280] sm:$0xff] }
 0x254   : > { %25335 = vst [vmem:[#allocation10_spill] sm:$0xff] %v19628_v7  ;;  %v19631_v28 = vadd.f32 %v18056_v27, %v19505_v51  ;;  %12869 = vmatpush2.bf16.msra.mxu0 %v16212_v5  ;;  %v16197_v5 = vcombine.high %v3371_v8, %v3375_v46  ;;  %12827 = vmatprep.subr.bf16.mxu1 %v16085_v2  ;;  %v3247_v8 = vld [vmem:[%s25320_s5 + $0x2a0] sm:$0xff] }
 0x255   : > { %v19639_v38 = vpop.f32.mrf.mxu0  ;;  %v19641_v16 = vpop.f32.mrf.mxu1  ;;  %12828 = vmatpush2.bf16.msra.mxu1 %v16084_v6  ;;  %v16069_v6 = vcombine.high %v3243_v45, %v3247_v8 }
 0x256   : > { %25336 = vst [vmem:[#allocation11_spill] sm:$0xff] %v19639_v38 }
 0x257   : > { %v19643_v43 = vpop.f32.mrf.mxu0  ;;  %v18059_v50 = vpop.f32.mrf.mxu1 }
 0x258   : > { %25337 = vst [vmem:[#allocation12_spill] sm:$0xff] %v19643_v43  ;;  %v19646_v51 = vadd.f32 %v18059_v50, %v19525_v20  ;;  %v3379_v20 = vld [vmem:[%s25320_s5 + $0x6c0] sm:$0xff] }
 0x259   : > { %v19648_v3 = vpop.f32.mrf.mxu0  ;;  %v1518_v33 = vpop.f32.mrf.mxu1  ;;  %v16204_v42 = vcombine.low %v3379_v20, %v3383_v49 }
 0x25a   : > { %25338 = vst [vmem:[#allocation13_spill] sm:$0xff] %v19648_v3  ;;  %v19657_v56 = vadd.f32 %v1518_v33, %v19535_v9  ;;  %v16205_v9 = vcombine.high %v3379_v20, %v3383_v49 }
 0x25b   : > { %v19668_v37 = vpop.f32.mrf.mxu0  ;;  %v18060_v60 = vpop.f32.mrf.mxu1 }
 0x25c   : > { %25339 = vst [vmem:[#allocation14_spill] sm:$0xff] %v19668_v37  ;;  %v19680_v30 = vadd.f32 %v18060_v60, %v19545_v36  ;;  %12870 = vmatprep.subr.bf16.mxu0 %v16205_v9  ;;  %v3251_v36 = vld [vmem:[%s25320_s5 + $0x2c0] sm:$0xff] }
 0x25d   : > { %v19682_v27 = vpop.f32.mrf.mxu0  ;;  %v19684_v31 = vpop.f32.mrf.mxu1  ;;  %12871 = vmatpush2.bf16.msra.mxu0 %v16204_v42  ;;  %v16077_v52 = vcombine.high %v3251_v36, %v3255_v55  ;;  %v16076_v49 = vcombine.low %v3251_v36, %v3255_v55  ;;  %v3367_v60 = vld [vmem:[%s25320_s5 + $0x660] sm:$0xff]  ;;  %v16068_v36 = vcombine.low %v3243_v45, %v3247_v8 }
 0x25e   : > { %25340 = vst [vmem:[#allocation15_spill] sm:$0xff] %v19682_v27  ;;  %12872 = vmatprep.subr.bf16.mxu0 %v16197_v5  ;;  %v16189_v9 = vcombine.high %v3363_v0, %v3367_v60  ;;  %v3359_v5 = vld [vmem:[%s25320_s5 + $0x620] sm:$0xff] }
 0x25f   : > { %v19686_v50 = vpop.f32.mrf.mxu0  ;;  %v18063_v33 = vpop.f32.mrf.mxu1  ;;  %12829 = vmatprep.subr.bf16.mxu1 %v16077_v52 }
 0x260   : > { %25341 = vst [vmem:[#allocation16_spill] sm:$0xff] %v19686_v50  ;;  %v19695_v62 = vadd.f32 %v18063_v33, %v19565_v39  ;;  %v16188_v39 = vcombine.low %v3363_v0, %v3367_v60  ;;  %12830 = vmatpush2.bf16.msra.mxu1 %v16076_v49  ;;  %v3235_v49 = vld [vmem:[%s25320_s5 + $0x240] sm:$0xff] }
 0x261   : > { %v19697_v18 = vpop.f32.mrf.mxu0  ;;  %v1534_v20 = vpop.f32.mrf.mxu1  ;;  %12873 = vmatpush2.bf16.msra.mxu0 %v16196_v17  ;;  %12831 = vmatprep.subr.bf16.mxu1 %v16069_v6 }
 0x262   : > { %25342 = vst [vmem:[#allocation17_spill] sm:$0xff] %v19697_v18  ;;  %v19706_v42 = vadd.f32 %v1534_v20, %v19575_v21  ;;  %12874 = vmatprep.subr.bf16.mxu0 %v16189_v9  ;;  %v3355_v21 = vld [vmem:[%s25320_s5 + $0x600] sm:$0xff] }
 0x263   : > { %v19714_v46 = vpop.f32.mrf.mxu0  ;;  %v18064_v2 = vpop.f32.mrf.mxu1  ;;  %v16181_v55 = vcombine.high %v3355_v21, %v3359_v5  ;;  %v16180_v52 = vcombine.low %v3355_v21, %v3359_v5  ;;  %v19745_v5 = vld [vmem:[%s25320_s5 + $0xdc0] sm:$0xff] }
 0x264   : > { %25343 = vst [vmem:[#allocation18_spill] sm:$0xff] %v19714_v46  ;;  %12832 = vmatpush2.bf16.msra.mxu1 %v16068_v36  ;;  %25345 = vst [vmem:[#allocation20_spill] sm:$0xff] %v19745_v5 }
 0x265   : > { %v18224_v17 = vpop.f32.mrf.mxu0  ;;  %v19722_v33 = vpop.f32.mrf.mxu1  ;;  %12875 = vmatpush2.bf16.msra.mxu0 %v16188_v39  ;;  %v3239_v39 = vld [vmem:[%s25320_s5 + $0x260] sm:$0xff] }
 0x266   : > { %12876 = vmatprep.subr.bf16.mxu0 %v16181_v55  ;;  %v16061_v8 = vcombine.high %v3235_v49, %v3239_v39  ;;  %v16060_v21 = vcombine.low %v3235_v49, %v3239_v39  ;;  %v19750_v17 = vld [vmem:[%s25320_s5 + $0xde0] sm:$0xff] }
 0x267   : > { %v19724_v20 = vpop.f32.mrf.mxu0  ;;  %v18083_v0 = vpop.f32.mrf.mxu1  ;;  %25346 = vst [vmem:[#allocation21_spill] sm:$0xff] %v19750_v17  ;;  %v16429_v55 = vcombine.high %v19745_v5, %v19750_v17 }
 0x268   : > { %25344 = vst [vmem:[#allocation19_spill] sm:$0xff] %v19724_v20  ;;  %v19727_v60 = vadd.f32 %v18083_v0, %v19602_v57  ;;  %12833 = vmatprep.subr.bf16.mxu1 %v16061_v8  ;;  %v3231_v0 = vld [vmem:[%s25320_s5 + $0x220] sm:$0xff] }
 0x269   : > { %v19729_v9 = vpop.f32.mrf.mxu0  ;;  %v1670_v2 = vpop.f32.mrf.mxu1  ;;  %12877 = vmatpush2.bf16.msra.mxu0 %v16180_v52  ;;  %v3227_v52 = vld [vmem:[%s25320_s5 + $0x200] sm:$0xff]  ;;  %12834 = vmatpush2.bf16.msra.mxu1 %v16060_v21 }
 0x26a   : > { %v19738_v45 = vadd.f32 %v1670_v2, %v19607_v26  ;;  %v16053_v39 = vcombine.high %v3227_v52, %v3231_v0  ;;  %12928 = vmatprep.subr.bf16.mxu0 %v16429_v55  ;;  %v19775_v20 = vld [vmem:[%s25320_s5 + $0x9c0] sm:$0xff] }
 0x26b   : > { %v19740_v6 = vpop.f32.mrf.mxu0  ;;  %v18084_v57 = vpop.f32.mrf.mxu1  ;;  %25350 = vst [vmem:[#allocation25_spill] sm:$0xff] %v19775_v20  ;;  %v19780_v21 = vld [vmem:[%s25320_s5 + $0x9e0] sm:$0xff] }
 0x26c   : > { %v1735_v36 = vadd.f32 %v18084_v57, %v19612_v22  ;;  %v16052_v22 = vcombine.low %v3227_v52, %v3231_v0  ;;  %12835 = vmatprep.subr.bf16.mxu1 %v16053_v39  ;;  %25351 = vst [vmem:[#allocation26_spill] sm:$0xff] %v19780_v21 }
 0x26d   : > { %v19763_v2 = vpop.f32.mrf.mxu0  ;;  %v19765_v49 = vpop.f32.mrf.mxu1 }
 0x26e   : > { %25347 = vst [vmem:[#allocation22_spill] sm:$0xff] %v19763_v2  ;;  %12836 = vmatpush2.bf16.msra.mxu1 %v16052_v22 }
 0x26f   : > { %v19767_v8 = vpop.f32.mrf.mxu0  ;;  %v18087_v57 = vpop.f32.mrf.mxu1 }
 0x270   : > { %25348 = vst [vmem:[#allocation23_spill] sm:$0xff] %v19767_v8  ;;  %v1738_v26 = vadd.f32 %v18087_v57, %v19621_v19  ;;  %v16301_v19 = vcombine.high %v19775_v20, %v19780_v21 }
 0x271   : > { %v19770_v17 = vpop.f32.mrf.mxu0  ;;  %v1686_v5 = vpop.f32.mrf.mxu1 }
 0x272   : > { %25349 = vst [vmem:[#allocation24_spill] sm:$0xff] %v19770_v17  ;;  %v19783_v55 = vadd.f32 %v1686_v5, %v19626_v29  ;;  %12887 = vmatprep.subr.bf16.mxu1 %v16301_v19 }
 0x273   : > { %v19787_v52 = vpop.f32.mrf.mxu0  ;;  %v18088_v0 = vpop.f32.mrf.mxu1 }
 0x274   : > { %25352 = vst [vmem:[#allocation27_spill] sm:$0xff] %v19787_v52  ;;  %v1739_v39 = vadd.f32 %v18088_v0, %v19631_v28 }
 0x275   : > { %v19792_v57 = vpop.f32.mrf.mxu0  ;;  %v19794_v46 = vpop.f32.mrf.mxu1 }
 0x276   : > { %25353 = vst [vmem:[#allocation28_spill] sm:$0xff] %v19792_v57 }
 0x277   : > { %v19796_v18 = vpop.f32.mrf.mxu0  ;;  %v18091_v29 = vpop.f32.mrf.mxu1 }
 0x278   : > { %25354 = vst [vmem:[#allocation29_spill] sm:$0xff] %v19796_v18  ;;  %v1742_v5 = vadd.f32 %v18091_v29, %v19646_v51 }
 0x279   : > { %v19799_v50 = vpop.f32.mrf.mxu0  ;;  %v1702_v27 = vpop.f32.mrf.mxu1 }
 0x27a   : > { %25355 = vst [vmem:[#allocation30_spill] sm:$0xff] %v19799_v50  ;;  %v1740_v52 = vadd.f32 %v1702_v27, %v19657_v56 }
 0x27b   : > { %v19802_v37 = vpop.f32.mrf.mxu0  ;;  %v18092_v22 = vpop.f32.mrf.mxu1 }
 0x27c   : > { %25356 = vst [vmem:[#allocation31_spill] sm:$0xff] %v19802_v37  ;;  %v1743_v28 = vadd.f32 %v18092_v22, %v19680_v30 }
 0x27d   : > { %v19805_v19 = vpop.f32.mrf.mxu0  ;;  %v19807_v0 = vpop.f32.mrf.mxu1 }
 0x27e   : > { %25357 = vst [vmem:[#allocation32_spill] sm:$0xff] %v19805_v19 }
 0x27f   : > { %v19809_v21 = vpop.f32.mrf.mxu0  ;;  %v18095_v20 = vpop.f32.mrf.mxu1 }
 0x280   : > { %25358 = vst [vmem:[#allocation33_spill] sm:$0xff] %v19809_v21  ;;  %v1746_v18 = vadd.f32 %v18095_v20, %v19695_v62 }
 0x281   : > { %v19812_v51 = vpop.f32.mrf.mxu0  ;;  %v1718_v29 = vpop.f32.mrf.mxu1 }
 0x282   : > { %25359 = vst [vmem:[#allocation34_spill] sm:$0xff] %v19812_v51  ;;  %v1744_v50 = vadd.f32 %v1718_v29, %v19706_v42 }
 0x283   : > { %v19815_v56 = vpop.f32.mrf.mxu0  ;;  %v18096_v27 = vpop.f32.mrf.mxu1 }
 0x284   : > { %25360 = vst [vmem:[#allocation35_spill] sm:$0xff] %v19815_v56 }
 0x285   : > { %v18288_v37 = vpop.f32.mrf.mxu0  ;;  %v19817_v57 = vpop.f32.mrf.mxu1 }
 0x287   : > { %v18115_v30 = vpop.f32.mrf.mxu1 }
 0x289   : > { %v1869_v22 = vpop.f32.mrf.mxu1 }
 0x28b   : > { %v18116_v19 = vpop.f32.mrf.mxu1 }
 0x28c   : > { %v19819_v17 = vadd.f32 %v18116_v19, %v1735_v36 }
 0x28d   : > { %v1872_v21 = vpop.f32.mrf.mxu1 }
 0x28f   : > { %v18119_v3 = vpop.f32.mrf.mxu1 }
 0x290   : > { %v1937_v43 = vadd.f32 %v18119_v3, %v1738_v26 }
 0x291   : > { %v19821_v62 = vpop.f32.mrf.mxu1 }
 0x292   : > { %v2136_v24 = vadd.f32 %v19487_v47, %v1937_v43 }
 0x293   : > { %v18120_v20 = vpop.f32.mrf.mxu1 }
 0x294   : > { %v1938_v51 = vadd.f32 %v18120_v20, %v1739_v39 }
 0x295   : > { %v19823_v38 = vpop.f32.mrf.mxu1 }
 0x297   : > { %v18123_v42 = vpop.f32.mrf.mxu1 }
 0x298   : > { %v1941_v29 = vadd.f32 %v18123_v42, %v1742_v5 }
 0x299   : > { %v1901_v27 = vpop.f32.mrf.mxu1 }
 0x29a   : > { %v1939_v37 = vadd.f32 %v1901_v27, %v1740_v52 }
 0x29b   : > { %v18124_v56 = vpop.f32.mrf.mxu1 }
 0x29c   : > { %v1942_v8 = vadd.f32 %v18124_v56, %v1743_v28  ;;  %v2137_v28 = vadd.f32 %v19507_v63, %v1938_v51  ;;  %v1933_v63 = vadd.f32 %v18115_v30, %v19727_v60 }
 0x29d   : > { %v19825_v7 = vpop.f32.mrf.mxu1 }
 0x29f   : > { %v18127_v44 = vpop.f32.mrf.mxu1 }
 0x2a0   : > { %v1945_v36 = vadd.f32 %v18127_v44, %v1746_v18  ;;  %v2140_v18 = vadd.f32 %v19527_v48, %v1941_v29  ;;  %v1490_v48 = vadd.f32 %v19616_v35, %v19475_v4  ;;  %v1931_v29 = vadd.f32 %v1869_v22, %v19738_v45  ;;  %v19866_v4 = vld [vmem:[%s25320_s5 + $0xd80] sm:$0xff] }
 0x2a1   : > { %v1917_v19 = vpop.f32.mrf.mxu1  ;;  %v2133_v35 = vadd.f32 %v19467_v53, %v19819_v17  ;;  %v19882_v45 = vld [vmem:[%s25320_s5 + $0xd40] sm:$0xff] }
 0x2a2   : > { %v1943_v1 = vadd.f32 %v1917_v19, %v1744_v50  ;;  %v2138_v19 = vadd.f32 %v19537_v25, %v1939_v37  ;;  %v1733_v37 = vadd.f32 %v19765_v49, %v1490_v48  ;;  %v19887_v49 = vld [vmem:[%s25320_s5 + $0xd60] sm:$0xff] }
 0x2a3   : > { %v18128_v2 = vpop.f32.mrf.mxu1  ;;  %v19906_v17 = vld [vmem:[%s25320_s5 + $0x9a0] sm:$0xff] }
 0x2a4   : > { %v2142_v60 = vadd.f32 %v19583_v58, %v1943_v1  ;;  %v1932_v30 = vadd.f32 %v1872_v21, %v1733_v37  ;;  %v1522_v1 = vadd.f32 %v19684_v31, %v19555_v10  ;;  %v1935_v10 = vadd.f32 %v19821_v62, %v19783_v55  ;;  %v19901_v31 = vld [vmem:[%s25320_s5 + $0x980] sm:$0xff] }
 0x2a5   : > { %v19827_v3 = vpop.f32.mrf.mxu1 }
 0x2a6   : > { %v1741_v55 = vadd.f32 %v19807_v0, %v1522_v1  ;;  %v2134_v48 = vadd.f32 %v19497_v61, %v1935_v10  ;;  %v19948_v61 = vld [vmem:[%s25320_s5 + $0x940] sm:$0xff] }
 0x2a7   : > { %v18179_v26 = vpop.f32.mrf.mxu1  ;;  %v19966_v1 = vld [vmem:[%s25320_s5 + $0xcc0] sm:$0xff] }
 0x2a9   : > { %v2267_v54 = vpop.f32.mrf.mxu1 }
 0x2ab   : > { %v18180_v39 = vpop.f32.mrf.mxu1 }
 0x2ad   : > { %v2270_v20 = vpop.f32.mrf.mxu1 }
 0x2af   : > { %v18183_v5 = vpop.f32.mrf.mxu1 }
 0x2b0   : > { %v19830_v42 = vadd.f32 %v18183_v5, %v2136_v24  ;;  %v2141_v24 = vadd.f32 %v19547_v41, %v1942_v8 }
 0x2b1   : > { %v19832_v52 = vpop.f32.mrf.mxu1 }
 0x2b3   : > { %v18184_v56 = vpop.f32.mrf.mxu1 }
 0x2b4   : > { %v19835_v44 = vadd.f32 %v18184_v56, %v2137_v28  ;;  %v2144_v56 = vadd.f32 %v19573_v15, %v1945_v36  ;;  %v1506_v15 = vadd.f32 %v19641_v16, %v19515_v12  ;;  %v1538_v12 = vadd.f32 %v19722_v33, %v19591_v13 }
 0x2b5   : > { %v19837_v50 = vpop.f32.mrf.mxu1  ;;  %v2332_v13 = vadd.f32 %v18180_v39, %v2133_v35  ;;  %v16412_v36 = vcombine.low %v19882_v45, %v19887_v49 }
 0x2b6   : > { %v1737_v16 = vadd.f32 %v19794_v46, %v1506_v15  ;;  %v2131_v46 = vadd.f32 %v19477_v40, %v1932_v30  ;;  %v19921_v40 = vld [vmem:[%s25320_s5 + $0xd00] sm:$0xff]  ;;  %v25361_v15 = vld [vmem:[#allocation8_spill] sm:$0xff] }
 0x2b7   : > { %v18187_v2 = vpop.f32.mrf.mxu1  ;;  %v2531_v37 = vadd.f32 %v19614_v32, %v2332_v13  ;;  %v25363_v13 = vld [vmem:[#allocation22_spill] sm:$0xff] }
 0x2b8   : > { %v19840_v27 = vadd.f32 %v18187_v2, %v2140_v18  ;;  %v2132_v18 = vadd.f32 %v19447_v14, %v1933_v63  ;;  %v19871_v14 = vld [vmem:[%s25320_s5 + $0xda0] sm:$0xff]  ;;  %v1936_v22 = vadd.f32 %v19823_v38, %v1737_v16  ;;  %v2330_v0 = vadd.f32 %v2270_v20, %v2131_v46 }
 0x2b9   : > { %v2299_v47 = vpop.f32.mrf.mxu1  ;;  %v16420_v53 = vcombine.low %v19866_v4, %v19871_v14  ;;  %v16421_v21 = vcombine.high %v19866_v4, %v19871_v14  ;;  %v1940_v63 = vadd.f32 %v19825_v7, %v1741_v55  ;;  %v16292_v20 = vcombine.low %v19901_v31, %v19906_v17  ;;  %v19953_v7 = vld [vmem:[%s25320_s5 + $0x960] sm:$0xff]  ;;  %v25390_v4 = vld [vmem:[#allocation25_spill] sm:$0xff] }
 0x2ba   : > { %v19843_v43 = vadd.f32 %v2299_v47, %v2138_v19  ;;  %v2331_v2 = vadd.f32 %v18179_v26, %v2132_v18  ;;  %v2130_v19 = vadd.f32 %v19457_v59, %v1931_v29  ;;  %v16413_v26 = vcombine.high %v19882_v45, %v19887_v49  ;;  %v19937_v29 = vld [vmem:[%s25319_s4] ss:$0 sm:$0xff]  ;;  %v25364_v55 = vld [vmem:[#allocation7_spill] sm:$0xff] }
 0x2bb   : > { %v18188_v5 = vpop.f32.mrf.mxu1  ;;  %v25391_v14 = vld [vmem:[#allocation26_spill] sm:$0xff] }
 0x2bc   : > { %v19847_v51 = vadd.f32 %v18188_v5, %v2141_v24  ;;  %v2329_v59 = vadd.f32 %v2267_v54, %v2130_v19  ;;  %v2530_v33 = vadd.f32 %v19604_v23, %v2331_v2  ;;  %v19926_v23 = vld [vmem:[%s25320_s5 + $0xd20] sm:$0xff]  ;;  %v16293_v24 = vcombine.high %v19901_v31, %v19906_v17 }
 0x2bd   : > { %v19849_v28 = vpop.f32.mrf.mxu1  ;;  %v1745_v5 = vadd.f32 %v19817_v57, %v1538_v12  ;;  %v16405_v57 = vcombine.high %v19921_v40, %v19926_v23  ;;  %v16285_v12 = vcombine.high %v19948_v61, %v19953_v7 }
 0x2be   : > { %v2528_v38 = vadd.f32 %v19609_v34, %v2329_v59 }
 0x2bf   : > { %v18191_v25 = vpop.f32.mrf.mxu1  ;;  %v1944_v18 = vadd.f32 %v19827_v3, %v1745_v5 }
 0x2c0   : > { %v19857_v41 = vadd.f32 %v18191_v25, %v2144_v56 }
 0x2c1   : > { %v2315_v8 = vpop.f32.mrf.mxu1 }
 0x2c2   : > { %v19861_v47 = vadd.f32 %v2315_v8, %v2142_v60  ;;  %v2135_v60 = vadd.f32 %v19517_v11, %v1936_v22  ;;  %v16404_v8 = vcombine.low %v19921_v40, %v19926_v23  ;;  %v19971_v11 = vld [vmem:[%s25320_s5 + $0xce0] sm:$0xff]  ;;  %v2143_v22 = vadd.f32 %v25364_v55, %v1944_v18 }
 0x2c3   : > { %v18192_v58 = vpop.f32.mrf.mxu1  ;;  %v16397_v5 = vcombine.high %v19966_v1, %v19971_v11 }
 0x2c4   : > { %v2529_v58 = vadd.f32 %v25361_v15, %v2330_v0  ;;  %v2334_v3 = vadd.f32 %v19837_v50, %v2135_v60 }
 0x2c5   : > { %v19894_v54 = vpop.f32.mrf.mxu1 }
 0x2c7   : > { %v18243_v62 = vpop.f32.mrf.mxu1 }
 0x2c8   : > { %v2729_v39 = vadd.f32 %v18243_v62, %v2530_v33  ;;  %v25365_v62 = vld [vmem:[#allocation9_spill] sm:$0xff] }
 0x2c9   : > { %v2665_v56 = vpop.f32.mrf.mxu1  ;;  %v2534_v50 = vadd.f32 %v25365_v62, %v19830_v42  ;;  %v25370_v42 = vld [vmem:[#allocation13_spill] sm:$0xff]  ;;  %v25374_v62 = vld [vmem:[#allocation16_spill] sm:$0xff] }
 0x2ca   : > { %v2928_v34 = vadd.f32 %v19729_v9, %v2729_v39  ;;  %v2727_v25 = vadd.f32 %v2665_v56, %v2528_v38  ;;  %v2333_v9 = vadd.f32 %v19832_v52, %v2134_v48  ;;  %v25362_v52 = vld [vmem:[#allocation6_spill] sm:$0xff] }
 0x2cb   : > { %v18244_v32 = vpop.f32.mrf.mxu1  ;;  %v2139_v59 = vadd.f32 %v25362_v52, %v1940_v63  ;;  %v25366_v39 = vld [vmem:[#allocation10_spill] sm:$0xff]  ;;  %v25371_v52 = vld [vmem:[#allocation24_spill] sm:$0xff] }
 0x2cc   : > { %v2950_v30 = vadd.f32 %v19937_v29, %v2928_v34  ;;  %v2926_v2 = vadd.f32 %v19740_v6, %v2727_v25  ;;  %v2730_v19 = vadd.f32 %v18244_v32, %v2531_v37  ;;  %v16284_v6 = vcombine.low %v19948_v61, %v19953_v7  ;;  %v25367_v34 = vld [vmem:[#allocation23_spill] sm:$0xff] }
 0x2cd   : > { %v2668_v35 = vpop.f32.mrf.mxu1  ;;  %v2532_v38 = vadd.f32 %v25366_v39, %v2333_v9  ;;  %v2338_v63 = vadd.f32 %v19849_v28, %v2139_v59  ;;  %v25368_v32 = vld [vmem:[#allocation11_spill] sm:$0xff] }
 0x2ce   : > { %v2965_v16 = vmax.f32 %v2950_v30, 0.0  ;;  %v2948_v10 = vadd.f32 %v19937_v29, %v2926_v2  ;;  %v2929_v46 = vadd.f32 %v25363_v13, %v2730_v19  ;;  %v2728_v33 = vadd.f32 %v2668_v35, %v2529_v58  ;;  %v25369_v30 = vld [vmem:[#allocation12_spill] sm:$0xff]  ;;  %v25372_v13 = vld [vmem:[#allocation14_spill] sm:$0xff] }
 0x2cf   : > { %v18247_v0 = vpop.f32.mrf.mxu1  ;;  %v2535_v18 = vadd.f32 %v25368_v32, %v19835_v44  ;;  %v2533_v2 = vadd.f32 %v25369_v30, %v2334_v3  ;;  %v2538_v19 = vadd.f32 %v25370_v42, %v19840_v27  ;;  %v25373_v44 = vld [vmem:[#allocation15_spill] sm:$0xff] }
 0x2d0   : > { %v2991_v48 = vrot.slane %v2965_v16, 1  ;;  %v2963_v56 = vmax.f32 %v2948_v10, 0.0  ;;  %v2927_v25 = vadd.f32 %v25367_v34, %v2728_v33  ;;  %v2733_v37 = vadd.f32 %v18247_v0, %v2534_v50  ;;  %v25375_v0 = vld [vmem:[#allocation27_spill] sm:$0xff] }
 0x2d1   : > { %v2681_v60 = vpop.f32.mrf.mxu1  ;;  %v2951_v58 = vadd.f32 %v19937_v29, %v2929_v46  ;;  %v2536_v33 = vadd.f32 %v25372_v13, %v19843_v43  ;;  %v2539_v3 = vadd.f32 %v25373_v44, %v19847_v51  ;;  %v2537_v50 = vadd.f32 %v25374_v62, %v2338_v63  ;;  %v25377_v63 = vld [vmem:[#allocation28_spill] sm:$0xff]  ;;  %v3435_v7 = vld [vmem:[%s25320_s5 + $0x880] sm:$0xff] }
 0x2d2   : > { %v19994_v9 = vmax.f32 %v2965_v16, %v2991_v48  ;;  %v2979_v15 = vrot.slane %v2963_v56, 1  ;;  %v2949_v28 = vadd.f32 %v19937_v29, %v2927_v25  ;;  %v2932_v59 = vadd.f32 %v25371_v52, %v2733_v37 }
 0x2d3   : > { %v2731_v35 = vadd.f32 %v2681_v60, %v2532_v38  ;;  %v18248_v10 = vpop.f32.mrf.mxu1  ;;  %v25376_v38 = vld [vmem:[#allocation17_spill] sm:$0xff]  ;;  %v2966_v37 = vmax.f32 %v2951_v58, 0.0 }
 0x2d4   : > { %v2995_v55 = vrot.slane %v19994_v9, 4  ;;  %v2981_v27 = vmax.f32 %v2963_v56, %v2979_v15  ;;  %v2964_v16 = vmax.f32 %v2949_v28, 0.0  ;;  %v2954_v46 = vadd.f32 %v19937_v29, %v2932_v59  ;;  %v25378_v15 = vld [vmem:[#allocation18_spill] sm:$0xff] }
 0x2d5   : > { %v2930_v39 = vadd.f32 %v25375_v0, %v2731_v35  ;;  %v2734_v48 = vadd.f32 %v18248_v10, %v2535_v18  ;;  %v2684_v34 = vpop.f32.mrf.mxu1  ;;  %v2542_v25 = vadd.f32 %v25376_v38, %v19857_v41  ;;  %v2342_v56 = vadd.f32 %v19894_v54, %v2143_v22  ;;  %v25379_v41 = vld [vmem:[#allocation29_spill] sm:$0xff]  ;;  %v25380_v0 = vld [vmem:[#allocation30_spill] sm:$0xff] }
 0x2d6   : > { %v2997_v43 = vmax.f32 %v2981_v27, %v2995_v55  ;;  %v2983_v51 = vrot.slane %v2964_v16, 1  ;;  %v2732_v60 = vadd.f32 %v2684_v34, %v2533_v2  ;;  %v2540_v18 = vadd.f32 %v25378_v15, %v19861_v47  ;;  %v3447_v9 = vld [vmem:[%s25320_s5 + $0x8e0] sm:$0xff] }
 0x2d7   : > { %v2952_v32 = vadd.f32 %v19937_v29, %v2930_v39  ;;  %v2933_v30 = vadd.f32 %v25377_v63, %v2734_v48  ;;  %v18251_v42 = vpop.f32.mrf.mxu1  ;;  %v2969_v10 = vmax.f32 %v2954_v46, 0.0  ;;  %v3000_v22 = vrot.slane %v2966_v37, 1  ;;  %v25381_v63 = vld [vmem:[#allocation31_spill] sm:$0xff] }
 0x2d8   : > { %v3087_v28 = vrot.slane %v2997_v43, 4  ;;  %v20016_v52 = vmax.f32 %v2964_v16, %v2983_v51  ;;  %v2931_v59 = vadd.f32 %v25379_v41, %v2732_v60  ;;  %v2737_v35 = vadd.f32 %v18251_v42, %v2538_v19 }
 0x2d9   : > { %v2967_v58 = vmax.f32 %v2952_v32, 0.0  ;;  %v2955_v2 = vadd.f32 %v19937_v29, %v2933_v30  ;;  %v2697_v13 = vpop.f32.mrf.mxu1  ;;  %v3089_v54 = vrot.slane %v2997_v43, 6  ;;  %v3021_v43 = vrot.slane %v2969_v10, 1 }
 0x2da   : > { %v2987_v44 = vrot.slane %v20016_v52, 4  ;;  %v2953_v62 = vadd.f32 %v19937_v29, %v2931_v59  ;;  %v2936_v39 = vadd.f32 %v25380_v0, %v2737_v35  ;;  %v20023_v47 = vpack.c.bf16 %v3087_v28, %v3087_v28  ;;  %v25382_v59 = vld [vmem:[#allocation32_spill] sm:$0xff] }
 0x2db   : > { %v3004_v16 = vrot.slane %v2967_v58, 1  ;;  %v2970_v48 = vmax.f32 %v2955_v2, 0.0  ;;  %v2735_v34 = vadd.f32 %v2697_v13, %v2536_v33  ;;  %v18252_v38 = vpop.f32.mrf.mxu1  ;;  %v20028_v60 = vpack.c.bf16 %v3089_v54, %v3089_v54 }
 0x2dc   : > { %v2968_v19 = vmax.f32 %v2953_v62, 0.0  ;;  %v20026_v46 = vadd.f32 %v19937_v29, %v2936_v39  ;;  %v2738_v51 = vadd.f32 %v18252_v38, %v2539_v3  ;;  %v2989_v15 = vmax.f32 %v2981_v27, %v2987_v44  ;;  %v25384_v44 = vld [vmem:[#allocation33_spill] sm:$0xff] }
 0x2dd   : > { %v20030_v32 = vmax.f32 %v2967_v58, %v3004_v16  ;;  %v2934_v30 = vadd.f32 %v25381_v63, %v2735_v34  ;;  %v2700_v42 = vpop.f32.mrf.mxu1  ;;  %v3025_v28 = vrot.slane %v2970_v48, 1  ;;  %12878 = vmatprep.mubr.bf16.mxu0 %v20028_v60  ;;  %v3002_v2 = vmax.f32 %v2966_v37, %v3000_v22  ;;  %v25383_v58 = vld [vmem:[#allocation19_spill] sm:$0xff]  ;;  %v25385_v34 = vld [vmem:[#allocation20_spill] sm:$0xff]  ;;  %v25386_v38 = vld [vmem:[#allocation21_spill] sm:$0xff] }
 0x2de   : > { %v3012_v41 = vrot.slane %v2968_v19, 1  ;;  %v2937_v35 = vadd.f32 %v25382_v59, %v2738_v51  ;;  %v2736_v33 = vadd.f32 %v2700_v42, %v2537_v50  ;;  %12879 = vmatmul.mubr.bf16.vlgmr.msra.gmra.mxu0 %v20023_v47  ;;  %v3084_v54 = vrot.slane %v2989_v15, 2 }
 0x2df   : > { %v2956_v13 = vadd.f32 %v19937_v29, %v2934_v30  ;;  %v18255_v3 = vpop.f32.mrf.mxu1  ;;  %v2541_v62 = vadd.f32 %v25383_v58, %v2342_v56  ;;  %v3008_v0 = vrot.slane %v20030_v32, 4  ;;  %v25387_v50 = vcombine.low %v25385_v34, %v25386_v38 }
 0x2e0   : > { %v20039_v39 = vmax.f32 %v2968_v19, %v3012_v41  ;;  %v2959_v27 = vadd.f32 %v19937_v29, %v2937_v35  ;;  %v2935_v16 = vadd.f32 %v25384_v44, %v2736_v33  ;;  %v3023_v37 = vmax.f32 %v2969_v10, %v3021_v43  ;;  %v25388_v35 = vld [vmem:[#allocation34_spill] sm:$0xff] }
 0x2e1   : > { %12929 = vmatpush1.bf16.msra.mxu0 %v25387_v50  ;;  %v2971_v22 = vmax.f32 %v2956_v13, 0.0  ;;  %v2741_v51 = vadd.f32 %v18255_v3, %v2542_v25  ;;  %v2713_v56 = vpop.f32.mrf.mxu1  ;;  %v20049_v63 = vpack.c.bf16 %v3084_v54, %v3084_v54  ;;  %v3027_v19 = vmax.f32 %v2970_v48, %v3025_v28  ;;  %v25389_v3 = vld [vmem:[#allocation35_spill] sm:$0xff] }
 0x2e2   : > { %12930 = vmatprep.subr.bf16.mxu0 %v16421_v21  ;;  %v2973_v30 = vmax.f32 %v20026_v46, 0.0  ;;  %v2974_v42 = vmax.f32 %v2959_v27, 0.0  ;;  %v2957_v41 = vadd.f32 %v19937_v29, %v2935_v16  ;;  %v2739_v58 = vadd.f32 %v2713_v56, %v2540_v18 }
 0x2e3   : > { %v3033_v59 = vrot.slane %v2971_v22, 1  ;;  %v2940_v33 = vadd.f32 %v25388_v35, %v2741_v51  ;;  %12837 = vmatprep.mubr.bf16.mxu1 %v20049_v63  ;;  %v18256_v25 = vpop.f32.mrf.mxu1  ;;  %v20055_v10 = vpack.c.bf16 %v2989_v15, %v2989_v15  ;;  %v3016_v21 = vrot.slane %v20039_v39, 4 }
 0x2e4   : > { %v3054_v43 = vrot.slane %v2974_v42, 1  ;;  %v2972_v13 = vmax.f32 %v2957_v41, 0.0  ;;  %v20061_v48 = vmax.f32 %v3002_v2, %v3008_v0  ;;  %v2938_v18 = vadd.f32 %v25389_v3, %v2739_v58 }
 0x2e5   : > { %12931 = vmatpush1.bf16.msra.mxu0 %v16420_v53  ;;  %v3035_v46 = vmax.f32 %v2971_v22, %v3033_v59  ;;  %v2962_v28 = vadd.f32 %v19937_v29, %v2940_v33  ;;  %12838 = vmatmul.mubr.bf16.vlgmr.msra.gmra.mxu1 %v20055_v10  ;;  %v2716_v15 = vpop.f32.mrf.mxu1  ;;  %v3029_v54 = vrot.slane %v3027_v19, 4  ;;  %v25392_v53 = vcombine.low %v25390_v4, %v25391_v14  ;;  %v3567_v33 = vld [vmem:[%s25320_s5 + $0xca0] sm:$0xff] }
 0x2e6   : > { %12932 = vmatprep.subr.bf16.mxu0 %v16413_v26  ;;  %v20069_v27 = vmax.f32 %v2974_v42, %v3054_v43  ;;  %v3042_v44 = vrot.slane %v2972_v13, 1  ;;  %v20076_v0 = vpack.c.bf16 %v20061_v48, %v20061_v48  ;;  %v2960_v38 = vadd.f32 %v19937_v29, %v2938_v18  ;;  %v2915_v42 = vpop.f32.mrf.mxu0 }
 0x2e7   : > { %12888 = vmatpush1.bf16.msra.mxu1 %v25392_v53  ;;  %v3037_v16 = vrot.slane %v3035_v46, 4  ;;  %v2977_v34 = vmax.f32 %v2962_v28, 0.0  ;;  %v2740_v50 = vadd.f32 %v2716_v15, %v2541_v62  ;;  %v3046_v26 = vrot.slane %v2973_v30, 1  ;;  %v3451_v62 = vld [vmem:[%s25320_s5 + $0x900] sm:$0xff] }
 0x2e8   : > { %12889 = vmatprep.subr.bf16.mxu1 %v16293_v24  ;;  %v3058_v22 = vrot.slane %v20069_v27, 4  ;;  %v3044_v51 = vmax.f32 %v2972_v13, %v3042_v44  ;;  %12919 = vmatprep.mubr.bf16.mxu1 %v20076_v0  ;;  %v20089_v56 = vmax.f32 %v3002_v2, %v3016_v21  ;;  %v3455_v24 = vld [vmem:[%s25320_s5 + $0x920] sm:$0xff]  ;;  %v2975_v45 = vmax.f32 %v2960_v38, 0.0 }
 0x2e9   : > { %12933 = vmatpush1.bf16.msra.mxu0 %v16412_v36  ;;  %v20097_v41 = vmax.f32 %v3023_v37, %v3037_v16  ;;  %v20099_v59 = vmax.f32 %v3027_v19, %v3037_v16  ;;  %v3075_v35 = vrot.slane %v2977_v34, 1  ;;  %v2939_v36 = vadd.f32 %v2915_v42, %v2740_v50  ;;  %v3563_v19 = vld [vmem:[%s25320_s5 + $0xc80] sm:$0xff] }
 0x2ea   : > { %12934 = vmatprep.subr.bf16.mxu0 %v16405_v57  ;;  %v20106_v49 = vmax.f32 %v3044_v51, %v3058_v22  ;;  %v3095_v2 = vrot.slane %v20089_v56, 4  ;;  %v20118_v57 = vmax.f32 %v3023_v37, %v3029_v54  ;;  %v3063_v25 = vrot.slane %v2975_v45, 1  ;;  %v3547_v15 = vld [vmem:[%s25320_s5 + $0xc00] sm:$0xff] }
 0x2eb   : > { %12890 = vmatpush1.bf16.msra.mxu1 %v16292_v20  ;;  %v3077_v58 = vmax.f32 %v2977_v34, %v3075_v35  ;;  %v16277_v31 = vcombine.high %v3451_v62, %v3455_v24  ;;  %v20126_v17 = vmax.f32 %v20016_v52, %v2995_v55  ;;  %v20128_v20 = vmax.f32 %v2973_v30, %v3046_v26  ;;  %v3559_v30 = vld [vmem:[%s25320_s5 + $0xc60] sm:$0xff] }
 0x2ec   : > { %12891 = vmatprep.subr.bf16.mxu1 %v16285_v12  ;;  %v2961_v43 = vadd.f32 %v19937_v29, %v2939_v36  ;;  %v20134_v37 = vpack.c.bf16 %v3095_v2, %v3095_v2  ;;  %v16396_v13 = vcombine.low %v19966_v1, %v19971_v11  ;;  %v3443_v12 = vld [vmem:[%s25320_s5 + $0x8c0] sm:$0xff]  ;;  %v20144_v52 = vmax.f32 %v2975_v45, %v3063_v25 }
 0x2ed   : > { %12935 = vmatpush1.bf16.msra.mxu0 %v16404_v8  ;;  %v3079_v55 = vrot.slane %v3077_v58, 4  ;;  %v16389_v40 = vcombine.high %v3563_v19, %v3567_v33  ;;  %v16276_v29 = vcombine.low %v3451_v62, %v3455_v24  ;;  %v3555_v8 = vld [vmem:[%s25320_s5 + $0xc40] sm:$0xff]  ;;  %v16269_v11 = vcombine.high %v3443_v12, %v3447_v9 }
 0x2ee   : > { %12936 = vmatprep.subr.bf16.mxu0 %v16397_v5  ;;  %v2976_v23 = vmax.f32 %v2961_v43, 0.0  ;;  %12960 = vmatprep.mubr.bf16.mxu0 %v20134_v37  ;;  %v3050_v5 = vrot.slane %v20128_v20, 4  ;;  %v16388_v61 = vcombine.low %v3563_v19, %v3567_v33  ;;  %v16381_v28 = vcombine.high %v3555_v8, %v3559_v30  ;;  %v3551_v54 = vld [vmem:[%s25320_s5 + $0xc20] sm:$0xff] }
 0x2ef   : > { %12892 = vmatpush1.bf16.msra.mxu1 %v16284_v6  ;;  %v20160_v1 = vmax.f32 %v20144_v52, %v3079_v55  ;;  %v3439_v6 = vld [vmem:[%s25320_s5 + $0x8a0] sm:$0xff]  ;;  %v16268_v18 = vcombine.low %v3443_v12, %v3447_v9  ;;  %v16380_v53 = vcombine.low %v3555_v8, %v3559_v30  ;;  %v16373_v38 = vcombine.high %v3547_v15, %v3551_v54 }
 0x2f0   : > { %12893 = vmatprep.subr.bf16.mxu1 %v16277_v31  ;;  %v3067_v46 = vrot.slane %v2976_v23, 1  ;;  %v20175_v44 = vmax.f32 %v3044_v51, %v3050_v5  ;;  %v16261_v4 = vcombine.high %v3435_v7, %v3439_v6  ;;  %v3427_v16 = vld [vmem:[%s25320_s5 + $0x840] sm:$0xff]  ;;  %v16260_v50 = vcombine.low %v3435_v7, %v3439_v6 }
 0x2f1   : > { %12937 = vmatpush1.bf16.msra.mxu0 %v16396_v13  ;;  %v3431_v34 = vld [vmem:[%s25320_s5 + $0x860] sm:$0xff]  ;;  %v16372_v24 = vcombine.low %v3547_v15, %v3551_v54  ;;  %v20212_v13 = vmax.f32 %v20128_v20, %v3058_v22  ;;  %v20344_v39 = vpack.c.bf16 %v20126_v17, %v20126_v17 }
 0x2f2   : > { %12938 = vmatprep.subr.bf16.mxu0 %v16389_v40  ;;  %v3069_v3 = vmax.f32 %v2976_v23, %v3067_v46  ;;  %v3667_v26 = vld [vmem:[%s25320_s5 + $0xfc0] sm:$0xff]  ;;  %v16253_v62 = vcombine.high %v3427_v16, %v3431_v34  ;;  %v16252_v36 = vcombine.low %v3427_v16, %v3431_v34 }
 0x2f3   : > { %12894 = vmatpush1.bf16.msra.mxu1 %v16276_v29  ;;  %v3671_v51 = vld [vmem:[%s25320_s5 + $0xfe0] sm:$0xff] }
 0x2f4   : > { %12895 = vmatprep.subr.bf16.mxu1 %v16269_v11  ;;  %v20177_v14 = vmax.f32 %v3069_v3, %v3079_v55  ;;  %v3419_v42 = vld [vmem:[%s25320_s5 + $0x800] sm:$0xff]  ;;  %v16493_v45 = vcombine.high %v3667_v26, %v3671_v51  ;;  %v3071_v58 = vrot.slane %v3069_v3, 4  ;;  %v16492_v25 = vcombine.low %v3667_v26, %v3671_v51 }
 0x2f5   : > { %12939 = vmatpush1.bf16.msra.mxu0 %v16388_v61  ;;  %v3423_v35 = vld [vmem:[%s25320_s5 + $0x820] sm:$0xff] }
 0x2f6   : > { %12940 = vmatprep.subr.bf16.mxu0 %v16381_v28  ;;  %v3659_v2 = vld [vmem:[%s25320_s5 + $0xf80] sm:$0xff]  ;;  %v16245_v33 = vcombine.high %v3419_v42, %v3423_v35  ;;  %v16244_v9 = vcombine.low %v3419_v42, %v3423_v35  ;;  %v20227_v20 = vmax.f32 %v20144_v52, %v3071_v58 }
 0x2f7   : > { %12896 = vmatpush1.bf16.msra.mxu1 %v16268_v18  ;;  %v3663_v19 = vld [vmem:[%s25320_s5 + $0xfa0] sm:$0xff] }
 0x2f8   : > { %12897 = vmatprep.subr.bf16.mxu1 %v16261_v4  ;;  %v3539_v31 = vld [vmem:[%s25320_s5 + $0xbc0] sm:$0xff]  ;;  %v16485_v12 = vcombine.high %v3659_v2, %v3663_v19  ;;  %v16484_v29 = vcombine.low %v3659_v2, %v3663_v19 }
 0x2f9   : > { %12941 = vmatpush1.bf16.msra.mxu0 %v16380_v53  ;;  %v3543_v43 = vld [vmem:[%s25320_s5 + $0xbe0] sm:$0xff] }
 0x2fa   : > { %12942 = vmatprep.subr.bf16.mxu0 %v16373_v38  ;;  %v3651_v55 = vld [vmem:[%s25320_s5 + $0xf40] sm:$0xff]  ;;  %v16365_v23 = vcombine.high %v3539_v31, %v3543_v43  ;;  %v16364_v30 = vcombine.low %v3539_v31, %v3543_v43 }
 0x2fb   : > { %12898 = vmatpush1.bf16.msra.mxu1 %v16260_v50  ;;  %v3655_v40 = vld [vmem:[%s25320_s5 + $0xf60] sm:$0xff] }
 0x2fc   : > { %12899 = vmatprep.subr.bf16.mxu1 %v16253_v62  ;;  %v3531_v27 = vld [vmem:[%s25320_s5 + $0xb80] sm:$0xff]  ;;  %v16477_v8 = vcombine.high %v3651_v55, %v3655_v40  ;;  %v16476_v61 = vcombine.low %v3651_v55, %v3655_v40 }
 0x2fd   : > { %12943 = vmatpush1.bf16.msra.mxu0 %v16372_v24  ;;  %v3535_v22 = vld [vmem:[%s25320_s5 + $0xba0] sm:$0xff] }
 0x2fe   : > { %12944 = vmatprep.subr.bf16.mxu0 %v16493_v45  ;;  %v3643_v11 = vld [vmem:[%s25320_s5 + $0xf00] sm:$0xff]  ;;  %v16357_v46 = vcombine.high %v3531_v27, %v3535_v22  ;;  %v16356_v28 = vcombine.low %v3531_v27, %v3535_v22 }
 0x2ff   : > { %12900 = vmatpush1.bf16.msra.mxu1 %v16252_v36  ;;  %v3647_v5 = vld [vmem:[%s25320_s5 + $0xf20] sm:$0xff] }
 0x300   : > { %12901 = vmatprep.subr.bf16.mxu1 %v16245_v33  ;;  %v3523_v52 = vld [vmem:[%s25320_s5 + $0xb40] sm:$0xff]  ;;  %v16469_v6 = vcombine.high %v3643_v11, %v3647_v5  ;;  %v16468_v54 = vcombine.low %v3643_v11, %v3647_v5 }
 0x301   : > { %12945 = vmatpush2.bf16.msra.mxu0 %v16492_v25  ;;  %v3527_v7 = vld [vmem:[%s25320_s5 + $0xb60] sm:$0xff] }
 0x302   : > { %12946 = vmatprep.subr.bf16.mxu0 %v16485_v12  ;;  %v3635_v3 = vld [vmem:[%s25320_s5 + $0xec0] sm:$0xff]  ;;  %v16349_v15 = vcombine.high %v3523_v52, %v3527_v7  ;;  %v16348_v34 = vcombine.low %v3523_v52, %v3527_v7 }
 0x303   : > { %12902 = vmatpush1.bf16.msra.mxu1 %v16244_v9  ;;  %v3639_v18 = vld [vmem:[%s25320_s5 + $0xee0] sm:$0xff] }
 0x304   : > { %12903 = vmatprep.subr.bf16.mxu1 %v16365_v23  ;;  %v3515_v4 = vld [vmem:[%s25320_s5 + $0xb00] sm:$0xff]  ;;  %v16461_v16 = vcombine.high %v3635_v3, %v3639_v18  ;;  %v16460_v51 = vcombine.low %v3635_v3, %v3639_v18 }
 0x305   : > { %12947 = vmatpush2.bf16.msra.mxu0 %v16484_v29  ;;  %v3519_v53 = vld [vmem:[%s25320_s5 + $0xb20] sm:$0xff] }
 0x306   : > { %12948 = vmatprep.subr.bf16.mxu0 %v16477_v8  ;;  %v3627_v38 = vld [vmem:[%s25320_s5 + $0xe80] sm:$0xff]  ;;  %v16341_v26 = vcombine.high %v3515_v4, %v3519_v53  ;;  %v16340_v35 = vcombine.low %v3515_v4, %v3519_v53 }
 0x307   : > { %12904 = vmatpush2.bf16.msra.mxu1 %v16364_v30  ;;  %v3631_v50 = vld [vmem:[%s25320_s5 + $0xea0] sm:$0xff] }
 0x308   : > { %12905 = vmatprep.subr.bf16.mxu1 %v16357_v46  ;;  %v3507_v62 = vld [vmem:[%s25320_s5 + $0xac0] sm:$0xff]  ;;  %v16453_v42 = vcombine.high %v3627_v38, %v3631_v50  ;;  %v16452_v19 = vcombine.low %v3627_v38, %v3631_v50 }
 0x309   : > { %12949 = vmatpush2.bf16.msra.mxu0 %v16476_v61  ;;  %v3511_v24 = vld [vmem:[%s25320_s5 + $0xae0] sm:$0xff]  ;;  %v3092_v61 = vrot.slane %v20061_v48, 2 }
 0x30a   : > { %12950 = vmatprep.subr.bf16.mxu0 %v16469_v6  ;;  %v3619_v45 = vld [vmem:[%s25320_s5 + $0xe40] sm:$0xff]  ;;  %v16333_v2 = vcombine.high %v3507_v62, %v3511_v24  ;;  %v16332_v31 = vcombine.low %v3507_v62, %v3511_v24  ;;  %v3100_v6 = vrot.slane %v20118_v57, 2  ;;  %v3019_v62 = vmax.f32 %v20030_v32, %v3016_v21 }
 0x30b   : > { %12906 = vmatpush2.bf16.msra.mxu1 %v16356_v28  ;;  %v3623_v36 = vld [vmem:[%s25320_s5 + $0xe60] sm:$0xff]  ;;  %v20315_v4 = vpack.c.bf16 %v3092_v61, %v3092_v61 }
 0x30c   : > { %12907 = vmatprep.subr.bf16.mxu1 %v16349_v15  ;;  %v3499_v33 = vld [vmem:[%s25320_s5 + $0xa80] sm:$0xff]  ;;  %v16445_v25 = vcombine.high %v3619_v45, %v3623_v36  ;;  %v16444_v55 = vcombine.low %v3619_v45, %v3623_v36 }
 0x30d   : > { %12951 = vmatpush2.bf16.msra.mxu0 %v16468_v54  ;;  %v3503_v58 = vld [vmem:[%s25320_s5 + $0xaa0] sm:$0xff] }
 0x30e   : > { %12952 = vmatprep.subr.bf16.mxu0 %v16461_v16  ;;  %v3611_v43 = vld [vmem:[%s25320_s5 + $0xe00] sm:$0xff]  ;;  %v16325_v9 = vcombine.high %v3499_v33, %v3503_v58  ;;  %v16324_v27 = vcombine.low %v3499_v33, %v3503_v58  ;;  %v20317_v16 = vpack.c.bf16 %v3100_v6, %v3100_v6 }
 0x30f   : > { %12908 = vmatpush2.bf16.msra.mxu1 %v16348_v34  ;;  %v3615_v12 = vld [vmem:[%s25320_s5 + $0xe20] sm:$0xff] }
 0x310   : > { %12909 = vmatprep.subr.bf16.mxu1 %v16341_v26  ;;  %v3491_v40 = vld [vmem:[%s25320_s5 + $0xa40] sm:$0xff]  ;;  %v16437_v29 = vcombine.high %v3611_v43, %v3615_v12  ;;  %v16436_v11 = vcombine.low %v3611_v43, %v3615_v12 }
 0x311   : > { %12953 = vmatpush2.bf16.msra.mxu0 %v16460_v51  ;;  %v3495_v23 = vld [vmem:[%s25320_s5 + $0xa60] sm:$0xff] }
 0x312   : > { %12954 = vmatprep.subr.bf16.mxu0 %v16453_v42  ;;  %v3859_v22 = vld [vmem:[%s25320_s5 + $0x15c0] sm:$0xff]  ;;  %v16317_v30 = vcombine.high %v3491_v40, %v3495_v23  ;;  %v16316_v7 = vcombine.low %v3491_v40, %v3495_v23 }
 0x313   : > { %12910 = vmatpush2.bf16.msra.mxu1 %v16340_v35  ;;  %v3863_v8 = vld [vmem:[%s25320_s5 + $0x15e0] sm:$0xff] }
 0x314   : > { %12911 = vmatprep.subr.bf16.mxu1 %v16333_v2  ;;  %v3483_v5 = vld [vmem:[%s25320_s5 + $0xa00] sm:$0xff]  ;;  %v16685_v52 = vcombine.high %v3859_v22, %v3863_v8  ;;  %v16684_v15 = vcombine.low %v3859_v22, %v3863_v8  ;;  %v20346_v2 = vpack.c.bf16 %v3019_v62, %v3019_v62 }
 0x315   : > { %12955 = vmatpush2.bf16.msra.mxu0 %v16452_v19  ;;  %v3487_v46 = vld [vmem:[%s25320_s5 + $0xa20] sm:$0xff] }
 0x316   : > { %12956 = vmatprep.subr.bf16.mxu0 %v16445_v25  ;;  %v3851_v28 = vld [vmem:[%s25320_s5 + $0x1580] sm:$0xff]  ;;  %v16309_v18 = vcombine.high %v3483_v5, %v3487_v46  ;;  %v16308_v34 = vcombine.low %v3483_v5, %v3487_v46 }
 0x317   : > { %12912 = vmatpush2.bf16.msra.mxu1 %v16332_v31  ;;  %v3855_v3 = vld [vmem:[%s25320_s5 + $0x15a0] sm:$0xff] }
 0x318   : > { %12913 = vmatprep.subr.bf16.mxu1 %v16325_v9  ;;  %v3731_v48 = vld [vmem:[%s25320_s5 + $0x11c0] sm:$0xff]  ;;  %v16677_v53 = vcombine.high %v3851_v28, %v3855_v3  ;;  %v16676_v51 = vcombine.low %v3851_v28, %v3855_v3 }
 0x319   : > { %12957 = vmatpush2.bf16.msra.mxu0 %v16444_v55  ;;  %v3735_v54 = vld [vmem:[%s25320_s5 + $0x11e0] sm:$0xff] }
 0x31a   : > { %12958 = vmatprep.subr.bf16.mxu0 %v16437_v29  ;;  %v3843_v38 = vld [vmem:[%s25320_s5 + $0x1540] sm:$0xff]  ;;  %v16557_v26 = vcombine.high %v3731_v48, %v3735_v54  ;;  %v16556_v45 = vcombine.low %v3731_v48, %v3735_v54 }
 0x31b   : > { %12914 = vmatpush2.bf16.msra.mxu1 %v16324_v27  ;;  %v3847_v50 = vld [vmem:[%s25320_s5 + $0x1560] sm:$0xff] }
 0x31c   : > { %12915 = vmatprep.subr.bf16.mxu1 %v16317_v30  ;;  %v3723_v24 = vld [vmem:[%s25320_s5 + $0x1180] sm:$0xff]  ;;  %v16669_v35 = vcombine.high %v3843_v38, %v3847_v50  ;;  %v16668_v19 = vcombine.low %v3843_v38, %v3847_v50 }
 0x31d   : > { %12959 = vmatpush2.bf16.msra.mxu0 %v16436_v11  ;;  %v3727_v42 = vld [vmem:[%s25320_s5 + $0x11a0] sm:$0xff] }
 0x31e   : > { %13010 = vmatprep.subr.bf16.mxu0 %v16685_v52  ;;  %v3835_v36 = vld [vmem:[%s25320_s5 + $0x1500] sm:$0xff]  ;;  %v16549_v21 = vcombine.high %v3723_v24, %v3727_v42  ;;  %v16548_v17 = vcombine.low %v3723_v24, %v3727_v42 }
 0x31f   : > { %12916 = vmatpush2.bf16.msra.mxu1 %v16316_v7  ;;  %v3839_v32 = vld [vmem:[%s25320_s5 + $0x1520] sm:$0xff] }
 0x320   : > { %12961 = vmatmul.mubr.bf16.vlgmr.msra.gmra.mxu0 %v20315_v4  ;;  %12917 = vmatprep.subr.bf16.mxu1 %v16309_v18  ;;  %v3715_v33 = vld [vmem:[%s25320_s5 + $0x1140] sm:$0xff]  ;;  %v16661_v25 = vcombine.high %v3835_v36, %v3839_v32  ;;  %v16660_v9 = vcombine.low %v3835_v36, %v3839_v32 }
 0x321   : > { %13011 = vmatpush1.bf16.msra.mxu0 %v16684_v15  ;;  %13042 = vmatprep.mubr.bf16.mxu0 %v20317_v16  ;;  %v3719_v58 = vld [vmem:[%s25320_s5 + $0x1160] sm:$0xff] }
 0x322   : > { %13012 = vmatprep.subr.bf16.mxu0 %v16677_v53  ;;  %v3827_v31 = vld [vmem:[%s25320_s5 + $0x14c0] sm:$0xff]  ;;  %v16541_v12 = vcombine.high %v3715_v33, %v3719_v58  ;;  %v16540_v29 = vcombine.low %v3715_v33, %v3719_v58 }
 0x323   : > { %12918 = vmatpush2.bf16.msra.mxu1 %v16308_v34  ;;  %v3831_v43 = vld [vmem:[%s25320_s5 + $0x14e0] sm:$0xff] }
 0x324   : > { %12969 = vmatprep.subr.bf16.mxu1 %v16557_v26  ;;  %v3707_v55 = vld [vmem:[%s25320_s5 + $0x1100] sm:$0xff]  ;;  %v16653_v23 = vcombine.high %v3827_v31, %v3831_v43  ;;  %v16652_v30 = vcombine.low %v3827_v31, %v3831_v43 }
 0x325   : > { %13013 = vmatpush1.bf16.msra.mxu0 %v16676_v51  ;;  %v3711_v40 = vld [vmem:[%s25320_s5 + $0x1120] sm:$0xff] }
 0x326   : > { %12920 = vmatmul.mubr.bf16.vlgmr.msra.gmra.mxu1 %v20344_v39  ;;  %13014 = vmatprep.subr.bf16.mxu0 %v16669_v35  ;;  %v3819_v27 = vld [vmem:[%s25320_s5 + $0x1480] sm:$0xff]  ;;  %v16533_v8 = vcombine.high %v3707_v55, %v3711_v40  ;;  %v16532_v61 = vcombine.low %v3707_v55, %v3711_v40 }
 0x327   : > { %12970 = vmatpush1.bf16.msra.mxu1 %v16556_v45  ;;  %13001 = vmatprep.mubr.bf16.mxu1 %v20346_v2  ;;  %v3823_v22 = vld [vmem:[%s25320_s5 + $0x14a0] sm:$0xff] }
 0x328   : > { %12971 = vmatprep.subr.bf16.mxu1 %v16549_v21  ;;  %v3699_v11 = vld [vmem:[%s25320_s5 + $0x10c0] sm:$0xff]  ;;  %v16645_v46 = vcombine.high %v3819_v27, %v3823_v22  ;;  %v16644_v28 = vcombine.low %v3819_v27, %v3823_v22 }
 0x329   : > { %13015 = vmatpush1.bf16.msra.mxu0 %v16668_v19  ;;  %v3703_v5 = vld [vmem:[%s25320_s5 + $0x10e0] sm:$0xff] }
 0x32a   : > { %13016 = vmatprep.subr.bf16.mxu0 %v16661_v25  ;;  %v3811_v52 = vld [vmem:[%s25320_s5 + $0x1440] sm:$0xff]  ;;  %v16525_v6 = vcombine.high %v3699_v11, %v3703_v5  ;;  %v16524_v48 = vcombine.low %v3699_v11, %v3703_v5 }
 0x32b   : > { %12972 = vmatpush1.bf16.msra.mxu1 %v16548_v17  ;;  %v3815_v7 = vld [vmem:[%s25320_s5 + $0x1460] sm:$0xff] }
 0x32c   : > { %12973 = vmatprep.subr.bf16.mxu1 %v16541_v12  ;;  %v3691_v3 = vld [vmem:[%s25320_s5 + $0x1080] sm:$0xff]  ;;  %v16637_v15 = vcombine.high %v3811_v52, %v3815_v7  ;;  %v16636_v38 = vcombine.low %v3811_v52, %v3815_v7 }
 0x32d   : > { %13017 = vmatpush1.bf16.msra.mxu0 %v16660_v9  ;;  %v3695_v18 = vld [vmem:[%s25320_s5 + $0x10a0] sm:$0xff] }
 0x32e   : > { %13018 = vmatprep.subr.bf16.mxu0 %v16653_v23  ;;  %v3803_v54 = vld [vmem:[%s25320_s5 + $0x1400] sm:$0xff]  ;;  %v16517_v34 = vcombine.high %v3691_v3, %v3695_v18  ;;  %v16516_v62 = vcombine.low %v3691_v3, %v3695_v18 }
 0x32f   : > { %12974 = vmatpush1.bf16.msra.mxu1 %v16540_v29  ;;  %v3807_v53 = vld [vmem:[%s25320_s5 + $0x1420] sm:$0xff] }
 0x330   : > { %12975 = vmatprep.subr.bf16.mxu1 %v16533_v8  ;;  %v3683_v50 = vld [vmem:[%s25320_s5 + $0x1040] sm:$0xff]  ;;  %v16629_v51 = vcombine.high %v3803_v54, %v3807_v53  ;;  %v16628_v45 = vcombine.low %v3803_v54, %v3807_v53 }
 0x331   : > { %13019 = vmatpush1.bf16.msra.mxu0 %v16652_v30  ;;  %v3687_v26 = vld [vmem:[%s25320_s5 + $0x1060] sm:$0xff] }
 0x332   : > { %13020 = vmatprep.subr.bf16.mxu0 %v16645_v46  ;;  %v3923_v24 = vld [vmem:[%s25320_s5 + $0x17c0] sm:$0xff]  ;;  %v16509_v35 = vcombine.high %v3683_v50, %v3687_v26  ;;  %v16508_v19 = vcombine.low %v3683_v50, %v3687_v26 }
 0x333   : > { %12976 = vmatpush1.bf16.msra.mxu1 %v16532_v61  ;;  %v3927_v42 = vld [vmem:[%s25320_s5 + $0x17e0] sm:$0xff] }
 0x334   : > { %12977 = vmatprep.subr.bf16.mxu1 %v16525_v6  ;;  %v3675_v36 = vld [vmem:[%s25320_s5 + $0x1000] sm:$0xff]  ;;  %v16749_v21 = vcombine.high %v3923_v24, %v3927_v42  ;;  %v16748_v17 = vcombine.low %v3923_v24, %v3927_v42 }
 0x335   : > { %13021 = vmatpush1.bf16.msra.mxu0 %v16644_v28  ;;  %v3679_v32 = vld [vmem:[%s25320_s5 + $0x1020] sm:$0xff] }
 0x336   : > { %13022 = vmatprep.subr.bf16.mxu0 %v16637_v15  ;;  %v3915_v33 = vld [vmem:[%s25320_s5 + $0x1780] sm:$0xff]  ;;  %v16501_v25 = vcombine.high %v3675_v36, %v3679_v32  ;;  %v16500_v9 = vcombine.low %v3675_v36, %v3679_v32 }
 0x337   : > { %12978 = vmatpush1.bf16.msra.mxu1 %v16524_v48  ;;  %v3919_v58 = vld [vmem:[%s25320_s5 + $0x17a0] sm:$0xff] }
 0x338   : > { %12979 = vmatprep.subr.bf16.mxu1 %v16517_v34  ;;  %v3795_v31 = vld [vmem:[%s25320_s5 + $0x13c0] sm:$0xff]  ;;  %v16741_v12 = vcombine.high %v3915_v33, %v3919_v58  ;;  %v16740_v29 = vcombine.low %v3915_v33, %v3919_v58 }
 0x339   : > { %13023 = vmatpush1.bf16.msra.mxu0 %v16636_v38  ;;  %v3799_v43 = vld [vmem:[%s25320_s5 + $0x13e0] sm:$0xff] }
 0x33a   : > { %13024 = vmatprep.subr.bf16.mxu0 %v16629_v51  ;;  %v3907_v55 = vld [vmem:[%s25320_s5 + $0x1740] sm:$0xff]  ;;  %v16621_v23 = vcombine.high %v3795_v31, %v3799_v43  ;;  %v16620_v30 = vcombine.low %v3795_v31, %v3799_v43 }
 0x33b   : > { %12980 = vmatpush1.bf16.msra.mxu1 %v16516_v62  ;;  %v3911_v40 = vld [vmem:[%s25320_s5 + $0x1760] sm:$0xff] }
 0x33c   : > { %12981 = vmatprep.subr.bf16.mxu1 %v16509_v35  ;;  %v3787_v27 = vld [vmem:[%s25320_s5 + $0x1380] sm:$0xff]  ;;  %v16733_v8 = vcombine.high %v3907_v55, %v3911_v40  ;;  %v16732_v61 = vcombine.low %v3907_v55, %v3911_v40 }
 0x33d   : > { %13025 = vmatpush1.bf16.msra.mxu0 %v16628_v45  ;;  %v3791_v22 = vld [vmem:[%s25320_s5 + $0x13a0] sm:$0xff] }
 0x33e   : > { %13026 = vmatprep.subr.bf16.mxu0 %v16749_v21  ;;  %v3899_v11 = vld [vmem:[%s25320_s5 + $0x1700] sm:$0xff]  ;;  %v16613_v46 = vcombine.high %v3787_v27, %v3791_v22  ;;  %v16612_v28 = vcombine.low %v3787_v27, %v3791_v22 }
 0x33f   : > { %12982 = vmatpush1.bf16.msra.mxu1 %v16508_v19  ;;  %v3903_v5 = vld [vmem:[%s25320_s5 + $0x1720] sm:$0xff] }
 0x340   : > { %12983 = vmatprep.subr.bf16.mxu1 %v16501_v25  ;;  %v3779_v52 = vld [vmem:[%s25320_s5 + $0x1340] sm:$0xff]  ;;  %v16725_v6 = vcombine.high %v3899_v11, %v3903_v5  ;;  %v16724_v48 = vcombine.low %v3899_v11, %v3903_v5 }
 0x341   : > { %13027 = vmatpush2.bf16.msra.mxu0 %v16748_v17  ;;  %v3783_v7 = vld [vmem:[%s25320_s5 + $0x1360] sm:$0xff] }
 0x342   : > { %13028 = vmatprep.subr.bf16.mxu0 %v16741_v12  ;;  %v3891_v3 = vld [vmem:[%s25320_s5 + $0x16c0] sm:$0xff]  ;;  %v16605_v15 = vcombine.high %v3779_v52, %v3783_v7  ;;  %v16604_v38 = vcombine.low %v3779_v52, %v3783_v7 }
 0x343   : > { %12984 = vmatpush1.bf16.msra.mxu1 %v16500_v9  ;;  %v3895_v18 = vld [vmem:[%s25320_s5 + $0x16e0] sm:$0xff] }
 0x344   : > { %12985 = vmatprep.subr.bf16.mxu1 %v16621_v23  ;;  %v3771_v54 = vld [vmem:[%s25320_s5 + $0x1300] sm:$0xff]  ;;  %v16717_v34 = vcombine.high %v3891_v3, %v3895_v18  ;;  %v16716_v62 = vcombine.low %v3891_v3, %v3895_v18 }
 0x345   : > { %13029 = vmatpush2.bf16.msra.mxu0 %v16740_v29  ;;  %v3775_v53 = vld [vmem:[%s25320_s5 + $0x1320] sm:$0xff] }
 0x346   : > { %13030 = vmatprep.subr.bf16.mxu0 %v16733_v8  ;;  %v3883_v50 = vld [vmem:[%s25320_s5 + $0x1680] sm:$0xff]  ;;  %v16597_v51 = vcombine.high %v3771_v54, %v3775_v53  ;;  %v16596_v45 = vcombine.low %v3771_v54, %v3775_v53  ;;  %v20530_v54 = vpack.c.bf16 %v20175_v44, %v20175_v44 }
 0x347   : > { %12986 = vmatpush2.bf16.msra.mxu1 %v16620_v30  ;;  %v3887_v26 = vld [vmem:[%s25320_s5 + $0x16a0] sm:$0xff] }
 0x348   : > { %12987 = vmatprep.subr.bf16.mxu1 %v16613_v46  ;;  %v3763_v24 = vld [vmem:[%s25320_s5 + $0x12c0] sm:$0xff]  ;;  %v16709_v35 = vcombine.high %v3883_v50, %v3887_v26  ;;  %v16708_v19 = vcombine.low %v3883_v50, %v3887_v26 }
 0x349   : > { %13031 = vmatpush2.bf16.msra.mxu0 %v16732_v61  ;;  %v3767_v42 = vld [vmem:[%s25320_s5 + $0x12e0] sm:$0xff] }
 0x34a   : > { %13032 = vmatprep.subr.bf16.mxu0 %v16725_v6  ;;  %v3875_v36 = vld [vmem:[%s25320_s5 + $0x1640] sm:$0xff]  ;;  %v16589_v21 = vcombine.high %v3763_v24, %v3767_v42  ;;  %v16588_v17 = vcombine.low %v3763_v24, %v3767_v42 }
 0x34b   : > { %12988 = vmatpush2.bf16.msra.mxu1 %v16612_v28  ;;  %v3879_v32 = vld [vmem:[%s25320_s5 + $0x1660] sm:$0xff] }
 0x34c   : > { %12989 = vmatprep.subr.bf16.mxu1 %v16605_v15  ;;  %v3755_v33 = vld [vmem:[%s25320_s5 + $0x1280] sm:$0xff]  ;;  %v16701_v25 = vcombine.high %v3875_v36, %v3879_v32  ;;  %v16700_v9 = vcombine.low %v3875_v36, %v3879_v32  ;;  %v20526_v15 = vpack.c.bf16 %v20118_v57, %v20118_v57  ;;  %v3097_v57 = vrot.slane %v20089_v56, 6 }
 0x34d   : > { %13033 = vmatpush2.bf16.msra.mxu0 %v16724_v48  ;;  %v3759_v58 = vld [vmem:[%s25320_s5 + $0x12a0] sm:$0xff] }
 0x34e   : > { %13034 = vmatprep.subr.bf16.mxu0 %v16717_v34  ;;  %v3867_v31 = vld [vmem:[%s25320_s5 + $0x1600] sm:$0xff]  ;;  %v16581_v12 = vcombine.high %v3755_v33, %v3759_v58  ;;  %v16580_v29 = vcombine.low %v3755_v33, %v3759_v58  ;;  %v20554_v36 = vpack.c.bf16 %v3097_v57, %v3097_v57 }
 0x34f   : > { %12990 = vmatpush2.bf16.msra.mxu1 %v16604_v38  ;;  %v3871_v43 = vld [vmem:[%s25320_s5 + $0x1620] sm:$0xff] }
 0x350   : > { %12991 = vmatprep.subr.bf16.mxu1 %v16597_v51  ;;  %v3747_v55 = vld [vmem:[%s25320_s5 + $0x1240] sm:$0xff]  ;;  %v16693_v23 = vcombine.high %v3867_v31, %v3871_v43  ;;  %v16692_v30 = vcombine.low %v3867_v31, %v3871_v43  ;;  %v3105_v51 = vrot.slane %v20097_v41, 6 }
 0x351   : > { %13035 = vmatpush2.bf16.msra.mxu0 %v16716_v62  ;;  %v3751_v40 = vld [vmem:[%s25320_s5 + $0x1260] sm:$0xff] }
 0x352   : > { %13036 = vmatprep.subr.bf16.mxu0 %v16709_v35  ;;  %v4115_v27 = vld [vmem:[%s25320_s5 + $0x1dc0] sm:$0xff]  ;;  %v16573_v8 = vcombine.high %v3747_v55, %v3751_v40  ;;  %v16572_v61 = vcombine.low %v3747_v55, %v3751_v40 }
 0x353   : > { %12992 = vmatpush2.bf16.msra.mxu1 %v16596_v45  ;;  %v4119_v22 = vld [vmem:[%s25320_s5 + $0x1de0] sm:$0xff] }
 0x354   : > { %12993 = vmatprep.subr.bf16.mxu1 %v16589_v21  ;;  %v3739_v11 = vld [vmem:[%s25320_s5 + $0x1200] sm:$0xff]  ;;  %v16941_v46 = vcombine.high %v4115_v27, %v4119_v22  ;;  %v16940_v28 = vcombine.low %v4115_v27, %v4119_v22  ;;  %v20556_v21 = vpack.c.bf16 %v3105_v51, %v3105_v51 }
 0x355   : > { %13037 = vmatpush2.bf16.msra.mxu0 %v16708_v19  ;;  %v3743_v5 = vld [vmem:[%s25320_s5 + $0x1220] sm:$0xff] }
 0x356   : > { %13038 = vmatprep.subr.bf16.mxu0 %v16701_v25  ;;  %v4107_v52 = vld [vmem:[%s25320_s5 + $0x1d80] sm:$0xff]  ;;  %v16565_v6 = vcombine.high %v3739_v11, %v3743_v5  ;;  %v16564_v53 = vcombine.low %v3739_v11, %v3743_v5 }
 0x357   : > { %12994 = vmatpush2.bf16.msra.mxu1 %v16588_v17  ;;  %v4111_v7 = vld [vmem:[%s25320_s5 + $0x1da0] sm:$0xff] }
 0x358   : > { %12995 = vmatprep.subr.bf16.mxu1 %v16581_v12  ;;  %v3987_v3 = vld [vmem:[%s25320_s5 + $0x19c0] sm:$0xff]  ;;  %v16933_v48 = vcombine.high %v4107_v52, %v4111_v7  ;;  %v16932_v26 = vcombine.low %v4107_v52, %v4111_v7 }
 0x359   : > { %13039 = vmatpush2.bf16.msra.mxu0 %v16700_v9  ;;  %v3991_v18 = vld [vmem:[%s25320_s5 + $0x19e0] sm:$0xff] }
 0x35a   : > { %13040 = vmatprep.subr.bf16.mxu0 %v16693_v23  ;;  %v4099_v34 = vld [vmem:[%s25320_s5 + $0x1d40] sm:$0xff]  ;;  %v16813_v50 = vcombine.high %v3987_v3, %v3991_v18  ;;  %v16812_v35 = vcombine.low %v3987_v3, %v3991_v18 }
 0x35b   : > { %12996 = vmatpush2.bf16.msra.mxu1 %v16580_v29  ;;  %v4103_v38 = vld [vmem:[%s25320_s5 + $0x1d60] sm:$0xff] }
 0x35c   : > { %12997 = vmatprep.subr.bf16.mxu1 %v16573_v8  ;;  %v3979_v62 = vld [vmem:[%s25320_s5 + $0x1980] sm:$0xff]  ;;  %v16925_v42 = vcombine.high %v4099_v34, %v4103_v38  ;;  %v16924_v19 = vcombine.low %v4099_v34, %v4103_v38 }
 0x35d   : > { %13041 = vmatpush2.bf16.msra.mxu0 %v16692_v30  ;;  %v3983_v24 = vld [vmem:[%s25320_s5 + $0x19a0] sm:$0xff] }
 0x35e   : > { %13092 = vmatprep.subr.bf16.mxu0 %v16941_v46  ;;  %v4091_v56 = vld [vmem:[%s25320_s5 + $0x1d00] sm:$0xff]  ;;  %v16805_v32 = vcombine.high %v3979_v62, %v3983_v24  ;;  %v16804_v17 = vcombine.low %v3979_v62, %v3983_v24 }
 0x35f   : > { %12998 = vmatpush2.bf16.msra.mxu1 %v16572_v61  ;;  %v4095_v45 = vld [vmem:[%s25320_s5 + $0x1d20] sm:$0xff] }
 0x360   : > { %13043 = vmatmul.mubr.bf16.vlgmr.msra.gmra.mxu0 %v20526_v15  ;;  %12999 = vmatprep.subr.bf16.mxu1 %v16565_v6  ;;  %v3971_v33 = vld [vmem:[%s25320_s5 + $0x1940] sm:$0xff]  ;;  %v16917_v25 = vcombine.high %v4091_v56, %v4095_v45  ;;  %v16916_v9 = vcombine.low %v4091_v56, %v4095_v45 }
 0x361   : > { %13093 = vmatpush1.bf16.msra.mxu0 %v16940_v28  ;;  %13124 = vmatprep.mubr.bf16.mxu0 %v20530_v54  ;;  %v3975_v58 = vld [vmem:[%s25320_s5 + $0x1960] sm:$0xff] }
 0x362   : > { %13094 = vmatprep.subr.bf16.mxu0 %v16933_v48  ;;  %v4083_v31 = vld [vmem:[%s25320_s5 + $0x1cc0] sm:$0xff]  ;;  %v16797_v12 = vcombine.high %v3971_v33, %v3975_v58  ;;  %v16796_v29 = vcombine.low %v3971_v33, %v3975_v58 }
 0x363   : > { %13000 = vmatpush2.bf16.msra.mxu1 %v16564_v53  ;;  %v4087_v43 = vld [vmem:[%s25320_s5 + $0x1ce0] sm:$0xff] }
 0x364   : > { %13051 = vmatprep.subr.bf16.mxu1 %v16813_v50  ;;  %v3963_v55 = vld [vmem:[%s25320_s5 + $0x1900] sm:$0xff]  ;;  %v16909_v23 = vcombine.high %v4083_v31, %v4087_v43  ;;  %v16908_v30 = vcombine.low %v4083_v31, %v4087_v43 }
 0x365   : > { %13095 = vmatpush1.bf16.msra.mxu0 %v16932_v26  ;;  %v3967_v40 = vld [vmem:[%s25320_s5 + $0x1920] sm:$0xff] }
 0x366   : > { %13002 = vmatmul.mubr.bf16.vlgmr.msra.gmra.mxu1 %v20554_v36  ;;  %13096 = vmatprep.subr.bf16.mxu0 %v16925_v42  ;;  %v4075_v27 = vld [vmem:[%s25320_s5 + $0x1c80] sm:$0xff]  ;;  %v16789_v8 = vcombine.high %v3963_v55, %v3967_v40  ;;  %v16788_v61 = vcombine.low %v3963_v55, %v3967_v40 }
 0x367   : > { %13052 = vmatpush1.bf16.msra.mxu1 %v16812_v35  ;;  %13083 = vmatprep.mubr.bf16.mxu1 %v20556_v21  ;;  %v4079_v22 = vld [vmem:[%s25320_s5 + $0x1ca0] sm:$0xff] }
 0x368   : > { %13053 = vmatprep.subr.bf16.mxu1 %v16805_v32  ;;  %v3955_v11 = vld [vmem:[%s25320_s5 + $0x18c0] sm:$0xff]  ;;  %v16901_v46 = vcombine.high %v4075_v27, %v4079_v22  ;;  %v16900_v28 = vcombine.low %v4075_v27, %v4079_v22 }
 0x369   : > { %13097 = vmatpush1.bf16.msra.mxu0 %v16924_v19  ;;  %v3959_v5 = vld [vmem:[%s25320_s5 + $0x18e0] sm:$0xff] }
 0x36a   : > { %13098 = vmatprep.subr.bf16.mxu0 %v16917_v25  ;;  %v4067_v52 = vld [vmem:[%s25320_s5 + $0x1c40] sm:$0xff]  ;;  %v16781_v6 = vcombine.high %v3955_v11, %v3959_v5  ;;  %v16780_v53 = vcombine.low %v3955_v11, %v3959_v5 }
 0x36b   : > { %13054 = vmatpush1.bf16.msra.mxu1 %v16804_v17  ;;  %v4071_v7 = vld [vmem:[%s25320_s5 + $0x1c60] sm:$0xff] }
 0x36c   : > { %13055 = vmatprep.subr.bf16.mxu1 %v16797_v12  ;;  %v3947_v3 = vld [vmem:[%s25320_s5 + $0x1880] sm:$0xff]  ;;  %v16893_v48 = vcombine.high %v4067_v52, %v4071_v7  ;;  %v16892_v50 = vcombine.low %v4067_v52, %v4071_v7 }
 0x36d   : > { %13099 = vmatpush1.bf16.msra.mxu0 %v16916_v9  ;;  %v3951_v18 = vld [vmem:[%s25320_s5 + $0x18a0] sm:$0xff] }
 0x36e   : > { %13100 = vmatprep.subr.bf16.mxu0 %v16909_v23  ;;  %v4059_v34 = vld [vmem:[%s25320_s5 + $0x1c00] sm:$0xff]  ;;  %v16773_v57 = vcombine.high %v3947_v3, %v3951_v18  ;;  %v16772_v24 = vcombine.low %v3947_v3, %v3951_v18 }
 0x36f   : > { %13056 = vmatpush1.bf16.msra.mxu1 %v16796_v29  ;;  %v4063_v38 = vld [vmem:[%s25320_s5 + $0x1c20] sm:$0xff] }
 0x370   : > { %13057 = vmatprep.subr.bf16.mxu1 %v16789_v8  ;;  %v3939_v26 = vld [vmem:[%s25320_s5 + $0x1840] sm:$0xff]  ;;  %v16885_v62 = vcombine.high %v4059_v34, %v4063_v38  ;;  %v16884_v45 = vcombine.low %v4059_v34, %v4063_v38 }
 0x371   : > { %13101 = vmatpush1.bf16.msra.mxu0 %v16908_v30  ;;  %v3943_v51 = vld [vmem:[%s25320_s5 + $0x1860] sm:$0xff] }
 0x372   : > { %13102 = vmatprep.subr.bf16.mxu0 %v16901_v46  ;;  %v4179_v42 = vld [vmem:[%s25320_s5 + $0x1fc0] sm:$0xff]  ;;  %v16765_v56 = vcombine.high %v3939_v26, %v3943_v51  ;;  %v16764_v58 = vcombine.low %v3939_v26, %v3943_v51 }
 0x373   : > { %13058 = vmatpush1.bf16.msra.mxu1 %v16788_v61  ;;  %v4183_v35 = vld [vmem:[%s25320_s5 + $0x1fe0] sm:$0xff] }
 0x374   : > { %13059 = vmatprep.subr.bf16.mxu1 %v16781_v6  ;;  %v3931_v32 = vld [vmem:[%s25320_s5 + $0x1800] sm:$0xff]  ;;  %v17005_v33 = vcombine.high %v4179_v42, %v4183_v35  ;;  %v17004_v43 = vcombine.low %v4179_v42, %v4183_v35 }
 0x375   : > { %13103 = vmatpush1.bf16.msra.mxu0 %v16900_v28  ;;  %v3935_v19 = vld [vmem:[%s25320_s5 + $0x1820] sm:$0xff] }
 0x376   : > { %13104 = vmatprep.subr.bf16.mxu0 %v16893_v48  ;;  %v4171_v25 = vld [vmem:[%s25320_s5 + $0x1f80] sm:$0xff]  ;;  %v16757_v31 = vcombine.high %v3931_v32, %v3935_v19  ;;  %v16756_v40 = vcombine.low %v3931_v32, %v3935_v19 }
 0x377   : > { %13060 = vmatpush1.bf16.msra.mxu1 %v16780_v53  ;;  %v4175_v17 = vld [vmem:[%s25320_s5 + $0x1fa0] sm:$0xff] }
 0x378   : > { %13061 = vmatprep.subr.bf16.mxu1 %v16773_v57  ;;  %v4051_v12 = vld [vmem:[%s25320_s5 + $0x1bc0] sm:$0xff]  ;;  %v16997_v55 = vcombine.high %v4171_v25, %v4175_v17  ;;  %v16996_v22 = vcombine.low %v4171_v25, %v4175_v17 }
 0x379   : > { %13105 = vmatpush1.bf16.msra.mxu0 %v16892_v50  ;;  %v4055_v9 = vld [vmem:[%s25320_s5 + $0x1be0] sm:$0xff] }
 0x37a   : > { %13106 = vmatprep.subr.bf16.mxu0 %v16885_v62  ;;  %v4163_v23 = vld [vmem:[%s25320_s5 + $0x1f40] sm:$0xff]  ;;  %v16877_v27 = vcombine.high %v4051_v12, %v4055_v9  ;;  %v16876_v5 = vcombine.low %v4051_v12, %v4055_v9 }
 0x37b   : > { %13062 = vmatpush1.bf16.msra.mxu1 %v16772_v24  ;;  %v4167_v29 = vld [vmem:[%s25320_s5 + $0x1f60] sm:$0xff] }
 0x37c   : > { %13063 = vmatprep.subr.bf16.mxu1 %v16765_v56  ;;  %v4043_v8 = vld [vmem:[%s25320_s5 + $0x1b80] sm:$0xff]  ;;  %v16989_v11 = vcombine.high %v4163_v23, %v4167_v29  ;;  %v16988_v7 = vcombine.low %v4163_v23, %v4167_v29 }
 0x37d   : > { %13107 = vmatpush1.bf16.msra.mxu0 %v16884_v45  ;;  %v4047_v30 = vld [vmem:[%s25320_s5 + $0x1ba0] sm:$0xff] }
 0x37e   : > { %13108 = vmatprep.subr.bf16.mxu0 %v17005_v33  ;;  %v4155_v46 = vld [vmem:[%s25320_s5 + $0x1f00] sm:$0xff]  ;;  %v16869_v52 = vcombine.high %v4043_v8, %v4047_v30  ;;  %v16868_v18 = vcombine.low %v4043_v8, %v4047_v30 }
 0x37f   : > { %13064 = vmatpush1.bf16.msra.mxu1 %v16764_v58  ;;  %v4159_v61 = vld [vmem:[%s25320_s5 + $0x1f20] sm:$0xff] }
 0x380   : > { %13065 = vmatprep.subr.bf16.mxu1 %v16757_v31  ;;  %v4035_v6 = vld [vmem:[%s25320_s5 + $0x1b40] sm:$0xff]  ;;  %v16981_v3 = vcombine.high %v4155_v46, %v4159_v61  ;;  %v16980_v38 = vcombine.low %v4155_v46, %v4159_v61  ;;  %v3111_v46 = vrot.slane %v20212_v13, 6  ;;  %v12765_v61 = vlaneseq }
 0x381   : > { %13109 = vmatpush2.bf16.msra.mxu0 %v17004_v43  ;;  %v4039_v28 = vld [vmem:[%s25320_s5 + $0x1b60] sm:$0xff] }
 0x382   : > { %13110 = vmatprep.subr.bf16.mxu0 %v16997_v55  ;;  %v4147_v48 = vld [vmem:[%s25320_s5 + $0x1ec0] sm:$0xff]  ;;  %v16861_v34 = vcombine.high %v4035_v6, %v4039_v28  ;;  %v16860_v51 = vcombine.low %v4035_v6, %v4039_v28 }
 0x383   : > { %13066 = vmatpush1.bf16.msra.mxu1 %v16756_v40  ;;  %v4151_v53 = vld [vmem:[%s25320_s5 + $0x1ee0] sm:$0xff] }
 0x384   : > { %13067 = vmatprep.subr.bf16.mxu1 %v16877_v27  ;;  %v4027_v57 = vld [vmem:[%s25320_s5 + $0x1b00] sm:$0xff]  ;;  %v16973_v26 = vcombine.high %v4147_v48, %v4151_v53  ;;  %v16972_v35 = vcombine.low %v4147_v48, %v4151_v53  ;;  %v3123_v48 = vrot.slane %v3111_v46, 2 }
 0x385   : > { %13111 = vmatpush2.bf16.msra.mxu0 %v16996_v22  ;;  %v4031_v50 = vld [vmem:[%s25320_s5 + $0x1b20] sm:$0xff] }
 0x386   : > { %13112 = vmatprep.subr.bf16.mxu0 %v16989_v11  ;;  %v4139_v62 = vld [vmem:[%s25320_s5 + $0x1e80] sm:$0xff]  ;;  %v16853_v42 = vcombine.high %v4027_v57, %v4031_v50  ;;  %v16852_v19 = vcombine.low %v4027_v57, %v4031_v50 }
 0x387   : > { %13068 = vmatpush2.bf16.msra.mxu1 %v16876_v5  ;;  %v4143_v24 = vld [vmem:[%s25320_s5 + $0x1ea0] sm:$0xff] }
 0x388   : > { %13069 = vmatprep.subr.bf16.mxu1 %v16869_v52  ;;  %v4019_v56 = vld [vmem:[%s25320_s5 + $0x1ac0] sm:$0xff]  ;;  %v16965_v32 = vcombine.high %v4139_v62, %v4143_v24  ;;  %v16964_v17 = vcombine.low %v4139_v62, %v4143_v24  ;;  %v20740_v62 = vpack.c.bf16 %v20099_v59, %v20099_v59 }
 0x389   : > { %13113 = vmatpush2.bf16.msra.mxu0 %v16988_v7  ;;  %v4023_v45 = vld [vmem:[%s25320_s5 + $0x1ae0] sm:$0xff] }
 0x38a   : > { %13114 = vmatprep.subr.bf16.mxu0 %v16981_v3  ;;  %v4131_v33 = vld [vmem:[%s25320_s5 + $0x1e40] sm:$0xff]  ;;  %v16845_v25 = vcombine.high %v4019_v56, %v4023_v45  ;;  %v16844_v9 = vcombine.low %v4019_v56, %v4023_v45 }
 0x38b   : > { %13070 = vmatpush2.bf16.msra.mxu1 %v16868_v18  ;;  %v4135_v58 = vld [vmem:[%s25320_s5 + $0x1e60] sm:$0xff] }
 0x38c   : > { %13071 = vmatprep.subr.bf16.mxu1 %v16861_v34  ;;  %v4011_v31 = vld [vmem:[%s25320_s5 + $0x1a80] sm:$0xff]  ;;  %v16957_v12 = vcombine.high %v4131_v33, %v4135_v58  ;;  %v16956_v29 = vcombine.low %v4131_v33, %v4135_v58  ;;  %v20729_v34 = vshrl.u32 %v12765_v61, 7 }
 0x38d   : > { %13115 = vmatpush2.bf16.msra.mxu0 %v16980_v38  ;;  %v4015_v43 = vld [vmem:[%s25320_s5 + $0x1aa0] sm:$0xff] }
 0x38e   : > { %13116 = vmatprep.subr.bf16.mxu0 %v16973_v26  ;;  %v4123_v55 = vld [vmem:[%s25320_s5 + $0x1e00] sm:$0xff]  ;;  %v16837_v23 = vcombine.high %v4011_v31, %v4015_v43  ;;  %v16836_v30 = vcombine.low %v4011_v31, %v4015_v43  ;;  %v12767_v56 = vsub.s32 0, %v20729_v34  ;;  %v12771_v31 = vsub.s32 1, %v20729_v34 }
 0x38f   : > { %13072 = vmatpush2.bf16.msra.mxu1 %v16860_v51  ;;  %v4127_v40 = vld [vmem:[%s25320_s5 + $0x1e20] sm:$0xff]  ;;  %v3108_v51 = vrot.slane %v20106_v49, 2 }
 0x390   : > { %13073 = vmatprep.subr.bf16.mxu1 %v16853_v42  ;;  %v4003_v27 = vld [vmem:[%s25320_s5 + $0x1a40] sm:$0xff]  ;;  %v16949_v8 = vcombine.high %v4123_v55, %v4127_v40  ;;  %v16948_v7 = vcombine.low %v4123_v55, %v4127_v40  ;;  %v20742_v42 = vpack.c.bf16 %v3123_v48, %v3123_v48 }
 0x391   : > { %13117 = vmatpush2.bf16.msra.mxu0 %v16972_v35  ;;  %v4007_v22 = vld [vmem:[%s25320_s5 + $0x1a60] sm:$0xff] }
 0x392   : > { %13118 = vmatprep.subr.bf16.mxu0 %v16965_v32  ;;  %v4371_v11 = vld [vmem:[%s25320_s5 + $0x25c0] sm:$0xff]  ;;  %v16829_v52 = vcombine.high %v4003_v27, %v4007_v22  ;;  %v16828_v18 = vcombine.low %v4003_v27, %v4007_v22 }
 0x393   : > { %13074 = vmatpush2.bf16.msra.mxu1 %v16852_v19  ;;  %v4375_v5 = vld [vmem:[%s25320_s5 + $0x25e0] sm:$0xff]  ;;  %v3103_v19 = vrot.slane %v20097_v41, 4 }
 0x394   : > { %13075 = vmatprep.subr.bf16.mxu1 %v16845_v25  ;;  %v3995_v6 = vld [vmem:[%s25320_s5 + $0x1a00] sm:$0xff]  ;;  %v17197_v3 = vcombine.high %v4371_v11, %v4375_v5  ;;  %v17196_v57 = vcombine.low %v4371_v11, %v4375_v5 }
 0x395   : > { %13119 = vmatpush2.bf16.msra.mxu0 %v16964_v17  ;;  %v3999_v28 = vld [vmem:[%s25320_s5 + $0x1a20] sm:$0xff]  ;;  %v3121_v17 = vrot.slane %v3108_v51, 2  ;;  %v20770_v22 = vpack.c.bf16 %v3103_v19, %v3103_v19 }
 0x396   : > { %13120 = vmatprep.subr.bf16.mxu0 %v16957_v12  ;;  %v4363_v13 = vld [vmem:[%s25320_s5 + $0x2580] sm:$0xff]  ;;  %v16821_v38 = vcombine.high %v3995_v6, %v3999_v28  ;;  %v16820_v35 = vcombine.low %v3995_v6, %v3999_v28 }
 0x397   : > { %13076 = vmatpush2.bf16.msra.mxu1 %v16844_v9  ;;  %v4367_v53 = vld [vmem:[%s25320_s5 + $0x25a0] sm:$0xff] }
 0x398   : > { %13077 = vmatprep.subr.bf16.mxu1 %v16837_v23  ;;  %v4243_v50 = vld [vmem:[%s25320_s5 + $0x21c0] sm:$0xff]  ;;  %v17189_v24 = vcombine.high %v4363_v13, %v4367_v53  ;;  %v17188_v25 = vcombine.low %v4363_v13, %v4367_v53 }
 0x399   : > { %13121 = vmatpush2.bf16.msra.mxu0 %v16956_v29  ;;  %v4247_v26 = vld [vmem:[%s25320_s5 + $0x21e0] sm:$0xff] }
 0x39a   : > { %13122 = vmatprep.subr.bf16.mxu0 %v16949_v8  ;;  %v4355_v45 = vld [vmem:[%s25320_s5 + $0x2540] sm:$0xff]  ;;  %v17069_v33 = vcombine.high %v4243_v50, %v4247_v26  ;;  %v17068_v55 = vcombine.low %v4243_v50, %v4247_v26 }
 0x39b   : > { %13078 = vmatpush2.bf16.msra.mxu1 %v16836_v30  ;;  %v4359_v32 = vld [vmem:[%s25320_s5 + $0x2560] sm:$0xff]  ;;  %v20772_v30 = vpack.c.bf16 %v3121_v17, %v3121_v17 }
 0x39c   : > { %13079 = vmatprep.subr.bf16.mxu1 %v16829_v52  ;;  %v4763_v58 = vld [vmem:[%s25321_s6] sm:$0xff]  ;;  %v17181_v9 = vcombine.high %v4355_v45, %v4359_v32  ;;  %v17180_v11 = vcombine.low %v4355_v45, %v4359_v32 }
 0x39d   : > { %13123 = vmatpush2.bf16.msra.mxu0 %v16948_v7  ;;  %v4235_v43 = vld [vmem:[%s25320_s5 + $0x2180] sm:$0xff]  ;;  %v12768_v40 = vrot.slane %v4763_v58, %v12767_v56  ;;  %v12772_v5 = vrot.slane %v4763_v58, %v12771_v31 }
 0x39e   : > { %13174 = vmatprep.subr.bf16.mxu0 %v17197_v3  ;;  %v12880_v59 = vpop.f32.mrf.mxu0  ;;  %v4239_v41 = vld [vmem:[%s25320_s5 + $0x21a0] sm:$0xff] }
 0x39f   : > { %13080 = vmatpush2.bf16.msra.mxu1 %v16828_v18  ;;  %v4347_v23 = vld [vmem:[%s25320_s5 + $0x2500] sm:$0xff]  ;;  %v17061_v8 = vcombine.high %v4235_v43, %v4239_v41  ;;  %v17060_v3 = vcombine.low %v4235_v43, %v4239_v41 }
 0x3a0   : > { %13125 = vmatmul.mubr.bf16.vlgmr.msra.gmra.mxu0 %v20740_v62  ;;  %13081 = vmatprep.subr.bf16.mxu1 %v16821_v38  ;;  %v12882_v12 = vpop.f32.mrf.mxu0  ;;  %v4351_v29 = vld [vmem:[%s25320_s5 + $0x2520] sm:$0xff] }
 0x3a1   : > { %13175 = vmatpush1.bf16.msra.mxu0 %v17196_v57  ;;  %13206 = vmatprep.mubr.bf16.mxu0 %v20742_v42  ;;  %v4227_v46 = vld [vmem:[%s25320_s5 + $0x2140] sm:$0xff]  ;;  %v17173_v6 = vcombine.high %v4347_v23, %v4351_v29  ;;  %v17172_v57 = vcombine.low %v4347_v23, %v4351_v29 }
 0x3a2   : > { %13176 = vmatprep.subr.bf16.mxu0 %v17189_v24  ;;  %v12884_v27 = vpop.f32.mrf.mxu0  ;;  %v4231_v61 = vld [vmem:[%s25320_s5 + $0x2160] sm:$0xff] }
 0x3a3   : > { %13082 = vmatpush2.bf16.msra.mxu1 %v16820_v35  ;;  %v4339_v18 = vld [vmem:[%s25320_s5 + $0x24c0] sm:$0xff]  ;;  %v17053_v53 = vcombine.high %v4227_v46, %v4231_v61  ;;  %v17052_v56 = vcombine.low %v4227_v46, %v4231_v61 }
 0x3a4   : > { %13133 = vmatprep.subr.bf16.mxu1 %v17069_v33  ;;  %v12885_v7 = vpop.f32.mrf.mxu0  ;;  %v4343_v48 = vld [vmem:[%s25320_s5 + $0x24e0] sm:$0xff] }
 0x3a5   : > { %13177 = vmatpush1.bf16.msra.mxu0 %v17188_v25  ;;  %v12839_v52 = vpop.f32.mrf.mxu1  ;;  %v4219_v50 = vld [vmem:[%s25320_s5 + $0x2100] sm:$0xff]  ;;  %v17165_v35 = vcombine.high %v4339_v18, %v4343_v48 }
 0x3a6   : > { %13084 = vmatmul.mubr.bf16.vlgmr.msra.gmra.mxu1 %v20770_v22  ;;  %13178 = vmatprep.subr.bf16.mxu0 %v17181_v9  ;;  %v12840_v28 = vadd.f32 %v12839_v52, %v12768_v40  ;;  %v4223_v26 = vld [vmem:[%s25320_s5 + $0x2120] sm:$0xff] }
 0x3a7   : > { %13134 = vmatpush1.bf16.msra.mxu1 %v17068_v55  ;;  %13165 = vmatprep.mubr.bf16.mxu1 %v20772_v30  ;;  %v12841_v13 = vpop.f32.mrf.mxu1  ;;  %v4331_v45 = vld [vmem:[%s25320_s5 + $0x2480] sm:$0xff]  ;;  %v17045_v58 = vcombine.high %v4219_v50, %v4223_v26  ;;  %v17044_v43 = vcombine.low %v4219_v50, %v4223_v26 }
 0x3a8   : > { %13135 = vmatprep.subr.bf16.mxu1 %v17061_v8  ;;  %v12842_v38 = vadd.f32 %v12841_v13, %v12772_v5  ;;  %v20794_v51 = vadd.f32 %v12880_v59, %v12840_v28  ;;  %v4335_v32 = vld [vmem:[%s25320_s5 + $0x24a0] sm:$0xff]  ;;  %v17164_v59 = vcombine.low %v4339_v18, %v4343_v48 }
 0x3a9   : > { %13179 = vmatpush1.bf16.msra.mxu0 %v17180_v11  ;;  %v12843_v24 = vpop.f32.mrf.mxu1  ;;  %v4211_v25 = vld [vmem:[%s25320_s5 + $0x20c0] sm:$0xff]  ;;  %v17157_v31 = vcombine.high %v4331_v45, %v4335_v32  ;;  %v17156_v55 = vcombine.low %v4331_v45, %v4335_v32 }
 0x3aa   : > { %13180 = vmatprep.subr.bf16.mxu0 %v17173_v6  ;;  %v20802_v19 = vadd.f32 %v12882_v12, %v12842_v38  ;;  %v4215_v17 = vld [vmem:[%s25320_s5 + $0x20e0] sm:$0xff] }
 0x3ab   : > { %13136 = vmatpush1.bf16.msra.mxu1 %v17060_v3  ;;  %v12844_v33 = vpop.f32.mrf.mxu1  ;;  %v4323_v41 = vld [vmem:[%s25320_s5 + $0x2440] sm:$0xff]  ;;  %v17037_v9 = vcombine.high %v4211_v25, %v4215_v17  ;;  %v17036_v27 = vcombine.low %v4211_v25, %v4215_v17 }
 0x3ac   : > { %13137 = vmatprep.subr.bf16.mxu1 %v17053_v53  ;;  %v4327_v12 = vld [vmem:[%s25320_s5 + $0x2460] sm:$0xff] }
 0x3ad   : > { %13181 = vmatpush1.bf16.msra.mxu0 %v17172_v57  ;;  %v4203_v40 = vld [vmem:[%s25320_s5 + $0x2080] sm:$0xff]  ;;  %v17149_v29 = vcombine.high %v4323_v41, %v4327_v12  ;;  %v17148_v46 = vcombine.low %v4323_v41, %v4327_v12 }
 0x3ae   : > { %13182 = vmatprep.subr.bf16.mxu0 %v17165_v35  ;;  %v4207_v23 = vld [vmem:[%s25320_s5 + $0x20a0] sm:$0xff] }
 0x3af   : > { %13138 = vmatpush1.bf16.msra.mxu1 %v17052_v56  ;;  %v4315_v8 = vld [vmem:[%s25320_s5 + $0x2400] sm:$0xff]  ;;  %v17029_v5 = vcombine.high %v4203_v40, %v4207_v23  ;;  %v17028_v6 = vcombine.low %v4203_v40, %v4207_v23 }
 0x3b0   : > { %13139 = vmatprep.subr.bf16.mxu1 %v17045_v58  ;;  %v4319_v11 = vld [vmem:[%s25320_s5 + $0x2420] sm:$0xff] }
 0x3b1   : > { %13183 = vmatpush1.bf16.msra.mxu0 %v17164_v59  ;;  %v4195_v61 = vld [vmem:[%s25320_s5 + $0x2040] sm:$0xff]  ;;  %v17141_v7 = vcombine.high %v4315_v8, %v4319_v11  ;;  %v17140_v48 = vcombine.low %v4315_v8, %v4319_v11 }
 0x3b2   : > { %13184 = vmatprep.subr.bf16.mxu0 %v17157_v31  ;;  %v4199_v52 = vld [vmem:[%s25320_s5 + $0x2060] sm:$0xff] }
 0x3b3   : > { %13140 = vmatpush1.bf16.msra.mxu1 %v17044_v43  ;;  %v4435_v28 = vld [vmem:[%s25320_s5 + $0x27c0] sm:$0xff]  ;;  %v17021_v18 = vcombine.high %v4195_v61, %v4199_v52  ;;  %v17020_v57 = vcombine.low %v4195_v61, %v4199_v52 }
 0x3b4   : > { %13141 = vmatprep.subr.bf16.mxu1 %v17037_v9  ;;  %v4439_v3 = vld [vmem:[%s25320_s5 + $0x27e0] sm:$0xff] }
 0x3b5   : > { %13185 = vmatpush1.bf16.msra.mxu0 %v17156_v55  ;;  %v4187_v13 = vld [vmem:[%s25320_s5 + $0x2000] sm:$0xff]  ;;  %v17261_v38 = vcombine.high %v4435_v28, %v4439_v3  ;;  %v17260_v35 = vcombine.low %v4435_v28, %v4439_v3 }
 0x3b6   : > { %13186 = vmatprep.subr.bf16.mxu0 %v17149_v29  ;;  %v4191_v53 = vld [vmem:[%s25320_s5 + $0x2020] sm:$0xff] }
 0x3b7   : > { %13142 = vmatpush1.bf16.msra.mxu1 %v17036_v27  ;;  %v4427_v50 = vld [vmem:[%s25320_s5 + $0x2780] sm:$0xff]  ;;  %v17013_v24 = vcombine.high %v4187_v13, %v4191_v53  ;;  %v17012_v33 = vcombine.low %v4187_v13, %v4191_v53 }
 0x3b8   : > { %13143 = vmatprep.subr.bf16.mxu1 %v17029_v5  ;;  %v4431_v26 = vld [vmem:[%s25320_s5 + $0x27a0] sm:$0xff] }
 0x3b9   : > { %13187 = vmatpush1.bf16.msra.mxu0 %v17148_v46  ;;  %v4307_v56 = vld [vmem:[%s25320_s5 + $0x23c0] sm:$0xff]  ;;  %v17253_v32 = vcombine.high %v4427_v50, %v4431_v26  ;;  %v17252_v17 = vcombine.low %v4427_v50, %v4431_v26 }
 0x3ba   : > { %13188 = vmatprep.subr.bf16.mxu0 %v17141_v7  ;;  %v4311_v45 = vld [vmem:[%s25320_s5 + $0x23e0] sm:$0xff] }
 0x3bb   : > { %13144 = vmatpush1.bf16.msra.mxu1 %v17028_v6  ;;  %v4419_v58 = vld [vmem:[%s25320_s5 + $0x2740] sm:$0xff]  ;;  %v17133_v25 = vcombine.high %v4307_v56, %v4311_v45  ;;  %v17132_v12 = vcombine.low %v4307_v56, %v4311_v45 }
 0x3bc   : > { %13145 = vmatprep.subr.bf16.mxu1 %v17021_v18  ;;  %v4423_v59 = vld [vmem:[%s25320_s5 + $0x2760] sm:$0xff] }
 0x3bd   : > { %13189 = vmatpush1.bf16.msra.mxu0 %v17140_v48  ;;  %v4299_v31 = vld [vmem:[%s25320_s5 + $0x2380] sm:$0xff]  ;;  %v17245_v41 = vcombine.high %v4419_v58, %v4423_v59  ;;  %v17244_v23 = vcombine.low %v4419_v58, %v4423_v59 }
 0x3be   : > { %13190 = vmatprep.subr.bf16.mxu0 %v17261_v38  ;;  %v4303_v43 = vld [vmem:[%s25320_s5 + $0x23a0] sm:$0xff] }
 0x3bf   : > { %13146 = vmatpush1.bf16.msra.mxu1 %v17020_v57  ;;  %v4411_v9 = vld [vmem:[%s25320_s5 + $0x2700] sm:$0xff]  ;;  %v17125_v40 = vcombine.high %v4299_v31, %v4303_v43  ;;  %v17124_v11 = vcombine.low %v4299_v31, %v4303_v43 }
 0x3c0   : > { %13147 = vmatprep.subr.bf16.mxu1 %v17013_v24  ;;  %v4415_v55 = vld [vmem:[%s25320_s5 + $0x2720] sm:$0xff] }
 0x3c1   : > { %13191 = vmatpush2.bf16.msra.mxu0 %v17260_v35  ;;  %v4291_v29 = vld [vmem:[%s25320_s5 + $0x2340] sm:$0xff]  ;;  %v17237_v8 = vcombine.high %v4411_v9, %v4415_v55  ;;  %v17236_v52 = vcombine.low %v4411_v9, %v4415_v55  ;;  %v3109_v9 = vrot.slane %v20106_v49, 4 }
 0x3c2   : > { %13192 = vmatprep.subr.bf16.mxu0 %v17253_v32  ;;  %v4295_v27 = vld [vmem:[%s25320_s5 + $0x2360] sm:$0xff] }
 0x3c3   : > { %13148 = vmatpush1.bf16.msra.mxu1 %v17012_v33  ;;  %v4403_v5 = vld [vmem:[%s25320_s5 + $0x26c0] sm:$0xff]  ;;  %v17117_v61 = vcombine.high %v4291_v29, %v4295_v27  ;;  %v17116_v3 = vcombine.low %v4291_v29, %v4295_v27  ;;  %v3116_v27 = vrot.slane %v20160_v1, 4 }
 0x3c4   : > { %13149 = vmatprep.subr.bf16.mxu1 %v17133_v25  ;;  %v4407_v46 = vld [vmem:[%s25320_s5 + $0x26e0] sm:$0xff] }
 0x3c5   : > { %13193 = vmatpush2.bf16.msra.mxu0 %v17252_v17  ;;  %v4283_v7 = vld [vmem:[%s25320_s5 + $0x2300] sm:$0xff]  ;;  %v17229_v28 = vcombine.high %v4403_v5, %v4407_v46  ;;  %v17228_v53 = vcombine.low %v4403_v5, %v4407_v46  ;;  %v3122_v46 = vrot.slane %v3109_v9, 2 }
 0x3c6   : > { %13194 = vmatprep.subr.bf16.mxu0 %v17245_v41  ;;  %v4287_v6 = vld [vmem:[%s25320_s5 + $0x2320] sm:$0xff] }
 0x3c7   : > { %13150 = vmatpush2.bf16.msra.mxu1 %v17132_v12  ;;  %v4395_v18 = vld [vmem:[%s25320_s5 + $0x2680] sm:$0xff]  ;;  %v17109_v13 = vcombine.high %v4283_v7, %v4287_v6  ;;  %v17108_v26 = vcombine.low %v4283_v7, %v4287_v6  ;;  %v3127_v7 = vrot.slane %v3116_v27, 2 }
 0x3c8   : > { %13151 = vmatprep.subr.bf16.mxu1 %v17125_v40  ;;  %v4399_v48 = vld [vmem:[%s25320_s5 + $0x26a0] sm:$0xff] }
 0x3c9   : > { %13195 = vmatpush2.bf16.msra.mxu0 %v17244_v23  ;;  %v4275_v38 = vld [vmem:[%s25320_s5 + $0x22c0] sm:$0xff]  ;;  %v17221_v50 = vcombine.high %v4395_v18, %v4399_v48  ;;  %v17220_v45 = vcombine.low %v4395_v18, %v4399_v48 }
 0x3ca   : > { %13196 = vmatprep.subr.bf16.mxu0 %v17237_v8  ;;  %v4279_v57 = vld [vmem:[%s25320_s5 + $0x22e0] sm:$0xff] }
 0x3cb   : > { %13152 = vmatpush2.bf16.msra.mxu1 %v17124_v11  ;;  %v4387_v24 = vld [vmem:[%s25320_s5 + $0x2640] sm:$0xff]  ;;  %v17101_v56 = vcombine.high %v4275_v38, %v4279_v57  ;;  %v17100_v59 = vcombine.low %v4275_v38, %v4279_v57  ;;  %v20958_v57 = vpack.c.bf16 %v3127_v7, %v3127_v7 }
 0x3cc   : > { %13153 = vmatprep.subr.bf16.mxu1 %v17117_v61  ;;  %v4391_v35 = vld [vmem:[%s25320_s5 + $0x2660] sm:$0xff] }
 0x3cd   : > { %13197 = vmatpush2.bf16.msra.mxu0 %v17236_v52  ;;  %v4267_v32 = vld [vmem:[%s25320_s5 + $0x2280] sm:$0xff]  ;;  %v17213_v58 = vcombine.high %v4387_v24, %v4391_v35  ;;  %v17212_v43 = vcombine.low %v4387_v24, %v4391_v35  ;;  %v3120_v35 = vrot.slane %v20175_v44, 2 }
 0x3ce   : > { %13198 = vmatprep.subr.bf16.mxu0 %v17229_v28  ;;  %v4271_v33 = vld [vmem:[%s25320_s5 + $0x22a0] sm:$0xff] }
 0x3cf   : > { %13154 = vmatpush2.bf16.msra.mxu1 %v17116_v3  ;;  %v4379_v25 = vld [vmem:[%s25320_s5 + $0x2600] sm:$0xff]  ;;  %v17093_v31 = vcombine.high %v4267_v32, %v4271_v33  ;;  %v17092_v40 = vcombine.low %v4267_v32, %v4271_v33  ;;  %v3125_v33 = vrot.slane %v20227_v20, 2 }
 0x3d0   : > { %13155 = vmatprep.subr.bf16.mxu1 %v17109_v13  ;;  %v4383_v17 = vld [vmem:[%s25320_s5 + $0x2620] sm:$0xff] }
 0x3d1   : > { %13199 = vmatpush2.bf16.msra.mxu0 %v17228_v53  ;;  %v4259_v41 = vld [vmem:[%s25320_s5 + $0x2240] sm:$0xff]  ;;  %v17205_v55 = vcombine.high %v4379_v25, %v4383_v17  ;;  %v17204_v11 = vcombine.low %v4379_v25, %v4383_v17  ;;  %v20956_v53 = vpack.c.bf16 %v3122_v46, %v3122_v46 }
 0x3d2   : > { %13200 = vmatprep.subr.bf16.mxu0 %v17221_v50  ;;  %v4263_v12 = vld [vmem:[%s25320_s5 + $0x2260] sm:$0xff] }
 0x3d3   : > { %13156 = vmatpush2.bf16.msra.mxu1 %v17108_v26  ;;  %v4627_v23 = vld [vmem:[%s25320_s5 + $0x2dc0] sm:$0xff]  ;;  %v17085_v8 = vcombine.high %v4259_v41, %v4263_v12  ;;  %v17084_v52 = vcombine.low %v4259_v41, %v4263_v12  ;;  %v20982_v12 = vpack.c.bf16 %v3120_v35, %v3120_v35 }
 0x3d4   : > { %13157 = vmatprep.subr.bf16.mxu1 %v17101_v56  ;;  %v4631_v29 = vld [vmem:[%s25320_s5 + $0x2de0] sm:$0xff] }
 0x3d5   : > { %13201 = vmatpush2.bf16.msra.mxu0 %v17220_v45  ;;  %v4251_v49 = vld [vmem:[%s25320_s5 + $0x2200] sm:$0xff]  ;;  %v17453_v61 = vcombine.high %v4627_v23, %v4631_v29  ;;  %v17452_v18 = vcombine.low %v4627_v23, %v4631_v29 }
 0x3d6   : > { %13202 = vmatprep.subr.bf16.mxu0 %v17213_v58  ;;  %v4255_v5 = vld [vmem:[%s25320_s5 + $0x2220] sm:$0xff] }
 0x3d7   : > { %13158 = vmatpush2.bf16.msra.mxu1 %v17100_v59  ;;  %v4619_v6 = vld [vmem:[%s25320_s5 + $0x2d80] sm:$0xff]  ;;  %v17077_v3 = vcombine.high %v4251_v49, %v4255_v5  ;;  %v17076_v50 = vcombine.low %v4251_v49, %v4255_v5 }
 0x3d8   : > { %13159 = vmatprep.subr.bf16.mxu1 %v17093_v31  ;;  %v4623_v28 = vld [vmem:[%s25320_s5 + $0x2da0] sm:$0xff] }
 0x3d9   : > { %13203 = vmatpush2.bf16.msra.mxu0 %v17212_v43  ;;  %v4499_v48 = vld [vmem:[%s25320_s5 + $0x29c0] sm:$0xff]  ;;  %v17445_v38 = vcombine.high %v4619_v6, %v4623_v28  ;;  %v17444_v32 = vcombine.low %v4619_v6, %v4623_v28 }
 0x3da   : > { %13204 = vmatprep.subr.bf16.mxu0 %v17205_v55  ;;  %v4503_v13 = vld [vmem:[%s25320_s5 + $0x29e0] sm:$0xff]  ;;  %v20984_v55 = vpack.c.bf16 %v3125_v33, %v3125_v33 }
 0x3db   : > { %13160 = vmatpush2.bf16.msra.mxu1 %v17092_v40  ;;  %v4611_v26 = vld [vmem:[%s25320_s5 + $0x2d40] sm:$0xff]  ;;  %v17325_v45 = vcombine.high %v4499_v48, %v4503_v13  ;;  %v17324_v17 = vcombine.low %v4499_v48, %v4503_v13 }
 0x3dc   : > { %13161 = vmatprep.subr.bf16.mxu1 %v17085_v8  ;;  %v4615_v24 = vld [vmem:[%s25320_s5 + $0x2d60] sm:$0xff] }
 0x3dd   : > { %13205 = vmatpush2.bf16.msra.mxu0 %v17204_v11  ;;  %v4491_v58 = vld [vmem:[%s25320_s5 + $0x2980] sm:$0xff]  ;;  %v17437_v25 = vcombine.high %v4611_v26, %v4615_v24  ;;  %v17436_v40 = vcombine.low %v4611_v26, %v4615_v24 }
 0x3de   : > { %13256 = vmatprep.subr.bf16.mxu0 %v17453_v61  ;;  %v4495_v59 = vld [vmem:[%s25320_s5 + $0x29a0] sm:$0xff] }
 0x3df   : > { %13162 = vmatpush2.bf16.msra.mxu1 %v17084_v52  ;;  %v4603_v31 = vld [vmem:[%s25320_s5 + $0x2d00] sm:$0xff]  ;;  %v17317_v9 = vcombine.high %v4491_v58, %v4495_v59  ;;  %v17316_v5 = vcombine.low %v4491_v58, %v4495_v59 }
 0x3e0   : > { %v12962_v56 = vpop.f32.mrf.mxu0  ;;  %13207 = vmatmul.mubr.bf16.vlgmr.msra.gmra.mxu0 %v20956_v53  ;;  %13163 = vmatprep.subr.bf16.mxu1 %v17077_v3  ;;  %v4607_v43 = vld [vmem:[%s25320_s5 + $0x2d20] sm:$0xff] }
 0x3e1   : > { %13257 = vmatpush1.bf16.msra.mxu0 %v17452_v18  ;;  %13288 = vmatprep.mubr.bf16.mxu0 %v20958_v57  ;;  %v4483_v23 = vld [vmem:[%s25320_s5 + $0x2940] sm:$0xff]  ;;  %v17429_v11 = vcombine.high %v4603_v31, %v4607_v43  ;;  %v17428_v28 = vcombine.low %v4603_v31, %v4607_v43 }
 0x3e2   : > { %v12964_v44 = vpop.f32.mrf.mxu0  ;;  %13258 = vmatprep.subr.bf16.mxu0 %v17445_v38  ;;  %v4487_v29 = vld [vmem:[%s25320_s5 + $0x2960] sm:$0xff] }
 0x3e3   : > { %13164 = vmatpush2.bf16.msra.mxu1 %v17076_v50  ;;  %v4595_v46 = vld [vmem:[%s25320_s5 + $0x2cc0] sm:$0xff]  ;;  %v17309_v7 = vcombine.high %v4483_v23, %v4487_v29  ;;  %v17308_v38 = vcombine.low %v4483_v23, %v4487_v29 }
 0x3e4   : > { %v12966_v41 = vpop.f32.mrf.mxu0  ;;  %13215 = vmatprep.subr.bf16.mxu1 %v17325_v45  ;;  %v4599_v61 = vld [vmem:[%s25320_s5 + $0x2ce0] sm:$0xff] }
 0x3e5   : > { %13259 = vmatpush1.bf16.msra.mxu0 %v17444_v32  ;;  %v4479_v3 = vld [vmem:[%s25320_s5 + $0x2920] sm:$0xff]  ;;  %v17421_v13 = vcombine.high %v4595_v46, %v4599_v61 }
 0x3e6   : > { %v12921_v27 = vpop.f32.mrf.mxu1  ;;  %v12967_v8 = vpop.f32.mrf.mxu0  ;;  %13166 = vmatmul.mubr.bf16.vlgmr.msra.gmra.mxu1 %v20982_v12  ;;  %13260 = vmatprep.subr.bf16.mxu0 %v17437_v25  ;;  %v4591_v50 = vld [vmem:[%s25320_s5 + $0x2ca0] sm:$0xff] }
 0x3e7   : > { %v12922_v49 = vadd.f32 %v12921_v27, %v20794_v51  ;;  %13216 = vmatpush1.bf16.msra.mxu1 %v17324_v17  ;;  %13247 = vmatprep.mubr.bf16.mxu1 %v20984_v55  ;;  %v4475_v51 = vld [vmem:[%s25320_s5 + $0x2900] sm:$0xff] }
 0x3e8   : > { %v12923_v52 = vpop.f32.mrf.mxu1  ;;  %13217 = vmatprep.subr.bf16.mxu1 %v17317_v9  ;;  %v17301_v35 = vcombine.high %v4475_v51, %v4479_v3  ;;  %v4467_v45 = vld [vmem:[%s25320_s5 + $0x28c0] sm:$0xff]  ;;  %v17300_v58 = vcombine.low %v4475_v51, %v4479_v3 }
 0x3e9   : > { %v12924_v6 = vadd.f32 %v12923_v52, %v20802_v19  ;;  %13261 = vmatpush1.bf16.msra.mxu0 %v17436_v40  ;;  %v21008_v18 = vadd.f32 %v12962_v56, %v12922_v49  ;;  %v4587_v19 = vld [vmem:[%s25320_s5 + $0x2c80] sm:$0xff]  ;;  %v17420_v56 = vcombine.low %v4595_v46, %v4599_v61 }
 0x3ea   : > { %v12925_v48 = vpop.f32.mrf.mxu1  ;;  %13262 = vmatprep.subr.bf16.mxu0 %v17429_v11  ;;  %v4471_v32 = vld [vmem:[%s25320_s5 + $0x28e0] sm:$0xff]  ;;  %v17413_v33 = vcombine.high %v4587_v19, %v4591_v50  ;;  %v17412_v17 = vcombine.low %v4587_v19, %v4591_v50 }
 0x3eb   : > { %13218 = vmatpush1.bf16.msra.mxu1 %v17316_v5  ;;  %v21016_v26 = vadd.f32 %v12964_v44, %v12924_v6  ;;  %v4579_v59 = vld [vmem:[%s25320_s5 + $0x2c40] sm:$0xff]  ;;  %v17293_v25 = vcombine.high %v4467_v45, %v4471_v32  ;;  %v17292_v9 = vcombine.low %v4467_v45, %v4471_v32 }
 0x3ec   : > { %v12926_v24 = vpop.f32.mrf.mxu1  ;;  %13219 = vmatprep.subr.bf16.mxu1 %v17309_v7  ;;  %v4583_v44 = vld [vmem:[%s25320_s5 + $0x2c60] sm:$0xff] }
 0x3ed   : > { %13263 = vmatpush1.bf16.msra.mxu0 %v17428_v28  ;;  %v4459_v31 = vld [vmem:[%s25320_s5 + $0x2880] sm:$0xff]  ;;  %v17405_v41 = vcombine.high %v4579_v59, %v4583_v44  ;;  %v17404_v27 = vcombine.low %v4579_v59, %v4583_v44 }
 0x3ee   : > { %13264 = vmatprep.subr.bf16.mxu0 %v17421_v13  ;;  %v4463_v43 = vld [vmem:[%s25320_s5 + $0x28a0] sm:$0xff] }
 0x3ef   : > { %13220 = vmatpush1.bf16.msra.mxu1 %v17308_v38  ;;  %v4571_v40 = vld [vmem:[%s25320_s5 + $0x2c00] sm:$0xff]  ;;  %v17285_v29 = vcombine.high %v4459_v31, %v4463_v43  ;;  %v17284_v5 = vcombine.low %v4459_v31, %v4463_v43 }
 0x3f0   : > { %13221 = vmatprep.subr.bf16.mxu1 %v17301_v35  ;;  %v4575_v23 = vld [vmem:[%s25320_s5 + $0x2c20] sm:$0xff] }
 0x3f1   : > { %13265 = vmatpush1.bf16.msra.mxu0 %v17420_v56  ;;  %v4451_v8 = vld [vmem:[%s25320_s5 + $0x2840] sm:$0xff]  ;;  %v17397_v49 = vcombine.high %v4571_v40, %v4575_v23  ;;  %v17396_v7 = vcombine.low %v4571_v40, %v4575_v23 }
 0x3f2   : > { %13266 = vmatprep.subr.bf16.mxu0 %v17413_v33  ;;  %v4455_v11 = vld [vmem:[%s25320_s5 + $0x2860] sm:$0xff] }
 0x3f3   : > { %13222 = vmatpush1.bf16.msra.mxu1 %v17300_v58  ;;  %v4691_v46 = vld [vmem:[%s25320_s5 + $0x2fc0] sm:$0xff]  ;;  %v17277_v52 = vcombine.high %v4451_v8, %v4455_v11  ;;  %v17276_v3 = vcombine.low %v4451_v8, %v4455_v11 }
 0x3f4   : > { %13223 = vmatprep.subr.bf16.mxu1 %v17293_v25  ;;  %v4695_v61 = vld [vmem:[%s25320_s5 + $0x2fe0] sm:$0xff] }
 0x3f5   : > { %13267 = vmatpush1.bf16.msra.mxu0 %v17412_v17  ;;  %v4443_v6 = vld [vmem:[%s25320_s5 + $0x2800] sm:$0xff]  ;;  %v17517_v51 = vcombine.high %v4691_v46, %v4695_v61  ;;  %v17516_v19 = vcombine.low %v4691_v46, %v4695_v61 }
 0x3f6   : > { %13268 = vmatprep.subr.bf16.mxu0 %v17405_v41  ;;  %v4447_v28 = vld [vmem:[%s25320_s5 + $0x2820] sm:$0xff] }
 0x3f7   : > { %13224 = vmatpush1.bf16.msra.mxu1 %v17292_v9  ;;  %v4683_v48 = vld [vmem:[%s25320_s5 + $0x2f80] sm:$0xff]  ;;  %v17269_v38 = vcombine.high %v4443_v6, %v4447_v28  ;;  %v17268_v56 = vcombine.low %v4443_v6, %v4447_v28 }
 0x3f8   : > { %13225 = vmatprep.subr.bf16.mxu1 %v17285_v29  ;;  %v4687_v13 = vld [vmem:[%s25320_s5 + $0x2fa0] sm:$0xff] }
 0x3f9   : > { %13269 = vmatpush1.bf16.msra.mxu0 %v17404_v27  ;;  %v4563_v50 = vld [vmem:[%s25320_s5 + $0x2bc0] sm:$0xff]  ;;  %v17509_v35 = vcombine.high %v4683_v48, %v4687_v13  ;;  %v17508_v58 = vcombine.low %v4683_v48, %v4687_v13 }
 0x3fa   : > { %13270 = vmatprep.subr.bf16.mxu0 %v17397_v49  ;;  %v4567_v24 = vld [vmem:[%s25320_s5 + $0x2be0] sm:$0xff] }
 0x3fb   : > { %13226 = vmatpush1.bf16.msra.mxu1 %v17284_v5  ;;  %v4675_v45 = vld [vmem:[%s25320_s5 + $0x2f40] sm:$0xff]  ;;  %v17389_v33 = vcombine.high %v4563_v50, %v4567_v24  ;;  %v17388_v17 = vcombine.low %v4563_v50, %v4567_v24 }
 0x3fc   : > { %13227 = vmatprep.subr.bf16.mxu1 %v17277_v52  ;;  %v4679_v32 = vld [vmem:[%s25320_s5 + $0x2f60] sm:$0xff] }
 0x3fd   : > { %13271 = vmatpush1.bf16.msra.mxu0 %v17396_v7  ;;  %v4555_v59 = vld [vmem:[%s25320_s5 + $0x2b80] sm:$0xff]  ;;  %v17501_v25 = vcombine.high %v4675_v45, %v4679_v32  ;;  %v17500_v9 = vcombine.low %v4675_v45, %v4679_v32 }
 0x3fe   : > { %13272 = vmatprep.subr.bf16.mxu0 %v17517_v51  ;;  %v4559_v44 = vld [vmem:[%s25320_s5 + $0x2ba0] sm:$0xff] }
 0x3ff   : > { %13228 = vmatpush1.bf16.msra.mxu1 %v17276_v3  ;;  %v4667_v31 = vld [vmem:[%s25320_s5 + $0x2f00] sm:$0xff]  ;;  %v17381_v41 = vcombine.high %v4555_v59, %v4559_v44  ;;  %v17380_v27 = vcombine.low %v4555_v59, %v4559_v44 }
 0x400   : > { %13229 = vmatprep.subr.bf16.mxu1 %v17269_v38  ;;  %v4671_v43 = vld [vmem:[%s25320_s5 + $0x2f20] sm:$0xff] }
 0x401   : > { %13273 = vmatpush2.bf16.msra.mxu0 %v17516_v19  ;;  %v4547_v40 = vld [vmem:[%s25320_s5 + $0x2b40] sm:$0xff]  ;;  %v17493_v29 = vcombine.high %v4667_v31, %v4671_v43  ;;  %v17492_v5 = vcombine.low %v4667_v31, %v4671_v43 }
 0x402   : > { %13274 = vmatprep.subr.bf16.mxu0 %v17509_v35  ;;  %v4551_v23 = vld [vmem:[%s25320_s5 + $0x2b60] sm:$0xff] }
 0x403   : > { %13230 = vmatpush1.bf16.msra.mxu1 %v17268_v56  ;;  %v4659_v8 = vld [vmem:[%s25320_s5 + $0x2ec0] sm:$0xff]  ;;  %v17373_v49 = vcombine.high %v4547_v40, %v4551_v23  ;;  %v17372_v7 = vcombine.low %v4547_v40, %v4551_v23  ;;  %v3220_v23 = vld [vmem:[%s25320_s5 + $0x1c8] sm:$0xff] }
 0x404   : > { %13231 = vmatprep.subr.bf16.mxu1 %v17389_v33  ;;  %v4663_v11 = vld [vmem:[%s25320_s5 + $0x2ee0] sm:$0xff] }
 0x405   : > { %13275 = vmatpush2.bf16.msra.mxu0 %v17508_v58  ;;  %v4539_v46 = vld [vmem:[%s25320_s5 + $0x2b00] sm:$0xff]  ;;  %v17485_v52 = vcombine.high %v4659_v8, %v4663_v11  ;;  %v17484_v3 = vcombine.low %v4659_v8, %v4663_v11 }
 0x406   : > { %13276 = vmatprep.subr.bf16.mxu0 %v17501_v25  ;;  %v4543_v61 = vld [vmem:[%s25320_s5 + $0x2b20] sm:$0xff] }
 0x407   : > { %13232 = vmatpush2.bf16.msra.mxu1 %v17388_v17  ;;  %v4651_v6 = vld [vmem:[%s25320_s5 + $0x2e80] sm:$0xff]  ;;  %v17365_v51 = vcombine.high %v4539_v46, %v4543_v61  ;;  %v17364_v19 = vcombine.low %v4539_v46, %v4543_v61  ;;  %v3212_v61 = vld [vmem:[%s25320_s5 + $0x188] sm:$0xff] }
 0x408   : > { %13233 = vmatprep.subr.bf16.mxu1 %v17381_v41  ;;  %v4655_v28 = vld [vmem:[%s25320_s5 + $0x2ea0] sm:$0xff]  ;;  %v3115_v41 = vrot.slane %v20160_v1, 2 }
 0x409   : > { %13277 = vmatpush2.bf16.msra.mxu0 %v17500_v9  ;;  %v4531_v48 = vld [vmem:[%s25320_s5 + $0x2ac0] sm:$0xff]  ;;  %v17477_v38 = vcombine.high %v4651_v6, %v4655_v28  ;;  %v17476_v56 = vcombine.low %v4651_v6, %v4655_v28 }
 0x40a   : > { %13278 = vmatprep.subr.bf16.mxu0 %v17493_v29  ;;  %v4535_v13 = vld [vmem:[%s25320_s5 + $0x2ae0] sm:$0xff]  ;;  %v3224_v29 = vld [vmem:[%s25320_s5 + $0x1e8] sm:$0xff] }
 0x40b   : > { %13234 = vmatpush2.bf16.msra.mxu1 %v17380_v27  ;;  %v4643_v50 = vld [vmem:[%s25320_s5 + $0x2e40] sm:$0xff]  ;;  %v17357_v35 = vcombine.high %v4531_v48, %v4535_v13  ;;  %v17356_v58 = vcombine.low %v4531_v48, %v4535_v13  ;;  %v16046_v28 = vcombine.low %v3220_v23, %v3224_v29 }
 0x40c   : > { %13235 = vmatprep.subr.bf16.mxu1 %v17373_v49  ;;  %v4647_v24 = vld [vmem:[%s25320_s5 + $0x2e60] sm:$0xff]  ;;  %v3126_v49 = vrot.slane %v3115_v41, 2 }
 0x40d   : > { %13279 = vmatpush2.bf16.msra.mxu0 %v17492_v5  ;;  %v4523_v45 = vld [vmem:[%s25320_s5 + $0x2a80] sm:$0xff]  ;;  %v17469_v33 = vcombine.high %v4643_v50, %v4647_v24  ;;  %v17468_v17 = vcombine.low %v4643_v50, %v4647_v24  ;;  %v16047_v5 = vcombine.high %v3220_v23, %v3224_v29 }
 0x40e   : > { %13280 = vmatprep.subr.bf16.mxu0 %v17485_v52  ;;  %v4527_v32 = vld [vmem:[%s25320_s5 + $0x2aa0] sm:$0xff]  ;;  %v3216_v52 = vld [vmem:[%s25320_s5 + $0x1a8] sm:$0xff]  ;;  %v21170_v48 = vpack.c.bf16 %v3126_v49, %v3126_v49 }
 0x40f   : > { %13236 = vmatpush2.bf16.msra.mxu1 %v17372_v7  ;;  %v4635_v59 = vld [vmem:[%s25320_s5 + $0x2e00] sm:$0xff]  ;;  %v17349_v25 = vcombine.high %v4523_v45, %v4527_v32  ;;  %v17348_v40 = vcombine.low %v4523_v45, %v4527_v32  ;;  %v3113_v7 = vrot.slane %v20227_v20, 6  ;;  %v16039_v13 = vcombine.high %v3212_v61, %v3216_v52  ;;  %v3204_v20 = vld [vmem:[%s25320_s5 + $0x148] sm:$0xff] }
 0x410   : > { %13237 = vmatprep.subr.bf16.mxu1 %v17365_v51  ;;  %v4639_v44 = vld [vmem:[%s25320_s5 + $0x2e20] sm:$0xff]  ;;  %v3192_v49 = vld [vmem:[%s25320_s5 + $0xe8] sm:$0xff] }
 0x411   : > { %13281 = vmatpush2.bf16.msra.mxu0 %v17484_v3  ;;  %v4515_v31 = vld [vmem:[%s25320_s5 + $0x2a40] sm:$0xff]  ;;  %v17461_v9 = vcombine.high %v4635_v59, %v4639_v44  ;;  %v17460_v8 = vcombine.low %v4635_v59, %v4639_v44  ;;  %v3124_v24 = vrot.slane %v3113_v7, 2  ;;  %v3196_v44 = vld [vmem:[%s25320_s5 + $0x108] sm:$0xff] }
 0x412   : > { %13282 = vmatprep.subr.bf16.mxu0 %v17477_v38  ;;  %v4519_v43 = vld [vmem:[%s25320_s5 + $0x2a60] sm:$0xff] }
 0x413   : > { %13238 = vmatpush2.bf16.msra.mxu1 %v17364_v19  ;;  %v17341_v27 = vcombine.high %v4515_v31, %v4519_v43  ;;  %v4507_v1 = vld [vmem:[%s25320_s5 + $0x2a00] sm:$0xff]  ;;  %v17340_v46 = vcombine.low %v4515_v31, %v4519_v43  ;;  %v3208_v19 = vld [vmem:[%s25320_s5 + $0x168] sm:$0xff]  ;;  %v21192_v31 = vpack.c.bf16 %v3124_v24, %v3124_v24 }
 0x414   : > { %13239 = vmatprep.subr.bf16.mxu1 %v17357_v35  ;;  %v4511_v11 = vld [vmem:[%s25320_s5 + $0x2a20] sm:$0xff]  ;;  %v16030_v41 = vcombine.low %v3204_v20, %v3208_v19 }
 0x415   : > { %13283 = vmatpush2.bf16.msra.mxu0 %v17476_v56  ;;  %v17333_v6 = vcombine.high %v4507_v1, %v4511_v11  ;;  %v4755_v51 = vld [vmem:[%s25320_s5 + $0x31c0] sm:$0xff]  ;;  %v17332_v38 = vcombine.low %v4507_v1, %v4511_v11  ;;  %v16038_v56 = vcombine.low %v3212_v61, %v3216_v52  ;;  %v3188_v11 = vld [vmem:[%s25320_s5 + $0xc8] sm:$0xff] }
 0x416   : > { %13284 = vmatprep.subr.bf16.mxu0 %v17469_v33  ;;  %v4759_v3 = vld [vmem:[%s25320_s5 + $0x31e0] sm:$0xff] }
 0x417   : > { %13240 = vmatpush2.bf16.msra.mxu1 %v17356_v58  ;;  %v17581_v35 = vcombine.high %v4755_v51, %v4759_v3  ;;  %v4747_v45 = vld [vmem:[%s25320_s5 + $0x3180] sm:$0xff]  ;;  %v16031_v58 = vcombine.high %v3204_v20, %v3208_v19  ;;  %v17580_v59 = vcombine.low %v4755_v51, %v4759_v3  ;;  %v16015_v3 = vcombine.high %v3188_v11, %v3192_v49 }
 0x418   : > { %13241 = vmatprep.subr.bf16.mxu1 %v17349_v25  ;;  %v4751_v32 = vld [vmem:[%s25320_s5 + $0x31a0] sm:$0xff]  ;;  %v3200_v25 = vld [vmem:[%s25320_s5 + $0x128] sm:$0xff] }
 0x419   : > { %13285 = vmatpush2.bf16.msra.mxu0 %v17468_v17  ;;  %v17573_v43 = vcombine.high %v4747_v45, %v4751_v32  ;;  %v17572_v1 = vcombine.low %v4747_v45, %v4751_v32  ;;  %v4731_v7 = vld [vmem:[%s25320_s5 + $0x3100] sm:$0xff] }
 0x41a   : > { %13286 = vmatprep.subr.bf16.mxu0 %v17461_v9  ;;  %v4739_v9 = vld [vmem:[%s25320_s5 + $0x3140] sm:$0xff] }
 0x41b   : > { %13242 = vmatpush2.bf16.msra.mxu1 %v17348_v40  ;;  %v4743_v40 = vld [vmem:[%s25320_s5 + $0x3160] sm:$0xff] }
 0x41c   : > { %13243 = vmatprep.subr.bf16.mxu1 %v17341_v27  ;;  %v16023_v27 = vcombine.high %v3196_v44, %v3200_v25  ;;  %v17565_v61 = vcombine.high %v4739_v9, %v4743_v40 }
 0x41d   : > { %13287 = vmatpush2.bf16.msra.mxu0 %v17460_v8 }
 0x41e   : > { %13338 = vmatprep.subr.bf16.mxu0 %v16047_v5  ;;  %v18575_v5 = vmov 0  }
 0x41f   : > { %13244 = vmatpush2.bf16.msra.mxu1 %v17340_v46 }
 0x420   : > { %v13044_v50 = vpop.f32.mrf.mxu0  ;;  %13289 = vmatmul.mubr.bf16.vlgmr.msra.gmra.mxu0 %v21170_v48  ;;  %13245 = vmatprep.subr.bf16.mxu1 %v17333_v6  ;;  %v4735_v6 = vld [vmem:[%s25320_s5 + $0x3120] sm:$0xff] }
 0x421   : > { %13339 = vmatpush1.bf16.msra.mxu0 %v16046_v28  ;;  %13370 = vmatprep.mubr.bf16.mxu0 %v20049_v63  ;;  %v17557_v24 = vcombine.high %v4731_v7, %v4735_v6  ;;  %v17556_v32 = vcombine.low %v4731_v7, %v4735_v6  ;;  %v4703_v7 = vld [vmem:[%s25320_s5 + $0x3020] sm:$0xff] }
 0x422   : > { %v13046_v33 = vpop.f32.mrf.mxu0  ;;  %13340 = vmatprep.subr.bf16.mxu0 %v16039_v13  ;;  %v17564_v13 = vcombine.low %v4739_v9, %v4743_v40  ;;  %v3164_v9 = vld [vmem:[%s25320_s5 + $0x8] sm:$0xff] }
 0x423   : > { %13246 = vmatpush2.bf16.msra.mxu1 %v17332_v38  ;;  %v3184_v38 = vld [vmem:[%s25320_s5 + $0xa8] sm:$0xff] }
 0x424   : > { %v13048_v17 = vpop.f32.mrf.mxu0  ;;  %13297 = vmatprep.subr.bf16.mxu1 %v17581_v35  ;;  %v4723_v35 = vld [vmem:[%s25320_s5 + $0x30c0] sm:$0xff]  ;;  %v3168_v40 = vld [vmem:[%s25320_s5 + $0x28] sm:$0xff] }
 0x425   : > { %13341 = vmatpush1.bf16.msra.mxu0 %v16038_v56  ;;  %v4727_v56 = vld [vmem:[%s25320_s5 + $0x30e0] sm:$0xff] }
 0x426   : > { %v13003_v23 = vpop.f32.mrf.mxu1  ;;  %v13049_v29 = vpop.f32.mrf.mxu0  ;;  %13248 = vmatmul.mubr.bf16.vlgmr.msra.gmra.mxu1 %v21192_v31  ;;  %13342 = vmatprep.subr.bf16.mxu0 %v16031_v58  ;;  %v3176_v58 = vld [vmem:[%s25320_s5 + $0x68] sm:$0xff]  ;;  %v4719_v17 = vld [vmem:[%s25320_s5 + $0x30a0] sm:$0xff] }
 0x427   : > { %v13004_v8 = vadd.f32 %v13003_v23, %v21008_v18  ;;  %13298 = vmatpush1.bf16.msra.mxu1 %v17580_v59  ;;  %13329 = vmatprep.mubr.bf16.mxu1 %v18575_v5  ;;  %v16022_v18 = vcombine.low %v3196_v44, %v3200_v25  ;;  %v17549_v59 = vcombine.high %v4723_v35, %v4727_v56  ;;  %v4715_v25 = vld [vmem:[%s25320_s5 + $0x3080] sm:$0xff] }
 0x428   : > { %v13005_v46 = vpop.f32.mrf.mxu1  ;;  %13299 = vmatprep.subr.bf16.mxu1 %v17573_v43  ;;  %v17541_v23 = vcombine.high %v4715_v25, %v4719_v17 }
 0x429   : > { %v13006_v52 = vadd.f32 %v13005_v46, %v21016_v26  ;;  %13343 = vmatpush1.bf16.msra.mxu0 %v16030_v41  ;;  %v21216_v28 = vadd.f32 %v13044_v50, %v13004_v8  ;;  %v3180_v26 = vld [vmem:[%s25320_s5 + $0x88] sm:$0xff]  ;;  %v16014_v50 = vcombine.low %v3188_v11, %v3192_v49  ;;  %v17548_v41 = vcombine.low %v4723_v35, %v4727_v56  ;;  %v4711_v8 = vld [vmem:[%s25320_s5 + $0x3060] sm:$0xff] }
 0x42a   : > { %v13007_v51 = vpop.f32.mrf.mxu1  ;;  %13344 = vmatprep.subr.bf16.mxu0 %v16023_v27  ;;  %v16007_v45 = vcombine.high %v3180_v26, %v3184_v38  ;;  %v16006_v44 = vcombine.low %v3180_v26, %v3184_v38  ;;  %v4707_v27 = vld [vmem:[%s25320_s5 + $0x3040] sm:$0xff]  ;;  %v17540_v11 = vcombine.low %v4715_v25, %v4719_v17  ;;  %v3284_v49 = vld [vmem:[%s25320_s5 + $0x3c8] sm:$0xff]  ;;  %v3118_v26 = vrot.slane %v20177_v14, 6 }
 0x42b   : > { %13300 = vmatpush1.bf16.msra.mxu1 %v17572_v1  ;;  %v21224_v20 = vadd.f32 %v13046_v33, %v13006_v52  ;;  %v3172_v33 = vld [vmem:[%s25320_s5 + $0x48] sm:$0xff]  ;;  %v15991_v1 = vcombine.high %v3164_v9, %v3168_v40  ;;  %v15990_v52 = vcombine.low %v3164_v9, %v3168_v40  ;;  %v17532_v51 = vcombine.low %v4707_v27, %v4711_v8 }
 0x42c   : > { %v13008_v19 = vpop.f32.mrf.mxu1  ;;  %13301 = vmatprep.subr.bf16.mxu1 %v17565_v61  ;;  %v15999_v43 = vcombine.high %v3172_v33, %v3176_v58  ;;  %v15998_v29 = vcombine.low %v3172_v33, %v3176_v58  ;;  %v3288_v46 = vld [vmem:[%s25320_s5 + $0x3e8] sm:$0xff]  ;;  %v17533_v61 = vcombine.high %v4707_v27, %v4711_v8 }
 0x42d   : > { %13345 = vmatpush1.bf16.msra.mxu0 %v16022_v18  ;;  %v4699_v18 = vld [vmem:[%s25320_s5 + $0x3000] sm:$0xff]  ;;  %v16111_v6 = vcombine.high %v3284_v49, %v3288_v46  ;;  %v16110_v19 = vcombine.low %v3284_v49, %v3288_v46  ;;  %v3268_v14 = vld [vmem:[%s25320_s5 + $0x348] sm:$0xff] }
 0x42e   : > { %13346 = vmatprep.subr.bf16.mxu0 %v16015_v3  ;;  %v3276_v3 = vld [vmem:[%s25320_s5 + $0x388] sm:$0xff]  ;;  %v17525_v38 = vcombine.high %v4699_v18, %v4703_v7  ;;  %v17524_v56 = vcombine.low %v4699_v18, %v4703_v7 }
 0x42f   : > { %13302 = vmatpush1.bf16.msra.mxu1 %v17564_v13  ;;  %v3280_v13 = vld [vmem:[%s25320_s5 + $0x3a8] sm:$0xff] }
 0x430   : > { %13303 = vmatprep.subr.bf16.mxu1 %v17557_v24  ;;  %v3348_v24 = vld [vmem:[%s25320_s5 + $0x5c8] sm:$0xff]  ;;  %v16103_v35 = vcombine.high %v3276_v3, %v3280_v13  ;;  %v16102_v58 = vcombine.low %v3276_v3, %v3280_v13 }
 0x431   : > { %13347 = vmatpush1.bf16.msra.mxu0 %v16014_v50  ;;  %v3352_v50 = vld [vmem:[%s25320_s5 + $0x5e8] sm:$0xff] }
 0x432   : > { %13348 = vmatprep.subr.bf16.mxu0 %v16007_v45  ;;  %v3272_v45 = vld [vmem:[%s25320_s5 + $0x368] sm:$0xff]  ;;  %v16175_v33 = vcombine.high %v3348_v24, %v3352_v50  ;;  %v16174_v17 = vcombine.low %v3348_v24, %v3352_v50 }
 0x433   : > { %13304 = vmatpush1.bf16.msra.mxu1 %v17556_v32  ;;  %v3128_v32 = vrot.slane %v3118_v26, 2  ;;  %v16095_v25 = vcombine.high %v3268_v14, %v3272_v45  ;;  %v3336_v27 = vld [vmem:[%s25320_s5 + $0x568] sm:$0xff] }
 0x434   : > { %13305 = vmatprep.subr.bf16.mxu1 %v17549_v59  ;;  %v3340_v59 = vld [vmem:[%s25320_s5 + $0x588] sm:$0xff] }
 0x435   : > { %13349 = vmatpush1.bf16.msra.mxu0 %v16006_v44  ;;  %v3344_v44 = vld [vmem:[%s25320_s5 + $0x5a8] sm:$0xff]  ;;  %v21299_v9 = vpack.c.bf16 %v3128_v32, %v3128_v32 }
 0x436   : > { %13350 = vmatprep.subr.bf16.mxu0 %v15999_v43  ;;  %v3260_v43 = vld [vmem:[%s25320_s5 + $0x308] sm:$0xff]  ;;  %v16167_v40 = vcombine.high %v3340_v59, %v3344_v44 }
 0x437   : > { %13306 = vmatpush1.bf16.msra.mxu1 %v17548_v41  ;;  %v3264_v41 = vld [vmem:[%s25320_s5 + $0x328] sm:$0xff] }
 0x438   : > { %13307 = vmatprep.subr.bf16.mxu1 %v17541_v23  ;;  %v16094_v23 = vcombine.low %v3268_v14, %v3272_v45  ;;  %v16087_v8 = vcombine.high %v3260_v43, %v3264_v41  ;;  %v3256_v49 = vld [vmem:[%s25320_s5 + $0x2e8] sm:$0xff] }
 0x439   : > { %13351 = vmatpush1.bf16.msra.mxu0 %v15998_v29  ;;  %v3332_v29 = vld [vmem:[%s25320_s5 + $0x548] sm:$0xff] }
 0x43a   : > { %13352 = vmatprep.subr.bf16.mxu0 %v15991_v1  ;;  %v16166_v1 = vcombine.low %v3340_v59, %v3344_v44  ;;  %v16159_v46 = vcombine.high %v3332_v29, %v3336_v27  ;;  %v3328_v18 = vld [vmem:[%s25320_s5 + $0x528] sm:$0xff] }
 0x43b   : > { %13308 = vmatpush1.bf16.msra.mxu1 %v17540_v11  ;;  %v3252_v11 = vld [vmem:[%s25320_s5 + $0x2c8] sm:$0xff] }
 0x43c   : > { %13309 = vmatprep.subr.bf16.mxu1 %v17533_v61  ;;  %v16086_v61 = vcombine.low %v3260_v43, %v3264_v41  ;;  %v16079_v7 = vcombine.high %v3252_v11, %v3256_v49  ;;  %v3248_v3 = vld [vmem:[%s25320_s5 + $0x2a8] sm:$0xff]  ;;  %v16078_v26 = vcombine.low %v3252_v11, %v3256_v49 }
 0x43d   : > { %13353 = vmatpush1.bf16.msra.mxu0 %v15990_v52  ;;  %v3324_v52 = vld [vmem:[%s25320_s5 + $0x508] sm:$0xff] }
 0x43e   : > { %13354 = vmatprep.subr.bf16.mxu0 %v16111_v6  ;;  %v16158_v6 = vcombine.low %v3332_v29, %v3336_v27  ;;  %v16151_v13 = vcombine.high %v3324_v52, %v3328_v18  ;;  %v16150_v50 = vcombine.low %v3324_v52, %v3328_v18  ;;  %v3308_v32 = vld [vmem:[%s25320_s5 + $0x488] sm:$0xff] }
 0x43f   : > { %13310 = vmatpush1.bf16.msra.mxu1 %v17532_v51  ;;  %v3244_v51 = vld [vmem:[%s25320_s5 + $0x288] sm:$0xff] }
 0x440   : > { %13311 = vmatprep.subr.bf16.mxu1 %v17525_v38  ;;  %v3316_v38 = vld [vmem:[%s25320_s5 + $0x4c8] sm:$0xff]  ;;  %v16071_v24 = vcombine.high %v3244_v51, %v3248_v3  ;;  %v16070_v45 = vcombine.low %v3244_v51, %v3248_v3 }
 0x441   : > { %13355 = vmatpush2.bf16.msra.mxu0 %v16110_v19  ;;  %v3320_v19 = vld [vmem:[%s25320_s5 + $0x4e8] sm:$0xff] }
 0x442   : > { %13356 = vmatprep.subr.bf16.mxu0 %v16103_v35  ;;  %v3236_v35 = vld [vmem:[%s25320_s5 + $0x248] sm:$0xff]  ;;  %v16143_v14 = vcombine.high %v3316_v38, %v3320_v19  ;;  %v16142_v59 = vcombine.low %v3316_v38, %v3320_v19 }
 0x443   : > { %13312 = vmatpush1.bf16.msra.mxu1 %v17524_v56  ;;  %v3240_v56 = vld [vmem:[%s25320_s5 + $0x268] sm:$0xff] }
 0x444   : > { %13379 = vmatprep.subr.bf16.mxu1 %v16175_v33  ;;  %v3312_v33 = vld [vmem:[%s25320_s5 + $0x4a8] sm:$0xff]  ;;  %v16062_v43 = vcombine.low %v3236_v35, %v3240_v56 }
 0x445   : > { %13357 = vmatpush2.bf16.msra.mxu0 %v16102_v58  ;;  %v16063_v58 = vcombine.high %v3236_v35, %v3240_v56  ;;  %v3228_v44 = vld [vmem:[%s25320_s5 + $0x208] sm:$0xff]  ;;  %v16134_v29 = vcombine.low %v3308_v32, %v3312_v33 }
 0x446   : > { %13330 = vmatmul.mubr.bf16.vlgmr.msra.gmra.mxu1 %v21299_v9  ;;  %13358 = vmatprep.subr.bf16.mxu0 %v16095_v25  ;;  %v3232_v25 = vld [vmem:[%s25320_s5 + $0x228] sm:$0xff] }
 0x447   : > { %13380 = vmatpush1.bf16.msra.mxu1 %v16174_v17  ;;  %13411 = vmatprep.mubr.bf16.mxu1 %v20028_v60  ;;  %v16135_v17 = vcombine.high %v3308_v32, %v3312_v33  ;;  %v3300_v41 = vld [vmem:[%s25320_s5 + $0x448] sm:$0xff]  ;;  %v16054_v11 = vcombine.low %v3228_v44, %v3232_v25 }
 0x448   : > { %13381 = vmatprep.subr.bf16.mxu1 %v16167_v40  ;;  %v3304_v40 = vld [vmem:[%s25320_s5 + $0x468] sm:$0xff] }
 0x449   : > { %13359 = vmatpush2.bf16.msra.mxu0 %v16094_v23  ;;  %v16055_v23 = vcombine.high %v3228_v44, %v3232_v25  ;;  %v3476_v27 = vld [vmem:[%s25320_s5 + $0x9c8] sm:$0xff]  ;;  %v16126_v52 = vcombine.low %v3300_v41, %v3304_v40 }
 0x44a   : > { %13360 = vmatprep.subr.bf16.mxu0 %v16087_v8  ;;  %v3480_v8 = vld [vmem:[%s25320_s5 + $0x9e8] sm:$0xff] }
 0x44b   : > { %13382 = vmatpush1.bf16.msra.mxu1 %v16166_v1  ;;  %v16127_v1 = vcombine.high %v3300_v41, %v3304_v40  ;;  %v3292_v49 = vld [vmem:[%s25320_s5 + $0x408] sm:$0xff]  ;;  %v16302_v51 = vcombine.low %v3476_v27, %v3480_v8 }
 0x44c   : > { %13383 = vmatprep.subr.bf16.mxu1 %v16159_v46  ;;  %v3296_v46 = vld [vmem:[%s25320_s5 + $0x428] sm:$0xff] }
 0x44d   : > { %13361 = vmatpush2.bf16.msra.mxu0 %v16086_v61  ;;  %v16303_v61 = vcombine.high %v3476_v27, %v3480_v8  ;;  %v3468_v18 = vld [vmem:[%s25320_s5 + $0x988] sm:$0xff]  ;;  %v16118_v38 = vcombine.low %v3292_v49, %v3296_v46 }
 0x44e   : > { %13362 = vmatprep.subr.bf16.mxu0 %v16079_v7  ;;  %v3472_v7 = vld [vmem:[%s25320_s5 + $0x9a8] sm:$0xff] }
 0x44f   : > { %13384 = vmatpush1.bf16.msra.mxu1 %v16158_v6  ;;  %v16119_v6 = vcombine.high %v3292_v49, %v3296_v46  ;;  %v3412_v3 = vld [vmem:[%s25320_s5 + $0x7c8] sm:$0xff]  ;;  %v16294_v56 = vcombine.low %v3468_v18, %v3472_v7 }
 0x450   : > { %13385 = vmatprep.subr.bf16.mxu1 %v16151_v13  ;;  %v3416_v13 = vld [vmem:[%s25320_s5 + $0x7e8] sm:$0xff] }
 0x451   : > { %13363 = vmatpush2.bf16.msra.mxu0 %v16078_v26  ;;  %v16295_v26 = vcombine.high %v3468_v18, %v3472_v7  ;;  %v3460_v19 = vld [vmem:[%s25320_s5 + $0x948] sm:$0xff]  ;;  %v16239_v35 = vcombine.high %v3412_v3, %v3416_v13 }
 0x452   : > { %13364 = vmatprep.subr.bf16.mxu0 %v16071_v24  ;;  %v3464_v24 = vld [vmem:[%s25320_s5 + $0x968] sm:$0xff] }
 0x453   : > { %13386 = vmatpush1.bf16.msra.mxu1 %v16150_v50  ;;  %v16287_v33 = vcombine.high %v3460_v19, %v3464_v24  ;;  %v3456_v44 = vld [vmem:[%s25320_s5 + $0x928] sm:$0xff] }
 0x454   : > { %13387 = vmatprep.subr.bf16.mxu1 %v16143_v14  ;;  %v3404_v14 = vld [vmem:[%s25320_s5 + $0x788] sm:$0xff] }
 0x455   : > { %13365 = vmatpush2.bf16.msra.mxu0 %v16070_v45  ;;  %v3408_v45 = vld [vmem:[%s25320_s5 + $0x7a8] sm:$0xff] }
 0x456   : > { %13366 = vmatprep.subr.bf16.mxu0 %v16063_v58  ;;  %v16238_v58 = vcombine.low %v3412_v3, %v3416_v13  ;;  %v3396_v41 = vld [vmem:[%s25320_s5 + $0x748] sm:$0xff] }
 0x457   : > { %13388 = vmatpush1.bf16.msra.mxu1 %v16142_v59  ;;  %v3452_v59 = vld [vmem:[%s25320_s5 + $0x908] sm:$0xff] }
 0x458   : > { %13389 = vmatprep.subr.bf16.mxu1 %v16135_v17  ;;  %v16231_v17 = vcombine.high %v3404_v14, %v3408_v45  ;;  %v3400_v40 = vld [vmem:[%s25320_s5 + $0x768] sm:$0xff]  ;;  %v16279_v27 = vcombine.high %v3452_v59, %v3456_v44  ;;  %v16278_v18 = vcombine.low %v3452_v59, %v3456_v44 }
 0x459   : > { %13367 = vmatpush2.bf16.msra.mxu0 %v16062_v43  ;;  %v16286_v43 = vcombine.low %v3460_v19, %v3464_v24  ;;  %v3448_v49 = vld [vmem:[%s25320_s5 + $0x8e8] sm:$0xff]  ;;  %v16222_v13 = vcombine.low %v3396_v41, %v3400_v40 }
 0x45a   : > { %13368 = vmatprep.subr.bf16.mxu0 %v16055_v23  ;;  %v3392_v7 = vld [vmem:[%s25320_s5 + $0x728] sm:$0xff] }
 0x45b   : > { %13390 = vmatpush1.bf16.msra.mxu1 %v16134_v29  ;;  %v3372_v44 = vld [vmem:[%s25320_s5 + $0x688] sm:$0xff] }
 0x45c   : > { %13391 = vmatprep.subr.bf16.mxu1 %v16127_v1  ;;  %v16230_v1 = vcombine.low %v3404_v14, %v3408_v45 }
 0x45d   : > { %13369 = vmatpush2.bf16.msra.mxu0 %v16054_v11  ;;  %v3444_v11 = vld [vmem:[%s25320_s5 + $0x8c8] sm:$0xff] }
 0x45e   : > { %13420 = vmatprep.subr.bf16.mxu0 %v16303_v61  ;;  %v16223_v61 = vcombine.high %v3396_v41, %v3400_v40  ;;  %v16271_v3 = vcombine.high %v3444_v11, %v3448_v49  ;;  %v3420_v41 = vld [vmem:[%s25320_s5 + $0x808] sm:$0xff] }
 0x45f   : > { %13392 = vmatpush1.bf16.msra.mxu1 %v16126_v52  ;;  %v3424_v40 = vld [vmem:[%s25320_s5 + $0x828] sm:$0xff] }
 0x460   : > { %v13126_v50 = vpop.f32.mrf.mxu0  ;;  %13371 = vmatmul.mubr.bf16.vlgmr.msra.gmra.mxu0 %v20055_v10  ;;  %13393 = vmatprep.subr.bf16.mxu1 %v16119_v6 }
 0x461   : > { %13421 = vmatpush1.bf16.msra.mxu0 %v16302_v51  ;;  %13452 = vmatprep.mubr.bf16.mxu0 %v20076_v0 }
 0x462   : > { %v13128_v32 = vpop.f32.mrf.mxu0  ;;  %13422 = vmatprep.subr.bf16.mxu0 %v16295_v26  ;;  %v3440_v26 = vld [vmem:[%s25320_s5 + $0x8a8] sm:$0xff] }
 0x463   : > { %13394 = vmatpush1.bf16.msra.mxu1 %v16118_v38 }
 0x464   : > { %v13130_v25 = vpop.f32.mrf.mxu0  ;;  %13395 = vmatprep.subr.bf16.mxu1 %v16239_v35  ;;  %v3380_v35 = vld [vmem:[%s25320_s5 + $0x6c8] sm:$0xff] }
 0x465   : > { %13423 = vmatpush1.bf16.msra.mxu0 %v16294_v56  ;;  %v3384_v56 = vld [vmem:[%s25320_s5 + $0x6e8] sm:$0xff] }
 0x466   : > { %v13085_v23 = vpop.f32.mrf.mxu1  ;;  %v13131_v29 = vpop.f32.mrf.mxu0  ;;  %13424 = vmatprep.subr.bf16.mxu0 %v16287_v33  ;;  %v3432_v33 = vld [vmem:[%s25320_s5 + $0x868] sm:$0xff] }
 0x467   : > { %v13086_v8 = vadd.f32 %v13085_v23, %v21216_v28  ;;  %13396 = vmatpush2.bf16.msra.mxu1 %v16238_v58  ;;  %v3388_v28 = vld [vmem:[%s25320_s5 + $0x708] sm:$0xff]  ;;  %v16207_v58 = vcombine.high %v3380_v35, %v3384_v56 }
 0x468   : > { %v13087_v46 = vpop.f32.mrf.mxu1  ;;  %13397 = vmatprep.subr.bf16.mxu1 %v16231_v17  ;;  %v16215_v24 = vcombine.high %v3388_v28, %v3392_v7  ;;  %v16214_v45 = vcombine.low %v3388_v28, %v3392_v7  ;;  %v3376_v25 = vld [vmem:[%s25320_s5 + $0x6a8] sm:$0xff] }
 0x469   : > { %v13088_v52 = vadd.f32 %v13087_v46, %v21224_v20  ;;  %13425 = vmatpush1.bf16.msra.mxu0 %v16286_v43  ;;  %v21421_v6 = vadd.f32 %v13126_v50, %v13086_v8  ;;  %v3436_v20 = vld [vmem:[%s25320_s5 + $0x888] sm:$0xff]  ;;  %v16270_v50 = vcombine.low %v3444_v11, %v3448_v49  ;;  %v16206_v43 = vcombine.low %v3380_v35, %v3384_v56 }
 0x46a   : > { %v13089_v51 = vpop.f32.mrf.mxu1  ;;  %13426 = vmatprep.subr.bf16.mxu0 %v16279_v27  ;;  %v16263_v14 = vcombine.high %v3436_v20, %v3440_v26  ;;  %v16262_v59 = vcombine.low %v3436_v20, %v3440_v26  ;;  %v16199_v23 = vcombine.high %v3372_v44, %v3376_v25  ;;  %v3364_v27 = vld [vmem:[%s25320_s5 + $0x648] sm:$0xff]  ;;  %v16198_v11 = vcombine.low %v3372_v44, %v3376_v25 }
 0x46b   : > { %13398 = vmatpush2.bf16.msra.mxu1 %v16230_v1  ;;  %v21429_v38 = vadd.f32 %v13128_v32, %v13088_v52  ;;  %v3428_v32 = vld [vmem:[%s25320_s5 + $0x848] sm:$0xff]  ;;  %v16247_v1 = vcombine.high %v3420_v41, %v3424_v40  ;;  %v16246_v52 = vcombine.low %v3420_v41, %v3424_v40 }
 0x46c   : > { %v13090_v19 = vpop.f32.mrf.mxu1  ;;  %13399 = vmatprep.subr.bf16.mxu1 %v16223_v61  ;;  %v16255_v17 = vcombine.high %v3428_v32, %v3432_v33  ;;  %v16254_v29 = vcombine.low %v3428_v32, %v3432_v33  ;;  %v3368_v8 = vld [vmem:[%s25320_s5 + $0x668] sm:$0xff] }
 0x46d   : > { %13427 = vmatpush1.bf16.msra.mxu0 %v16278_v18  ;;  %v3540_v49 = vld [vmem:[%s25320_s5 + $0xbc8] sm:$0xff]  ;;  %v16191_v61 = vcombine.high %v3364_v27, %v3368_v8  ;;  %v16190_v51 = vcombine.low %v3364_v27, %v3368_v8 }
 0x46e   : > { %13428 = vmatprep.subr.bf16.mxu0 %v16271_v3  ;;  %v3544_v46 = vld [vmem:[%s25320_s5 + $0xbe8] sm:$0xff] }
 0x46f   : > { %13400 = vmatpush2.bf16.msra.mxu1 %v16222_v13  ;;  %v3356_v18 = vld [vmem:[%s25320_s5 + $0x608] sm:$0xff]  ;;  %v16367_v7 = vcombine.high %v3540_v49, %v3544_v46  ;;  %v16366_v26 = vcombine.low %v3540_v49, %v3544_v46 }
 0x470   : > { %13401 = vmatprep.subr.bf16.mxu1 %v16215_v24  ;;  %v3360_v28 = vld [vmem:[%s25320_s5 + $0x628] sm:$0xff] }
 0x471   : > { %13429 = vmatpush1.bf16.msra.mxu0 %v16270_v50  ;;  %v3532_v3 = vld [vmem:[%s25320_s5 + $0xb88] sm:$0xff]  ;;  %v16183_v20 = vcombine.high %v3356_v18, %v3360_v28  ;;  %v16182_v35 = vcombine.low %v3356_v18, %v3360_v28 }
 0x472   : > { %13430 = vmatprep.subr.bf16.mxu0 %v16263_v14  ;;  %v3536_v13 = vld [vmem:[%s25320_s5 + $0xba8] sm:$0xff] }
 0x473   : > { %13402 = vmatpush2.bf16.msra.mxu1 %v16214_v45  ;;  %v3604_v19 = vld [vmem:[%s25320_s5 + $0xdc8] sm:$0xff]  ;;  %v16359_v50 = vcombine.high %v3532_v3, %v3536_v13  ;;  %v16358_v32 = vcombine.low %v3532_v3, %v3536_v13 }
 0x474   : > { %13403 = vmatprep.subr.bf16.mxu1 %v16207_v58  ;;  %v3608_v24 = vld [vmem:[%s25320_s5 + $0xde8] sm:$0xff] }
 0x475   : > { %13431 = vmatpush1.bf16.msra.mxu0 %v16262_v59  ;;  %v3524_v56 = vld [vmem:[%s25320_s5 + $0xb48] sm:$0xff]  ;;  %v16431_v45 = vcombine.high %v3604_v19, %v3608_v24  ;;  %v16430_v44 = vcombine.low %v3604_v19, %v3608_v24 }
 0x476   : > { %13432 = vmatprep.subr.bf16.mxu0 %v16255_v17  ;;  %v3528_v14 = vld [vmem:[%s25320_s5 + $0xb68] sm:$0xff] }
 0x477   : > { %13404 = vmatpush2.bf16.msra.mxu1 %v16206_v43  ;;  %v3596_v33 = vld [vmem:[%s25320_s5 + $0xd88] sm:$0xff]  ;;  %v16351_v59 = vcombine.high %v3524_v56, %v3528_v14  ;;  %v16350_v41 = vcombine.low %v3524_v56, %v3528_v14 }
 0x478   : > { %13405 = vmatprep.subr.bf16.mxu1 %v16199_v23  ;;  %v3600_v58 = vld [vmem:[%s25320_s5 + $0xda8] sm:$0xff] }
 0x479   : > { %13433 = vmatpush1.bf16.msra.mxu0 %v16254_v29  ;;  %v3516_v25 = vld [vmem:[%s25320_s5 + $0xb08] sm:$0xff]  ;;  %v16423_v43 = vcombine.high %v3596_v33, %v3600_v58  ;;  %v16422_v27 = vcombine.low %v3596_v33, %v3600_v58 }
 0x47a   : > { %13434 = vmatprep.subr.bf16.mxu0 %v16247_v1  ;;  %v3520_v17 = vld [vmem:[%s25320_s5 + $0xb28] sm:$0xff] }
 0x47b   : > { %13406 = vmatpush2.bf16.msra.mxu1 %v16198_v11  ;;  %v3588_v40 = vld [vmem:[%s25320_s5 + $0xd48] sm:$0xff]  ;;  %v16343_v29 = vcombine.high %v3516_v25, %v3520_v17  ;;  %v16342_v49 = vcombine.low %v3516_v25, %v3520_v17 }
 0x47c   : > { %13407 = vmatprep.subr.bf16.mxu1 %v16191_v61  ;;  %v3592_v23 = vld [vmem:[%s25320_s5 + $0xd68] sm:$0xff] }
 0x47d   : > { %13435 = vmatpush1.bf16.msra.mxu0 %v16246_v52  ;;  %v3508_v8 = vld [vmem:[%s25320_s5 + $0xac8] sm:$0xff]  ;;  %v16415_v11 = vcombine.high %v3588_v40, %v3592_v23  ;;  %v16414_v18 = vcombine.low %v3588_v40, %v3592_v23 }
 0x47e   : > { %13436 = vmatprep.subr.bf16.mxu0 %v16367_v7  ;;  %v3512_v1 = vld [vmem:[%s25320_s5 + $0xae8] sm:$0xff] }
 0x47f   : > { %13408 = vmatpush2.bf16.msra.mxu1 %v16190_v51  ;;  %v3580_v46 = vld [vmem:[%s25320_s5 + $0xd08] sm:$0xff]  ;;  %v16335_v52 = vcombine.high %v3508_v8, %v3512_v1  ;;  %v16334_v3 = vcombine.low %v3508_v8, %v3512_v1 }
 0x480   : > { %13409 = vmatprep.subr.bf16.mxu1 %v16183_v20  ;;  %v3584_v61 = vld [vmem:[%s25320_s5 + $0xd28] sm:$0xff] }
 0x481   : > { %13437 = vmatpush2.bf16.msra.mxu0 %v16366_v26  ;;  %v3500_v28 = vld [vmem:[%s25320_s5 + $0xa88] sm:$0xff]  ;;  %v16407_v51 = vcombine.high %v3580_v46, %v3584_v61  ;;  %v16406_v19 = vcombine.low %v3580_v46, %v3584_v61 }
 0x482   : > { %13438 = vmatprep.subr.bf16.mxu0 %v16359_v50  ;;  %v3504_v7 = vld [vmem:[%s25320_s5 + $0xaa8] sm:$0xff] }
 0x483   : > { %13410 = vmatpush2.bf16.msra.mxu1 %v16182_v35  ;;  %v3572_v13 = vld [vmem:[%s25320_s5 + $0xcc8] sm:$0xff]  ;;  %v16327_v26 = vcombine.high %v3500_v28, %v3504_v7  ;;  %v16326_v56 = vcombine.low %v3500_v28, %v3504_v7 }
 0x484   : > { %13461 = vmatprep.subr.bf16.mxu1 %v16431_v45  ;;  %v3576_v20 = vld [vmem:[%s25320_s5 + $0xce8] sm:$0xff] }
 0x485   : > { %13439 = vmatpush2.bf16.msra.mxu0 %v16358_v32  ;;  %v3492_v24 = vld [vmem:[%s25320_s5 + $0xa48] sm:$0xff]  ;;  %v16399_v35 = vcombine.high %v3572_v13, %v3576_v20  ;;  %v16398_v33 = vcombine.low %v3572_v13, %v3576_v20 }
 0x486   : > { %13412 = vmatmul.mubr.bf16.vlgmr.msra.gmra.mxu1 %v20023_v47  ;;  %13440 = vmatprep.subr.bf16.mxu0 %v16351_v59  ;;  %v3496_v50 = vld [vmem:[%s25320_s5 + $0xa68] sm:$0xff] }
 0x487   : > { %13462 = vmatpush1.bf16.msra.mxu1 %v16430_v44  ;;  %13493 = vmatprep.mubr.bf16.mxu1 %v20134_v37  ;;  %v3564_v14 = vld [vmem:[%s25320_s5 + $0xc88] sm:$0xff]  ;;  %v16319_v32 = vcombine.high %v3492_v24, %v3496_v50  ;;  %v16318_v25 = vcombine.low %v3492_v24, %v3496_v50 }
 0x488   : > { %13463 = vmatprep.subr.bf16.mxu1 %v16423_v43  ;;  %v3568_v45 = vld [vmem:[%s25320_s5 + $0xca8] sm:$0xff] }
 0x489   : > { %13441 = vmatpush2.bf16.msra.mxu0 %v16350_v41  ;;  %v3484_v58 = vld [vmem:[%s25320_s5 + $0xa08] sm:$0xff]  ;;  %v16391_v44 = vcombine.high %v3564_v14, %v3568_v45  ;;  %v16390_v40 = vcombine.low %v3564_v14, %v3568_v45 }
 0x48a   : > { %13442 = vmatprep.subr.bf16.mxu0 %v16343_v29  ;;  %v3488_v59 = vld [vmem:[%s25320_s5 + $0xa28] sm:$0xff] }
 0x48b   : > { %13464 = vmatpush1.bf16.msra.mxu1 %v16422_v27  ;;  %v3556_v17 = vld [vmem:[%s25320_s5 + $0xc48] sm:$0xff]  ;;  %v16311_v41 = vcombine.high %v3484_v58, %v3488_v59  ;;  %v16310_v8 = vcombine.low %v3484_v58, %v3488_v59 }
 0x48c   : > { %13465 = vmatprep.subr.bf16.mxu1 %v16415_v11  ;;  %v3560_v43 = vld [vmem:[%s25320_s5 + $0xc68] sm:$0xff] }
 0x48d   : > { %13443 = vmatpush2.bf16.msra.mxu0 %v16342_v49  ;;  %v3732_v23 = vld [vmem:[%s25320_s5 + $0x11c8] sm:$0xff]  ;;  %v16383_v27 = vcombine.high %v3556_v17, %v3560_v43  ;;  %v16382_v46 = vcombine.low %v3556_v17, %v3560_v43 }
 0x48e   : > { %13444 = vmatprep.subr.bf16.mxu0 %v16335_v52  ;;  %v3736_v29 = vld [vmem:[%s25320_s5 + $0x11e8] sm:$0xff] }
 0x48f   : > { %13466 = vmatpush1.bf16.msra.mxu1 %v16414_v18  ;;  %v3548_v1 = vld [vmem:[%s25320_s5 + $0xc08] sm:$0xff]  ;;  %v16559_v49 = vcombine.high %v3732_v23, %v3736_v29  ;;  %v16558_v28 = vcombine.low %v3732_v23, %v3736_v29 }
 0x490   : > { %13467 = vmatprep.subr.bf16.mxu1 %v16407_v51  ;;  %v3552_v11 = vld [vmem:[%s25320_s5 + $0xc28] sm:$0xff] }
 0x491   : > { %13445 = vmatpush2.bf16.msra.mxu0 %v16334_v3  ;;  %v3724_v61 = vld [vmem:[%s25320_s5 + $0x1188] sm:$0xff]  ;;  %v16375_v18 = vcombine.high %v3548_v1, %v3552_v11  ;;  %v16374_v13 = vcombine.low %v3548_v1, %v3552_v11 }
 0x492   : > { %13446 = vmatprep.subr.bf16.mxu0 %v16327_v26  ;;  %v3728_v52 = vld [vmem:[%s25320_s5 + $0x11a8] sm:$0xff] }
 0x493   : > { %13468 = vmatpush1.bf16.msra.mxu1 %v16406_v19  ;;  %v3668_v7 = vld [vmem:[%s25320_s5 + $0xfc8] sm:$0xff]  ;;  %v16551_v3 = vcombine.high %v3724_v61, %v3728_v52  ;;  %v16550_v50 = vcombine.low %v3724_v61, %v3728_v52 }
 0x494   : > { %13469 = vmatprep.subr.bf16.mxu1 %v16399_v35  ;;  %v3672_v51 = vld [vmem:[%s25320_s5 + $0xfe8] sm:$0xff] }
 0x495   : > { %13447 = vmatpush2.bf16.msra.mxu0 %v16326_v56  ;;  %v3716_v20 = vld [vmem:[%s25320_s5 + $0x1148] sm:$0xff]  ;;  %v16495_v24 = vcombine.high %v3668_v7, %v3672_v51 }
 0x496   : > { %13448 = vmatprep.subr.bf16.mxu0 %v16319_v32  ;;  %v3720_v26 = vld [vmem:[%s25320_s5 + $0x1168] sm:$0xff]  ;;  %v16494_v32 = vcombine.low %v3668_v7, %v3672_v51 }
 0x497   : > { %13470 = vmatpush1.bf16.msra.mxu1 %v16398_v33  ;;  %v3660_v35 = vld [vmem:[%s25320_s5 + $0xf88] sm:$0xff]  ;;  %v16543_v45 = vcombine.high %v3716_v20, %v3720_v26 }
 0x498   : > { %13471 = vmatprep.subr.bf16.mxu1 %v16391_v44  ;;  %v3664_v56 = vld [vmem:[%s25320_s5 + $0xfa8] sm:$0xff] }
 0x499   : > { %13449 = vmatpush2.bf16.msra.mxu0 %v16318_v25  ;;  %v3708_v33 = vld [vmem:[%s25320_s5 + $0x1108] sm:$0xff]  ;;  %v16487_v44 = vcombine.high %v3660_v35, %v3664_v56  ;;  %v16542_v25 = vcombine.low %v3716_v20, %v3720_v26 }
 0x49a   : > { %13450 = vmatprep.subr.bf16.mxu0 %v16311_v41  ;;  %v3712_v58 = vld [vmem:[%s25320_s5 + $0x1128] sm:$0xff] }
 0x49b   : > { %13472 = vmatpush1.bf16.msra.mxu1 %v16390_v40  ;;  %v3652_v17 = vld [vmem:[%s25320_s5 + $0xf48] sm:$0xff]  ;;  %v16535_v23 = vcombine.high %v3708_v33, %v3712_v58  ;;  %v16534_v61 = vcombine.low %v3708_v33, %v3712_v58 }
 0x49c   : > { %13473 = vmatprep.subr.bf16.mxu1 %v16383_v27  ;;  %v3656_v43 = vld [vmem:[%s25320_s5 + $0xf68] sm:$0xff]  ;;  %v16486_v27 = vcombine.low %v3660_v35, %v3664_v56 }
 0x49d   : > { %13451 = vmatpush2.bf16.msra.mxu0 %v16310_v8  ;;  %v3700_v8 = vld [vmem:[%s25320_s5 + $0x10c8] sm:$0xff]  ;;  %v16478_v51 = vcombine.low %v3652_v17, %v3656_v43 }
 0x49e   : > { %13502 = vmatprep.subr.bf16.mxu0 %v16559_v49  ;;  %v3704_v1 = vld [vmem:[%s25320_s5 + $0x10e8] sm:$0xff]  ;;  %v16479_v49 = vcombine.high %v3652_v17, %v3656_v43 }
 0x49f   : > { %13474 = vmatpush1.bf16.msra.mxu1 %v16382_v46  ;;  %v3648_v52 = vld [vmem:[%s25320_s5 + $0xf28] sm:$0xff]  ;;  %v16527_v7 = vcombine.high %v3700_v8, %v3704_v1 }
 0x4a0   : > { %v13208_v19 = vpop.f32.mrf.mxu0  ;;  %13453 = vmatmul.mubr.bf16.vlgmr.msra.gmra.mxu0 %v20344_v39  ;;  %13475 = vmatprep.subr.bf16.mxu1 %v16375_v18  ;;  %v3628_v58 = vld [vmem:[%s25320_s5 + $0xe88] sm:$0xff] }
 0x4a1   : > { %13503 = vmatpush1.bf16.msra.mxu0 %v16558_v28  ;;  %13534 = vmatprep.mubr.bf16.mxu0 %v20346_v2  ;;  %v3676_v17 = vld [vmem:[%s25320_s5 + $0x1008] sm:$0xff] }
 0x4a2   : > { %v13210_v14 = vpop.f32.mrf.mxu0  ;;  %13504 = vmatprep.subr.bf16.mxu0 %v16551_v3  ;;  %v3696_v3 = vld [vmem:[%s25320_s5 + $0x10a8] sm:$0xff] }
 0x4a3   : > { %13476 = vmatpush1.bf16.msra.mxu1 %v16374_v13  ;;  %v3680_v43 = vld [vmem:[%s25320_s5 + $0x1028] sm:$0xff] }
 0x4a4   : > { %v13212_v59 = vpop.f32.mrf.mxu0  ;;  %13477 = vmatprep.subr.bf16.mxu1 %v16495_v24  ;;  %v3636_v24 = vld [vmem:[%s25320_s5 + $0xec8] sm:$0xff] }
 0x4a5   : > { %13505 = vmatpush1.bf16.msra.mxu0 %v16550_v50  ;;  %v3640_v50 = vld [vmem:[%s25320_s5 + $0xee8] sm:$0xff] }
 0x4a6   : > { %v13167_v41 = vpop.f32.mrf.mxu1  ;;  %v13213_v40 = vpop.f32.mrf.mxu0  ;;  %13506 = vmatprep.subr.bf16.mxu0 %v16543_v45  ;;  %v3688_v45 = vld [vmem:[%s25320_s5 + $0x1068] sm:$0xff] }
 0x4a7   : > { %v13168_v29 = vadd.f32 %v13167_v41, %v21421_v6  ;;  %13478 = vmatpush2.bf16.msra.mxu1 %v16494_v32  ;;  %v3644_v6 = vld [vmem:[%s25320_s5 + $0xf08] sm:$0xff]  ;;  %v16463_v32 = vcombine.high %v3636_v24, %v3640_v50 }
 0x4a8   : > { %v13169_v11 = vpop.f32.mrf.mxu1  ;;  %13479 = vmatprep.subr.bf16.mxu1 %v16487_v44  ;;  %v16471_v26 = vcombine.high %v3644_v6, %v3648_v52  ;;  %v16470_v56 = vcombine.low %v3644_v6, %v3648_v52  ;;  %v3632_v59 = vld [vmem:[%s25320_s5 + $0xea8] sm:$0xff] }
 0x4a9   : > { %v13170_v46 = vadd.f32 %v13169_v11, %v21429_v38  ;;  %13507 = vmatpush1.bf16.msra.mxu0 %v16542_v25  ;;  %v21623_v18 = vadd.f32 %v13208_v19, %v13168_v29  ;;  %v3692_v38 = vld [vmem:[%s25320_s5 + $0x1088] sm:$0xff]  ;;  %v16526_v19 = vcombine.low %v3700_v8, %v3704_v1  ;;  %v16462_v25 = vcombine.low %v3636_v24, %v3640_v50 }
 0x4aa   : > { %v13171_v28 = vpop.f32.mrf.mxu1  ;;  %13508 = vmatprep.subr.bf16.mxu0 %v16535_v23  ;;  %v16519_v35 = vcombine.high %v3692_v38, %v3696_v3  ;;  %v16518_v33 = vcombine.low %v3692_v38, %v3696_v3  ;;  %v16455_v41 = vcombine.high %v3628_v58, %v3632_v59  ;;  %v3620_v23 = vld [vmem:[%s25320_s5 + $0xe48] sm:$0xff]  ;;  %v16454_v8 = vcombine.low %v3628_v58, %v3632_v59 }
 0x4ab   : > { %13480 = vmatpush2.bf16.msra.mxu1 %v16486_v27  ;;  %v21631_v13 = vadd.f32 %v13210_v14, %v13170_v46  ;;  %v3684_v14 = vld [vmem:[%s25320_s5 + $0x1048] sm:$0xff]  ;;  %v16503_v27 = vcombine.high %v3676_v17, %v3680_v43  ;;  %v16502_v46 = vcombine.low %v3676_v17, %v3680_v43 }
 0x4ac   : > { %v13172_v20 = vpop.f32.mrf.mxu1  ;;  %13481 = vmatprep.subr.bf16.mxu1 %v16479_v49  ;;  %v16511_v44 = vcombine.high %v3684_v14, %v3688_v45  ;;  %v16510_v40 = vcombine.low %v3684_v14, %v3688_v45  ;;  %v3624_v29 = vld [vmem:[%s25320_s5 + $0xe68] sm:$0xff] }
 0x4ad   : > { %13509 = vmatpush1.bf16.msra.mxu0 %v16534_v61  ;;  %v3796_v1 = vld [vmem:[%s25320_s5 + $0x13c8] sm:$0xff]  ;;  %v16447_v49 = vcombine.high %v3620_v23, %v3624_v29  ;;  %v16446_v28 = vcombine.low %v3620_v23, %v3624_v29 }
 0x4ae   : > { %13510 = vmatprep.subr.bf16.mxu0 %v16527_v7  ;;  %v3800_v11 = vld [vmem:[%s25320_s5 + $0x13e8] sm:$0xff] }
 0x4af   : > { %13482 = vmatpush2.bf16.msra.mxu1 %v16478_v51  ;;  %v3612_v61 = vld [vmem:[%s25320_s5 + $0xe08] sm:$0xff]  ;;  %v16623_v52 = vcombine.high %v3796_v1, %v3800_v11  ;;  %v16622_v3 = vcombine.low %v3796_v1, %v3800_v11 }
 0x4b0   : > { %13483 = vmatprep.subr.bf16.mxu1 %v16471_v26  ;;  %v3616_v6 = vld [vmem:[%s25320_s5 + $0xe28] sm:$0xff] }
 0x4b1   : > { %13511 = vmatpush1.bf16.msra.mxu0 %v16526_v19  ;;  %v3788_v7 = vld [vmem:[%s25320_s5 + $0x1388] sm:$0xff]  ;;  %v16439_v38 = vcombine.high %v3612_v61, %v3616_v6  ;;  %v16438_v24 = vcombine.low %v3612_v61, %v3616_v6 }
 0x4b2   : > { %13512 = vmatprep.subr.bf16.mxu0 %v16519_v35  ;;  %v3792_v51 = vld [vmem:[%s25320_s5 + $0x13a8] sm:$0xff] }
 0x4b3   : > { %13484 = vmatpush2.bf16.msra.mxu1 %v16470_v56  ;;  %v3860_v20 = vld [vmem:[%s25320_s5 + $0x15c8] sm:$0xff]  ;;  %v16615_v19 = vcombine.high %v3788_v7, %v3792_v51  ;;  %v16614_v14 = vcombine.low %v3788_v7, %v3792_v51 }
 0x4b4   : > { %13485 = vmatprep.subr.bf16.mxu1 %v16463_v32  ;;  %v3864_v26 = vld [vmem:[%s25320_s5 + $0x15e8] sm:$0xff] }
 0x4b5   : > { %13513 = vmatpush1.bf16.msra.mxu0 %v16518_v33  ;;  %v3780_v50 = vld [vmem:[%s25320_s5 + $0x1348] sm:$0xff]  ;;  %v16687_v56 = vcombine.high %v3860_v20, %v3864_v26  ;;  %v16686_v58 = vcombine.low %v3860_v20, %v3864_v26 }
 0x4b6   : > { %13514 = vmatprep.subr.bf16.mxu0 %v16511_v44  ;;  %v3784_v35 = vld [vmem:[%s25320_s5 + $0x1368] sm:$0xff] }
 0x4b7   : > { %13486 = vmatpush2.bf16.msra.mxu1 %v16462_v25  ;;  %v3852_v45 = vld [vmem:[%s25320_s5 + $0x1588] sm:$0xff]  ;;  %v16607_v33 = vcombine.high %v3780_v50, %v3784_v35  ;;  %v16606_v17 = vcombine.low %v3780_v50, %v3784_v35 }
 0x4b8   : > { %13487 = vmatprep.subr.bf16.mxu1 %v16455_v41  ;;  %v3856_v32 = vld [vmem:[%s25320_s5 + $0x15a8] sm:$0xff] }
 0x4b9   : > { %13515 = vmatpush1.bf16.msra.mxu0 %v16510_v40  ;;  %v3772_v59 = vld [vmem:[%s25320_s5 + $0x1308] sm:$0xff]  ;;  %v16679_v25 = vcombine.high %v3852_v45, %v3856_v32  ;;  %v16678_v23 = vcombine.low %v3852_v45, %v3856_v32 }
 0x4ba   : > { %13516 = vmatprep.subr.bf16.mxu0 %v16503_v27  ;;  %v3776_v44 = vld [vmem:[%s25320_s5 + $0x1328] sm:$0xff] }
 0x4bb   : > { %13488 = vmatpush2.bf16.msra.mxu1 %v16454_v8  ;;  %v3844_v43 = vld [vmem:[%s25320_s5 + $0x1548] sm:$0xff]  ;;  %v16599_v40 = vcombine.high %v3772_v59, %v3776_v44  ;;  %v16598_v1 = vcombine.low %v3772_v59, %v3776_v44 }
 0x4bc   : > { %13489 = vmatprep.subr.bf16.mxu1 %v16447_v49  ;;  %v3848_v41 = vld [vmem:[%s25320_s5 + $0x1568] sm:$0xff] }
 0x4bd   : > { %13517 = vmatpush1.bf16.msra.mxu0 %v16502_v46  ;;  %v3764_v29 = vld [vmem:[%s25320_s5 + $0x12c8] sm:$0xff]  ;;  %v16671_v8 = vcombine.high %v3844_v43, %v3848_v41  ;;  %v16670_v61 = vcombine.low %v3844_v43, %v3848_v41 }
 0x4be   : > { %13518 = vmatprep.subr.bf16.mxu0 %v16623_v52  ;;  %v3768_v27 = vld [vmem:[%s25320_s5 + $0x12e8] sm:$0xff] }
 0x4bf   : > { %13490 = vmatpush2.bf16.msra.mxu1 %v16446_v28  ;;  %v3836_v11 = vld [vmem:[%s25320_s5 + $0x1508] sm:$0xff]  ;;  %v16591_v46 = vcombine.high %v3764_v29, %v3768_v27  ;;  %v16590_v7 = vcombine.low %v3764_v29, %v3768_v27 }
 0x4c0   : > { %13491 = vmatprep.subr.bf16.mxu1 %v16439_v38  ;;  %v3840_v49 = vld [vmem:[%s25320_s5 + $0x1528] sm:$0xff] }
 0x4c1   : > { %13519 = vmatpush2.bf16.msra.mxu0 %v16622_v3  ;;  %v3756_v6 = vld [vmem:[%s25320_s5 + $0x1288] sm:$0xff]  ;;  %v16663_v28 = vcombine.high %v3836_v11, %v3840_v49  ;;  %v16662_v20 = vcombine.low %v3836_v11, %v3840_v49 }
 0x4c2   : > { %13520 = vmatprep.subr.bf16.mxu0 %v16615_v19  ;;  %v3760_v52 = vld [vmem:[%s25320_s5 + $0x12a8] sm:$0xff] }
 0x4c3   : > { %13492 = vmatpush2.bf16.msra.mxu1 %v16438_v24  ;;  %v3828_v51 = vld [vmem:[%s25320_s5 + $0x14c8] sm:$0xff]  ;;  %v16583_v3 = vcombine.high %v3756_v6, %v3760_v52  ;;  %v16582_v50 = vcombine.low %v3756_v6, %v3760_v52 }
 0x4c4   : > { %13543 = vmatprep.subr.bf16.mxu1 %v16687_v56  ;;  %v3832_v38 = vld [vmem:[%s25320_s5 + $0x14e8] sm:$0xff] }
 0x4c5   : > { %13521 = vmatpush2.bf16.msra.mxu0 %v16614_v14  ;;  %v3748_v26 = vld [vmem:[%s25320_s5 + $0x1248] sm:$0xff]  ;;  %v16655_v24 = vcombine.high %v3828_v51, %v3832_v38  ;;  %v16654_v45 = vcombine.low %v3828_v51, %v3832_v38 }
 0x4c6   : > { %13494 = vmatmul.mubr.bf16.vlgmr.msra.gmra.mxu1 %v20315_v4  ;;  %13522 = vmatprep.subr.bf16.mxu0 %v16607_v33  ;;  %v3752_v19 = vld [vmem:[%s25320_s5 + $0x1268] sm:$0xff] }
 0x4c7   : > { %13544 = vmatpush1.bf16.msra.mxu1 %v16686_v58  ;;  %13575 = vmatprep.mubr.bf16.mxu1 %v20317_v16  ;;  %v3820_v35 = vld [vmem:[%s25320_s5 + $0x1488] sm:$0xff]  ;;  %v16575_v14 = vcombine.high %v3748_v26, %v3752_v19  ;;  %v16574_v59 = vcombine.low %v3748_v26, %v3752_v19 }
 0x4c8   : > { %13545 = vmatprep.subr.bf16.mxu1 %v16679_v25  ;;  %v3824_v56 = vld [vmem:[%s25320_s5 + $0x14a8] sm:$0xff] }
 0x4c9   : > { %13523 = vmatpush2.bf16.msra.mxu0 %v16606_v17  ;;  %v3740_v32 = vld [vmem:[%s25320_s5 + $0x1208] sm:$0xff]  ;;  %v16647_v58 = vcombine.high %v3820_v35, %v3824_v56  ;;  %v16646_v43 = vcombine.low %v3820_v35, %v3824_v56 }
 0x4ca   : > { %13524 = vmatprep.subr.bf16.mxu0 %v16599_v40  ;;  %v3744_v33 = vld [vmem:[%s25320_s5 + $0x1228] sm:$0xff] }
 0x4cb   : > { %13546 = vmatpush1.bf16.msra.mxu1 %v16678_v23  ;;  %v3812_v44 = vld [vmem:[%s25320_s5 + $0x1448] sm:$0xff]  ;;  %v16567_v17 = vcombine.high %v3740_v32, %v3744_v33  ;;  %v16566_v29 = vcombine.low %v3740_v32, %v3744_v33 }
 0x4cc   : > { %13547 = vmatprep.subr.bf16.mxu1 %v16671_v8  ;;  %v3816_v25 = vld [vmem:[%s25320_s5 + $0x1468] sm:$0xff] }
 0x4cd   : > { %13525 = vmatpush2.bf16.msra.mxu0 %v16598_v1  ;;  %v3988_v41 = vld [vmem:[%s25320_s5 + $0x19c8] sm:$0xff]  ;;  %v16639_v23 = vcombine.high %v3812_v44, %v3816_v25  ;;  %v16638_v11 = vcombine.low %v3812_v44, %v3816_v25 }
 0x4ce   : > { %13526 = vmatprep.subr.bf16.mxu0 %v16591_v46  ;;  %v3992_v40 = vld [vmem:[%s25320_s5 + $0x19e8] sm:$0xff] }
 0x4cf   : > { %13548 = vmatpush1.bf16.msra.mxu1 %v16670_v61  ;;  %v3804_v27 = vld [vmem:[%s25320_s5 + $0x1408] sm:$0xff]  ;;  %v16815_v1 = vcombine.high %v3988_v41, %v3992_v40  ;;  %v16814_v6 = vcombine.low %v3988_v41, %v3992_v40 }
 0x4d0   : > { %13549 = vmatprep.subr.bf16.mxu1 %v16663_v28  ;;  %v3808_v8 = vld [vmem:[%s25320_s5 + $0x1428] sm:$0xff] }
 0x4d1   : > { %13527 = vmatpush2.bf16.msra.mxu0 %v16590_v7  ;;  %v3980_v49 = vld [vmem:[%s25320_s5 + $0x1988] sm:$0xff]  ;;  %v16631_v61 = vcombine.high %v3804_v27, %v3808_v8  ;;  %v16630_v51 = vcombine.low %v3804_v27, %v3808_v8 }
 0x4d2   : > { %13528 = vmatprep.subr.bf16.mxu0 %v16583_v3  ;;  %v3984_v46 = vld [vmem:[%s25320_s5 + $0x19a8] sm:$0xff] }
 0x4d3   : > { %13550 = vmatpush1.bf16.msra.mxu1 %v16662_v20  ;;  %v3924_v52 = vld [vmem:[%s25320_s5 + $0x17c8] sm:$0xff]  ;;  %v16807_v7 = vcombine.high %v3980_v49, %v3984_v46  ;;  %v16806_v19 = vcombine.low %v3980_v49, %v3984_v46 }
 0x4d4   : > { %13551 = vmatprep.subr.bf16.mxu1 %v16655_v24  ;;  %v3928_v28 = vld [vmem:[%s25320_s5 + $0x17e8] sm:$0xff] }
 0x4d5   : > { %13529 = vmatpush2.bf16.msra.mxu0 %v16582_v50  ;;  %v3972_v38 = vld [vmem:[%s25320_s5 + $0x1948] sm:$0xff]  ;;  %v16751_v26 = vcombine.high %v3924_v52, %v3928_v28 }
 0x4d6   : > { %13530 = vmatprep.subr.bf16.mxu0 %v16575_v14  ;;  %v3976_v3 = vld [vmem:[%s25320_s5 + $0x1968] sm:$0xff]  ;;  %v16750_v14 = vcombine.low %v3924_v52, %v3928_v28 }
 0x4d7   : > { %13552 = vmatpush1.bf16.msra.mxu1 %v16654_v45  ;;  %v3916_v24 = vld [vmem:[%s25320_s5 + $0x1788] sm:$0xff]  ;;  %v16799_v56 = vcombine.high %v3972_v38, %v3976_v3 }
 0x4d8   : > { %13553 = vmatprep.subr.bf16.mxu1 %v16647_v58  ;;  %v3920_v50 = vld [vmem:[%s25320_s5 + $0x17a8] sm:$0xff] }
 0x4d9   : > { %13531 = vmatpush2.bf16.msra.mxu0 %v16574_v59  ;;  %v3964_v45 = vld [vmem:[%s25320_s5 + $0x1908] sm:$0xff]  ;;  %v16743_v58 = vcombine.high %v3916_v24, %v3920_v50  ;;  %v16798_v59 = vcombine.low %v3972_v38, %v3976_v3 }
 0x4da   : > { %13532 = vmatprep.subr.bf16.mxu0 %v16567_v17  ;;  %v3968_v32 = vld [vmem:[%s25320_s5 + $0x1928] sm:$0xff] }
 0x4db   : > { %13554 = vmatpush1.bf16.msra.mxu1 %v16646_v43  ;;  %v3908_v44 = vld [vmem:[%s25320_s5 + $0x1748] sm:$0xff]  ;;  %v16791_v41 = vcombine.high %v3964_v45, %v3968_v32  ;;  %v16790_v49 = vcombine.low %v3964_v45, %v3968_v32 }
 0x4dc   : > { %13555 = vmatprep.subr.bf16.mxu1 %v16639_v23  ;;  %v3912_v25 = vld [vmem:[%s25320_s5 + $0x1768] sm:$0xff]  ;;  %v16742_v23 = vcombine.low %v3916_v24, %v3920_v50 }
 0x4dd   : > { %13533 = vmatpush2.bf16.msra.mxu0 %v16566_v29  ;;  %v3956_v29 = vld [vmem:[%s25320_s5 + $0x18c8] sm:$0xff]  ;;  %v16734_v28 = vcombine.low %v3908_v44, %v3912_v25 }
 0x4de   : > { %13584 = vmatprep.subr.bf16.mxu0 %v16815_v1  ;;  %v3960_v27 = vld [vmem:[%s25320_s5 + $0x18e8] sm:$0xff]  ;;  %v16735_v1 = vcombine.high %v3908_v44, %v3912_v25 }
 0x4df   : > { %13556 = vmatpush1.bf16.msra.mxu1 %v16638_v11  ;;  %v3904_v46 = vld [vmem:[%s25320_s5 + $0x1728] sm:$0xff]  ;;  %v16783_v52 = vcombine.high %v3956_v29, %v3960_v27 }
 0x4e0   : > { %v13290_v20 = vpop.f32.mrf.mxu0  ;;  %13535 = vmatmul.mubr.bf16.vlgmr.msra.gmra.mxu0 %v20554_v36  ;;  %13557 = vmatprep.subr.bf16.mxu1 %v16631_v61  ;;  %v3884_v32 = vld [vmem:[%s25320_s5 + $0x1688] sm:$0xff] }
 0x4e1   : > { %13585 = vmatpush1.bf16.msra.mxu0 %v16814_v6  ;;  %13616 = vmatprep.mubr.bf16.mxu0 %v20556_v21  ;;  %v3932_v44 = vld [vmem:[%s25320_s5 + $0x1808] sm:$0xff] }
 0x4e2   : > { %v13292_v35 = vpop.f32.mrf.mxu0  ;;  %13586 = vmatprep.subr.bf16.mxu0 %v16807_v7  ;;  %v3952_v7 = vld [vmem:[%s25320_s5 + $0x18a8] sm:$0xff] }
 0x4e3   : > { %13558 = vmatpush1.bf16.msra.mxu1 %v16630_v51  ;;  %v3936_v25 = vld [vmem:[%s25320_s5 + $0x1828] sm:$0xff] }
 0x4e4   : > { %v13294_v33 = vpop.f32.mrf.mxu0  ;;  %13559 = vmatprep.subr.bf16.mxu1 %v16751_v26  ;;  %v3892_v26 = vld [vmem:[%s25320_s5 + $0x16c8] sm:$0xff] }
 0x4e5   : > { %13587 = vmatpush1.bf16.msra.mxu0 %v16806_v19  ;;  %v3896_v19 = vld [vmem:[%s25320_s5 + $0x16e8] sm:$0xff] }
 0x4e6   : > { %v13249_v17 = vpop.f32.mrf.mxu1  ;;  %v13295_v43 = vpop.f32.mrf.mxu0  ;;  %13588 = vmatprep.subr.bf16.mxu0 %v16799_v56  ;;  %v3944_v56 = vld [vmem:[%s25320_s5 + $0x1868] sm:$0xff] }
 0x4e7   : > { %v13250_v40 = vadd.f32 %v13249_v17, %v21623_v18  ;;  %13560 = vmatpush2.bf16.msra.mxu1 %v16750_v14  ;;  %v3900_v18 = vld [vmem:[%s25320_s5 + $0x1708] sm:$0xff]  ;;  %v16719_v14 = vcombine.high %v3892_v26, %v3896_v19 }
 0x4e8   : > { %v13251_v8 = vpop.f32.mrf.mxu1  ;;  %13561 = vmatprep.subr.bf16.mxu1 %v16743_v58  ;;  %v16727_v3 = vcombine.high %v3900_v18, %v3904_v46  ;;  %v16726_v50 = vcombine.low %v3900_v18, %v3904_v46  ;;  %v3888_v33 = vld [vmem:[%s25320_s5 + $0x16a8] sm:$0xff] }
 0x4e9   : > { %v13252_v11 = vadd.f32 %v13251_v8, %v21631_v13  ;;  %13589 = vmatpush1.bf16.msra.mxu0 %v16798_v59  ;;  %v21825_v61 = vadd.f32 %v13290_v20, %v13250_v40  ;;  %v3948_v13 = vld [vmem:[%s25320_s5 + $0x1888] sm:$0xff]  ;;  %v16782_v20 = vcombine.low %v3956_v29, %v3960_v27  ;;  %v16718_v59 = vcombine.low %v3892_v26, %v3896_v19 }
 0x4ea   : > { %v13253_v6 = vpop.f32.mrf.mxu1  ;;  %13590 = vmatprep.subr.bf16.mxu0 %v16791_v41  ;;  %v16775_v24 = vcombine.high %v3948_v13, %v3952_v7  ;;  %v16774_v45 = vcombine.low %v3948_v13, %v3952_v7  ;;  %v16711_v17 = vcombine.high %v3884_v32, %v3888_v33  ;;  %v3876_v41 = vld [vmem:[%s25320_s5 + $0x1648] sm:$0xff]  ;;  %v16710_v29 = vcombine.low %v3884_v32, %v3888_v33 }
 0x4eb   : > { %13562 = vmatpush2.bf16.msra.mxu1 %v16742_v23  ;;  %v21833_v51 = vadd.f32 %v13292_v35, %v13252_v11  ;;  %v3940_v35 = vld [vmem:[%s25320_s5 + $0x1848] sm:$0xff]  ;;  %v16759_v23 = vcombine.high %v3932_v44, %v3936_v25  ;;  %v16758_v11 = vcombine.low %v3932_v44, %v3936_v25 }
 0x4ec   : > { %v13254_v38 = vpop.f32.mrf.mxu1  ;;  %13563 = vmatprep.subr.bf16.mxu1 %v16735_v1  ;;  %v16767_v58 = vcombine.high %v3940_v35, %v3944_v56  ;;  %v16766_v43 = vcombine.low %v3940_v35, %v3944_v56  ;;  %v3880_v40 = vld [vmem:[%s25320_s5 + $0x1668] sm:$0xff] }
 0x4ed   : > { %13591 = vmatpush1.bf16.msra.mxu0 %v16790_v49  ;;  %v4052_v27 = vld [vmem:[%s25320_s5 + $0x1bc8] sm:$0xff]  ;;  %v16703_v1 = vcombine.high %v3876_v41, %v3880_v40  ;;  %v16702_v6 = vcombine.low %v3876_v41, %v3880_v40 }
 0x4ee   : > { %13592 = vmatprep.subr.bf16.mxu0 %v16783_v52  ;;  %v4056_v8 = vld [vmem:[%s25320_s5 + $0x1be8] sm:$0xff] }
 0x4ef   : > { %13564 = vmatpush2.bf16.msra.mxu1 %v16734_v28  ;;  %v3868_v49 = vld [vmem:[%s25320_s5 + $0x1608] sm:$0xff]  ;;  %v16879_v46 = vcombine.high %v4052_v27, %v4056_v8  ;;  %v16878_v7 = vcombine.low %v4052_v27, %v4056_v8 }
 0x4f0   : > { %13565 = vmatprep.subr.bf16.mxu1 %v16727_v3  ;;  %v3872_v18 = vld [vmem:[%s25320_s5 + $0x1628] sm:$0xff] }
 0x4f1   : > { %13593 = vmatpush1.bf16.msra.mxu0 %v16782_v20  ;;  %v4044_v52 = vld [vmem:[%s25320_s5 + $0x1b88] sm:$0xff]  ;;  %v16695_v13 = vcombine.high %v3868_v49, %v3872_v18  ;;  %v16694_v26 = vcombine.low %v3868_v49, %v3872_v18 }
 0x4f2   : > { %13594 = vmatprep.subr.bf16.mxu0 %v16775_v24  ;;  %v4048_v28 = vld [vmem:[%s25320_s5 + $0x1ba8] sm:$0xff] }
 0x4f3   : > { %13566 = vmatpush2.bf16.msra.mxu1 %v16726_v50  ;;  %v4116_v38 = vld [vmem:[%s25320_s5 + $0x1dc8] sm:$0xff]  ;;  %v16871_v20 = vcombine.high %v4044_v52, %v4048_v28  ;;  %v16870_v35 = vcombine.low %v4044_v52, %v4048_v28 }
 0x4f4   : > { %13567 = vmatprep.subr.bf16.mxu1 %v16719_v14  ;;  %v4120_v3 = vld [vmem:[%s25320_s5 + $0x1de8] sm:$0xff] }
 0x4f5   : > { %13595 = vmatpush1.bf16.msra.mxu0 %v16774_v45  ;;  %v4036_v19 = vld [vmem:[%s25320_s5 + $0x1b48] sm:$0xff]  ;;  %v16943_v50 = vcombine.high %v4116_v38, %v4120_v3  ;;  %v16942_v32 = vcombine.low %v4116_v38, %v4120_v3 }
 0x4f6   : > { %13596 = vmatprep.subr.bf16.mxu0 %v16767_v58  ;;  %v4040_v24 = vld [vmem:[%s25320_s5 + $0x1b68] sm:$0xff] }
 0x4f7   : > { %13568 = vmatpush2.bf16.msra.mxu1 %v16718_v59  ;;  %v4108_v56 = vld [vmem:[%s25320_s5 + $0x1d88] sm:$0xff]  ;;  %v16863_v45 = vcombine.high %v4036_v19, %v4040_v24  ;;  %v16862_v44 = vcombine.low %v4036_v19, %v4040_v24 }
 0x4f8   : > { %13569 = vmatprep.subr.bf16.mxu1 %v16711_v17  ;;  %v4112_v14 = vld [vmem:[%s25320_s5 + $0x1da8] sm:$0xff] }
 0x4f9   : > { %13597 = vmatpush1.bf16.msra.mxu0 %v16766_v43  ;;  %v4028_v33 = vld [vmem:[%s25320_s5 + $0x1b08] sm:$0xff]  ;;  %v16935_v59 = vcombine.high %v4108_v56, %v4112_v14 }
 0x4fa   : > { %13598 = vmatprep.subr.bf16.mxu0 %v16759_v23  ;;  %v4032_v58 = vld [vmem:[%s25320_s5 + $0x1b28] sm:$0xff]  ;;  %v16934_v23 = vcombine.low %v4108_v56, %v4112_v14 }
 0x4fb   : > { %13570 = vmatpush2.bf16.msra.mxu1 %v16710_v29  ;;  %v4100_v25 = vld [vmem:[%s25320_s5 + $0x1d48] sm:$0xff]  ;;  %v16855_v41 = vcombine.high %v4028_v33, %v4032_v58 }
 0x4fc   : > { %13571 = vmatprep.subr.bf16.mxu1 %v16703_v1  ;;  %v4104_v17 = vld [vmem:[%s25320_s5 + $0x1d68] sm:$0xff] }
 0x4fd   : > { %13599 = vmatpush1.bf16.msra.mxu0 %v16758_v11  ;;  %v4020_v29 = vld [vmem:[%s25320_s5 + $0x1ac8] sm:$0xff]  ;;  %v16927_v1 = vcombine.high %v4100_v25, %v4104_v17  ;;  %v16926_v52 = vcombine.low %v4100_v25, %v4104_v17 }
 0x4fe   : > { %13600 = vmatprep.subr.bf16.mxu0 %v16879_v46  ;;  %v4024_v27 = vld [vmem:[%s25320_s5 + $0x1ae8] sm:$0xff] }
 0x4ff   : > { %13572 = vmatpush2.bf16.msra.mxu1 %v16702_v6  ;;  %v4092_v49 = vld [vmem:[%s25320_s5 + $0x1d08] sm:$0xff]  ;;  %v16847_v6 = vcombine.high %v4020_v29, %v4024_v27  ;;  %v16846_v38 = vcombine.low %v4020_v29, %v4024_v27 }
 0x500   : > { %13573 = vmatprep.subr.bf16.mxu1 %v16695_v13  ;;  %v4096_v18 = vld [vmem:[%s25320_s5 + $0x1d28] sm:$0xff] }
 0x501   : > { %13601 = vmatpush2.bf16.msra.mxu0 %v16878_v7  ;;  %v4016_v28 = vld [vmem:[%s25320_s5 + $0x1aa8] sm:$0xff]  ;;  %v16919_v7 = vcombine.high %v4092_v49, %v4096_v18  ;;  %v16918_v19 = vcombine.low %v4092_v49, %v4096_v18 }
 0x502   : > { %13602 = vmatprep.subr.bf16.mxu0 %v16871_v20  ;;  %v4084_v3 = vld [vmem:[%s25320_s5 + $0x1cc8] sm:$0xff] }
 0x503   : > { %13574 = vmatpush2.bf16.msra.mxu1 %v16694_v26  ;;  %v4088_v20 = vld [vmem:[%s25320_s5 + $0x1ce8] sm:$0xff] }
 0x504   : > { %13625 = vmatprep.subr.bf16.mxu1 %v16943_v50  ;;  %v4004_v24 = vld [vmem:[%s25320_s5 + $0x1a48] sm:$0xff] }
 0x505   : > { %13603 = vmatpush2.bf16.msra.mxu0 %v16870_v35  ;;  %v4008_v50 = vld [vmem:[%s25320_s5 + $0x1a68] sm:$0xff]  ;;  %v16911_v35 = vcombine.high %v4084_v3, %v4088_v20 }
 0x506   : > { %v13331_v43 = vpop.f32.mrf.mxu1  ;;  %13576 = vmatmul.mubr.bf16.vlgmr.msra.gmra.mxu1 %v20526_v15  ;;  %13604 = vmatprep.subr.bf16.mxu0 %v16863_v45  ;;  %v4076_v14 = vld [vmem:[%s25320_s5 + $0x1c88] sm:$0xff]  ;;  %v16830_v25 = vcombine.low %v4004_v24, %v4008_v50 }
 0x507   : > { %v21915_v40 = vadd.f32 %v13331_v43, %v21825_v61  ;;  %13626 = vmatpush1.bf16.msra.mxu1 %v16942_v32  ;;  %13657 = vmatprep.mubr.bf16.mxu1 %v20530_v54  ;;  %v16854_v61 = vcombine.low %v4028_v33, %v4032_v58  ;;  %v4080_v45 = vld [vmem:[%s25320_s5 + $0x1ca8] sm:$0xff]  ;;  %v16831_v32 = vcombine.high %v4004_v24, %v4008_v50 }
 0x508   : > { %v13333_v8 = vpop.f32.mrf.mxu1  ;;  %13627 = vmatprep.subr.bf16.mxu1 %v16935_v59  ;;  %v16910_v33 = vcombine.low %v4084_v3, %v4088_v20  ;;  %v3996_v58 = vld [vmem:[%s25320_s5 + $0x1a08] sm:$0xff] }
 0x509   : > { %v21925_v11 = vadd.f32 %v13333_v8, %v21833_v51  ;;  %13605 = vmatpush2.bf16.msra.mxu0 %v16862_v44  ;;  %v4012_v51 = vld [vmem:[%s25320_s5 + $0x1a88] sm:$0xff]  ;;  %v16903_v44 = vcombine.high %v4076_v14, %v4080_v45 }
 0x50a   : > { %v13335_v46 = vpop.f32.mrf.mxu1  ;;  %13606 = vmatprep.subr.bf16.mxu0 %v16855_v41  ;;  %v16839_v26 = vcombine.high %v4012_v51, %v4016_v28  ;;  %v16838_v56 = vcombine.low %v4012_v51, %v4016_v28  ;;  %v4000_v59 = vld [vmem:[%s25320_s5 + $0x1a28] sm:$0xff] }
 0x50b   : > { %13628 = vmatpush1.bf16.msra.mxu1 %v16934_v23  ;;  %v4068_v17 = vld [vmem:[%s25320_s5 + $0x1c48] sm:$0xff]  ;;  %v16823_v41 = vcombine.high %v3996_v58, %v4000_v59  ;;  %v16902_v23 = vcombine.low %v4076_v14, %v4080_v45 }
 0x50c   : > { %v13336_v13 = vpop.f32.mrf.mxu1  ;;  %13629 = vmatprep.subr.bf16.mxu1 %v16927_v1  ;;  %v4072_v43 = vld [vmem:[%s25320_s5 + $0x1c68] sm:$0xff]  ;;  %v16822_v1 = vcombine.low %v3996_v58, %v4000_v59 }
 0x50d   : > { %13607 = vmatpush2.bf16.msra.mxu0 %v16854_v61  ;;  %v4244_v29 = vld [vmem:[%s25320_s5 + $0x21c8] sm:$0xff]  ;;  %v16895_v8 = vcombine.high %v4068_v17, %v4072_v43  ;;  %v16894_v46 = vcombine.low %v4068_v17, %v4072_v43 }
 0x50e   : > { %13608 = vmatprep.subr.bf16.mxu0 %v16847_v6  ;;  %v4248_v27 = vld [vmem:[%s25320_s5 + $0x21e8] sm:$0xff] }
 0x50f   : > { %13630 = vmatpush1.bf16.msra.mxu1 %v16926_v52  ;;  %v4060_v61 = vld [vmem:[%s25320_s5 + $0x1c08] sm:$0xff]  ;;  %v17071_v18 = vcombine.high %v4244_v29, %v4248_v27  ;;  %v17070_v28 = vcombine.low %v4244_v29, %v4248_v27 }
 0x510   : > { %13631 = vmatprep.subr.bf16.mxu1 %v16919_v7  ;;  %v4064_v49 = vld [vmem:[%s25320_s5 + $0x1c28] sm:$0xff] }
 0x511   : > { %13609 = vmatpush2.bf16.msra.mxu0 %v16846_v38  ;;  %v4236_v6 = vld [vmem:[%s25320_s5 + $0x2188] sm:$0xff]  ;;  %v16887_v51 = vcombine.high %v4060_v61, %v4064_v49  ;;  %v16886_v3 = vcombine.low %v4060_v61, %v4064_v49 }
 0x512   : > { %13610 = vmatprep.subr.bf16.mxu0 %v16839_v26  ;;  %v4240_v52 = vld [vmem:[%s25320_s5 + $0x21a8] sm:$0xff] }
 0x513   : > { %13632 = vmatpush1.bf16.msra.mxu1 %v16918_v19  ;;  %v4180_v13 = vld [vmem:[%s25320_s5 + $0x1fc8] sm:$0xff]  ;;  %v17063_v38 = vcombine.high %v4236_v6, %v4240_v52  ;;  %v17062_v50 = vcombine.low %v4236_v6, %v4240_v52 }
 0x514   : > { %13633 = vmatprep.subr.bf16.mxu1 %v16911_v35  ;;  %v4184_v7 = vld [vmem:[%s25320_s5 + $0x1fe8] sm:$0xff] }
 0x515   : > { %13611 = vmatpush2.bf16.msra.mxu0 %v16838_v56  ;;  %v4228_v20 = vld [vmem:[%s25320_s5 + $0x2148] sm:$0xff]  ;;  %v17007_v24 = vcombine.high %v4180_v13, %v4184_v7 }
 0x516   : > { %13612 = vmatprep.subr.bf16.mxu0 %v16831_v32  ;;  %v4232_v26 = vld [vmem:[%s25320_s5 + $0x2168] sm:$0xff]  ;;  %v17006_v32 = vcombine.low %v4180_v13, %v4184_v7 }
 0x517   : > { %13634 = vmatpush1.bf16.msra.mxu1 %v16910_v33  ;;  %v4172_v35 = vld [vmem:[%s25320_s5 + $0x1f88] sm:$0xff]  ;;  %v17055_v45 = vcombine.high %v4228_v20, %v4232_v26 }
 0x518   : > { %13635 = vmatprep.subr.bf16.mxu1 %v16903_v44  ;;  %v4176_v56 = vld [vmem:[%s25320_s5 + $0x1fa8] sm:$0xff] }
 0x519   : > { %13613 = vmatpush2.bf16.msra.mxu0 %v16830_v25  ;;  %v4220_v33 = vld [vmem:[%s25320_s5 + $0x2108] sm:$0xff]  ;;  %v16999_v44 = vcombine.high %v4172_v35, %v4176_v56  ;;  %v17054_v25 = vcombine.low %v4228_v20, %v4232_v26  ;;  %v16998_v29 = vcombine.low %v4172_v35, %v4176_v56 }
 0x51a   : > { %13614 = vmatprep.subr.bf16.mxu0 %v16823_v41  ;;  %v4224_v58 = vld [vmem:[%s25320_s5 + $0x2128] sm:$0xff] }
 0x51b   : > { %13636 = vmatpush1.bf16.msra.mxu1 %v16902_v23  ;;  %v4164_v17 = vld [vmem:[%s25320_s5 + $0x1f48] sm:$0xff]  ;;  %v17047_v23 = vcombine.high %v4220_v33, %v4224_v58  ;;  %v17046_v61 = vcombine.low %v4220_v33, %v4224_v58 }
 0x51c   : > { %13637 = vmatprep.subr.bf16.mxu1 %v16895_v8  ;;  %v4168_v43 = vld [vmem:[%s25320_s5 + $0x1f68] sm:$0xff] }
 0x51d   : > { %13615 = vmatpush2.bf16.msra.mxu0 %v16822_v1  ;;  %v4212_v27 = vld [vmem:[%s25320_s5 + $0x20c8] sm:$0xff]  ;;  %v16991_v1 = vcombine.high %v4164_v17, %v4168_v43  ;;  %v16990_v6 = vcombine.low %v4164_v17, %v4168_v43 }
 0x51e   : > { %13666 = vmatprep.subr.bf16.mxu0 %v17071_v18  ;;  %v4216_v8 = vld [vmem:[%s25320_s5 + $0x20e8] sm:$0xff] }
 0x51f   : > { %13638 = vmatpush1.bf16.msra.mxu1 %v16894_v46  ;;  %v4156_v49 = vld [vmem:[%s25320_s5 + $0x1f08] sm:$0xff]  ;;  %v17039_v46 = vcombine.high %v4212_v27, %v4216_v8  ;;  %v17038_v13 = vcombine.low %v4212_v27, %v4216_v8 }
 0x520   : > { %v21999_v19 = vpop.f32.mrf.mxu0  ;;  %13617 = vmatmul.mubr.bf16.vlgmr.msra.gmra.mxu0 %v20770_v22  ;;  %13639 = vmatprep.subr.bf16.mxu1 %v16887_v51  ;;  %v4160_v18 = vld [vmem:[%s25320_s5 + $0x1f28] sm:$0xff] }
 0x521   : > { %13667 = vmatpush1.bf16.msra.mxu0 %v17070_v28  ;;  %13698 = vmatprep.mubr.bf16.mxu0 %v20772_v30  ;;  %v4204_v52 = vld [vmem:[%s25320_s5 + $0x2088] sm:$0xff]  ;;  %v16983_v28 = vcombine.high %v4156_v49, %v4160_v18  ;;  %v16982_v20 = vcombine.low %v4156_v49, %v4160_v18 }
 0x522   : > { %v22009_v14 = vpop.f32.mrf.mxu0  ;;  %13668 = vmatprep.subr.bf16.mxu0 %v17063_v38  ;;  %v4208_v51 = vld [vmem:[%s25320_s5 + $0x20a8] sm:$0xff] }
 0x523   : > { %13640 = vmatpush1.bf16.msra.mxu1 %v16886_v3  ;;  %v4148_v7 = vld [vmem:[%s25320_s5 + $0x1ec8] sm:$0xff]  ;;  %v17031_v3 = vcombine.high %v4204_v52, %v4208_v51  ;;  %v17030_v35 = vcombine.low %v4204_v52, %v4208_v51 }
 0x524   : > { %v13376_v59 = vpop.f32.mrf.mxu0  ;;  %13641 = vmatprep.subr.bf16.mxu1 %v17007_v24  ;;  %v4152_v38 = vld [vmem:[%s25320_s5 + $0x1ee8] sm:$0xff] }
 0x525   : > { %13669 = vmatpush1.bf16.msra.mxu0 %v17062_v50  ;;  %v4196_v26 = vld [vmem:[%s25320_s5 + $0x2048] sm:$0xff]  ;;  %v16975_v50 = vcombine.high %v4148_v7, %v4152_v38  ;;  %v16974_v33 = vcombine.low %v4148_v7, %v4152_v38 }
 0x526   : > { %v13377_v41 = vpop.f32.mrf.mxu0  ;;  %13670 = vmatprep.subr.bf16.mxu0 %v17055_v45  ;;  %v4200_v24 = vld [vmem:[%s25320_s5 + $0x2068] sm:$0xff] }
 0x527   : > { %13642 = vmatpush2.bf16.msra.mxu1 %v17006_v32  ;;  %v4140_v56 = vld [vmem:[%s25320_s5 + $0x1e88] sm:$0xff]  ;;  %v17023_v32 = vcombine.high %v4196_v26, %v4200_v24 }
 0x528   : > { %13643 = vmatprep.subr.bf16.mxu1 %v16999_v44  ;;  %v4144_v45 = vld [vmem:[%s25320_s5 + $0x1ea8] sm:$0xff] }
 0x529   : > { %13671 = vmatpush1.bf16.msra.mxu0 %v17054_v25  ;;  %v4188_v58 = vld [vmem:[%s25320_s5 + $0x2008] sm:$0xff]  ;;  %v16967_v44 = vcombine.high %v4140_v56, %v4144_v45  ;;  %v17022_v25 = vcombine.low %v4196_v26, %v4200_v24 }
 0x52a   : > { %13672 = vmatprep.subr.bf16.mxu0 %v17047_v23  ;;  %v4192_v59 = vld [vmem:[%s25320_s5 + $0x2028] sm:$0xff]  ;;  %v16966_v23 = vcombine.low %v4140_v56, %v4144_v45  ;;  %v18509_v56 = vld [vmem:[%s25321_s6] sm:$0xff] }
 0x52b   : > { %13644 = vmatpush2.bf16.msra.mxu1 %v16998_v29  ;;  %v4132_v17 = vld [vmem:[%s25320_s5 + $0x1e48] sm:$0xff]  ;;  %v17015_v41 = vcombine.high %v4188_v58, %v4192_v59 }
 0x52c   : > { %13645 = vmatprep.subr.bf16.mxu1 %v16991_v1  ;;  %v4136_v43 = vld [vmem:[%s25320_s5 + $0x1e68] sm:$0xff]  ;;  %v17014_v1 = vcombine.low %v4188_v58, %v4192_v59 }
 0x52d   : > { %13673 = vmatpush1.bf16.msra.mxu0 %v17046_v61  ;;  %v4308_v29 = vld [vmem:[%s25320_s5 + $0x23c8] sm:$0xff]  ;;  %v16959_v8 = vcombine.high %v4132_v17, %v4136_v43 }
 0x52e   : > { %13674 = vmatprep.subr.bf16.mxu0 %v17039_v46  ;;  %v4312_v27 = vld [vmem:[%s25320_s5 + $0x23e8] sm:$0xff]  ;;  %v16958_v46 = vcombine.low %v4132_v17, %v4136_v43 }
 0x52f   : > { %13646 = vmatpush2.bf16.msra.mxu1 %v16990_v6  ;;  %v4124_v61 = vld [vmem:[%s25320_s5 + $0x1e08] sm:$0xff]  ;;  %v17135_v18 = vcombine.high %v4308_v29, %v4312_v27 }
 0x530   : > { %13647 = vmatprep.subr.bf16.mxu1 %v16983_v28  ;;  %v4128_v49 = vld [vmem:[%s25320_s5 + $0x1e28] sm:$0xff]  ;;  %v12775_v28 = vsub.s32 2, %v20729_v34 }
 0x531   : > { %13675 = vmatpush1.bf16.msra.mxu0 %v17038_v13  ;;  %v4300_v6 = vld [vmem:[%s25320_s5 + $0x2388] sm:$0xff]  ;;  %v16951_v51 = vcombine.high %v4124_v61, %v4128_v49  ;;  %v17134_v13 = vcombine.low %v4308_v29, %v4312_v27  ;;  %v16950_v26 = vcombine.low %v4124_v61, %v4128_v49 }
 0x532   : > { %13676 = vmatprep.subr.bf16.mxu0 %v17031_v3  ;;  %v4304_v52 = vld [vmem:[%s25320_s5 + $0x23a8] sm:$0xff]  ;;  %v12776_v45 = vrot.slane %v18509_v56, %v12775_v28 }
 0x533   : > { %13648 = vmatpush2.bf16.msra.mxu1 %v16982_v20  ;;  %v4372_v7 = vld [vmem:[%s25320_s5 + $0x25c8] sm:$0xff]  ;;  %v17127_v3 = vcombine.high %v4300_v6, %v4304_v52  ;;  %v12779_v20 = vsub.s32 3, %v20729_v34 }
 0x534   : > { %13649 = vmatprep.subr.bf16.mxu1 %v16975_v50  ;;  %v4376_v38 = vld [vmem:[%s25320_s5 + $0x25e8] sm:$0xff] }
 0x535   : > { %13677 = vmatpush1.bf16.msra.mxu0 %v17030_v35  ;;  %v4292_v24 = vld [vmem:[%s25320_s5 + $0x2348] sm:$0xff]  ;;  %v17199_v35 = vcombine.high %v4372_v7, %v4376_v38 }
 0x536   : > { %13678 = vmatprep.subr.bf16.mxu0 %v17023_v32  ;;  %v4296_v50 = vld [vmem:[%s25320_s5 + $0x2368] sm:$0xff]  ;;  %v17126_v32 = vcombine.low %v4300_v6, %v4304_v52 }
 0x537   : > { %13650 = vmatpush2.bf16.msra.mxu1 %v16974_v33  ;;  %v4364_v33 = vld [vmem:[%s25320_s5 + $0x2588] sm:$0xff]  ;;  %v17119_v59 = vcombine.high %v4292_v24, %v4296_v50  ;;  %v17118_v29 = vcombine.low %v4292_v24, %v4296_v50 }
 0x538   : > { %13651 = vmatprep.subr.bf16.mxu1 %v16967_v44  ;;  %v4368_v58 = vld [vmem:[%s25320_s5 + $0x25a8] sm:$0xff]  ;;  %v12780_v44 = vrot.slane %v18509_v56, %v12779_v20 }
 0x539   : > { %13679 = vmatpush1.bf16.msra.mxu0 %v17022_v25  ;;  %v17198_v25 = vcombine.low %v4372_v7, %v4376_v38  ;;  %v4284_v17 = vld [vmem:[%s25320_s5 + $0x2308] sm:$0xff] }
 0x53a   : > { %13680 = vmatprep.subr.bf16.mxu0 %v17015_v41  ;;  %v4288_v43 = vld [vmem:[%s25320_s5 + $0x2328] sm:$0xff]  ;;  %v17191_v41 = vcombine.high %v4364_v33, %v4368_v58  ;;  %v13375_v49 = vadd.f32 %v22009_v14, %v12780_v44 }
 0x53b   : > { %13652 = vmatpush2.bf16.msra.mxu1 %v16966_v23  ;;  %v13373_v23 = vadd.f32 %v21999_v19, %v12776_v45  ;;  %v4356_v27 = vld [vmem:[%s25320_s5 + $0x2548] sm:$0xff]  ;;  %v17111_v61 = vcombine.high %v4284_v17, %v4288_v43  ;;  %v17190_v19 = vcombine.low %v4364_v33, %v4368_v58  ;;  %v17110_v14 = vcombine.low %v4284_v17, %v4288_v43 }
 0x53c   : > { %13653 = vmatprep.subr.bf16.mxu1 %v16959_v8  ;;  %v4360_v8 = vld [vmem:[%s25320_s5 + $0x2568] sm:$0xff] }
 0x53d   : > { %13681 = vmatpush1.bf16.msra.mxu0 %v17014_v1  ;;  %v4280_v6 = vld [vmem:[%s25320_s5 + $0x22e8] sm:$0xff]  ;;  %v17182_v20 = vcombine.low %v4356_v27, %v4360_v8 }
 0x53e   : > { %13682 = vmatprep.subr.bf16.mxu0 %v17135_v18  ;;  %v4352_v7 = vld [vmem:[%s25320_s5 + $0x2528] sm:$0xff] }
 0x53f   : > { %13654 = vmatpush2.bf16.msra.mxu1 %v16958_v46  ;;  %v4276_v46 = vld [vmem:[%s25320_s5 + $0x22c8] sm:$0xff] }
 0x540   : > { %13655 = vmatprep.subr.bf16.mxu1 %v16951_v51  ;;  %v17183_v51 = vcombine.high %v4356_v27, %v4360_v8  ;;  %v4272_v24 = vld [vmem:[%s25320_s5 + $0x22a8] sm:$0xff]  ;;  %v17102_v56 = vcombine.low %v4276_v46, %v4280_v6 }
 0x541   : > { %13683 = vmatpush2.bf16.msra.mxu0 %v17134_v13  ;;  %v4348_v13 = vld [vmem:[%s25320_s5 + $0x2508] sm:$0xff] }
 0x542   : > { %13684 = vmatprep.subr.bf16.mxu0 %v17127_v3  ;;  %v17103_v3 = vcombine.high %v4276_v46, %v4280_v6  ;;  %v4340_v45 = vld [vmem:[%s25320_s5 + $0x24c8] sm:$0xff]  ;;  %v17174_v58 = vcombine.low %v4348_v13, %v4352_v7 }
 0x543   : > { %13656 = vmatpush2.bf16.msra.mxu1 %v16950_v26  ;;  %v4268_v26 = vld [vmem:[%s25320_s5 + $0x2288] sm:$0xff] }
 0x544   : > { %13707 = vmatprep.subr.bf16.mxu1 %v17199_v35  ;;  %v17175_v35 = vcombine.high %v4348_v13, %v4352_v7  ;;  %v17095_v33 = vcombine.high %v4268_v26, %v4272_v24  ;;  %v4264_v44 = vld [vmem:[%s25320_s5 + $0x2268] sm:$0xff]  ;;  %v17094_v17 = vcombine.low %v4268_v26, %v4272_v24 }
 0x545   : > { %13685 = vmatpush2.bf16.msra.mxu0 %v17126_v32  ;;  %v4344_v32 = vld [vmem:[%s25320_s5 + $0x24e8] sm:$0xff] }
 0x546   : > { %v13413_v1 = vpop.f32.mrf.mxu1  ;;  %13658 = vmatmul.mubr.bf16.vlgmr.msra.gmra.mxu1 %v20740_v62  ;;  %13686 = vmatprep.subr.bf16.mxu0 %v17119_v59  ;;  %v4260_v59 = vld [vmem:[%s25320_s5 + $0x2248] sm:$0xff] }
 0x547   : > { %v22127_v18 = vadd.f32 %v13413_v1, %v13373_v23  ;;  %13708 = vmatpush1.bf16.msra.mxu1 %v17198_v25  ;;  %13739 = vmatprep.mubr.bf16.mxu1 %v20742_v42  ;;  %v17167_v25 = vcombine.high %v4340_v45, %v4344_v32  ;;  %v4332_v43 = vld [vmem:[%s25320_s5 + $0x2488] sm:$0xff]  ;;  %v17087_v23 = vcombine.high %v4260_v59, %v4264_v44 }
 0x548   : > { %v13415_v52 = vpop.f32.mrf.mxu1  ;;  %13709 = vmatprep.subr.bf16.mxu1 %v17191_v41  ;;  %v4336_v41 = vld [vmem:[%s25320_s5 + $0x24a8] sm:$0xff] }
 0x549   : > { %v22136_v28 = vadd.f32 %v13415_v52, %v13375_v49  ;;  %13687 = vmatpush2.bf16.msra.mxu0 %v17118_v29  ;;  %v17166_v29 = vcombine.low %v4340_v45, %v4344_v32  ;;  %v4252_v27 = vld [vmem:[%s25320_s5 + $0x2208] sm:$0xff]  ;;  %v17159_v1 = vcombine.high %v4332_v43, %v4336_v41  ;;  %v17158_v6 = vcombine.low %v4332_v43, %v4336_v41 }
 0x54a   : > { %v13417_v38 = vpop.f32.mrf.mxu1  ;;  %13688 = vmatprep.subr.bf16.mxu0 %v17111_v61  ;;  %v4256_v8 = vld [vmem:[%s25320_s5 + $0x2228] sm:$0xff]  ;;  %v17086_v61 = vcombine.low %v4260_v59, %v4264_v44 }
 0x54b   : > { %13710 = vmatpush1.bf16.msra.mxu1 %v17190_v19  ;;  %v4324_v49 = vld [vmem:[%s25320_s5 + $0x2448] sm:$0xff]  ;;  %v17079_v46 = vcombine.high %v4252_v27, %v4256_v8  ;;  %v17078_v13 = vcombine.low %v4252_v27, %v4256_v8 }
 0x54c   : > { %v13418_v50 = vpop.f32.mrf.mxu1  ;;  %13711 = vmatprep.subr.bf16.mxu1 %v17183_v51  ;;  %v4328_v19 = vld [vmem:[%s25320_s5 + $0x2468] sm:$0xff] }
 0x54d   : > { %13689 = vmatpush2.bf16.msra.mxu0 %v17110_v14  ;;  %v4500_v52 = vld [vmem:[%s25320_s5 + $0x29c8] sm:$0xff]  ;;  %v17151_v14 = vcombine.high %v4324_v49, %v4328_v19 }
 0x54e   : > { %13690 = vmatprep.subr.bf16.mxu0 %v17103_v3  ;;  %v4504_v51 = vld [vmem:[%s25320_s5 + $0x29e8] sm:$0xff] }
 0x54f   : > { %13712 = vmatpush1.bf16.msra.mxu1 %v17182_v20  ;;  %v4316_v7 = vld [vmem:[%s25320_s5 + $0x2408] sm:$0xff]  ;;  %v17327_v3 = vcombine.high %v4500_v52, %v4504_v51  ;;  %v17150_v20 = vcombine.low %v4324_v49, %v4328_v19 }
 0x550   : > { %13713 = vmatprep.subr.bf16.mxu1 %v17175_v35  ;;  %v4320_v38 = vld [vmem:[%s25320_s5 + $0x2428] sm:$0xff]  ;;  %v17326_v35 = vcombine.low %v4500_v52, %v4504_v51 }
 0x551   : > { %13691 = vmatpush2.bf16.msra.mxu0 %v17102_v56  ;;  %v4492_v26 = vld [vmem:[%s25320_s5 + $0x2988] sm:$0xff]  ;;  %v17143_v50 = vcombine.high %v4316_v7, %v4320_v38 }
 0x552   : > { %13692 = vmatprep.subr.bf16.mxu0 %v17095_v33  ;;  %v4496_v24 = vld [vmem:[%s25320_s5 + $0x29a8] sm:$0xff]  ;;  %v17142_v33 = vcombine.low %v4316_v7, %v4320_v38 }
 0x553   : > { %13714 = vmatpush1.bf16.msra.mxu1 %v17174_v58  ;;  %v4436_v56 = vld [vmem:[%s25320_s5 + $0x27c8] sm:$0xff]  ;;  %v17319_v32 = vcombine.high %v4492_v26, %v4496_v24  ;;  %v17318_v43 = vcombine.low %v4492_v26, %v4496_v24 }
 0x554   : > { %13715 = vmatprep.subr.bf16.mxu1 %v17167_v25  ;;  %v4440_v45 = vld [vmem:[%s25320_s5 + $0x27e8] sm:$0xff] }
 0x555   : > { %13693 = vmatpush2.bf16.msra.mxu0 %v17094_v17  ;;  %v4484_v58 = vld [vmem:[%s25320_s5 + $0x2948] sm:$0xff]  ;;  %v17263_v25 = vcombine.high %v4436_v56, %v4440_v45 }
 0x556   : > { %13694 = vmatprep.subr.bf16.mxu0 %v17087_v23  ;;  %v4488_v59 = vld [vmem:[%s25320_s5 + $0x2968] sm:$0xff] }
 0x557   : > { %13716 = vmatpush1.bf16.msra.mxu1 %v17166_v29  ;;  %v4428_v41 = vld [vmem:[%s25320_s5 + $0x2788] sm:$0xff]  ;;  %v17311_v27 = vcombine.high %v4484_v58, %v4488_v59 }
 0x558   : > { %13717 = vmatprep.subr.bf16.mxu1 %v17159_v1  ;;  %v4432_v23 = vld [vmem:[%s25320_s5 + $0x27a8] sm:$0xff] }
 0x559   : > { %13695 = vmatpush2.bf16.msra.mxu0 %v17086_v61  ;;  %v4476_v1 = vld [vmem:[%s25320_s5 + $0x2908] sm:$0xff]  ;;  %v17255_v19 = vcombine.high %v4428_v41, %v4432_v23 }
 0x55a   : > { %13696 = vmatprep.subr.bf16.mxu0 %v17079_v46  ;;  %v4480_v61 = vld [vmem:[%s25320_s5 + $0x2928] sm:$0xff]  ;;  %v17310_v46 = vcombine.low %v4484_v58, %v4488_v59 }
 0x55b   : > { %13718 = vmatpush1.bf16.msra.mxu1 %v17158_v6  ;;  %v4424_v6 = vld [vmem:[%s25320_s5 + $0x2768] sm:$0xff]  ;;  %v17303_v51 = vcombine.high %v4476_v1, %v4480_v61 }
 0x55c   : > { %13719 = vmatprep.subr.bf16.mxu1 %v17151_v14  ;;  %v17254_v14 = vcombine.low %v4428_v41, %v4432_v23  ;;  %v4472_v7 = vld [vmem:[%s25320_s5 + $0x28e8] sm:$0xff] }
 0x55d   : > { %13697 = vmatpush2.bf16.msra.mxu0 %v17078_v13  ;;  %v4468_v13 = vld [vmem:[%s25320_s5 + $0x28c8] sm:$0xff] }
 0x55e   : > { %13748 = vmatprep.subr.bf16.mxu0 %v17327_v3  ;;  %v17302_v3 = vcombine.low %v4476_v1, %v4480_v61  ;;  %v4416_v26 = vld [vmem:[%s25320_s5 + $0x2728] sm:$0xff]  ;;  %v17295_v24 = vcombine.high %v4468_v13, %v4472_v7 }
 0x55f   : > { %13720 = vmatpush1.bf16.msra.mxu1 %v17150_v20  ;;  %v4412_v20 = vld [vmem:[%s25320_s5 + $0x2708] sm:$0xff] }
 0x560   : > { %v13454_v44 = vpop.f32.mrf.mxu0  ;;  %13699 = vmatmul.mubr.bf16.vlgmr.msra.gmra.mxu0 %v20982_v12  ;;  %13721 = vmatprep.subr.bf16.mxu1 %v17143_v50  ;;  %v4408_v58 = vld [vmem:[%s25320_s5 + $0x26e8] sm:$0xff] }
 0x561   : > { %v22212_v17 = vadd.f32 %v13454_v44, %v22127_v18  ;;  %13749 = vmatpush1.bf16.msra.mxu0 %v17326_v35  ;;  %13780 = vmatprep.mubr.bf16.mxu0 %v20984_v55  ;;  %v17262_v18 = vcombine.low %v4436_v56, %v4440_v45  ;;  %v4460_v35 = vld [vmem:[%s25320_s5 + $0x2888] sm:$0xff]  ;;  %v17239_v45 = vcombine.high %v4412_v20, %v4416_v26 }
 0x562   : > { %v13456_v29 = vpop.f32.mrf.mxu0  ;;  %13750 = vmatprep.subr.bf16.mxu0 %v17319_v32  ;;  %v4464_v56 = vld [vmem:[%s25320_s5 + $0x28a8] sm:$0xff]  ;;  %v17294_v32 = vcombine.low %v4468_v13, %v4472_v7  ;;  %v17238_v44 = vcombine.low %v4412_v20, %v4416_v26 }
 0x563   : > { %v22222_v8 = vadd.f32 %v13456_v29, %v22136_v28  ;;  %13722 = vmatpush1.bf16.msra.mxu1 %v17142_v33  ;;  %v4420_v28 = vld [vmem:[%s25320_s5 + $0x2748] sm:$0xff]  ;;  %v17287_v59 = vcombine.high %v4460_v35, %v4464_v56  ;;  %v17286_v23 = vcombine.low %v4460_v35, %v4464_v56 }
 0x564   : > { %v13458_v49 = vpop.f32.mrf.mxu0  ;;  %13723 = vmatprep.subr.bf16.mxu1 %v17263_v25  ;;  %v17247_v38 = vcombine.high %v4420_v28, %v4424_v6  ;;  %v17246_v50 = vcombine.low %v4420_v28, %v4424_v6  ;;  %v4404_v33 = vld [vmem:[%s25320_s5 + $0x26c8] sm:$0xff] }
 0x565   : > { %13751 = vmatpush1.bf16.msra.mxu0 %v17318_v43  ;;  %v4452_v25 = vld [vmem:[%s25320_s5 + $0x2848] sm:$0xff]  ;;  %v17231_v41 = vcombine.high %v4404_v33, %v4408_v58  ;;  %v17230_v1 = vcombine.low %v4404_v33, %v4408_v58 }
 0x566   : > { %v13459_v52 = vpop.f32.mrf.mxu0  ;;  %13752 = vmatprep.subr.bf16.mxu0 %v17311_v27  ;;  %v4456_v43 = vld [vmem:[%s25320_s5 + $0x2868] sm:$0xff] }
 0x567   : > { %13724 = vmatpush2.bf16.msra.mxu1 %v17262_v18  ;;  %v4396_v29 = vld [vmem:[%s25320_s5 + $0x2688] sm:$0xff]  ;;  %v17279_v18 = vcombine.high %v4452_v25, %v4456_v43 }
 0x568   : > { %13725 = vmatprep.subr.bf16.mxu1 %v17255_v19  ;;  %v4400_v27 = vld [vmem:[%s25320_s5 + $0x26a8] sm:$0xff] }
 0x569   : > { %13753 = vmatpush1.bf16.msra.mxu0 %v17310_v46  ;;  %v4444_v61 = vld [vmem:[%s25320_s5 + $0x2808] sm:$0xff]  ;;  %v17223_v19 = vcombine.high %v4396_v29, %v4400_v27  ;;  %v17278_v46 = vcombine.low %v4452_v25, %v4456_v43 }
 0x56a   : > { %13754 = vmatprep.subr.bf16.mxu0 %v17303_v51  ;;  %v4448_v49 = vld [vmem:[%s25320_s5 + $0x2828] sm:$0xff]  ;;  %v17222_v51 = vcombine.low %v4396_v29, %v4400_v27 }
 0x56b   : > { %13726 = vmatpush2.bf16.msra.mxu1 %v17254_v14  ;;  %v4388_v28 = vld [vmem:[%s25320_s5 + $0x2648] sm:$0xff]  ;;  %v17271_v52 = vcombine.high %v4444_v61, %v4448_v49 }
 0x56c   : > { %13727 = vmatprep.subr.bf16.mxu1 %v17247_v38  ;;  %v4392_v6 = vld [vmem:[%s25320_s5 + $0x2668] sm:$0xff]  ;;  %v17270_v38 = vcombine.low %v4444_v61, %v4448_v49 }
 0x56d   : > { %13755 = vmatpush1.bf16.msra.mxu0 %v17302_v3  ;;  %v4564_v14 = vld [vmem:[%s25320_s5 + $0x2bc8] sm:$0xff]  ;;  %v17215_v7 = vcombine.high %v4388_v28, %v4392_v6 }
 0x56e   : > { %13756 = vmatprep.subr.bf16.mxu0 %v17295_v24  ;;  %v4568_v13 = vld [vmem:[%s25320_s5 + $0x2be8] sm:$0xff]  ;;  %v17214_v24 = vcombine.low %v4388_v28, %v4392_v6 }
 0x56f   : > { %13728 = vmatpush2.bf16.msra.mxu1 %v17246_v50  ;;  %v4380_v3 = vld [vmem:[%s25320_s5 + $0x2608] sm:$0xff]  ;;  %v17391_v26 = vcombine.high %v4564_v14, %v4568_v13 }
 0x570   : > { %13729 = vmatprep.subr.bf16.mxu1 %v17239_v45  ;;  %v4384_v20 = vld [vmem:[%s25320_s5 + $0x2628] sm:$0xff]  ;;  %v17390_v45 = vcombine.low %v4564_v14, %v4568_v13 }
 0x571   : > { %13757 = vmatpush1.bf16.msra.mxu0 %v17294_v32  ;;  %v4556_v50 = vld [vmem:[%s25320_s5 + $0x2b88] sm:$0xff]  ;;  %v17207_v56 = vcombine.high %v4380_v3, %v4384_v20 }
 0x572   : > { %13758 = vmatprep.subr.bf16.mxu0 %v17287_v59  ;;  %v4560_v35 = vld [vmem:[%s25320_s5 + $0x2ba8] sm:$0xff]  ;;  %v17206_v59 = vcombine.low %v4380_v3, %v4384_v20 }
 0x573   : > { %13730 = vmatpush2.bf16.msra.mxu1 %v17238_v44  ;;  %v4628_v32 = vld [vmem:[%s25320_s5 + $0x2dc8] sm:$0xff]  ;;  %v17383_v58 = vcombine.high %v4556_v50, %v4560_v35 }
 0x574   : > { %13731 = vmatprep.subr.bf16.mxu1 %v17231_v41  ;;  %v4632_v33 = vld [vmem:[%s25320_s5 + $0x2de8] sm:$0xff]  ;;  %v17382_v41 = vcombine.low %v4556_v50, %v4560_v35 }
 0x575   : > { %13759 = vmatpush1.bf16.msra.mxu0 %v17286_v23  ;;  %v4548_v44 = vld [vmem:[%s25320_s5 + $0x2b48] sm:$0xff]  ;;  %v17455_v43 = vcombine.high %v4628_v32, %v4632_v33 }
 0x576   : > { %13760 = vmatprep.subr.bf16.mxu0 %v17279_v18  ;;  %v4552_v25 = vld [vmem:[%s25320_s5 + $0x2b68] sm:$0xff]  ;;  %v17454_v18 = vcombine.low %v4628_v32, %v4632_v33 }
 0x577   : > { %13732 = vmatpush2.bf16.msra.mxu1 %v17230_v1  ;;  %v4620_v23 = vld [vmem:[%s25320_s5 + $0x2d88] sm:$0xff]  ;;  %v17375_v27 = vcombine.high %v4548_v44, %v4552_v25 }
 0x578   : > { %13733 = vmatprep.subr.bf16.mxu1 %v17223_v19  ;;  %v4624_v29 = vld [vmem:[%s25320_s5 + $0x2da8] sm:$0xff]  ;;  %v17374_v19 = vcombine.low %v4548_v44, %v4552_v25 }
 0x579   : > { %13761 = vmatpush1.bf16.msra.mxu0 %v17278_v46  ;;  %v4540_v1 = vld [vmem:[%s25320_s5 + $0x2b08] sm:$0xff]  ;;  %v17447_v49 = vcombine.high %v4620_v23, %v4624_v29  ;;  %v17446_v14 = vcombine.low %v4620_v23, %v4624_v29 }
 0x57a   : > { %13762 = vmatprep.subr.bf16.mxu0 %v17271_v52  ;;  %v4544_v61 = vld [vmem:[%s25320_s5 + $0x2b28] sm:$0xff] }
 0x57b   : > { %13734 = vmatpush2.bf16.msra.mxu1 %v17222_v51  ;;  %v4612_v46 = vld [vmem:[%s25320_s5 + $0x2d48] sm:$0xff]  ;;  %v17367_v52 = vcombine.high %v4540_v1, %v4544_v61 }
 0x57c   : > { %13735 = vmatprep.subr.bf16.mxu1 %v17215_v7  ;;  %v4616_v28 = vld [vmem:[%s25320_s5 + $0x2d68] sm:$0xff] }
 0x57d   : > { %13763 = vmatpush1.bf16.msra.mxu0 %v17270_v38  ;;  %v4532_v13 = vld [vmem:[%s25320_s5 + $0x2ac8] sm:$0xff]  ;;  %v17439_v3 = vcombine.high %v4612_v46, %v4616_v28 }
 0x57e   : > { %13764 = vmatprep.subr.bf16.mxu0 %v17391_v26  ;;  %v4536_v7 = vld [vmem:[%s25320_s5 + $0x2ae8] sm:$0xff] }
 0x57f   : > { %13736 = vmatpush2.bf16.msra.mxu1 %v17214_v24  ;;  %v4604_v26 = vld [vmem:[%s25320_s5 + $0x2d08] sm:$0xff]  ;;  %v17359_v35 = vcombine.high %v4532_v13, %v4536_v7 }
 0x580   : > { %13737 = vmatprep.subr.bf16.mxu1 %v17207_v56  ;;  %v4608_v24 = vld [vmem:[%s25320_s5 + $0x2d28] sm:$0xff]  ;;  %v17438_v56 = vcombine.low %v4612_v46, %v4616_v28 }
 0x581   : > { %13765 = vmatpush2.bf16.msra.mxu0 %v17390_v45  ;;  %v4528_v45 = vld [vmem:[%s25320_s5 + $0x2aa8] sm:$0xff]  ;;  %v17431_v33 = vcombine.high %v4604_v26, %v4608_v24 }
 0x582   : > { %13766 = vmatprep.subr.bf16.mxu0 %v17383_v58  ;;  %v17358_v58 = vcombine.low %v4532_v13, %v4536_v7  ;;  %v4600_v44 = vld [vmem:[%s25320_s5 + $0x2ce8] sm:$0xff] }
 0x583   : > { %13738 = vmatpush2.bf16.msra.mxu1 %v17206_v59  ;;  %v4596_v59 = vld [vmem:[%s25320_s5 + $0x2cc8] sm:$0xff] }
 0x584   : > { %13789 = vmatprep.subr.bf16.mxu1 %v17455_v43  ;;  %v17430_v43 = vcombine.low %v4604_v26, %v4608_v24  ;;  %v4520_v23 = vld [vmem:[%s25320_s5 + $0x2a68] sm:$0xff]  ;;  %v17423_v29 = vcombine.high %v4596_v59, %v4600_v44 }
 0x585   : > { %13767 = vmatpush2.bf16.msra.mxu0 %v17382_v41  ;;  %v4516_v41 = vld [vmem:[%s25320_s5 + $0x2a48] sm:$0xff] }
 0x586   : > { %v13495_v6 = vpop.f32.mrf.mxu1  ;;  %13740 = vmatmul.mubr.bf16.vlgmr.msra.gmra.mxu1 %v20956_v53  ;;  %13768 = vmatprep.subr.bf16.mxu0 %v17375_v27  ;;  %v4512_v46 = vld [vmem:[%s25320_s5 + $0x2a28] sm:$0xff] }
 0x587   : > { %v22334_v51 = vadd.f32 %v13495_v6, %v22212_v17  ;;  %13790 = vmatpush1.bf16.msra.mxu1 %v17454_v18  ;;  %13821 = vmatprep.mubr.bf16.mxu1 %v20958_v57  ;;  %v17366_v17 = vcombine.low %v4540_v1, %v4544_v61  ;;  %v4588_v18 = vld [vmem:[%s25320_s5 + $0x2c88] sm:$0xff]  ;;  %v17343_v61 = vcombine.high %v4516_v41, %v4520_v23 }
 0x588   : > { %v13497_v38 = vpop.f32.mrf.mxu1  ;;  %13791 = vmatprep.subr.bf16.mxu1 %v17447_v49  ;;  %v4592_v1 = vld [vmem:[%s25320_s5 + $0x2ca8] sm:$0xff]  ;;  %v17422_v49 = vcombine.low %v4596_v59, %v4600_v44  ;;  %v17342_v6 = vcombine.low %v4516_v41, %v4520_v23 }
 0x589   : > { %v22344_v20 = vadd.f32 %v13497_v38, %v22222_v8  ;;  %13769 = vmatpush2.bf16.msra.mxu0 %v17374_v19  ;;  %v4524_v8 = vld [vmem:[%s25320_s5 + $0x2a88] sm:$0xff]  ;;  %v17415_v28 = vcombine.high %v4588_v18, %v4592_v1  ;;  %v17414_v7 = vcombine.low %v4588_v18, %v4592_v1 }
 0x58a   : > { %v13499_v50 = vpop.f32.mrf.mxu1  ;;  %13770 = vmatprep.subr.bf16.mxu0 %v17367_v52  ;;  %v17351_v25 = vcombine.high %v4524_v8, %v4528_v45  ;;  %v17350_v27 = vcombine.low %v4524_v8, %v4528_v45  ;;  %v4508_v19 = vld [vmem:[%s25320_s5 + $0x2a08] sm:$0xff] }
 0x58b   : > { %13792 = vmatpush1.bf16.msra.mxu1 %v17446_v14  ;;  %v4580_v52 = vld [vmem:[%s25320_s5 + $0x2c48] sm:$0xff]  ;;  %v17335_v13 = vcombine.high %v4508_v19, %v4512_v46  ;;  %v17334_v26 = vcombine.low %v4508_v19, %v4512_v46 }
 0x58c   : > { %v13500_v32 = vpop.f32.mrf.mxu1  ;;  %13793 = vmatprep.subr.bf16.mxu1 %v17439_v3  ;;  %v4584_v14 = vld [vmem:[%s25320_s5 + $0x2c68] sm:$0xff] }
 0x58d   : > { %13771 = vmatpush2.bf16.msra.mxu0 %v17366_v17  ;;  %v4756_v38 = vld [vmem:[%s25320_s5 + $0x31c8] sm:$0xff]  ;;  %v17407_v17 = vcombine.high %v4580_v52, %v4584_v14 }
 0x58e   : > { %13772 = vmatprep.subr.bf16.mxu0 %v17359_v35  ;;  %v4760_v3 = vld [vmem:[%s25320_s5 + $0x31e8] sm:$0xff] }
 0x58f   : > { %13794 = vmatpush1.bf16.msra.mxu1 %v17438_v56  ;;  %v4572_v24 = vld [vmem:[%s25320_s5 + $0x2c08] sm:$0xff]  ;;  %v17583_v35 = vcombine.high %v4756_v38, %v4760_v3  ;;  %v17406_v56 = vcombine.low %v4580_v52, %v4584_v14 }
 0x590   : > { %13795 = vmatprep.subr.bf16.mxu1 %v17431_v33  ;;  %v4576_v50 = vld [vmem:[%s25320_s5 + $0x2c28] sm:$0xff]  ;;  %v17582_v33 = vcombine.low %v4756_v38, %v4760_v3 }
 0x591   : > { %13773 = vmatpush2.bf16.msra.mxu0 %v17358_v58  ;;  %v4748_v8 = vld [vmem:[%s25320_s5 + $0x3188] sm:$0xff]  ;;  %v17399_v32 = vcombine.high %v4572_v24, %v4576_v50 }
 0x592   : > { %13774 = vmatprep.subr.bf16.mxu0 %v17351_v25  ;;  %v4752_v45 = vld [vmem:[%s25320_s5 + $0x31a8] sm:$0xff]  ;;  %v17398_v25 = vcombine.low %v4572_v24, %v4576_v50 }
 0x593   : > { %13796 = vmatpush1.bf16.msra.mxu1 %v17430_v43  ;;  %v4692_v58 = vld [vmem:[%s25320_s5 + $0x2fc8] sm:$0xff]  ;;  %v17575_v44 = vcombine.high %v4748_v8, %v4752_v45  ;;  %v17574_v18 = vcombine.low %v4748_v8, %v4752_v45 }
 0x594   : > { %13797 = vmatprep.subr.bf16.mxu1 %v17423_v29  ;;  %v4696_v59 = vld [vmem:[%s25320_s5 + $0x2fe8] sm:$0xff] }
 0x595   : > { %13775 = vmatpush2.bf16.msra.mxu0 %v17350_v27  ;;  %v4740_v43 = vld [vmem:[%s25320_s5 + $0x3148] sm:$0xff]  ;;  %v17519_v29 = vcombine.high %v4692_v58, %v4696_v59 }
 0x596   : > { %13776 = vmatprep.subr.bf16.mxu0 %v17343_v61  ;;  %v4744_v41 = vld [vmem:[%s25320_s5 + $0x3168] sm:$0xff] }
 0x597   : > { %13798 = vmatpush1.bf16.msra.mxu1 %v17422_v49  ;;  %v4684_v1 = vld [vmem:[%s25320_s5 + $0x2f88] sm:$0xff]  ;;  %v17567_v19 = vcombine.high %v4740_v43, %v4744_v41 }
 0x598   : > { %13799 = vmatprep.subr.bf16.mxu1 %v17415_v28  ;;  %v4688_v61 = vld [vmem:[%s25320_s5 + $0x2fa8] sm:$0xff] }
 0x599   : > { %13777 = vmatpush2.bf16.msra.mxu0 %v17342_v6  ;;  %v4732_v28 = vld [vmem:[%s25320_s5 + $0x3108] sm:$0xff]  ;;  %v17511_v14 = vcombine.high %v4684_v1, %v4688_v61 }
 0x59a   : > { %13778 = vmatprep.subr.bf16.mxu0 %v17335_v13  ;;  %v4736_v6 = vld [vmem:[%s25320_s5 + $0x3128] sm:$0xff]  ;;  %v17566_v13 = vcombine.low %v4740_v43, %v4744_v41 }
 0x59b   : > { %13800 = vmatpush1.bf16.msra.mxu1 %v17414_v7  ;;  %v4680_v7 = vld [vmem:[%s25320_s5 + $0x2f68] sm:$0xff]  ;;  %v17559_v3 = vcombine.high %v4732_v28, %v4736_v6 }
 0x59c   : > { %13801 = vmatprep.subr.bf16.mxu1 %v17407_v17  ;;  %v17510_v17 = vcombine.low %v4684_v1, %v4688_v61  ;;  %v4728_v24 = vld [vmem:[%s25320_s5 + $0x30e8] sm:$0xff] }
 0x59d   : > { %13779 = vmatpush2.bf16.msra.mxu0 %v17334_v26  ;;  %v4724_v26 = vld [vmem:[%s25320_s5 + $0x30c8] sm:$0xff] }
 0x59e   : > { %13830 = vmatprep.subr.bf16.mxu0 %v17583_v35  ;;  %v17558_v35 = vcombine.low %v4732_v28, %v4736_v6  ;;  %v4672_v8 = vld [vmem:[%s25320_s5 + $0x2f28] sm:$0xff]  ;;  %v17551_v45 = vcombine.high %v4724_v26, %v4728_v24 }
 0x59f   : > { %13802 = vmatpush1.bf16.msra.mxu1 %v17406_v56  ;;  %v4668_v56 = vld [vmem:[%s25320_s5 + $0x2f08] sm:$0xff] }
 0x5a0   : > { %v13536_v23 = vpop.f32.mrf.mxu0  ;;  %13781 = vmatmul.mubr.bf16.vlgmr.msra.gmra.mxu0 %v21192_v31  ;;  %13803 = vmatprep.subr.bf16.mxu1 %v17399_v32  ;;  %v4664_v43 = vld [vmem:[%s25320_s5 + $0x2ee8] sm:$0xff] }
 0x5a1   : > { %v22420_v27 = vadd.f32 %v13536_v23, %v22334_v51  ;;  %13831 = vmatpush1.bf16.msra.mxu0 %v17582_v33  ;;  %13862 = vmatprep.mubr.bf16.mxu0 %v18575_v5  ;;  %v17518_v51 = vcombine.low %v4692_v58, %v4696_v59  ;;  %v4716_v33 = vld [vmem:[%s25320_s5 + $0x3088] sm:$0xff]  ;;  %v17495_v59 = vcombine.high %v4668_v56, %v4672_v8 }
 0x5a2   : > { %v13538_v49 = vpop.f32.mrf.mxu0  ;;  %13832 = vmatprep.subr.bf16.mxu0 %v17575_v44  ;;  %v4720_v58 = vld [vmem:[%s25320_s5 + $0x30a8] sm:$0xff]  ;;  %v17550_v44 = vcombine.low %v4724_v26, %v4728_v24  ;;  %v17494_v23 = vcombine.low %v4668_v56, %v4672_v8  ;;  %v3353_v26 = vld [vmem:[%s25320_s5 + $0x5f0] sm:$0xff] }
 0x5a3   : > { %v22430_v46 = vadd.f32 %v13538_v49, %v22344_v20  ;;  %13804 = vmatpush1.bf16.msra.mxu1 %v17398_v25  ;;  %v4676_v20 = vld [vmem:[%s25320_s5 + $0x2f48] sm:$0xff]  ;;  %v17543_v41 = vcombine.high %v4716_v33, %v4720_v58  ;;  %v17542_v61 = vcombine.low %v4716_v33, %v4720_v58  ;;  %v3345_v33 = vld [vmem:[%s25320_s5 + $0x5b0] sm:$0xff] }
 0x5a4   : > { %v13540_v52 = vpop.f32.mrf.mxu0  ;;  %13805 = vmatprep.subr.bf16.mxu1 %v17519_v29  ;;  %v17503_v50 = vcombine.high %v4676_v20, %v4680_v7  ;;  %v17502_v32 = vcombine.low %v4676_v20, %v4680_v7  ;;  %v4660_v25 = vld [vmem:[%s25320_s5 + $0x2ec8] sm:$0xff] }
 0x5a5   : > { %13833 = vmatpush1.bf16.msra.mxu0 %v17574_v18  ;;  %v4708_v29 = vld [vmem:[%s25320_s5 + $0x3048] sm:$0xff]  ;;  %v17487_v1 = vcombine.high %v4660_v25, %v4664_v43  ;;  %v17486_v28 = vcombine.low %v4660_v25, %v4664_v43  ;;  %v3225_v25 = vld [vmem:[%s25320_s5 + $0x1f0] sm:$0xff] }
 0x5a6   : > { %v13541_v38 = vpop.f32.mrf.mxu0  ;;  %13834 = vmatprep.subr.bf16.mxu0 %v17567_v19  ;;  %v4712_v18 = vld [vmem:[%s25320_s5 + $0x3068] sm:$0xff] }
 0x5a7   : > { %13806 = vmatpush2.bf16.msra.mxu1 %v17518_v51  ;;  %v4652_v49 = vld [vmem:[%s25320_s5 + $0x2e88] sm:$0xff]  ;;  %v17535_v51 = vcombine.high %v4708_v29, %v4712_v18 }
 0x5a8   : > { %13807 = vmatprep.subr.bf16.mxu1 %v17511_v14  ;;  %v4656_v19 = vld [vmem:[%s25320_s5 + $0x2ea8] sm:$0xff] }
 0x5a9   : > { %13835 = vmatpush1.bf16.msra.mxu0 %v17566_v13  ;;  %v4700_v6 = vld [vmem:[%s25320_s5 + $0x3008] sm:$0xff]  ;;  %v17479_v14 = vcombine.high %v4652_v49, %v4656_v19  ;;  %v17534_v13 = vcombine.low %v4708_v29, %v4712_v18  ;;  %v3337_v29 = vld [vmem:[%s25320_s5 + $0x570] sm:$0xff] }
 0x5aa   : > { %13836 = vmatprep.subr.bf16.mxu0 %v17559_v3  ;;  %v4704_v52 = vld [vmem:[%s25320_s5 + $0x3028] sm:$0xff]  ;;  %v17478_v3 = vcombine.low %v4652_v49, %v4656_v19  ;;  %v3217_v49 = vld [vmem:[%s25320_s5 + $0x1b0] sm:$0xff] }
 0x5ab   : > { %13808 = vmatpush2.bf16.msra.mxu1 %v17510_v17  ;;  %v4644_v20 = vld [vmem:[%s25320_s5 + $0x2e48] sm:$0xff]  ;;  %v17527_v38 = vcombine.high %v4700_v6, %v4704_v52  ;;  %v3349_v17 = vld [vmem:[%s25320_s5 + $0x5d0] sm:$0xff] }
 0x5ac   : > { %13809 = vmatprep.subr.bf16.mxu1 %v17503_v50  ;;  %v4648_v7 = vld [vmem:[%s25320_s5 + $0x2e68] sm:$0xff]  ;;  %v17526_v50 = vcombine.low %v4700_v6, %v4704_v52  ;;  %v16177_v8 = vcombine.high %v3349_v17, %v3353_v26  ;;  %v3329_v6 = vld [vmem:[%s25320_s5 + $0x530] sm:$0xff] }
 0x5ad   : > { %13837 = vmatpush1.bf16.msra.mxu0 %v17558_v35  ;;  %v17471_v24 = vcombine.high %v4644_v20, %v4648_v7  ;;  %v4636_v35 = vld [vmem:[%s25320_s5 + $0x2e08] sm:$0xff] }
 0x5ae   : > { %13838 = vmatprep.subr.bf16.mxu0 %v17551_v45  ;;  %v4640_v56 = vld [vmem:[%s25320_s5 + $0x2e28] sm:$0xff]  ;;  %v17470_v45 = vcombine.low %v4644_v20, %v4648_v7  ;;  %v3209_v20 = vld [vmem:[%s25320_s5 + $0x170] sm:$0xff] }
 0x5af   : > { %13810 = vmatpush2.bf16.msra.mxu1 %v17502_v32  ;;  %v3341_v32 = vld [vmem:[%s25320_s5 + $0x590] sm:$0xff]  ;;  %v17463_v58 = vcombine.high %v4636_v35, %v4640_v56 }
 0x5b0   : > { %13811 = vmatprep.subr.bf16.mxu1 %v17495_v59  ;;  %v16176_v59 = vcombine.low %v3349_v17, %v3353_v26  ;;  %v16169_v43 = vcombine.high %v3341_v32, %v3345_v33  ;;  %v3317_v26 = vld [vmem:[%s25320_s5 + $0x4d0] sm:$0xff] }
 0x5b1   : > { %13839 = vmatpush1.bf16.msra.mxu0 %v17550_v44  ;;  %v3221_v44 = vld [vmem:[%s25320_s5 + $0x1d0] sm:$0xff] }
 0x5b2   : > { %13840 = vmatprep.subr.bf16.mxu0 %v17543_v41  ;;  %v17462_v41 = vcombine.low %v4636_v35, %v4640_v56  ;;  %v16049_v18 = vcombine.high %v3221_v44, %v3225_v25 }
 0x5b3   : > { %13812 = vmatpush2.bf16.msra.mxu1 %v17494_v23  ;;  %v3333_v23 = vld [vmem:[%s25320_s5 + $0x550] sm:$0xff] }
 0x5b4   : > { %13813 = vmatprep.subr.bf16.mxu1 %v17487_v1  ;;  %v16168_v1 = vcombine.low %v3341_v32, %v3345_v33  ;;  %v16161_v19 = vcombine.high %v3333_v23, %v3337_v29 }
 0x5b5   : > { %13841 = vmatpush1.bf16.msra.mxu0 %v17542_v61  ;;  %v3213_v61 = vld [vmem:[%s25320_s5 + $0x190] sm:$0xff] }
 0x5b6   : > { %13842 = vmatprep.subr.bf16.mxu0 %v17535_v51  ;;  %v16048_v51 = vcombine.low %v3221_v44, %v3225_v25  ;;  %v16041_v52 = vcombine.high %v3213_v61, %v3217_v49  ;;  %v16040_v17 = vcombine.low %v3213_v61, %v3217_v49  ;;  %v3305_v61 = vld [vmem:[%s25320_s5 + $0x470] sm:$0xff] }
 0x5b7   : > { %13814 = vmatpush2.bf16.msra.mxu1 %v17486_v28  ;;  %v3325_v28 = vld [vmem:[%s25320_s5 + $0x510] sm:$0xff] }
 0x5b8   : > { %13815 = vmatprep.subr.bf16.mxu1 %v17479_v14  ;;  %v16160_v14 = vcombine.low %v3333_v23, %v3337_v29  ;;  %v3193_v23 = vld [vmem:[%s25320_s5 + $0xf0] sm:$0xff] }
 0x5b9   : > { %13843 = vmatpush1.bf16.msra.mxu0 %v17534_v13  ;;  %v3205_v13 = vld [vmem:[%s25320_s5 + $0x150] sm:$0xff] }
 0x5ba   : > { %13844 = vmatprep.subr.bf16.mxu0 %v17527_v38  ;;  %v16153_v38 = vcombine.high %v3325_v28, %v3329_v6  ;;  %v16033_v35 = vcombine.high %v3205_v13, %v3209_v20 }
 0x5bb   : > { %13816 = vmatpush2.bf16.msra.mxu1 %v17478_v3 }
 0x5bc   : > { %13817 = vmatprep.subr.bf16.mxu1 %v17471_v24  ;;  %v3321_v24 = vld [vmem:[%s25320_s5 + $0x4f0] sm:$0xff] }
 0x5bd   : > { %13845 = vmatpush1.bf16.msra.mxu0 %v17526_v50  ;;  %v16145_v33 = vcombine.high %v3317_v26, %v3321_v24 }
 0x5be   : > { %13912 = vmatprep.subr.bf16.mxu0 %v16177_v8  ;;  %v3197_v8 = vld [vmem:[%s25320_s5 + $0x110] sm:$0xff] }
 0x5bf   : > { %13818 = vmatpush2.bf16.msra.mxu1 %v17470_v45  ;;  %v3201_v45 = vld [vmem:[%s25320_s5 + $0x130] sm:$0xff] }
 0x5c0   : > { %13863 = vmatmul.mubr.bf16.vlgmr.msra.gmra.mxu0 %v21299_v9  ;;  %13819 = vmatprep.subr.bf16.mxu1 %v17463_v58  ;;  %v16032_v58 = vcombine.low %v3205_v13, %v3209_v20  ;;  %v16025_v25 = vcombine.high %v3197_v8, %v3201_v45  ;;  %v3297_v13 = vld [vmem:[%s25320_s5 + $0x430] sm:$0xff] }
 0x5c1   : > { %13913 = vmatpush1.bf16.msra.mxu0 %v16176_v59  ;;  %13944 = vmatprep.mubr.bf16.mxu0 %v20028_v60  ;;  %v3313_v59 = vld [vmem:[%s25320_s5 + $0x4b0] sm:$0xff] }
 0x5c2   : > { %13914 = vmatprep.subr.bf16.mxu0 %v16169_v43  ;;  %v16144_v43 = vcombine.low %v3317_v26, %v3321_v24 }
 0x5c3   : > { %13820 = vmatpush2.bf16.msra.mxu1 %v17462_v41  ;;  %v3189_v41 = vld [vmem:[%s25320_s5 + $0xd0] sm:$0xff] }
 0x5c4   : > { %13871 = vmatprep.subr.bf16.mxu1 %v16049_v18  ;;  %v16024_v18 = vcombine.low %v3197_v8, %v3201_v45  ;;  %v16017_v49 = vcombine.high %v3189_v41, %v3193_v23  ;;  %v3165_v45 = vld [vmem:[%s25320_s5 + $0x10] sm:$0xff] }
 0x5c5   : > { %13915 = vmatpush1.bf16.msra.mxu0 %v16168_v1  ;;  %v3301_v1 = vld [vmem:[%s25320_s5 + $0x450] sm:$0xff] }
 0x5c6   : > { %v13577_v7 = vpop.f32.mrf.mxu1  ;;  %13822 = vmatmul.mubr.bf16.vlgmr.msra.gmra.mxu1 %v21170_v48  ;;  %13916 = vmatprep.subr.bf16.mxu0 %v16161_v19 }
 0x5c7   : > { %v22544_v3 = vadd.f32 %v13577_v7, %v22420_v27  ;;  %13872 = vmatpush1.bf16.msra.mxu1 %v16048_v51  ;;  %13903 = vmatprep.mubr.bf16.mxu1 %v20049_v63  ;;  %v16152_v27 = vcombine.low %v3325_v28, %v3329_v6  ;;  %v3181_v51 = vld [vmem:[%s25320_s5 + $0x90] sm:$0xff]  ;;  %v16129_v6 = vcombine.high %v3301_v1, %v3305_v61 }
 0x5c8   : > { %v13579_v50 = vpop.f32.mrf.mxu1  ;;  %13873 = vmatprep.subr.bf16.mxu1 %v16041_v52  ;;  %v3185_v28 = vld [vmem:[%s25320_s5 + $0xb0] sm:$0xff]  ;;  %v16016_v52 = vcombine.low %v3189_v41, %v3193_v23  ;;  %v16128_v7 = vcombine.low %v3301_v1, %v3305_v61 }
 0x5c9   : > { %v22554_v56 = vadd.f32 %v13579_v50, %v22430_v46  ;;  %13917 = vmatpush1.bf16.msra.mxu0 %v16160_v14  ;;  %v3309_v46 = vld [vmem:[%s25320_s5 + $0x490] sm:$0xff]  ;;  %v16009_v20 = vcombine.high %v3181_v51, %v3185_v28  ;;  %v16008_v24 = vcombine.low %v3181_v51, %v3185_v28 }
 0x5ca   : > { %v13581_v32 = vpop.f32.mrf.mxu1  ;;  %13918 = vmatprep.subr.bf16.mxu0 %v16153_v38  ;;  %v16137_v29 = vcombine.high %v3309_v46, %v3313_v59  ;;  %v16136_v19 = vcombine.low %v3309_v46, %v3313_v59  ;;  %v3293_v14 = vld [vmem:[%s25320_s5 + $0x410] sm:$0xff] }
 0x5cb   : > { %13874 = vmatpush1.bf16.msra.mxu1 %v16040_v17  ;;  %v3173_v38 = vld [vmem:[%s25320_s5 + $0x50] sm:$0xff]  ;;  %v16121_v26 = vcombine.high %v3293_v14, %v3297_v13  ;;  %v16120_v8 = vcombine.low %v3293_v14, %v3297_v13 }
 0x5cc   : > { %v13582_v44 = vpop.f32.mrf.mxu1  ;;  %13875 = vmatprep.subr.bf16.mxu1 %v16033_v35  ;;  %v3177_v17 = vld [vmem:[%s25320_s5 + $0x70] sm:$0xff] }
 0x5cd   : > { %13919 = vmatpush1.bf16.msra.mxu0 %v16152_v27  ;;  %v3413_v50 = vld [vmem:[%s25320_s5 + $0x7d0] sm:$0xff]  ;;  %v16001_v27 = vcombine.high %v3173_v38, %v3177_v17 }
 0x5ce   : > { %13920 = vmatprep.subr.bf16.mxu0 %v16145_v33  ;;  %v3417_v35 = vld [vmem:[%s25320_s5 + $0x7f0] sm:$0xff] }
 0x5cf   : > { %13876 = vmatpush1.bf16.msra.mxu1 %v16032_v58  ;;  %v3169_v32 = vld [vmem:[%s25320_s5 + $0x30] sm:$0xff]  ;;  %v16241_v33 = vcombine.high %v3413_v50, %v3417_v35  ;;  %v16000_v58 = vcombine.low %v3173_v38, %v3177_v17 }
 0x5d0   : > { %13877 = vmatprep.subr.bf16.mxu1 %v16025_v25  ;;  %v3405_v46 = vld [vmem:[%s25320_s5 + $0x790] sm:$0xff]  ;;  %v15993_v44 = vcombine.high %v3165_v45, %v3169_v32  ;;  %v16240_v25 = vcombine.low %v3413_v50, %v3417_v35 }
 0x5d1   : > { %13921 = vmatpush1.bf16.msra.mxu0 %v16144_v43  ;;  %v3409_v59 = vld [vmem:[%s25320_s5 + $0x7b0] sm:$0xff] }
 0x5d2   : > { %13922 = vmatprep.subr.bf16.mxu0 %v16137_v29  ;;  %v3285_v43 = vld [vmem:[%s25320_s5 + $0x3d0] sm:$0xff]  ;;  %v16233_v23 = vcombine.high %v3405_v46, %v3409_v59  ;;  %v15992_v29 = vcombine.low %v3165_v45, %v3169_v32  ;;  %v16232_v51 = vcombine.low %v3405_v46, %v3409_v59 }
 0x5d3   : > { %13878 = vmatpush1.bf16.msra.mxu1 %v16024_v18  ;;  %v3289_v41 = vld [vmem:[%s25320_s5 + $0x3f0] sm:$0xff] }
 0x5d4   : > { %13879 = vmatprep.subr.bf16.mxu1 %v16017_v49  ;;  %v3397_v18 = vld [vmem:[%s25320_s5 + $0x750] sm:$0xff]  ;;  %v16113_v49 = vcombine.high %v3285_v43, %v3289_v41 }
 0x5d5   : > { %13923 = vmatpush1.bf16.msra.mxu0 %v16136_v19  ;;  %v3401_v1 = vld [vmem:[%s25320_s5 + $0x770] sm:$0xff] }
 0x5d6   : > { %13924 = vmatprep.subr.bf16.mxu0 %v16129_v6  ;;  %v3277_v28 = vld [vmem:[%s25320_s5 + $0x390] sm:$0xff]  ;;  %v16225_v14 = vcombine.high %v3397_v18, %v3401_v1 }
 0x5d7   : > { %13880 = vmatpush1.bf16.msra.mxu1 %v16016_v52  ;;  %v3281_v6 = vld [vmem:[%s25320_s5 + $0x3b0] sm:$0xff] }
 0x5d8   : > { %13881 = vmatprep.subr.bf16.mxu1 %v16009_v20  ;;  %v16112_v20 = vcombine.low %v3285_v43, %v3289_v41  ;;  %v16105_v17 = vcombine.high %v3277_v28, %v3281_v6  ;;  %v3385_v45 = vld [vmem:[%s25320_s5 + $0x6f0] sm:$0xff] }
 0x5d9   : > { %13925 = vmatpush1.bf16.msra.mxu0 %v16128_v7  ;;  %v3393_v7 = vld [vmem:[%s25320_s5 + $0x730] sm:$0xff] }
 0x5da   : > { %13926 = vmatprep.subr.bf16.mxu0 %v16121_v26  ;;  %v16224_v26 = vcombine.low %v3397_v18, %v3401_v1  ;;  %v3265_v46 = vld [vmem:[%s25320_s5 + $0x330] sm:$0xff] }
 0x5db   : > { %13882 = vmatpush1.bf16.msra.mxu1 %v16008_v24  ;;  %v3273_v24 = vld [vmem:[%s25320_s5 + $0x370] sm:$0xff] }
 0x5dc   : > { %13883 = vmatprep.subr.bf16.mxu1 %v16001_v27  ;;  %v16104_v27 = vcombine.low %v3277_v28, %v3281_v6  ;;  %v3377_v43 = vld [vmem:[%s25320_s5 + $0x6b0] sm:$0xff] }
 0x5dd   : > { %13927 = vmatpush1.bf16.msra.mxu0 %v16120_v8  ;;  %v3381_v8 = vld [vmem:[%s25320_s5 + $0x6d0] sm:$0xff] }
 0x5de   : > { %13928 = vmatprep.subr.bf16.mxu0 %v16241_v33  ;;  %v16209_v59 = vcombine.high %v3381_v8, %v3385_v45  ;;  %v3257_v18 = vld [vmem:[%s25320_s5 + $0x2f0] sm:$0xff] }
 0x5df   : > { %13884 = vmatpush1.bf16.msra.mxu1 %v16000_v58  ;;  %v3261_v58 = vld [vmem:[%s25320_s5 + $0x310] sm:$0xff] }
 0x5e0   : > { %v13618_v61 = vpop.f32.mrf.mxu0  ;;  %13885 = vmatprep.subr.bf16.mxu1 %v15993_v44  ;;  %v16089_v41 = vcombine.high %v3261_v58, %v3265_v46 }
 0x5e1   : > { %v22629_v19 = vadd.f32 %v13618_v61, %v22544_v3  ;;  %13929 = vmatpush2.bf16.msra.mxu0 %v16240_v25  ;;  %v3389_v3 = vld [vmem:[%s25320_s5 + $0x710] sm:$0xff]  ;;  %v16088_v61 = vcombine.low %v3261_v58, %v3265_v46 }
 0x5e2   : > { %v13620_v52 = vpop.f32.mrf.mxu0  ;;  %13930 = vmatprep.subr.bf16.mxu0 %v16233_v23  ;;  %v16217_v35 = vcombine.high %v3389_v3, %v3393_v7  ;;  %v16216_v33 = vcombine.low %v3389_v3, %v3393_v7  ;;  %v3373_v25 = vld [vmem:[%s25320_s5 + $0x690] sm:$0xff]  ;;  %v16208_v23 = vcombine.low %v3381_v8, %v3385_v45 }
 0x5e3   : > { %v22638_v13 = vadd.f32 %v13620_v52, %v22554_v56  ;;  %13886 = vmatpush1.bf16.msra.mxu1 %v15992_v29  ;;  %v3269_v56 = vld [vmem:[%s25320_s5 + $0x350] sm:$0xff]  ;;  %v16201_v1 = vcombine.high %v3373_v25, %v3377_v43  ;;  %v16200_v6 = vcombine.low %v3373_v25, %v3377_v43 }
 0x5e4   : > { %v13622_v38 = vpop.f32.mrf.mxu0  ;;  %13887 = vmatprep.subr.bf16.mxu1 %v16113_v49  ;;  %v16097_v32 = vcombine.high %v3269_v56, %v3273_v24  ;;  %v16096_v44 = vcombine.low %v3269_v56, %v3273_v24  ;;  %v3253_v29 = vld [vmem:[%s25320_s5 + $0x2d0] sm:$0xff] }
 0x5e5   : > { %13931 = vmatpush2.bf16.msra.mxu0 %v16232_v51  ;;  %v3365_v49 = vld [vmem:[%s25320_s5 + $0x650] sm:$0xff]  ;;  %v16081_v28 = vcombine.high %v3253_v29, %v3257_v18  ;;  %v16080_v3 = vcombine.low %v3253_v29, %v3257_v18 }
 0x5e6   : > { %v13623_v50 = vpop.f32.mrf.mxu0  ;;  %13932 = vmatprep.subr.bf16.mxu0 %v16225_v14  ;;  %v3369_v51 = vld [vmem:[%s25320_s5 + $0x670] sm:$0xff] }
 0x5e7   : > { %13888 = vmatpush2.bf16.msra.mxu1 %v16112_v20  ;;  %v3245_v52 = vld [vmem:[%s25320_s5 + $0x290] sm:$0xff]  ;;  %v16193_v20 = vcombine.high %v3365_v49, %v3369_v51 }
 0x5e8   : > { %13889 = vmatprep.subr.bf16.mxu1 %v16105_v17  ;;  %v3249_v14 = vld [vmem:[%s25320_s5 + $0x2b0] sm:$0xff] }
 0x5e9   : > { %13933 = vmatpush2.bf16.msra.mxu0 %v16224_v26  ;;  %v3357_v7 = vld [vmem:[%s25320_s5 + $0x610] sm:$0xff]  ;;  %v16073_v17 = vcombine.high %v3245_v52, %v3249_v14  ;;  %v16192_v26 = vcombine.low %v3365_v49, %v3369_v51 }
 0x5ea   : > { %13934 = vmatprep.subr.bf16.mxu0 %v16217_v35  ;;  %v3361_v38 = vld [vmem:[%s25320_s5 + $0x630] sm:$0xff]  ;;  %v16072_v35 = vcombine.low %v3245_v52, %v3249_v14 }
 0x5eb   : > { %13890 = vmatpush2.bf16.msra.mxu1 %v16104_v27  ;;  %v3237_v56 = vld [vmem:[%s25320_s5 + $0x250] sm:$0xff]  ;;  %v16185_v50 = vcombine.high %v3357_v7, %v3361_v38 }
 0x5ec   : > { %13891 = vmatprep.subr.bf16.mxu1 %v16097_v32  ;;  %v3241_v24 = vld [vmem:[%s25320_s5 + $0x270] sm:$0xff]  ;;  %v16184_v32 = vcombine.low %v3357_v7, %v3361_v38 }
 0x5ed   : > { %13935 = vmatpush2.bf16.msra.mxu0 %v16216_v33  ;;  %v3605_v27 = vld [vmem:[%s25320_s5 + $0xdd0] sm:$0xff]  ;;  %v16065_v45 = vcombine.high %v3237_v56, %v3241_v24 }
 0x5ee   : > { %13936 = vmatprep.subr.bf16.mxu0 %v16209_v59  ;;  %v3609_v8 = vld [vmem:[%s25320_s5 + $0xdf0] sm:$0xff]  ;;  %v16064_v59 = vcombine.low %v3237_v56, %v3241_v24 }
 0x5ef   : > { %13892 = vmatpush2.bf16.msra.mxu1 %v16096_v44  ;;  %v3229_v33 = vld [vmem:[%s25320_s5 + $0x210] sm:$0xff]  ;;  %v16433_v46 = vcombine.high %v3605_v27, %v3609_v8 }
 0x5f0   : > { %13893 = vmatprep.subr.bf16.mxu1 %v16089_v41  ;;  %v3233_v58 = vld [vmem:[%s25320_s5 + $0x230] sm:$0xff]  ;;  %v16432_v41 = vcombine.low %v3605_v27, %v3609_v8 }
 0x5f1   : > { %13937 = vmatpush2.bf16.msra.mxu0 %v16208_v23  ;;  %v3597_v44 = vld [vmem:[%s25320_s5 + $0xd90] sm:$0xff]  ;;  %v16057_v43 = vcombine.high %v3229_v33, %v3233_v58 }
 0x5f2   : > { %13938 = vmatprep.subr.bf16.mxu0 %v16201_v1  ;;  %v3601_v25 = vld [vmem:[%s25320_s5 + $0xdb0] sm:$0xff]  ;;  %v16056_v1 = vcombine.low %v3229_v33, %v3233_v58 }
 0x5f3   : > { %13894 = vmatpush2.bf16.msra.mxu1 %v16088_v61  ;;  %v3477_v23 = vld [vmem:[%s25320_s5 + $0x9d0] sm:$0xff]  ;;  %v16425_v18 = vcombine.high %v3597_v44, %v3601_v25 }
 0x5f4   : > { %13895 = vmatprep.subr.bf16.mxu1 %v16081_v28  ;;  %v3481_v29 = vld [vmem:[%s25320_s5 + $0x9f0] sm:$0xff]  ;;  %v16424_v28 = vcombine.low %v3597_v44, %v3601_v25 }
 0x5f5   : > { %13939 = vmatpush2.bf16.msra.mxu0 %v16200_v6  ;;  %v3589_v61 = vld [vmem:[%s25320_s5 + $0xd50] sm:$0xff]  ;;  %v16305_v51 = vcombine.high %v3477_v23, %v3481_v29 }
 0x5f6   : > { %13940 = vmatprep.subr.bf16.mxu0 %v16193_v20  ;;  %v3593_v49 = vld [vmem:[%s25320_s5 + $0xd70] sm:$0xff]  ;;  %v16304_v20 = vcombine.low %v3477_v23, %v3481_v29 }
 0x5f7   : > { %13896 = vmatpush2.bf16.msra.mxu1 %v16080_v3  ;;  %v3469_v6 = vld [vmem:[%s25320_s5 + $0x990] sm:$0xff]  ;;  %v16417_v14 = vcombine.high %v3589_v61, %v3593_v49 }
 0x5f8   : > { %13897 = vmatprep.subr.bf16.mxu1 %v16073_v17  ;;  %v3473_v52 = vld [vmem:[%s25320_s5 + $0x9b0] sm:$0xff]  ;;  %v16416_v17 = vcombine.low %v3589_v61, %v3593_v49 }
 0x5f9   : > { %13941 = vmatpush2.bf16.msra.mxu0 %v16192_v26  ;;  %v3581_v3 = vld [vmem:[%s25320_s5 + $0xd10] sm:$0xff]  ;;  %v16297_v38 = vcombine.high %v3469_v6, %v3473_v52  ;;  %v16296_v27 = vcombine.low %v3469_v6, %v3473_v52 }
 0x5fa   : > { %13942 = vmatprep.subr.bf16.mxu0 %v16185_v50  ;;  %v3585_v7 = vld [vmem:[%s25320_s5 + $0xd30] sm:$0xff] }
 0x5fb   : > { %13898 = vmatpush2.bf16.msra.mxu1 %v16072_v35  ;;  %v3461_v26 = vld [vmem:[%s25320_s5 + $0x950] sm:$0xff]  ;;  %v16409_v50 = vcombine.high %v3581_v3, %v3585_v7 }
 0x5fc   : > { %13899 = vmatprep.subr.bf16.mxu1 %v16065_v45  ;;  %v3465_v56 = vld [vmem:[%s25320_s5 + $0x970] sm:$0xff] }
 0x5fd   : > { %13943 = vmatpush2.bf16.msra.mxu0 %v16184_v32  ;;  %v3573_v8 = vld [vmem:[%s25320_s5 + $0xcd0] sm:$0xff]  ;;  %v16289_v33 = vcombine.high %v3461_v26, %v3465_v56 }
 0x5fe   : > { %13994 = vmatprep.subr.bf16.mxu0 %v16433_v46  ;;  %v3577_v45 = vld [vmem:[%s25320_s5 + $0xcf0] sm:$0xff] }
 0x5ff   : > { %13900 = vmatpush2.bf16.msra.mxu1 %v16064_v59  ;;  %v3453_v46 = vld [vmem:[%s25320_s5 + $0x910] sm:$0xff]  ;;  %v16401_v25 = vcombine.high %v3573_v8, %v3577_v45 }
 0x600   : > { %13945 = vmatmul.mubr.bf16.vlgmr.msra.gmra.mxu0 %v20023_v47  ;;  %13901 = vmatprep.subr.bf16.mxu1 %v16057_v43  ;;  %v3457_v59 = vld [vmem:[%s25320_s5 + $0x930] sm:$0xff]  ;;  %v16288_v43 = vcombine.low %v3461_v26, %v3465_v56 }
 0x601   : > { %13995 = vmatpush1.bf16.msra.mxu0 %v16432_v41  ;;  %14026 = vmatprep.mubr.bf16.mxu0 %v20134_v37  ;;  %v3569_v41 = vld [vmem:[%s25320_s5 + $0xcb0] sm:$0xff]  ;;  %v16281_v29 = vcombine.high %v3453_v46, %v3457_v59 }
 0x602   : > { %13996 = vmatprep.subr.bf16.mxu0 %v16425_v18  ;;  %v16400_v18 = vcombine.low %v3573_v8, %v3577_v45  ;;  %v3449_v61 = vld [vmem:[%s25320_s5 + $0x8f0] sm:$0xff] }
 0x603   : > { %13902 = vmatpush2.bf16.msra.mxu1 %v16056_v1  ;;  %v3445_v1 = vld [vmem:[%s25320_s5 + $0x8d0] sm:$0xff] }
 0x604   : > { %13953 = vmatprep.subr.bf16.mxu1 %v16305_v51  ;;  %v16280_v51 = vcombine.low %v3453_v46, %v3457_v59  ;;  %v3561_v6 = vld [vmem:[%s25320_s5 + $0xc70] sm:$0xff]  ;;  %v16273_v52 = vcombine.high %v3445_v1, %v3449_v61 }
 0x605   : > { %13997 = vmatpush1.bf16.msra.mxu0 %v16424_v28  ;;  %v3557_v28 = vld [vmem:[%s25320_s5 + $0xc50] sm:$0xff] }
 0x606   : > { %v13659_v24 = vpop.f32.mrf.mxu1  ;;  %13904 = vmatmul.mubr.bf16.vlgmr.msra.gmra.mxu1 %v20055_v10  ;;  %13998 = vmatprep.subr.bf16.mxu0 %v16417_v14  ;;  %v3553_v26 = vld [vmem:[%s25320_s5 + $0xc30] sm:$0xff] }
 0x607   : > { %v22752_v35 = vadd.f32 %v13659_v24, %v22629_v19  ;;  %13954 = vmatpush1.bf16.msra.mxu1 %v16304_v20  ;;  %13985 = vmatprep.mubr.bf16.mxu1 %v20076_v0  ;;  %v16408_v19 = vcombine.low %v3581_v3, %v3585_v7  ;;  %v3437_v20 = vld [vmem:[%s25320_s5 + $0x890] sm:$0xff]  ;;  %v16385_v7 = vcombine.high %v3557_v28, %v3561_v6 }
 0x608   : > { %v13661_v32 = vpop.f32.mrf.mxu1  ;;  %13955 = vmatprep.subr.bf16.mxu1 %v16297_v38  ;;  %v3441_v3 = vld [vmem:[%s25320_s5 + $0x8b0] sm:$0xff]  ;;  %v16272_v38 = vcombine.low %v3445_v1, %v3449_v61  ;;  %v16384_v24 = vcombine.low %v3557_v28, %v3561_v6 }
 0x609   : > { %v22762_v58 = vadd.f32 %v13661_v32, %v22638_v13  ;;  %13999 = vmatpush1.bf16.msra.mxu0 %v16416_v17  ;;  %v3565_v13 = vld [vmem:[%s25320_s5 + $0xc90] sm:$0xff]  ;;  %v16265_v56 = vcombine.high %v3437_v20, %v3441_v3  ;;  %v16264_v45 = vcombine.low %v3437_v20, %v3441_v3 }
 0x60a   : > { %v13663_v44 = vpop.f32.mrf.mxu1  ;;  %14000 = vmatprep.subr.bf16.mxu0 %v16409_v50  ;;  %v16393_v49 = vcombine.high %v3565_v13, %v3569_v41  ;;  %v16392_v14 = vcombine.low %v3565_v13, %v3569_v41  ;;  %v3549_v17 = vld [vmem:[%s25320_s5 + $0xc10] sm:$0xff] }
 0x60b   : > { %13956 = vmatpush1.bf16.msra.mxu1 %v16296_v27  ;;  %v3429_v50 = vld [vmem:[%s25320_s5 + $0x850] sm:$0xff]  ;;  %v16377_v8 = vcombine.high %v3549_v17, %v3553_v26  ;;  %v16376_v46 = vcombine.low %v3549_v17, %v3553_v26 }
 0x60c   : > { %v13664_v23 = vpop.f32.mrf.mxu1  ;;  %13957 = vmatprep.subr.bf16.mxu1 %v16289_v33  ;;  %v3433_v27 = vld [vmem:[%s25320_s5 + $0x870] sm:$0xff] }
 0x60d   : > { %14001 = vmatpush1.bf16.msra.mxu0 %v16408_v19  ;;  %v3669_v32 = vld [vmem:[%s25320_s5 + $0xfd0] sm:$0xff]  ;;  %v16257_v19 = vcombine.high %v3429_v50, %v3433_v27 }
 0x60e   : > { %14002 = vmatprep.subr.bf16.mxu0 %v16401_v25  ;;  %v3673_v33 = vld [vmem:[%s25320_s5 + $0xff0] sm:$0xff] }
 0x60f   : > { %13958 = vmatpush1.bf16.msra.mxu1 %v16288_v43  ;;  %v3421_v59 = vld [vmem:[%s25320_s5 + $0x810] sm:$0xff]  ;;  %v16497_v25 = vcombine.high %v3669_v32, %v3673_v33  ;;  %v16256_v43 = vcombine.low %v3429_v50, %v3433_v27 }
 0x610   : > { %13959 = vmatprep.subr.bf16.mxu1 %v16281_v29  ;;  %v3425_v44 = vld [vmem:[%s25320_s5 + $0x830] sm:$0xff]  ;;  %v16496_v29 = vcombine.low %v3669_v32, %v3673_v33 }
 0x611   : > { %14003 = vmatpush1.bf16.msra.mxu0 %v16400_v18  ;;  %v3661_v13 = vld [vmem:[%s25320_s5 + $0xf90] sm:$0xff]  ;;  %v16249_v23 = vcombine.high %v3421_v59, %v3425_v44 }
 0x612   : > { %14004 = vmatprep.subr.bf16.mxu0 %v16393_v49  ;;  %v3665_v41 = vld [vmem:[%s25320_s5 + $0xfb0] sm:$0xff]  ;;  %v16248_v49 = vcombine.low %v3421_v59, %v3425_v44 }
 0x613   : > { %13960 = vmatpush1.bf16.msra.mxu1 %v16280_v51  ;;  %v3541_v18 = vld [vmem:[%s25320_s5 + $0xbd0] sm:$0xff]  ;;  %v16489_v61 = vcombine.high %v3661_v13, %v3665_v41  ;;  %v16488_v20 = vcombine.low %v3661_v13, %v3665_v41 }
 0x614   : > { %13961 = vmatprep.subr.bf16.mxu1 %v16273_v52  ;;  %v3545_v1 = vld [vmem:[%s25320_s5 + $0xbf0] sm:$0xff] }
 0x615   : > { %14005 = vmatpush1.bf16.msra.mxu0 %v16392_v14  ;;  %v3653_v51 = vld [vmem:[%s25320_s5 + $0xf50] sm:$0xff]  ;;  %v16369_v52 = vcombine.high %v3541_v18, %v3545_v1 }
 0x616   : > { %14006 = vmatprep.subr.bf16.mxu0 %v16385_v7  ;;  %v3657_v28 = vld [vmem:[%s25320_s5 + $0xf70] sm:$0xff] }
 0x617   : > { %13962 = vmatpush1.bf16.msra.mxu1 %v16272_v38  ;;  %v3533_v3 = vld [vmem:[%s25320_s5 + $0xb90] sm:$0xff]  ;;  %v16481_v17 = vcombine.high %v3653_v51, %v3657_v28 }
 0x618   : > { %13963 = vmatprep.subr.bf16.mxu1 %v16265_v56  ;;  %v3537_v7 = vld [vmem:[%s25320_s5 + $0xbb0] sm:$0xff]  ;;  %v16368_v56 = vcombine.low %v3541_v18, %v3545_v1 }
 0x619   : > { %14007 = vmatpush1.bf16.msra.mxu0 %v16384_v24  ;;  %v3649_v24 = vld [vmem:[%s25320_s5 + $0xf30] sm:$0xff]  ;;  %v16361_v27 = vcombine.high %v3533_v3, %v3537_v7 }
 0x61a   : > { %14008 = vmatprep.subr.bf16.mxu0 %v16377_v8  ;;  %v16480_v8 = vcombine.low %v3653_v51, %v3657_v28  ;;  %v3641_v59 = vld [vmem:[%s25320_s5 + $0xef0] sm:$0xff] }
 0x61b   : > { %13964 = vmatpush1.bf16.msra.mxu1 %v16264_v45  ;;  %v3529_v45 = vld [vmem:[%s25320_s5 + $0xb70] sm:$0xff] }
 0x61c   : > { %13965 = vmatprep.subr.bf16.mxu1 %v16257_v19  ;;  %v16360_v19 = vcombine.low %v3533_v3, %v3537_v7  ;;  %v3521_v13 = vld [vmem:[%s25320_s5 + $0xb30] sm:$0xff] }
 0x61d   : > { %14009 = vmatpush1.bf16.msra.mxu0 %v16376_v46  ;;  %v3637_v46 = vld [vmem:[%s25320_s5 + $0xed0] sm:$0xff] }
 0x61e   : > { %14010 = vmatprep.subr.bf16.mxu0 %v16497_v25  ;;  %v16465_v41 = vcombine.high %v3637_v46, %v3641_v59  ;;  %v3633_v18 = vld [vmem:[%s25320_s5 + $0xeb0] sm:$0xff] }
 0x61f   : > { %13966 = vmatpush1.bf16.msra.mxu1 %v16256_v43  ;;  %v3517_v43 = vld [vmem:[%s25320_s5 + $0xb10] sm:$0xff] }
 0x620   : > { %v13700_v6 = vpop.f32.mrf.mxu0  ;;  %13967 = vmatprep.subr.bf16.mxu1 %v16249_v23  ;;  %v16345_v1 = vcombine.high %v3517_v43, %v3521_v13  ;;  %v3513_v51 = vld [vmem:[%s25320_s5 + $0xaf0] sm:$0xff] }
 0x621   : > { %v22837_v14 = vadd.f32 %v13700_v6, %v22752_v35  ;;  %14011 = vmatpush2.bf16.msra.mxu0 %v16496_v29  ;;  %v3645_v35 = vld [vmem:[%s25320_s5 + $0xf10] sm:$0xff]  ;;  %v16344_v6 = vcombine.low %v3517_v43, %v3521_v13 }
 0x622   : > { %v13702_v38 = vpop.f32.mrf.mxu0  ;;  %14012 = vmatprep.subr.bf16.mxu0 %v16489_v61  ;;  %v16473_v33 = vcombine.high %v3645_v35, %v3649_v24  ;;  %v16472_v25 = vcombine.low %v3645_v35, %v3649_v24  ;;  %v3629_v29 = vld [vmem:[%s25320_s5 + $0xe90] sm:$0xff]  ;;  %v16464_v61 = vcombine.low %v3637_v46, %v3641_v59 }
 0x623   : > { %v22846_v26 = vadd.f32 %v13702_v38, %v22762_v58  ;;  %13968 = vmatpush1.bf16.msra.mxu1 %v16248_v49  ;;  %v3525_v58 = vld [vmem:[%s25320_s5 + $0xb50] sm:$0xff]  ;;  %v16457_v28 = vcombine.high %v3629_v29, %v3633_v18  ;;  %v16456_v7 = vcombine.low %v3629_v29, %v3633_v18 }
 0x624   : > { %v13704_v50 = vpop.f32.mrf.mxu0  ;;  %13969 = vmatprep.subr.bf16.mxu1 %v16369_v52  ;;  %v16353_v44 = vcombine.high %v3525_v58, %v3529_v45  ;;  %v16352_v23 = vcombine.low %v3525_v58, %v3529_v45  ;;  %v3509_v49 = vld [vmem:[%s25320_s5 + $0xad0] sm:$0xff] }
 0x625   : > { %14013 = vmatpush2.bf16.msra.mxu0 %v16488_v20  ;;  %v3621_v52 = vld [vmem:[%s25320_s5 + $0xe50] sm:$0xff]  ;;  %v16337_v3 = vcombine.high %v3509_v49, %v3513_v51  ;;  %v16336_v35 = vcombine.low %v3509_v49, %v3513_v51 }
 0x626   : > { %v13705_v32 = vpop.f32.mrf.mxu0  ;;  %14014 = vmatprep.subr.bf16.mxu0 %v16481_v17  ;;  %v3625_v20 = vld [vmem:[%s25320_s5 + $0xe70] sm:$0xff] }
 0x627   : > { %13970 = vmatpush2.bf16.msra.mxu1 %v16368_v56  ;;  %v3501_v38 = vld [vmem:[%s25320_s5 + $0xa90] sm:$0xff]  ;;  %v16449_v56 = vcombine.high %v3621_v52, %v3625_v20 }
 0x628   : > { %13971 = vmatprep.subr.bf16.mxu1 %v16361_v27  ;;  %v3505_v17 = vld [vmem:[%s25320_s5 + $0xab0] sm:$0xff] }
 0x629   : > { %14015 = vmatpush2.bf16.msra.mxu0 %v16480_v8  ;;  %v3613_v24 = vld [vmem:[%s25320_s5 + $0xe10] sm:$0xff]  ;;  %v16329_v27 = vcombine.high %v3501_v38, %v3505_v17  ;;  %v16448_v8 = vcombine.low %v3621_v52, %v3625_v20 }
 0x62a   : > { %14016 = vmatprep.subr.bf16.mxu0 %v16473_v33  ;;  %v3617_v50 = vld [vmem:[%s25320_s5 + $0xe30] sm:$0xff]  ;;  %v16328_v33 = vcombine.low %v3501_v38, %v3505_v17 }
 0x62b   : > { %13972 = vmatpush2.bf16.msra.mxu1 %v16360_v19  ;;  %v3493_v58 = vld [vmem:[%s25320_s5 + $0xa50] sm:$0xff]  ;;  %v16441_v32 = vcombine.high %v3613_v24, %v3617_v50 }
 0x62c   : > { %13973 = vmatprep.subr.bf16.mxu1 %v16353_v44  ;;  %v3497_v45 = vld [vmem:[%s25320_s5 + $0xa70] sm:$0xff]  ;;  %v16440_v44 = vcombine.low %v3613_v24, %v3617_v50 }
 0x62d   : > { %14017 = vmatpush2.bf16.msra.mxu0 %v16472_v25  ;;  %v3861_v19 = vld [vmem:[%s25320_s5 + $0x15d0] sm:$0xff]  ;;  %v16321_v59 = vcombine.high %v3493_v58, %v3497_v45 }
 0x62e   : > { %14018 = vmatprep.subr.bf16.mxu0 %v16465_v41  ;;  %v3865_v46 = vld [vmem:[%s25320_s5 + $0x15f0] sm:$0xff]  ;;  %v16320_v41 = vcombine.low %v3493_v58, %v3497_v45 }
 0x62f   : > { %13974 = vmatpush2.bf16.msra.mxu1 %v16352_v23  ;;  %v3485_v25 = vld [vmem:[%s25320_s5 + $0xa10] sm:$0xff]  ;;  %v16689_v13 = vcombine.high %v3861_v19, %v3865_v46 }
 0x630   : > { %13975 = vmatprep.subr.bf16.mxu1 %v16345_v1  ;;  %v3489_v43 = vld [vmem:[%s25320_s5 + $0xa30] sm:$0xff]  ;;  %v16688_v1 = vcombine.low %v3861_v19, %v3865_v46 }
 0x631   : > { %14019 = vmatpush2.bf16.msra.mxu0 %v16464_v61  ;;  %v3853_v23 = vld [vmem:[%s25320_s5 + $0x1590] sm:$0xff]  ;;  %v16313_v18 = vcombine.high %v3485_v25, %v3489_v43 }
 0x632   : > { %14020 = vmatprep.subr.bf16.mxu0 %v16457_v28  ;;  %v3857_v29 = vld [vmem:[%s25320_s5 + $0x15b0] sm:$0xff]  ;;  %v16312_v28 = vcombine.low %v3485_v25, %v3489_v43 }
 0x633   : > { %13976 = vmatpush2.bf16.msra.mxu1 %v16344_v6  ;;  %v3733_v61 = vld [vmem:[%s25320_s5 + $0x11d0] sm:$0xff]  ;;  %v16681_v51 = vcombine.high %v3853_v23, %v3857_v29 }
 0x634   : > { %13977 = vmatprep.subr.bf16.mxu1 %v16337_v3  ;;  %v3737_v49 = vld [vmem:[%s25320_s5 + $0x11f0] sm:$0xff]  ;;  %v16680_v3 = vcombine.low %v3853_v23, %v3857_v29 }
 0x635   : > { %14021 = vmatpush2.bf16.msra.mxu0 %v16456_v7  ;;  %v3845_v6 = vld [vmem:[%s25320_s5 + $0x1550] sm:$0xff]  ;;  %v16561_v20 = vcombine.high %v3733_v61, %v3737_v49 }
 0x636   : > { %14022 = vmatprep.subr.bf16.mxu0 %v16449_v56  ;;  %v3849_v52 = vld [vmem:[%s25320_s5 + $0x1570] sm:$0xff]  ;;  %v16560_v56 = vcombine.low %v3733_v61, %v3737_v49 }
 0x637   : > { %13978 = vmatpush2.bf16.msra.mxu1 %v16336_v35  ;;  %v3725_v7 = vld [vmem:[%s25320_s5 + $0x1190] sm:$0xff]  ;;  %v16673_v17 = vcombine.high %v3845_v6, %v3849_v52 }
 0x638   : > { %13979 = vmatprep.subr.bf16.mxu1 %v16329_v27  ;;  %v3729_v38 = vld [vmem:[%s25320_s5 + $0x11b0] sm:$0xff]  ;;  %v16672_v27 = vcombine.low %v3845_v6, %v3849_v52 }
 0x639   : > { %14023 = vmatpush2.bf16.msra.mxu0 %v16448_v8  ;;  %v3837_v35 = vld [vmem:[%s25320_s5 + $0x1510] sm:$0xff]  ;;  %v16553_v50 = vcombine.high %v3725_v7, %v3729_v38  ;;  %v16552_v19 = vcombine.low %v3725_v7, %v3729_v38 }
 0x63a   : > { %14024 = vmatprep.subr.bf16.mxu0 %v16441_v32  ;;  %v3841_v24 = vld [vmem:[%s25320_s5 + $0x1530] sm:$0xff] }
 0x63b   : > { %13980 = vmatpush2.bf16.msra.mxu1 %v16328_v33  ;;  %v3717_v8 = vld [vmem:[%s25320_s5 + $0x1150] sm:$0xff]  ;;  %v16665_v32 = vcombine.high %v3837_v35, %v3841_v24 }
 0x63c   : > { %13981 = vmatprep.subr.bf16.mxu1 %v16321_v59  ;;  %v3721_v58 = vld [vmem:[%s25320_s5 + $0x1170] sm:$0xff] }
 0x63d   : > { %14025 = vmatpush2.bf16.msra.mxu0 %v16440_v44  ;;  %v3829_v46 = vld [vmem:[%s25320_s5 + $0x14d0] sm:$0xff]  ;;  %v16545_v25 = vcombine.high %v3717_v8, %v3721_v58 }
 0x63e   : > { %14076 = vmatprep.subr.bf16.mxu0 %v16689_v13  ;;  %v3833_v59 = vld [vmem:[%s25320_s5 + $0x14f0] sm:$0xff] }
 0x63f   : > { %13982 = vmatpush2.bf16.msra.mxu1 %v16320_v41  ;;  %v3709_v13 = vld [vmem:[%s25320_s5 + $0x1110] sm:$0xff]  ;;  %v16657_v29 = vcombine.high %v3829_v46, %v3833_v59 }
 0x640   : > { %14027 = vmatmul.mubr.bf16.vlgmr.msra.gmra.mxu0 %v20315_v4  ;;  %13983 = vmatprep.subr.bf16.mxu1 %v16313_v18  ;;  %v3713_v41 = vld [vmem:[%s25320_s5 + $0x1130] sm:$0xff]  ;;  %v16544_v18 = vcombine.low %v3717_v8, %v3721_v58 }
 0x641   : > { %14077 = vmatpush1.bf16.msra.mxu0 %v16688_v1  ;;  %14108 = vmatprep.mubr.bf16.mxu0 %v20317_v16  ;;  %v3825_v1 = vld [vmem:[%s25320_s5 + $0x14b0] sm:$0xff]  ;;  %v16537_v49 = vcombine.high %v3709_v13, %v3713_v41 }
 0x642   : > { %14078 = vmatprep.subr.bf16.mxu0 %v16681_v51  ;;  %v16656_v51 = vcombine.low %v3829_v46, %v3833_v59  ;;  %v3705_v6 = vld [vmem:[%s25320_s5 + $0x10f0] sm:$0xff] }
 0x643   : > { %13984 = vmatpush2.bf16.msra.mxu1 %v16312_v28  ;;  %v3701_v28 = vld [vmem:[%s25320_s5 + $0x10d0] sm:$0xff] }
 0x644   : > { %14035 = vmatprep.subr.bf16.mxu1 %v16561_v20  ;;  %v16536_v20 = vcombine.low %v3709_v13, %v3713_v41  ;;  %v3817_v7 = vld [vmem:[%s25320_s5 + $0x1470] sm:$0xff]  ;;  %v16529_v38 = vcombine.high %v3701_v28, %v3705_v6 }
 0x645   : > { %14079 = vmatpush1.bf16.msra.mxu0 %v16680_v3  ;;  %v3813_v3 = vld [vmem:[%s25320_s5 + $0x1450] sm:$0xff] }
 0x646   : > { %v13741_v45 = vpop.f32.mrf.mxu1  ;;  %13986 = vmatmul.mubr.bf16.vlgmr.msra.gmra.mxu1 %v20344_v39  ;;  %14080 = vmatprep.subr.bf16.mxu0 %v16673_v17  ;;  %v3809_v8 = vld [vmem:[%s25320_s5 + $0x1430] sm:$0xff] }
 0x647   : > { %v22960_v33 = vadd.f32 %v13741_v45, %v22837_v14  ;;  %14036 = vmatpush1.bf16.msra.mxu1 %v16560_v56  ;;  %14067 = vmatprep.mubr.bf16.mxu1 %v20346_v2  ;;  %v16664_v14 = vcombine.low %v3837_v35, %v3841_v24  ;;  %v3693_v56 = vld [vmem:[%s25320_s5 + $0x1090] sm:$0xff]  ;;  %v16641_v24 = vcombine.high %v3813_v3, %v3817_v7 }
 0x648   : > { %v13743_v44 = vpop.f32.mrf.mxu1  ;;  %14037 = vmatprep.subr.bf16.mxu1 %v16553_v50  ;;  %v3697_v35 = vld [vmem:[%s25320_s5 + $0x10b0] sm:$0xff]  ;;  %v16528_v50 = vcombine.low %v3701_v28, %v3705_v6  ;;  %v16640_v45 = vcombine.low %v3813_v3, %v3817_v7 }
 0x649   : > { %v22970_v43 = vadd.f32 %v13743_v44, %v22846_v26  ;;  %14081 = vmatpush1.bf16.msra.mxu0 %v16672_v27  ;;  %v3821_v26 = vld [vmem:[%s25320_s5 + $0x1490] sm:$0xff]  ;;  %v16521_v58 = vcombine.high %v3693_v56, %v3697_v35  ;;  %v16520_v59 = vcombine.low %v3693_v56, %v3697_v35 }
 0x64a   : > { %v13745_v23 = vpop.f32.mrf.mxu1  ;;  %14082 = vmatprep.subr.bf16.mxu0 %v16665_v32  ;;  %v16649_v52 = vcombine.high %v3821_v26, %v3825_v1  ;;  %v16648_v17 = vcombine.low %v3821_v26, %v3825_v1  ;;  %v3805_v27 = vld [vmem:[%s25320_s5 + $0x1410] sm:$0xff] }
 0x64b   : > { %14038 = vmatpush1.bf16.msra.mxu1 %v16552_v19  ;;  %v3685_v32 = vld [vmem:[%s25320_s5 + $0x1050] sm:$0xff]  ;;  %v16633_v46 = vcombine.high %v3805_v27, %v3809_v8  ;;  %v16632_v13 = vcombine.low %v3805_v27, %v3809_v8 }
 0x64c   : > { %v13746_v61 = vpop.f32.mrf.mxu1  ;;  %14039 = vmatprep.subr.bf16.mxu1 %v16545_v25  ;;  %v3689_v19 = vld [vmem:[%s25320_s5 + $0x1070] sm:$0xff] }
 0x64d   : > { %14083 = vmatpush1.bf16.msra.mxu0 %v16664_v14  ;;  %v3925_v44 = vld [vmem:[%s25320_s5 + $0x17d0] sm:$0xff]  ;;  %v16513_v14 = vcombine.high %v3685_v32, %v3689_v19 }
 0x64e   : > { %14084 = vmatprep.subr.bf16.mxu0 %v16657_v29  ;;  %v3929_v25 = vld [vmem:[%s25320_s5 + $0x17f0] sm:$0xff] }
 0x64f   : > { %14040 = vmatpush1.bf16.msra.mxu1 %v16544_v18  ;;  %v3677_v41 = vld [vmem:[%s25320_s5 + $0x1010] sm:$0xff]  ;;  %v16753_v29 = vcombine.high %v3925_v44, %v3929_v25  ;;  %v16512_v18 = vcombine.low %v3685_v32, %v3689_v19 }
 0x650   : > { %14041 = vmatprep.subr.bf16.mxu1 %v16537_v49  ;;  %v3681_v23 = vld [vmem:[%s25320_s5 + $0x1030] sm:$0xff]  ;;  %v16752_v49 = vcombine.low %v3925_v44, %v3929_v25 }
 0x651   : > { %14085 = vmatpush1.bf16.msra.mxu0 %v16656_v51  ;;  %v3917_v26 = vld [vmem:[%s25320_s5 + $0x1790] sm:$0xff]  ;;  %v16505_v61 = vcombine.high %v3677_v41, %v3681_v23 }
 0x652   : > { %14086 = vmatprep.subr.bf16.mxu0 %v16649_v52  ;;  %v3921_v1 = vld [vmem:[%s25320_s5 + $0x17b0] sm:$0xff]  ;;  %v16504_v52 = vcombine.low %v3677_v41, %v3681_v23 }
 0x653   : > { %14042 = vmatpush1.bf16.msra.mxu1 %v16536_v20  ;;  %v3797_v51 = vld [vmem:[%s25320_s5 + $0x13d0] sm:$0xff]  ;;  %v16745_v6 = vcombine.high %v3917_v26, %v3921_v1  ;;  %v16744_v56 = vcombine.low %v3917_v26, %v3921_v1 }
 0x654   : > { %14043 = vmatprep.subr.bf16.mxu1 %v16529_v38  ;;  %v3801_v28 = vld [vmem:[%s25320_s5 + $0x13f0] sm:$0xff] }
 0x655   : > { %14087 = vmatpush1.bf16.msra.mxu0 %v16648_v17  ;;  %v3909_v20 = vld [vmem:[%s25320_s5 + $0x1750] sm:$0xff]  ;;  %v16625_v38 = vcombine.high %v3797_v51, %v3801_v28 }
 0x656   : > { %14088 = vmatprep.subr.bf16.mxu0 %v16641_v24  ;;  %v3913_v3 = vld [vmem:[%s25320_s5 + $0x1770] sm:$0xff] }
 0x657   : > { %14044 = vmatpush1.bf16.msra.mxu1 %v16528_v50  ;;  %v3789_v35 = vld [vmem:[%s25320_s5 + $0x1390] sm:$0xff]  ;;  %v16737_v27 = vcombine.high %v3909_v20, %v3913_v3 }
 0x658   : > { %14045 = vmatprep.subr.bf16.mxu1 %v16521_v58  ;;  %v3793_v24 = vld [vmem:[%s25320_s5 + $0x13b0] sm:$0xff]  ;;  %v16624_v58 = vcombine.low %v3797_v51, %v3801_v28 }
 0x659   : > { %14089 = vmatpush1.bf16.msra.mxu0 %v16640_v45  ;;  %v3905_v45 = vld [vmem:[%s25320_s5 + $0x1730] sm:$0xff]  ;;  %v16617_v19 = vcombine.high %v3789_v35, %v3793_v24 }
 0x65a   : > { %14090 = vmatprep.subr.bf16.mxu0 %v16633_v46  ;;  %v16736_v46 = vcombine.low %v3909_v20, %v3913_v3  ;;  %v3897_v41 = vld [vmem:[%s25320_s5 + $0x16f0] sm:$0xff] }
 0x65b   : > { %14046 = vmatpush1.bf16.msra.mxu1 %v16520_v59  ;;  %v3785_v59 = vld [vmem:[%s25320_s5 + $0x1370] sm:$0xff] }
 0x65c   : > { %14047 = vmatprep.subr.bf16.mxu1 %v16513_v14  ;;  %v16616_v14 = vcombine.low %v3789_v35, %v3793_v24  ;;  %v3777_v26 = vld [vmem:[%s25320_s5 + $0x1330] sm:$0xff] }
 0x65d   : > { %14091 = vmatpush1.bf16.msra.mxu0 %v16632_v13  ;;  %v3893_v13 = vld [vmem:[%s25320_s5 + $0x16d0] sm:$0xff] }
 0x65e   : > { %14092 = vmatprep.subr.bf16.mxu0 %v16753_v29  ;;  %v16721_v1 = vcombine.high %v3893_v13, %v3897_v41  ;;  %v3889_v51 = vld [vmem:[%s25320_s5 + $0x16b0] sm:$0xff] }
 0x65f   : > { %14048 = vmatpush1.bf16.msra.mxu1 %v16512_v18  ;;  %v3773_v18 = vld [vmem:[%s25320_s5 + $0x1310] sm:$0xff] }
 0x660   : > { %v13782_v7 = vpop.f32.mrf.mxu0  ;;  %14049 = vmatprep.subr.bf16.mxu1 %v16505_v61  ;;  %v16601_v28 = vcombine.high %v3773_v18, %v3777_v26  ;;  %v3769_v20 = vld [vmem:[%s25320_s5 + $0x12f0] sm:$0xff] }
 0x661   : > { %v23045_v17 = vadd.f32 %v13782_v7, %v22960_v33  ;;  %14093 = vmatpush2.bf16.msra.mxu0 %v16752_v49  ;;  %v3901_v33 = vld [vmem:[%s25320_s5 + $0x1710] sm:$0xff]  ;;  %v16600_v7 = vcombine.low %v3773_v18, %v3777_v26 }
 0x662   : > { %v13784_v50 = vpop.f32.mrf.mxu0  ;;  %14094 = vmatprep.subr.bf16.mxu0 %v16745_v6  ;;  %v16729_v25 = vcombine.high %v3901_v33, %v3905_v45  ;;  %v16728_v29 = vcombine.low %v3901_v33, %v3905_v45  ;;  %v3885_v49 = vld [vmem:[%s25320_s5 + $0x1690] sm:$0xff]  ;;  %v16720_v6 = vcombine.low %v3893_v13, %v3897_v41 }
 0x663   : > { %v23054_v8 = vadd.f32 %v13784_v50, %v22970_v43  ;;  %14050 = vmatpush1.bf16.msra.mxu1 %v16504_v52  ;;  %v3781_v43 = vld [vmem:[%s25320_s5 + $0x1350] sm:$0xff]  ;;  %v16713_v3 = vcombine.high %v3885_v49, %v3889_v51  ;;  %v16712_v24 = vcombine.low %v3885_v49, %v3889_v51 }
 0x664   : > { %v13786_v32 = vpop.f32.mrf.mxu0  ;;  %14051 = vmatprep.subr.bf16.mxu1 %v16625_v38  ;;  %v16609_v23 = vcombine.high %v3781_v43, %v3785_v59  ;;  %v16608_v61 = vcombine.low %v3781_v43, %v3785_v59  ;;  %v3765_v52 = vld [vmem:[%s25320_s5 + $0x12d0] sm:$0xff] }
 0x665   : > { %14095 = vmatpush2.bf16.msra.mxu0 %v16744_v56  ;;  %v3877_v38 = vld [vmem:[%s25320_s5 + $0x1650] sm:$0xff]  ;;  %v16593_v35 = vcombine.high %v3765_v52, %v3769_v20  ;;  %v16592_v33 = vcombine.low %v3765_v52, %v3769_v20 }
 0x666   : > { %v13787_v44 = vpop.f32.mrf.mxu0  ;;  %14096 = vmatprep.subr.bf16.mxu0 %v16737_v27  ;;  %v3881_v56 = vld [vmem:[%s25320_s5 + $0x1670] sm:$0xff] }
 0x667   : > { %14052 = vmatpush2.bf16.msra.mxu1 %v16624_v58  ;;  %v3757_v50 = vld [vmem:[%s25320_s5 + $0x1290] sm:$0xff]  ;;  %v16705_v58 = vcombine.high %v3877_v38, %v3881_v56 }
 0x668   : > { %14053 = vmatprep.subr.bf16.mxu1 %v16617_v19  ;;  %v3761_v27 = vld [vmem:[%s25320_s5 + $0x12b0] sm:$0xff] }
 0x669   : > { %14097 = vmatpush2.bf16.msra.mxu0 %v16736_v46  ;;  %v3869_v45 = vld [vmem:[%s25320_s5 + $0x1610] sm:$0xff]  ;;  %v16585_v19 = vcombine.high %v3757_v50, %v3761_v27  ;;  %v16704_v46 = vcombine.low %v3877_v38, %v3881_v56 }
 0x66a   : > { %14098 = vmatprep.subr.bf16.mxu0 %v16729_v25  ;;  %v3873_v32 = vld [vmem:[%s25320_s5 + $0x1630] sm:$0xff]  ;;  %v16584_v25 = vcombine.low %v3757_v50, %v3761_v27 }
 0x66b   : > { %14054 = vmatpush2.bf16.msra.mxu1 %v16616_v14  ;;  %v3749_v43 = vld [vmem:[%s25320_s5 + $0x1250] sm:$0xff]  ;;  %v16697_v44 = vcombine.high %v3869_v45, %v3873_v32 }
 0x66c   : > { %14055 = vmatprep.subr.bf16.mxu1 %v16609_v23  ;;  %v3753_v59 = vld [vmem:[%s25320_s5 + $0x1270] sm:$0xff]  ;;  %v16696_v23 = vcombine.low %v3869_v45, %v3873_v32 }
 0x66d   : > { %14099 = vmatpush2.bf16.msra.mxu0 %v16728_v29  ;;  %v4117_v14 = vld [vmem:[%s25320_s5 + $0x1dd0] sm:$0xff]  ;;  %v16577_v41 = vcombine.high %v3749_v43, %v3753_v59 }
 0x66e   : > { %14100 = vmatprep.subr.bf16.mxu0 %v16721_v1  ;;  %v4121_v13 = vld [vmem:[%s25320_s5 + $0x1df0] sm:$0xff]  ;;  %v16576_v1 = vcombine.low %v3749_v43, %v3753_v59 }
 0x66f   : > { %14056 = vmatpush2.bf16.msra.mxu1 %v16608_v61  ;;  %v3741_v29 = vld [vmem:[%s25320_s5 + $0x1210] sm:$0xff]  ;;  %v16945_v26 = vcombine.high %v4117_v14, %v4121_v13 }
 0x670   : > { %14057 = vmatprep.subr.bf16.mxu1 %v16601_v28  ;;  %v3745_v18 = vld [vmem:[%s25320_s5 + $0x1230] sm:$0xff]  ;;  %v16944_v28 = vcombine.low %v4117_v14, %v4121_v13 }
 0x671   : > { %14101 = vmatpush2.bf16.msra.mxu0 %v16720_v6  ;;  %v4109_v61 = vld [vmem:[%s25320_s5 + $0x1d90] sm:$0xff]  ;;  %v16569_v51 = vcombine.high %v3741_v29, %v3745_v18 }
 0x672   : > { %14102 = vmatprep.subr.bf16.mxu0 %v16713_v3  ;;  %v4113_v49 = vld [vmem:[%s25320_s5 + $0x1db0] sm:$0xff]  ;;  %v16568_v3 = vcombine.low %v3741_v29, %v3745_v18 }
 0x673   : > { %14058 = vmatpush2.bf16.msra.mxu1 %v16600_v7  ;;  %v3989_v6 = vld [vmem:[%s25320_s5 + $0x19d0] sm:$0xff]  ;;  %v16937_v20 = vcombine.high %v4109_v61, %v4113_v49 }
 0x674   : > { %14059 = vmatprep.subr.bf16.mxu1 %v16593_v35  ;;  %v3993_v52 = vld [vmem:[%s25320_s5 + $0x19f0] sm:$0xff] }
 0x675   : > { %14103 = vmatpush2.bf16.msra.mxu0 %v16712_v24  ;;  %v4101_v7 = vld [vmem:[%s25320_s5 + $0x1d50] sm:$0xff]  ;;  %v16817_v35 = vcombine.high %v3989_v6, %v3993_v52  ;;  %v16936_v24 = vcombine.low %v4109_v61, %v4113_v49  ;;  %v16816_v45 = vcombine.low %v3989_v6, %v3993_v52 }
 0x676   : > { %14104 = vmatprep.subr.bf16.mxu0 %v16705_v58  ;;  %v4105_v38 = vld [vmem:[%s25320_s5 + $0x1d70] sm:$0xff] }
 0x677   : > { %14060 = vmatpush2.bf16.msra.mxu1 %v16592_v33  ;;  %v3981_v50 = vld [vmem:[%s25320_s5 + $0x1990] sm:$0xff]  ;;  %v16929_v33 = vcombine.high %v4101_v7, %v4105_v38  ;;  %v16928_v59 = vcombine.low %v4101_v7, %v4105_v38 }
 0x678   : > { %14061 = vmatprep.subr.bf16.mxu1 %v16585_v19  ;;  %v3985_v27 = vld [vmem:[%s25320_s5 + $0x19b0] sm:$0xff] }
 0x679   : > { %14105 = vmatpush2.bf16.msra.mxu0 %v16704_v46  ;;  %v4093_v32 = vld [vmem:[%s25320_s5 + $0x1d10] sm:$0xff]  ;;  %v16809_v43 = vcombine.high %v3981_v50, %v3985_v27  ;;  %v16808_v29 = vcombine.low %v3981_v50, %v3985_v27 }
 0x67a   : > { %14106 = vmatprep.subr.bf16.mxu0 %v16697_v44  ;;  %v4097_v19 = vld [vmem:[%s25320_s5 + $0x1d30] sm:$0xff] }
 0x67b   : > { %14062 = vmatpush2.bf16.msra.mxu1 %v16584_v25  ;;  %v3973_v44 = vld [vmem:[%s25320_s5 + $0x1950] sm:$0xff] }
 0x67c   : > { %14063 = vmatprep.subr.bf16.mxu1 %v16577_v41  ;;  %v3977_v25 = vld [vmem:[%s25320_s5 + $0x1970] sm:$0xff]  ;;  %v16921_v41 = vcombine.high %v4093_v32, %v4097_v19 }
 0x67d   : > { %14107 = vmatpush2.bf16.msra.mxu0 %v16696_v23  ;;  %v4085_v18 = vld [vmem:[%s25320_s5 + $0x1cd0] sm:$0xff]  ;;  %v16801_v61 = vcombine.high %v3973_v44, %v3977_v25  ;;  %v16800_v7 = vcombine.low %v3973_v44, %v3977_v25 }
 0x67e   : > { %14158 = vmatprep.subr.bf16.mxu0 %v16945_v26  ;;  %v4089_v26 = vld [vmem:[%s25320_s5 + $0x1cf0] sm:$0xff] }
 0x67f   : > { %14064 = vmatpush2.bf16.msra.mxu1 %v16576_v1  ;;  %v3969_v6 = vld [vmem:[%s25320_s5 + $0x1930] sm:$0xff] }
 0x680   : > { %v13864_v56 = vpop.f32.mrf.mxu0  ;;  %14109 = vmatmul.mubr.bf16.vlgmr.msra.gmra.mxu0 %v20526_v15  ;;  %14065 = vmatprep.subr.bf16.mxu1 %v16569_v51  ;;  %v4081_v38 = vld [vmem:[%s25320_s5 + $0x1cb0] sm:$0xff] }
 0x681   : > { %14159 = vmatpush1.bf16.msra.mxu0 %v16944_v28  ;;  %14190 = vmatprep.mubr.bf16.mxu0 %v20530_v54  ;;  %v3965_v28 = vld [vmem:[%s25320_s5 + $0x1910] sm:$0xff] }
 0x682   : > { %v13866_v58 = vpop.f32.mrf.mxu0  ;;  %14160 = vmatprep.subr.bf16.mxu0 %v16937_v20  ;;  %v16913_v20 = vcombine.high %v4085_v18, %v4089_v26  ;;  %v3957_v50 = vld [vmem:[%s25320_s5 + $0x18d0] sm:$0xff] }
 0x683   : > { %14066 = vmatpush2.bf16.msra.mxu1 %v16568_v3  ;;  %v3961_v27 = vld [vmem:[%s25320_s5 + $0x18f0] sm:$0xff] }
 0x684   : > { %v13868_v46 = vpop.f32.mrf.mxu0  ;;  %14117 = vmatprep.subr.bf16.mxu1 %v16817_v35  ;;  %v16793_v35 = vcombine.high %v3965_v28, %v3969_v6  ;;  %v16784_v25 = vcombine.low %v3957_v50, %v3961_v27 }
 0x685   : > { %14161 = vmatpush1.bf16.msra.mxu0 %v16936_v24  ;;  %v16912_v24 = vcombine.low %v4085_v18, %v4089_v26  ;;  %v3945_v18 = vld [vmem:[%s25320_s5 + $0x1870] sm:$0xff] }
 0x686   : > { %v13823_v14 = vpop.f32.mrf.mxu1  ;;  %v13869_v13 = vpop.f32.mrf.mxu0  ;;  %14068 = vmatmul.mubr.bf16.vlgmr.msra.gmra.mxu1 %v20554_v36  ;;  %14162 = vmatprep.subr.bf16.mxu0 %v16929_v33  ;;  %v16792_v33 = vcombine.low %v3965_v28, %v3969_v6  ;;  %v3933_v6 = vld [vmem:[%s25320_s5 + $0x1810] sm:$0xff] }
 0x687   : > { %v13824_v23 = vadd.f32 %v13823_v14, %v23045_v17  ;;  %14118 = vmatpush1.bf16.msra.mxu1 %v16816_v45  ;;  %14149 = vmatprep.mubr.bf16.mxu1 %v20556_v21  ;;  %v16920_v17 = vcombine.low %v4093_v32, %v4097_v19  ;;  %v4069_v45 = vld [vmem:[%s25320_s5 + $0x1c50] sm:$0xff]  ;;  %v16785_v19 = vcombine.high %v3957_v50, %v3961_v27 }
 0x688   : > { %v13825_v1 = vpop.f32.mrf.mxu1  ;;  %14119 = vmatprep.subr.bf16.mxu1 %v16809_v43  ;;  %v4073_v32 = vld [vmem:[%s25320_s5 + $0x1c70] sm:$0xff] }
 0x689   : > { %v23175_v49 = vadd.f32 %v13864_v56, %v13824_v23  ;;  %v13826_v51 = vadd.f32 %v13825_v1, %v23054_v8  ;;  %14163 = vmatpush1.bf16.msra.mxu0 %v16928_v59  ;;  %v4077_v8 = vld [vmem:[%s25320_s5 + $0x1c90] sm:$0xff]  ;;  %v16897_v44 = vcombine.high %v4069_v45, %v4073_v32  ;;  %v16896_v23 = vcombine.low %v4069_v45, %v4073_v32 }
 0x68a   : > { %v13827_v52 = vpop.f32.mrf.mxu1  ;;  %14164 = vmatprep.subr.bf16.mxu0 %v16921_v41  ;;  %v16904_v46 = vcombine.low %v4077_v8, %v4081_v38  ;;  %v3949_v43 = vld [vmem:[%s25320_s5 + $0x1890] sm:$0xff] }
 0x68b   : > { %v23184_v3 = vadd.f32 %v13866_v58, %v13826_v51  ;;  %14120 = vmatpush1.bf16.msra.mxu1 %v16808_v29  ;;  %v16905_v58 = vcombine.high %v4077_v8, %v4081_v38  ;;  %v3953_v59 = vld [vmem:[%s25320_s5 + $0x18b0] sm:$0xff] }
 0x68c   : > { %v13828_v56 = vpop.f32.mrf.mxu1  ;;  %14121 = vmatprep.subr.bf16.mxu1 %v16801_v61  ;;  %v4061_v14 = vld [vmem:[%s25320_s5 + $0x1c10] sm:$0xff]  ;;  %v16777_v41 = vcombine.high %v3949_v43, %v3953_v59  ;;  %v16776_v1 = vcombine.low %v3949_v43, %v3953_v59 }
 0x68d   : > { %14165 = vmatpush1.bf16.msra.mxu0 %v16920_v17  ;;  %v4065_v13 = vld [vmem:[%s25320_s5 + $0x1c30] sm:$0xff] }
 0x68e   : > { %14166 = vmatprep.subr.bf16.mxu0 %v16913_v20  ;;  %v3941_v29 = vld [vmem:[%s25320_s5 + $0x1850] sm:$0xff]  ;;  %v16889_v26 = vcombine.high %v4061_v14, %v4065_v13  ;;  %v16888_v28 = vcombine.low %v4061_v14, %v4065_v13 }
 0x68f   : > { %14122 = vmatpush1.bf16.msra.mxu1 %v16800_v7  ;;  %v4181_v61 = vld [vmem:[%s25320_s5 + $0x1fd0] sm:$0xff]  ;;  %v16769_v17 = vcombine.high %v3941_v29, %v3945_v18  ;;  %v16768_v7 = vcombine.low %v3941_v29, %v3945_v18 }
 0x690   : > { %14123 = vmatprep.subr.bf16.mxu1 %v16793_v35  ;;  %v4185_v51 = vld [vmem:[%s25320_s5 + $0x1ff0] sm:$0xff] }
 0x691   : > { %14167 = vmatpush1.bf16.msra.mxu0 %v16912_v24  ;;  %v3937_v52 = vld [vmem:[%s25320_s5 + $0x1830] sm:$0xff]  ;;  %v17009_v20 = vcombine.high %v4181_v61, %v4185_v51  ;;  %v17008_v35 = vcombine.low %v4181_v61, %v4185_v51 }
 0x692   : > { %14168 = vmatprep.subr.bf16.mxu0 %v16905_v58  ;;  %v4173_v8 = vld [vmem:[%s25320_s5 + $0x1f90] sm:$0xff]  ;;  %v16761_v56 = vcombine.high %v3933_v6, %v3937_v52  ;;  %v16760_v58 = vcombine.low %v3933_v6, %v3937_v52 }
 0x693   : > { %14124 = vmatpush1.bf16.msra.mxu1 %v16792_v33  ;;  %v4177_v38 = vld [vmem:[%s25320_s5 + $0x1fb0] sm:$0xff] }
 0x694   : > { %14125 = vmatprep.subr.bf16.mxu1 %v16785_v19  ;;  %v4053_v24 = vld [vmem:[%s25320_s5 + $0x1bd0] sm:$0xff]  ;;  %v17001_v27 = vcombine.high %v4173_v8, %v4177_v38  ;;  %v17000_v19 = vcombine.low %v4173_v8, %v4177_v38 }
 0x695   : > { %14169 = vmatpush1.bf16.msra.mxu0 %v16904_v46  ;;  %v4057_v50 = vld [vmem:[%s25320_s5 + $0x1bf0] sm:$0xff] }
 0x696   : > { %14170 = vmatprep.subr.bf16.mxu0 %v16897_v44  ;;  %v4165_v33 = vld [vmem:[%s25320_s5 + $0x1f50] sm:$0xff]  ;;  %v16881_v32 = vcombine.high %v4053_v24, %v4057_v50  ;;  %v16880_v44 = vcombine.low %v4053_v24, %v4057_v50 }
 0x697   : > { %14126 = vmatpush1.bf16.msra.mxu1 %v16784_v25  ;;  %v4169_v45 = vld [vmem:[%s25320_s5 + $0x1f70] sm:$0xff] }
 0x698   : > { %14127 = vmatprep.subr.bf16.mxu1 %v16777_v41  ;;  %v4045_v46 = vld [vmem:[%s25320_s5 + $0x1b90] sm:$0xff]  ;;  %v16993_v59 = vcombine.high %v4165_v33, %v4169_v45  ;;  %v16992_v41 = vcombine.low %v4165_v33, %v4169_v45 }
 0x699   : > { %14171 = vmatpush1.bf16.msra.mxu0 %v16896_v23  ;;  %v4049_v43 = vld [vmem:[%s25320_s5 + $0x1bb0] sm:$0xff] }
 0x69a   : > { %14172 = vmatprep.subr.bf16.mxu0 %v16889_v26  ;;  %v4157_v25 = vld [vmem:[%s25320_s5 + $0x1f10] sm:$0xff]  ;;  %v16873_v13 = vcombine.high %v4045_v46, %v4049_v43  ;;  %v16872_v26 = vcombine.low %v4045_v46, %v4049_v43 }
 0x69b   : > { %14128 = vmatpush1.bf16.msra.mxu1 %v16776_v1  ;;  %v4161_v14 = vld [vmem:[%s25320_s5 + $0x1f30] sm:$0xff] }
 0x69c   : > { %14129 = vmatprep.subr.bf16.mxu1 %v16769_v17  ;;  %v4037_v23 = vld [vmem:[%s25320_s5 + $0x1b50] sm:$0xff]  ;;  %v16985_v18 = vcombine.high %v4157_v25, %v4161_v14  ;;  %v16984_v17 = vcombine.low %v4157_v25, %v4161_v14 }
 0x69d   : > { %14173 = vmatpush1.bf16.msra.mxu0 %v16888_v28  ;;  %v4041_v29 = vld [vmem:[%s25320_s5 + $0x1b70] sm:$0xff] }
 0x69e   : > { %14174 = vmatprep.subr.bf16.mxu0 %v17009_v20  ;;  %v4149_v1 = vld [vmem:[%s25320_s5 + $0x1ed0] sm:$0xff]  ;;  %v16865_v51 = vcombine.high %v4037_v23, %v4041_v29  ;;  %v16864_v20 = vcombine.low %v4037_v23, %v4041_v29 }
 0x69f   : > { %14130 = vmatpush1.bf16.msra.mxu1 %v16768_v7  ;;  %v4153_v61 = vld [vmem:[%s25320_s5 + $0x1ef0] sm:$0xff] }
 0x6a0   : > { %14131 = vmatprep.subr.bf16.mxu1 %v16761_v56  ;;  %v4029_v28 = vld [vmem:[%s25320_s5 + $0x1b10] sm:$0xff]  ;;  %v16977_v52 = vcombine.high %v4149_v1, %v4153_v61  ;;  %v16976_v56 = vcombine.low %v4149_v1, %v4153_v61 }
 0x6a1   : > { %14175 = vmatpush2.bf16.msra.mxu0 %v17008_v35  ;;  %v4033_v6 = vld [vmem:[%s25320_s5 + $0x1b30] sm:$0xff] }
 0x6a2   : > { %14176 = vmatprep.subr.bf16.mxu0 %v17001_v27  ;;  %v4141_v7 = vld [vmem:[%s25320_s5 + $0x1e90] sm:$0xff]  ;;  %v16857_v38 = vcombine.high %v4029_v28, %v4033_v6  ;;  %v16856_v27 = vcombine.low %v4029_v28, %v4033_v6 }
 0x6a3   : > { %14132 = vmatpush1.bf16.msra.mxu1 %v16760_v58  ;;  %v4145_v8 = vld [vmem:[%s25320_s5 + $0x1eb0] sm:$0xff] }
 0x6a4   : > { %14133 = vmatprep.subr.bf16.mxu1 %v16881_v32  ;;  %v4021_v35 = vld [vmem:[%s25320_s5 + $0x1ad0] sm:$0xff]  ;;  %v16969_v50 = vcombine.high %v4141_v7, %v4145_v8  ;;  %v16968_v32 = vcombine.low %v4141_v7, %v4145_v8 }
 0x6a5   : > { %14177 = vmatpush2.bf16.msra.mxu0 %v17000_v19  ;;  %v4025_v24 = vld [vmem:[%s25320_s5 + $0x1af0] sm:$0xff] }
 0x6a6   : > { %14178 = vmatprep.subr.bf16.mxu0 %v16993_v59  ;;  %v4133_v58 = vld [vmem:[%s25320_s5 + $0x1e50] sm:$0xff]  ;;  %v16849_v45 = vcombine.high %v4021_v35, %v4025_v24  ;;  %v16848_v59 = vcombine.low %v4021_v35, %v4025_v24 }
 0x6a7   : > { %14134 = vmatpush2.bf16.msra.mxu1 %v16880_v44  ;;  %v4137_v33 = vld [vmem:[%s25320_s5 + $0x1e70] sm:$0xff] }
 0x6a8   : > { %14135 = vmatprep.subr.bf16.mxu1 %v16873_v13  ;;  %v4013_v19 = vld [vmem:[%s25320_s5 + $0x1a90] sm:$0xff]  ;;  %v16961_v43 = vcombine.high %v4133_v58, %v4137_v33  ;;  %v16960_v13 = vcombine.low %v4133_v58, %v4137_v33 }
 0x6a9   : > { %14179 = vmatpush2.bf16.msra.mxu0 %v16992_v41  ;;  %v4017_v46 = vld [vmem:[%s25320_s5 + $0x1ab0] sm:$0xff] }
 0x6aa   : > { %14180 = vmatprep.subr.bf16.mxu0 %v16985_v18  ;;  %v4125_v44 = vld [vmem:[%s25320_s5 + $0x1e10] sm:$0xff]  ;;  %v16841_v14 = vcombine.high %v4013_v19, %v4017_v46  ;;  %v16840_v18 = vcombine.low %v4013_v19, %v4017_v46  ;;  %v12787_v46 = vsub.s32 5, %v20729_v34 }
 0x6ab   : > { %14136 = vmatpush2.bf16.msra.mxu1 %v16872_v26  ;;  %v4129_v25 = vld [vmem:[%s25320_s5 + $0x1e30] sm:$0xff] }
 0x6ac   : > { %14137 = vmatprep.subr.bf16.mxu1 %v16865_v51  ;;  %v4005_v41 = vld [vmem:[%s25320_s5 + $0x1a50] sm:$0xff]  ;;  %v16953_v29 = vcombine.high %v4125_v44, %v4129_v25  ;;  %v16952_v51 = vcombine.low %v4125_v44, %v4129_v25 }
 0x6ad   : > { %14181 = vmatpush2.bf16.msra.mxu0 %v16984_v17  ;;  %v4009_v23 = vld [vmem:[%s25320_s5 + $0x1a70] sm:$0xff] }
 0x6ae   : > { %14182 = vmatprep.subr.bf16.mxu0 %v16977_v52  ;;  %v4373_v26 = vld [vmem:[%s25320_s5 + $0x25d0] sm:$0xff]  ;;  %v16833_v61 = vcombine.high %v4005_v41, %v4009_v23  ;;  %v16832_v52 = vcombine.low %v4005_v41, %v4009_v23 }
 0x6af   : > { %14138 = vmatpush2.bf16.msra.mxu1 %v16864_v20  ;;  %v4377_v1 = vld [vmem:[%s25320_s5 + $0x25f0] sm:$0xff] }
 0x6b0   : > { %14139 = vmatprep.subr.bf16.mxu1 %v16857_v38  ;;  %v3997_v17 = vld [vmem:[%s25320_s5 + $0x1a10] sm:$0xff]  ;;  %v17201_v6 = vcombine.high %v4373_v26, %v4377_v1  ;;  %v17200_v38 = vcombine.low %v4373_v26, %v4377_v1 }
 0x6b1   : > { %14183 = vmatpush2.bf16.msra.mxu0 %v16976_v56  ;;  %v4001_v28 = vld [vmem:[%s25320_s5 + $0x1a30] sm:$0xff] }
 0x6b2   : > { %14184 = vmatprep.subr.bf16.mxu0 %v16969_v50  ;;  %v4365_v20 = vld [vmem:[%s25320_s5 + $0x2590] sm:$0xff]  ;;  %v16825_v8 = vcombine.high %v3997_v17, %v4001_v28  ;;  %v16824_v50 = vcombine.low %v3997_v17, %v4001_v28 }
 0x6b3   : > { %14140 = vmatpush2.bf16.msra.mxu1 %v16856_v27  ;;  %v4369_v7 = vld [vmem:[%s25320_s5 + $0x25b0] sm:$0xff]  ;;  %v12783_v27 = vsub.s32 4, %v20729_v34 }
 0x6b4   : > { %14141 = vmatprep.subr.bf16.mxu1 %v16849_v45  ;;  %v4245_v56 = vld [vmem:[%s25320_s5 + $0x21d0] sm:$0xff]  ;;  %v17193_v24 = vcombine.high %v4365_v20, %v4369_v7  ;;  %v17192_v19 = vcombine.low %v4365_v20, %v4369_v7 }
 0x6b5   : > { %14185 = vmatpush2.bf16.msra.mxu0 %v16968_v32  ;;  %v4249_v35 = vld [vmem:[%s25320_s5 + $0x21f0] sm:$0xff] }
 0x6b6   : > { %14186 = vmatprep.subr.bf16.mxu0 %v16961_v43  ;;  %v4357_v58 = vld [vmem:[%s25320_s5 + $0x2550] sm:$0xff]  ;;  %v17073_v32 = vcombine.high %v4245_v56, %v4249_v35  ;;  %v17072_v41 = vcombine.low %v4245_v56, %v4249_v35 }
 0x6b7   : > { %14142 = vmatpush2.bf16.msra.mxu1 %v16848_v59  ;;  %v4361_v33 = vld [vmem:[%s25320_s5 + $0x2570] sm:$0xff] }
 0x6b8   : > { %14143 = vmatprep.subr.bf16.mxu1 %v16841_v14  ;;  %v4237_v43 = vld [vmem:[%s25320_s5 + $0x2190] sm:$0xff]  ;;  %v17185_v25 = vcombine.high %v4357_v58, %v4361_v33  ;;  %v18510_v14 = vld [vmem:[%s25321_s6] sm:$0xff] }
 0x6b9   : > { %14187 = vmatpush2.bf16.msra.mxu0 %v16960_v13  ;;  %v4241_v59 = vld [vmem:[%s25320_s5 + $0x21b0] sm:$0xff]  ;;  %v12784_v13 = vrot.slane %v18510_v14, %v12783_v27  ;;  %v12788_v1 = vrot.slane %v18510_v14, %v12787_v46 }
 0x6ba   : > { %14188 = vmatprep.subr.bf16.mxu0 %v16953_v29  ;;  %v4349_v23 = vld [vmem:[%s25320_s5 + $0x2510] sm:$0xff]  ;;  %v17065_v26 = vcombine.high %v4237_v43, %v4241_v59  ;;  %v17064_v7 = vcombine.low %v4237_v43, %v4241_v59 }
 0x6bb   : > { %14144 = vmatpush2.bf16.msra.mxu1 %v16840_v18  ;;  %v4353_v29 = vld [vmem:[%s25320_s5 + $0x2530] sm:$0xff] }
 0x6bc   : > { %14145 = vmatprep.subr.bf16.mxu1 %v16833_v61  ;;  %v17184_v61 = vcombine.low %v4357_v58, %v4361_v33  ;;  %v4233_v17 = vld [vmem:[%s25320_s5 + $0x2170] sm:$0xff] }
 0x6bd   : > { %14189 = vmatpush2.bf16.msra.mxu0 %v16952_v51  ;;  %v4229_v51 = vld [vmem:[%s25320_s5 + $0x2150] sm:$0xff] }
 0x6be   : > { %14240 = vmatprep.subr.bf16.mxu0 %v17201_v6  ;;  %v17057_v35 = vcombine.high %v4229_v51, %v4233_v17  ;;  %v4221_v27 = vld [vmem:[%s25320_s5 + $0x2110] sm:$0xff]  ;;  %v17056_v46 = vcombine.low %v4229_v51, %v4233_v17 }
 0x6bf   : > { %14146 = vmatpush2.bf16.msra.mxu1 %v16832_v52  ;;  %v17177_v52 = vcombine.high %v4349_v23, %v4353_v29  ;;  %v4225_v58 = vld [vmem:[%s25320_s5 + $0x2130] sm:$0xff] }
 0x6c0   : > { %v13946_v45 = vpop.f32.mrf.mxu0  ;;  %14191 = vmatmul.mubr.bf16.vlgmr.msra.gmra.mxu0 %v20740_v62  ;;  %14147 = vmatprep.subr.bf16.mxu1 %v16825_v8  ;;  %v4341_v8 = vld [vmem:[%s25320_s5 + $0x24d0] sm:$0xff] }
 0x6c1   : > { %14241 = vmatpush1.bf16.msra.mxu0 %v17200_v38  ;;  %14272 = vmatprep.mubr.bf16.mxu0 %v20742_v42  ;;  %v4345_v38 = vld [vmem:[%s25320_s5 + $0x24f0] sm:$0xff] }
 0x6c2   : > { %v13948_v44 = vpop.f32.mrf.mxu0  ;;  %14242 = vmatprep.subr.bf16.mxu0 %v17193_v24  ;;  %v4333_v43 = vld [vmem:[%s25320_s5 + $0x2490] sm:$0xff] }
 0x6c3   : > { %14148 = vmatpush2.bf16.msra.mxu1 %v16824_v50  ;;  %v17176_v50 = vcombine.low %v4349_v23, %v4353_v29  ;;  %v4337_v59 = vld [vmem:[%s25320_s5 + $0x24b0] sm:$0xff] }
 0x6c4   : > { %v13950_v18 = vpop.f32.mrf.mxu0  ;;  %14199 = vmatprep.subr.bf16.mxu1 %v17073_v32  ;;  %v4217_v23 = vld [vmem:[%s25320_s5 + $0x20f0] sm:$0xff]  ;;  %v17161_v29 = vcombine.high %v4333_v43, %v4337_v59 }
 0x6c5   : > { %14243 = vmatpush1.bf16.msra.mxu0 %v17192_v19  ;;  %v17169_v19 = vcombine.high %v4341_v8, %v4345_v38  ;;  %v17048_v18 = vcombine.low %v4221_v27, %v4225_v58  ;;  %v4205_v51 = vld [vmem:[%s25320_s5 + $0x2090] sm:$0xff] }
 0x6c6   : > { %v13905_v28 = vpop.f32.mrf.mxu1  ;;  %v13951_v6 = vpop.f32.mrf.mxu0  ;;  %14150 = vmatmul.mubr.bf16.vlgmr.msra.gmra.mxu1 %v20770_v22  ;;  %14244 = vmatprep.subr.bf16.mxu0 %v17185_v25  ;;  %v4209_v17 = vld [vmem:[%s25320_s5 + $0x20b0] sm:$0xff] }
 0x6c7   : > { %v13906_v20 = vadd.f32 %v13905_v28, %v12784_v13  ;;  %14200 = vmatpush1.bf16.msra.mxu1 %v17072_v41  ;;  %14231 = vmatprep.mubr.bf16.mxu1 %v20772_v30  ;;  %v17049_v13 = vcombine.high %v4221_v27, %v4225_v58  ;;  %v4213_v41 = vld [vmem:[%s25320_s5 + $0x20d0] sm:$0xff] }
 0x6c8   : > { %v13907_v56 = vpop.f32.mrf.mxu1  ;;  %14201 = vmatprep.subr.bf16.mxu1 %v17065_v26  ;;  %v4329_v26 = vld [vmem:[%s25320_s5 + $0x2470] sm:$0xff]  ;;  %v17040_v6 = vcombine.low %v4213_v41, %v4217_v23 }
 0x6c9   : > { %v13908_v24 = vadd.f32 %v13907_v56, %v12788_v1  ;;  %14245 = vmatpush1.bf16.msra.mxu0 %v17184_v61  ;;  %v23387_v33 = vadd.f32 %v13946_v45, %v13906_v20  ;;  %v17168_v45 = vcombine.low %v4341_v8, %v4345_v38  ;;  %v17041_v1 = vcombine.high %v4213_v41, %v4217_v23  ;;  %v4321_v20 = vld [vmem:[%s25320_s5 + $0x2430] sm:$0xff] }
 0x6ca   : > { %v13909_v32 = vpop.f32.mrf.mxu1  ;;  %14246 = vmatprep.subr.bf16.mxu0 %v17177_v52  ;;  %v17160_v61 = vcombine.low %v4333_v43, %v4337_v59  ;;  %v4317_v52 = vld [vmem:[%s25320_s5 + $0x2410] sm:$0xff] }
 0x6cb   : > { %14202 = vmatpush1.bf16.msra.mxu1 %v17064_v7  ;;  %v23395_v25 = vadd.f32 %v13948_v44, %v13908_v24  ;;  %v4325_v44 = vld [vmem:[%s25320_s5 + $0x2450] sm:$0xff]  ;;  %v17033_v7 = vcombine.high %v4205_v51, %v4209_v17  ;;  %v17032_v24 = vcombine.low %v4205_v51, %v4209_v17  ;;  %v17144_v32 = vcombine.low %v4317_v52, %v4321_v20 }
 0x6cc   : > { %v13910_v14 = vpop.f32.mrf.mxu1  ;;  %14203 = vmatprep.subr.bf16.mxu1 %v17057_v35  ;;  %v17153_v28 = vcombine.high %v4325_v44, %v4329_v26  ;;  %v17152_v8 = vcombine.low %v4325_v44, %v4329_v26  ;;  %v4197_v38 = vld [vmem:[%s25320_s5 + $0x2050] sm:$0xff]  ;;  %v17145_v35 = vcombine.high %v4317_v52, %v4321_v20 }
 0x6cd   : > { %14247 = vmatpush1.bf16.msra.mxu0 %v17176_v50  ;;  %v4201_v56 = vld [vmem:[%s25320_s5 + $0x2070] sm:$0xff] }
 0x6ce   : > { %14248 = vmatprep.subr.bf16.mxu0 %v17169_v19  ;;  %v4437_v50 = vld [vmem:[%s25320_s5 + $0x27d0] sm:$0xff]  ;;  %v17025_v58 = vcombine.high %v4197_v38, %v4201_v56  ;;  %v17024_v59 = vcombine.low %v4197_v38, %v4201_v56 }
 0x6cf   : > { %14204 = vmatpush1.bf16.msra.mxu1 %v17056_v46  ;;  %v4441_v27 = vld [vmem:[%s25320_s5 + $0x27f0] sm:$0xff] }
 0x6d0   : > { %14205 = vmatprep.subr.bf16.mxu1 %v17049_v13  ;;  %v4189_v19 = vld [vmem:[%s25320_s5 + $0x2010] sm:$0xff]  ;;  %v17265_v43 = vcombine.high %v4437_v50, %v4441_v27  ;;  %v17264_v41 = vcombine.low %v4437_v50, %v4441_v27 }
 0x6d1   : > { %14249 = vmatpush1.bf16.msra.mxu0 %v17168_v45  ;;  %v4193_v46 = vld [vmem:[%s25320_s5 + $0x2030] sm:$0xff] }
 0x6d2   : > { %14250 = vmatprep.subr.bf16.mxu0 %v17161_v29  ;;  %v4429_v14 = vld [vmem:[%s25320_s5 + $0x2790] sm:$0xff]  ;;  %v17017_v45 = vcombine.high %v4189_v19, %v4193_v46  ;;  %v17016_v44 = vcombine.low %v4189_v19, %v4193_v46 }
 0x6d3   : > { %14206 = vmatpush1.bf16.msra.mxu1 %v17048_v18  ;;  %v4433_v13 = vld [vmem:[%s25320_s5 + $0x27b0] sm:$0xff] }
 0x6d4   : > { %14207 = vmatprep.subr.bf16.mxu1 %v17041_v1  ;;  %v4309_v23 = vld [vmem:[%s25320_s5 + $0x23d0] sm:$0xff]  ;;  %v17257_v18 = vcombine.high %v4429_v14, %v4433_v13  ;;  %v17256_v51 = vcombine.low %v4429_v14, %v4433_v13 }
 0x6d5   : > { %14251 = vmatpush1.bf16.msra.mxu0 %v17160_v61  ;;  %v4313_v29 = vld [vmem:[%s25320_s5 + $0x23f0] sm:$0xff] }
 0x6d6   : > { %14252 = vmatprep.subr.bf16.mxu0 %v17153_v28  ;;  %v4421_v26 = vld [vmem:[%s25320_s5 + $0x2750] sm:$0xff]  ;;  %v17137_v61 = vcombine.high %v4309_v23, %v4313_v29  ;;  %v17136_v52 = vcombine.low %v4309_v23, %v4313_v29 }
 0x6d7   : > { %14208 = vmatpush1.bf16.msra.mxu1 %v17040_v6  ;;  %v4425_v1 = vld [vmem:[%s25320_s5 + $0x2770] sm:$0xff] }
 0x6d8   : > { %14209 = vmatprep.subr.bf16.mxu1 %v17033_v7  ;;  %v4301_v17 = vld [vmem:[%s25320_s5 + $0x2390] sm:$0xff]  ;;  %v17249_v6 = vcombine.high %v4421_v26, %v4425_v1  ;;  %v17248_v38 = vcombine.low %v4421_v26, %v4425_v1 }
 0x6d9   : > { %14253 = vmatpush1.bf16.msra.mxu0 %v17152_v8  ;;  %v4305_v28 = vld [vmem:[%s25320_s5 + $0x23b0] sm:$0xff] }
 0x6da   : > { %14254 = vmatprep.subr.bf16.mxu0 %v17145_v35  ;;  %v4413_v20 = vld [vmem:[%s25320_s5 + $0x2710] sm:$0xff]  ;;  %v17129_v8 = vcombine.high %v4301_v17, %v4305_v28  ;;  %v17128_v50 = vcombine.low %v4301_v17, %v4305_v28 }
 0x6db   : > { %14210 = vmatpush1.bf16.msra.mxu1 %v17032_v24  ;;  %v4417_v7 = vld [vmem:[%s25320_s5 + $0x2730] sm:$0xff] }
 0x6dc   : > { %14211 = vmatprep.subr.bf16.mxu1 %v17025_v58  ;;  %v4293_v56 = vld [vmem:[%s25320_s5 + $0x2350] sm:$0xff]  ;;  %v17241_v24 = vcombine.high %v4413_v20, %v4417_v7  ;;  %v17240_v19 = vcombine.low %v4413_v20, %v4417_v7 }
 0x6dd   : > { %14255 = vmatpush1.bf16.msra.mxu0 %v17144_v32  ;;  %v4297_v35 = vld [vmem:[%s25320_s5 + $0x2370] sm:$0xff] }
 0x6de   : > { %14256 = vmatprep.subr.bf16.mxu0 %v17265_v43  ;;  %v4405_v27 = vld [vmem:[%s25320_s5 + $0x26d0] sm:$0xff]  ;;  %v17121_v32 = vcombine.high %v4293_v56, %v4297_v35  ;;  %v17120_v14 = vcombine.low %v4293_v56, %v4297_v35 }
 0x6df   : > { %14212 = vmatpush1.bf16.msra.mxu1 %v17024_v59  ;;  %v4409_v58 = vld [vmem:[%s25320_s5 + $0x26f0] sm:$0xff] }
 0x6e0   : > { %14213 = vmatprep.subr.bf16.mxu1 %v17017_v45  ;;  %v4285_v46 = vld [vmem:[%s25320_s5 + $0x2310] sm:$0xff]  ;;  %v17233_v59 = vcombine.high %v4405_v27, %v4409_v58  ;;  %v17232_v23 = vcombine.low %v4405_v27, %v4409_v58 }
 0x6e1   : > { %14257 = vmatpush2.bf16.msra.mxu0 %v17264_v41  ;;  %v4289_v43 = vld [vmem:[%s25320_s5 + $0x2330] sm:$0xff] }
 0x6e2   : > { %14258 = vmatprep.subr.bf16.mxu0 %v17257_v18  ;;  %v4397_v13 = vld [vmem:[%s25320_s5 + $0x2690] sm:$0xff]  ;;  %v17113_v41 = vcombine.high %v4285_v46, %v4289_v43  ;;  %v17112_v26 = vcombine.low %v4285_v46, %v4289_v43 }
 0x6e3   : > { %14214 = vmatpush1.bf16.msra.mxu1 %v17016_v44  ;;  %v4401_v45 = vld [vmem:[%s25320_s5 + $0x26b0] sm:$0xff] }
 0x6e4   : > { %14215 = vmatprep.subr.bf16.mxu1 %v17137_v61  ;;  %v4277_v29 = vld [vmem:[%s25320_s5 + $0x22d0] sm:$0xff]  ;;  %v17225_v44 = vcombine.high %v4397_v13, %v4401_v45  ;;  %v17224_v17 = vcombine.low %v4397_v13, %v4401_v45 }
 0x6e5   : > { %14259 = vmatpush2.bf16.msra.mxu0 %v17256_v51  ;;  %v4281_v18 = vld [vmem:[%s25320_s5 + $0x22f0] sm:$0xff] }
 0x6e6   : > { %14260 = vmatprep.subr.bf16.mxu0 %v17249_v6  ;;  %v4389_v1 = vld [vmem:[%s25320_s5 + $0x2650] sm:$0xff]  ;;  %v17105_v51 = vcombine.high %v4277_v29, %v4281_v18  ;;  %v17104_v20 = vcombine.low %v4277_v29, %v4281_v18 }
 0x6e7   : > { %14216 = vmatpush2.bf16.msra.mxu1 %v17136_v52  ;;  %v4393_v61 = vld [vmem:[%s25320_s5 + $0x2670] sm:$0xff] }
 0x6e8   : > { %14217 = vmatprep.subr.bf16.mxu1 %v17129_v8  ;;  %v4269_v28 = vld [vmem:[%s25320_s5 + $0x2290] sm:$0xff]  ;;  %v17217_v52 = vcombine.high %v4389_v1, %v4393_v61  ;;  %v17216_v56 = vcombine.low %v4389_v1, %v4393_v61 }
 0x6e9   : > { %14261 = vmatpush2.bf16.msra.mxu0 %v17248_v38  ;;  %v4273_v6 = vld [vmem:[%s25320_s5 + $0x22b0] sm:$0xff] }
 0x6ea   : > { %14262 = vmatprep.subr.bf16.mxu0 %v17241_v24  ;;  %v4381_v7 = vld [vmem:[%s25320_s5 + $0x2610] sm:$0xff]  ;;  %v17097_v38 = vcombine.high %v4269_v28, %v4273_v6  ;;  %v17096_v27 = vcombine.low %v4269_v28, %v4273_v6 }
 0x6eb   : > { %14218 = vmatpush2.bf16.msra.mxu1 %v17128_v50  ;;  %v4385_v8 = vld [vmem:[%s25320_s5 + $0x2630] sm:$0xff] }
 0x6ec   : > { %14219 = vmatprep.subr.bf16.mxu1 %v17121_v32  ;;  %v4261_v35 = vld [vmem:[%s25320_s5 + $0x2250] sm:$0xff]  ;;  %v17209_v50 = vcombine.high %v4381_v7, %v4385_v8  ;;  %v17208_v46 = vcombine.low %v4381_v7, %v4385_v8 }
 0x6ed   : > { %14263 = vmatpush2.bf16.msra.mxu0 %v17240_v19  ;;  %v4265_v24 = vld [vmem:[%s25320_s5 + $0x2270] sm:$0xff] }
 0x6ee   : > { %14264 = vmatprep.subr.bf16.mxu0 %v17233_v59  ;;  %v4629_v58 = vld [vmem:[%s25320_s5 + $0x2dd0] sm:$0xff]  ;;  %v17089_v19 = vcombine.high %v4261_v35, %v4265_v24  ;;  %v17088_v13 = vcombine.low %v4261_v35, %v4265_v24 }
 0x6ef   : > { %14220 = vmatpush2.bf16.msra.mxu1 %v17120_v14  ;;  %v4633_v32 = vld [vmem:[%s25320_s5 + $0x2df0] sm:$0xff] }
 0x6f0   : > { %14221 = vmatprep.subr.bf16.mxu1 %v17113_v41  ;;  %v4253_v43 = vld [vmem:[%s25320_s5 + $0x2210] sm:$0xff]  ;;  %v17457_v14 = vcombine.high %v4629_v58, %v4633_v32  ;;  %v17456_v29 = vcombine.low %v4629_v58, %v4633_v32 }
 0x6f1   : > { %14265 = vmatpush2.bf16.msra.mxu0 %v17232_v23  ;;  %v4257_v59 = vld [vmem:[%s25320_s5 + $0x2230] sm:$0xff] }
 0x6f2   : > { %14266 = vmatprep.subr.bf16.mxu0 %v17225_v44  ;;  %v4621_v45 = vld [vmem:[%s25320_s5 + $0x2d90] sm:$0xff]  ;;  %v17081_v23 = vcombine.high %v4253_v43, %v4257_v59  ;;  %v17080_v1 = vcombine.low %v4253_v43, %v4257_v59 }
 0x6f3   : > { %14222 = vmatpush2.bf16.msra.mxu1 %v17112_v26  ;;  %v4625_v41 = vld [vmem:[%s25320_s5 + $0x2db0] sm:$0xff] }
 0x6f4   : > { %14223 = vmatprep.subr.bf16.mxu1 %v17105_v51  ;;  %v4501_v18 = vld [vmem:[%s25320_s5 + $0x29d0] sm:$0xff]  ;;  %v17449_v26 = vcombine.high %v4621_v45, %v4625_v41  ;;  %v17448_v6 = vcombine.low %v4621_v45, %v4625_v41 }
 0x6f5   : > { %14267 = vmatpush2.bf16.msra.mxu0 %v17224_v17  ;;  %v4505_v44 = vld [vmem:[%s25320_s5 + $0x29f0] sm:$0xff] }
 0x6f6   : > { %14268 = vmatprep.subr.bf16.mxu0 %v17217_v52  ;;  %v4613_v61 = vld [vmem:[%s25320_s5 + $0x2d50] sm:$0xff]  ;;  %v17329_v28 = vcombine.high %v4501_v18, %v4505_v44 }
 0x6f7   : > { %14224 = vmatpush2.bf16.msra.mxu1 %v17104_v20  ;;  %v4617_v51 = vld [vmem:[%s25320_s5 + $0x2d70] sm:$0xff] }
 0x6f8   : > { %14225 = vmatprep.subr.bf16.mxu1 %v17097_v38  ;;  %v4493_v52 = vld [vmem:[%s25320_s5 + $0x2990] sm:$0xff]  ;;  %v17441_v8 = vcombine.high %v4613_v61, %v4617_v51  ;;  %v17328_v38 = vcombine.low %v4501_v18, %v4505_v44 }
 0x6f9   : > { %14269 = vmatpush2.bf16.msra.mxu0 %v17216_v56  ;;  %v4497_v20 = vld [vmem:[%s25320_s5 + $0x29b0] sm:$0xff] }
 0x6fa   : > { %14270 = vmatprep.subr.bf16.mxu0 %v17209_v50  ;;  %v4605_v56 = vld [vmem:[%s25320_s5 + $0x2d10] sm:$0xff]  ;;  %v17321_v50 = vcombine.high %v4493_v52, %v4497_v20 }
 0x6fb   : > { %14226 = vmatpush2.bf16.msra.mxu1 %v17096_v27  ;;  %v4609_v35 = vld [vmem:[%s25320_s5 + $0x2d30] sm:$0xff]  ;;  %v17440_v27 = vcombine.low %v4613_v61, %v4617_v51 }
 0x6fc   : > { %14227 = vmatprep.subr.bf16.mxu1 %v17089_v19  ;;  %v4485_v58 = vld [vmem:[%s25320_s5 + $0x2950] sm:$0xff]  ;;  %v17433_v43 = vcombine.high %v4605_v56, %v4609_v35  ;;  %v17432_v18 = vcombine.low %v4605_v56, %v4609_v35 }
 0x6fd   : > { %14271 = vmatpush2.bf16.msra.mxu0 %v17208_v46  ;;  %v4489_v32 = vld [vmem:[%s25320_s5 + $0x2970] sm:$0xff] }
 0x6fe   : > { %14322 = vmatprep.subr.bf16.mxu0 %v17457_v14  ;;  %v17320_v14 = vcombine.low %v4493_v52, %v4497_v20  ;;  %v4601_v45 = vld [vmem:[%s25320_s5 + $0x2cf0] sm:$0xff]  ;;  %v17312_v51 = vcombine.low %v4485_v58, %v4489_v32 }
 0x6ff   : > { %14228 = vmatpush2.bf16.msra.mxu1 %v17088_v13  ;;  %v4597_v13 = vld [vmem:[%s25320_s5 + $0x2cd0] sm:$0xff] }
 0x700   : > { %v14028_v17 = vpop.f32.mrf.mxu0  ;;  %14273 = vmatmul.mubr.bf16.vlgmr.msra.gmra.mxu0 %v20956_v53  ;;  %14229 = vmatprep.subr.bf16.mxu1 %v17081_v23  ;;  %v17313_v23 = vcombine.high %v4485_v58, %v4489_v32  ;;  %v4481_v44 = vld [vmem:[%s25320_s5 + $0x2930] sm:$0xff]  ;;  %v17425_v61 = vcombine.high %v4597_v13, %v4601_v45 }
 0x701   : > { %14323 = vmatpush1.bf16.msra.mxu0 %v17456_v29  ;;  %14354 = vmatprep.mubr.bf16.mxu0 %v20958_v57  ;;  %v4461_v58 = vld [vmem:[%s25320_s5 + $0x2890] sm:$0xff] }
 0x702   : > { %v14030_v7 = vpop.f32.mrf.mxu0  ;;  %14324 = vmatprep.subr.bf16.mxu0 %v17449_v26  ;;  %v4465_v32 = vld [vmem:[%s25320_s5 + $0x28b0] sm:$0xff] }
 0x703   : > { %14230 = vmatpush2.bf16.msra.mxu1 %v17080_v1 }
 0x704   : > { %v14032_v24 = vpop.f32.mrf.mxu0  ;;  %14281 = vmatprep.subr.bf16.mxu1 %v17329_v28  ;;  %v4593_v28 = vld [vmem:[%s25320_s5 + $0x2cb0] sm:$0xff] }
 0x705   : > { %14325 = vmatpush1.bf16.msra.mxu0 %v17448_v6  ;;  %v4585_v24 = vld [vmem:[%s25320_s5 + $0x2c70] sm:$0xff] }
 0x706   : > { %v13987_v19 = vpop.f32.mrf.mxu1  ;;  %v14033_v46 = vpop.f32.mrf.mxu0  ;;  %14232 = vmatmul.mubr.bf16.vlgmr.msra.gmra.mxu1 %v20982_v12  ;;  %14326 = vmatprep.subr.bf16.mxu0 %v17441_v8  ;;  %v4469_v8 = vld [vmem:[%s25320_s5 + $0x28d0] sm:$0xff] }
 0x707   : > { %v13988_v59 = vadd.f32 %v13987_v19, %v23387_v33  ;;  %14282 = vmatpush1.bf16.msra.mxu1 %v17328_v38  ;;  %14313 = vmatprep.mubr.bf16.mxu1 %v20984_v55  ;;  %v4477_v33 = vld [vmem:[%s25320_s5 + $0x2910] sm:$0xff] }
 0x708   : > { %v13989_v41 = vpop.f32.mrf.mxu1  ;;  %14283 = vmatprep.subr.bf16.mxu1 %v17321_v50  ;;  %v17305_v20 = vcombine.high %v4477_v33, %v4481_v44  ;;  %v4473_v38 = vld [vmem:[%s25320_s5 + $0x28f0] sm:$0xff]  ;;  %v17304_v35 = vcombine.low %v4477_v33, %v4481_v44 }
 0x709   : > { %v13990_v29 = vadd.f32 %v13989_v41, %v23395_v25  ;;  %14327 = vmatpush1.bf16.msra.mxu0 %v17440_v27  ;;  %v23589_v26 = vadd.f32 %v14028_v17, %v13988_v59  ;;  %v4589_v25 = vld [vmem:[%s25320_s5 + $0x2c90] sm:$0xff]  ;;  %v17424_v17 = vcombine.low %v4597_v13, %v4601_v45  ;;  %v17297_v50 = vcombine.high %v4469_v8, %v4473_v38 }
 0x70a   : > { %v13991_v1 = vpop.f32.mrf.mxu1  ;;  %14328 = vmatprep.subr.bf16.mxu0 %v17433_v43  ;;  %v17417_v56 = vcombine.high %v4589_v25, %v4593_v28  ;;  %v17416_v27 = vcombine.low %v4589_v25, %v4593_v28  ;;  %v17296_v46 = vcombine.low %v4469_v8, %v4473_v38  ;;  %v4573_v43 = vld [vmem:[%s25320_s5 + $0x2c10] sm:$0xff] }
 0x70b   : > { %14284 = vmatpush1.bf16.msra.mxu1 %v17320_v14  ;;  %v23597_v6 = vadd.f32 %v14030_v7, %v13990_v29  ;;  %v4581_v7 = vld [vmem:[%s25320_s5 + $0x2c50] sm:$0xff]  ;;  %v17289_v14 = vcombine.high %v4461_v58, %v4465_v32  ;;  %v17288_v29 = vcombine.low %v4461_v58, %v4465_v32 }
 0x70c   : > { %v13992_v52 = vpop.f32.mrf.mxu1  ;;  %14285 = vmatprep.subr.bf16.mxu1 %v17313_v23  ;;  %v17409_v19 = vcombine.high %v4581_v7, %v4585_v24  ;;  %v4577_v59 = vld [vmem:[%s25320_s5 + $0x2c30] sm:$0xff]  ;;  %v17408_v13 = vcombine.low %v4581_v7, %v4585_v24 }
 0x70d   : > { %14329 = vmatpush1.bf16.msra.mxu0 %v17432_v18  ;;  %v4453_v45 = vld [vmem:[%s25320_s5 + $0x2850] sm:$0xff]  ;;  %v17401_v23 = vcombine.high %v4573_v43, %v4577_v59  ;;  %v17400_v1 = vcombine.low %v4573_v43, %v4577_v59 }
 0x70e   : > { %14330 = vmatprep.subr.bf16.mxu0 %v17425_v61  ;;  %v4457_v41 = vld [vmem:[%s25320_s5 + $0x2870] sm:$0xff] }
 0x70f   : > { %14286 = vmatpush1.bf16.msra.mxu1 %v17312_v51  ;;  %v4693_v18 = vld [vmem:[%s25320_s5 + $0x2fd0] sm:$0xff]  ;;  %v17281_v44 = vcombine.high %v4453_v45, %v4457_v41  ;;  %v17280_v28 = vcombine.low %v4453_v45, %v4457_v41 }
 0x710   : > { %14287 = vmatprep.subr.bf16.mxu1 %v17305_v20  ;;  %v4697_v33 = vld [vmem:[%s25320_s5 + $0x2ff0] sm:$0xff] }
 0x711   : > { %14331 = vmatpush1.bf16.msra.mxu0 %v17424_v17  ;;  %v4445_v61 = vld [vmem:[%s25320_s5 + $0x2810] sm:$0xff]  ;;  %v17521_v25 = vcombine.high %v4693_v18, %v4697_v33  ;;  %v17520_v8 = vcombine.low %v4693_v18, %v4697_v33 }
 0x712   : > { %14332 = vmatprep.subr.bf16.mxu0 %v17417_v56  ;;  %v4449_v51 = vld [vmem:[%s25320_s5 + $0x2830] sm:$0xff] }
 0x713   : > { %14288 = vmatpush1.bf16.msra.mxu1 %v17304_v35  ;;  %v4685_v52 = vld [vmem:[%s25320_s5 + $0x2f90] sm:$0xff]  ;;  %v17273_v17 = vcombine.high %v4445_v61, %v4449_v51  ;;  %v17272_v7 = vcombine.low %v4445_v61, %v4449_v51 }
 0x714   : > { %14289 = vmatprep.subr.bf16.mxu1 %v17297_v50  ;;  %v4689_v20 = vld [vmem:[%s25320_s5 + $0x2fb0] sm:$0xff] }
 0x715   : > { %14333 = vmatpush1.bf16.msra.mxu0 %v17416_v27  ;;  %v4565_v38 = vld [vmem:[%s25320_s5 + $0x2bd0] sm:$0xff]  ;;  %v17513_v35 = vcombine.high %v4685_v52, %v4689_v20  ;;  %v17512_v58 = vcombine.low %v4685_v52, %v4689_v20 }
 0x716   : > { %14334 = vmatprep.subr.bf16.mxu0 %v17409_v19  ;;  %v4569_v56 = vld [vmem:[%s25320_s5 + $0x2bf0] sm:$0xff] }
 0x717   : > { %14290 = vmatpush1.bf16.msra.mxu1 %v17296_v46  ;;  %v4677_v24 = vld [vmem:[%s25320_s5 + $0x2f50] sm:$0xff]  ;;  %v17393_v27 = vcombine.high %v4565_v38, %v4569_v56  ;;  %v17392_v43 = vcombine.low %v4565_v38, %v4569_v56 }
 0x718   : > { %14291 = vmatprep.subr.bf16.mxu1 %v17289_v14  ;;  %v4681_v50 = vld [vmem:[%s25320_s5 + $0x2f70] sm:$0xff] }
 0x719   : > { %14335 = vmatpush1.bf16.msra.mxu0 %v17408_v13  ;;  %v4557_v32 = vld [vmem:[%s25320_s5 + $0x2b90] sm:$0xff]  ;;  %v17505_v46 = vcombine.high %v4677_v24, %v4681_v50  ;;  %v17504_v45 = vcombine.low %v4677_v24, %v4681_v50 }
 0x71a   : > { %14336 = vmatprep.subr.bf16.mxu0 %v17401_v23  ;;  %v4561_v19 = vld [vmem:[%s25320_s5 + $0x2bb0] sm:$0xff] }
 0x71b   : > { %14292 = vmatpush1.bf16.msra.mxu1 %v17288_v29  ;;  %v4669_v59 = vld [vmem:[%s25320_s5 + $0x2f10] sm:$0xff]  ;;  %v17385_v13 = vcombine.high %v4557_v32, %v4561_v19  ;;  %v17384_v18 = vcombine.low %v4557_v32, %v4561_v19 }
 0x71c   : > { %14293 = vmatprep.subr.bf16.mxu1 %v17281_v44  ;;  %v4673_v14 = vld [vmem:[%s25320_s5 + $0x2f30] sm:$0xff] }
 0x71d   : > { %14337 = vmatpush1.bf16.msra.mxu0 %v17400_v1  ;;  %v4549_v41 = vld [vmem:[%s25320_s5 + $0x2b50] sm:$0xff]  ;;  %v17497_v29 = vcombine.high %v4669_v59, %v4673_v14  ;;  %v17496_v61 = vcombine.low %v4669_v59, %v4673_v14 }
 0x71e   : > { %14338 = vmatprep.subr.bf16.mxu0 %v17521_v25  ;;  %v4553_v23 = vld [vmem:[%s25320_s5 + $0x2b70] sm:$0xff] }
 0x71f   : > { %14294 = vmatpush1.bf16.msra.mxu1 %v17280_v28  ;;  %v4661_v33 = vld [vmem:[%s25320_s5 + $0x2ed0] sm:$0xff]  ;;  %v17377_v1 = vcombine.high %v4549_v41, %v4553_v23  ;;  %v17376_v52 = vcombine.low %v4549_v41, %v4553_v23 }
 0x720   : > { %14295 = vmatprep.subr.bf16.mxu1 %v17273_v17  ;;  %v4665_v44 = vld [vmem:[%s25320_s5 + $0x2ef0] sm:$0xff] }
 0x721   : > { %14339 = vmatpush2.bf16.msra.mxu0 %v17520_v8  ;;  %v4541_v51 = vld [vmem:[%s25320_s5 + $0x2b10] sm:$0xff]  ;;  %v17489_v28 = vcombine.high %v4661_v33, %v4665_v44  ;;  %v17488_v38 = vcombine.low %v4661_v33, %v4665_v44  ;;  %v3222_v44 = vld [vmem:[%s25320_s5 + $0x1d8] sm:$0xff] }
 0x722   : > { %14340 = vmatprep.subr.bf16.mxu0 %v17513_v35  ;;  %v4545_v25 = vld [vmem:[%s25320_s5 + $0x2b30] sm:$0xff] }
 0x723   : > { %14296 = vmatpush1.bf16.msra.mxu1 %v17272_v7  ;;  %v4653_v20 = vld [vmem:[%s25320_s5 + $0x2e90] sm:$0xff]  ;;  %v17369_v8 = vcombine.high %v4541_v51, %v4545_v25  ;;  %v17368_v24 = vcombine.low %v4541_v51, %v4545_v25 }
 0x724   : > { %14297 = vmatprep.subr.bf16.mxu1 %v17393_v27  ;;  %v4657_v17 = vld [vmem:[%s25320_s5 + $0x2eb0] sm:$0xff] }
 0x725   : > { %14341 = vmatpush2.bf16.msra.mxu0 %v17512_v58  ;;  %v4533_v56 = vld [vmem:[%s25320_s5 + $0x2ad0] sm:$0xff]  ;;  %v17481_v7 = vcombine.high %v4653_v20, %v4657_v17  ;;  %v17480_v32 = vcombine.low %v4653_v20, %v4657_v17  ;;  %v3214_v17 = vld [vmem:[%s25320_s5 + $0x198] sm:$0xff] }
 0x726   : > { %14342 = vmatprep.subr.bf16.mxu0 %v17505_v46  ;;  %v4537_v35 = vld [vmem:[%s25320_s5 + $0x2af0] sm:$0xff] }
 0x727   : > { %14298 = vmatpush2.bf16.msra.mxu1 %v17392_v43  ;;  %v4645_v50 = vld [vmem:[%s25320_s5 + $0x2e50] sm:$0xff]  ;;  %v17361_v58 = vcombine.high %v4533_v56, %v4537_v35  ;;  %v17360_v59 = vcombine.low %v4533_v56, %v4537_v35 }
 0x728   : > { %14299 = vmatprep.subr.bf16.mxu1 %v17385_v13  ;;  %v4649_v27 = vld [vmem:[%s25320_s5 + $0x2e70] sm:$0xff] }
 0x729   : > { %14343 = vmatpush2.bf16.msra.mxu0 %v17504_v45  ;;  %v4525_v19 = vld [vmem:[%s25320_s5 + $0x2a90] sm:$0xff]  ;;  %v17473_v43 = vcombine.high %v4645_v50, %v4649_v27  ;;  %v17472_v41 = vcombine.low %v4645_v50, %v4649_v27  ;;  %v3206_v27 = vld [vmem:[%s25320_s5 + $0x158] sm:$0xff] }
 0x72a   : > { %14344 = vmatprep.subr.bf16.mxu0 %v17497_v29  ;;  %v4529_v46 = vld [vmem:[%s25320_s5 + $0x2ab0] sm:$0xff] }
 0x72b   : > { %14300 = vmatpush2.bf16.msra.mxu1 %v17384_v18  ;;  %v4637_v14 = vld [vmem:[%s25320_s5 + $0x2e10] sm:$0xff]  ;;  %v17353_v45 = vcombine.high %v4525_v19, %v4529_v46  ;;  %v17352_v33 = vcombine.low %v4525_v19, %v4529_v46 }
 0x72c   : > { %14301 = vmatprep.subr.bf16.mxu1 %v17377_v1  ;;  %v4641_v13 = vld [vmem:[%s25320_s5 + $0x2e30] sm:$0xff]  ;;  %v3226_v1 = vld [vmem:[%s25320_s5 + $0x1f8] sm:$0xff] }
 0x72d   : > { %14345 = vmatpush2.bf16.msra.mxu0 %v17496_v61  ;;  %v4517_v23 = vld [vmem:[%s25320_s5 + $0x2a50] sm:$0xff]  ;;  %v17465_v18 = vcombine.high %v4637_v14, %v4641_v13  ;;  %v17464_v51 = vcombine.low %v4637_v14, %v4641_v13  ;;  %v16050_v56 = vcombine.low %v3222_v44, %v3226_v1 }
 0x72e   : > { %14346 = vmatprep.subr.bf16.mxu0 %v17489_v28  ;;  %v4521_v29 = vld [vmem:[%s25320_s5 + $0x2a70] sm:$0xff] }
 0x72f   : > { %14302 = vmatpush2.bf16.msra.mxu1 %v17376_v52  ;;  %v17345_v61 = vcombine.high %v4517_v23, %v4521_v29  ;;  %v4509_v25 = vld [vmem:[%s25320_s5 + $0x2a10] sm:$0xff]  ;;  %v16051_v52 = vcombine.high %v3222_v44, %v3226_v1  ;;  %v17344_v20 = vcombine.low %v4517_v23, %v4521_v29 }
 0x730   : > { %14303 = vmatprep.subr.bf16.mxu1 %v17369_v8  ;;  %v4513_v28 = vld [vmem:[%s25320_s5 + $0x2a30] sm:$0xff]  ;;  %v3218_v8 = vld [vmem:[%s25320_s5 + $0x1b8] sm:$0xff] }
 0x731   : > { %14347 = vmatpush2.bf16.msra.mxu0 %v17488_v38  ;;  %v17337_v38 = vcombine.high %v4509_v25, %v4513_v28  ;;  %v4757_v35 = vld [vmem:[%s25320_s5 + $0x31d0] sm:$0xff]  ;;  %v17336_v50 = vcombine.low %v4509_v25, %v4513_v28  ;;  %v16042_v46 = vcombine.low %v3214_v17, %v3218_v8 }
 0x732   : > { %14348 = vmatprep.subr.bf16.mxu0 %v17481_v7  ;;  %v4761_v7 = vld [vmem:[%s25320_s5 + $0x31f0] sm:$0xff] }
 0x733   : > { %14304 = vmatpush2.bf16.msra.mxu1 %v17368_v24  ;;  %v16043_v24 = vcombine.high %v3214_v17, %v3218_v8  ;;  %v17585_v19 = vcombine.high %v4757_v35, %v4761_v7  ;;  %v4745_v44 = vld [vmem:[%s25320_s5 + $0x3170] sm:$0xff] }
 0x734   : > { %14305 = vmatprep.subr.bf16.mxu1 %v17361_v58  ;;  %v3210_v58 = vld [vmem:[%s25320_s5 + $0x178] sm:$0xff] }
 0x735   : > { %14349 = vmatpush2.bf16.msra.mxu0 %v17480_v32  ;;  %v16035_v13 = vcombine.high %v3206_v27, %v3210_v58 }
 0x736   : > { %14350 = vmatprep.subr.bf16.mxu0 %v17473_v43  ;;  %v4749_v43 = vld [vmem:[%s25320_s5 + $0x3190] sm:$0xff] }
 0x737   : > { %14306 = vmatpush2.bf16.msra.mxu1 %v17360_v59  ;;  %v4753_v59 = vld [vmem:[%s25320_s5 + $0x31b0] sm:$0xff] }
 0x738   : > { %14307 = vmatprep.subr.bf16.mxu1 %v17353_v45  ;;  %v17584_v45 = vcombine.low %v4757_v35, %v4761_v7  ;;  %v17577_v29 = vcombine.high %v4749_v43, %v4753_v59  ;;  %v17576_v28 = vcombine.low %v4749_v43, %v4753_v59  ;;  %v4737_v35 = vld [vmem:[%s25320_s5 + $0x3130] sm:$0xff] }
 0x739   : > { %14351 = vmatpush2.bf16.msra.mxu0 %v17472_v41  ;;  %v3198_v41 = vld [vmem:[%s25320_s5 + $0x118] sm:$0xff]  ;;  %v4725_v59 = vld [vmem:[%s25320_s5 + $0x30d0] sm:$0xff] }
 0x73a   : > { %14352 = vmatprep.subr.bf16.mxu0 %v17465_v18  ;;  %v16034_v18 = vcombine.low %v3206_v27, %v3210_v58  ;;  %v3186_v58 = vld [vmem:[%s25320_s5 + $0xb8] sm:$0xff] }
 0x73b   : > { %14308 = vmatpush2.bf16.msra.mxu1 %v17352_v33  ;;  %v4741_v33 = vld [vmem:[%s25320_s5 + $0x3150] sm:$0xff] }
 0x73c   : > { %14309 = vmatprep.subr.bf16.mxu1 %v17345_v61  ;;  %v17569_v8 = vcombine.high %v4741_v33, %v4745_v44  ;;  %v17568_v27 = vcombine.low %v4741_v33, %v4745_v44  ;;  %v4721_v33 = vld [vmem:[%s25320_s5 + $0x30b0] sm:$0xff] }
 0x73d   : > { %14353 = vmatpush2.bf16.msra.mxu0 %v17464_v51 }
 0x73e   : > { %14404 = vmatprep.subr.bf16.mxu0 %v16051_v52  ;;  %v3190_v52 = vld [vmem:[%s25320_s5 + $0xd8] sm:$0xff] }
 0x73f   : > { %14310 = vmatpush2.bf16.msra.mxu1 %v17344_v20  ;;  %v3194_v20 = vld [vmem:[%s25320_s5 + $0xf8] sm:$0xff] }
 0x740   : > { %v14110_v32 = vpop.f32.mrf.mxu0  ;;  %14355 = vmatmul.mubr.bf16.vlgmr.msra.gmra.mxu0 %v21170_v48  ;;  %14311 = vmatprep.subr.bf16.mxu1 %v17337_v38 }
 0x741   : > { %14405 = vmatpush1.bf16.msra.mxu0 %v16050_v56  ;;  %14436 = vmatprep.mubr.bf16.mxu0 %v20049_v63  ;;  %v3202_v63 = vld [vmem:[%s25320_s5 + $0x138] sm:$0xff] }
 0x742   : > { %v14112_v14 = vpop.f32.mrf.mxu0  ;;  %14406 = vmatprep.subr.bf16.mxu0 %v16043_v24  ;;  %v16027_v51 = vcombine.high %v3198_v41, %v3202_v63  ;;  %v16026_v56 = vcombine.low %v3198_v41, %v3202_v63  ;;  %v3178_v63 = vld [vmem:[%s25320_s5 + $0x78] sm:$0xff] }
 0x743   : > { %14312 = vmatpush2.bf16.msra.mxu1 %v17336_v50  ;;  %v16019_v50 = vcombine.high %v3190_v52, %v3194_v20 }
 0x744   : > { %v14114_v23 = vpop.f32.mrf.mxu0  ;;  %14363 = vmatprep.subr.bf16.mxu1 %v17585_v19 }
 0x745   : > { %14407 = vmatpush1.bf16.msra.mxu0 %v16042_v46 }
 0x746   : > { %v14069_v1 = vpop.f32.mrf.mxu1  ;;  %v14115_v61 = vpop.f32.mrf.mxu0  ;;  %14314 = vmatmul.mubr.bf16.vlgmr.msra.gmra.mxu1 %v21192_v31  ;;  %14408 = vmatprep.subr.bf16.mxu0 %v16035_v13  ;;  %v4729_v13 = vld [vmem:[%s25320_s5 + $0x30f0] sm:$0xff] }
 0x747   : > { %v14070_v25 = vadd.f32 %v14069_v1, %v23589_v26  ;;  %14364 = vmatpush1.bf16.msra.mxu1 %v17584_v45  ;;  %14395 = vmatprep.mubr.bf16.mxu1 %v18575_v5  ;;  %v4733_v26 = vld [vmem:[%s25320_s5 + $0x3110] sm:$0xff]  ;;  %v17553_v23 = vcombine.high %v4725_v59, %v4729_v13  ;;  %v17552_v1 = vcombine.low %v4725_v59, %v4729_v13  ;;  %v3166_v61 = vld [vmem:[%s25320_s5 + $0x18] sm:$0xff] }
 0x748   : > { %v14071_v17 = vpop.f32.mrf.mxu1  ;;  %14365 = vmatprep.subr.bf16.mxu1 %v17577_v29  ;;  %v17561_v43 = vcombine.high %v4733_v26, %v4737_v35  ;;  %v17560_v41 = vcombine.low %v4733_v26, %v4737_v35  ;;  %v3350_v59 = vld [vmem:[%s25320_s5 + $0x5d8] sm:$0xff] }
 0x749   : > { %v14072_v38 = vadd.f32 %v14071_v17, %v23597_v6  ;;  %14409 = vmatpush1.bf16.msra.mxu0 %v16034_v18  ;;  %v23791_v7 = vadd.f32 %v14110_v32, %v14070_v25  ;;  %v3182_v6 = vld [vmem:[%s25320_s5 + $0x98] sm:$0xff]  ;;  %v16018_v32 = vcombine.low %v3190_v52, %v3194_v20  ;;  %v4717_v18 = vld [vmem:[%s25320_s5 + $0x3090] sm:$0xff] }
 0x74a   : > { %v14073_v24 = vpop.f32.mrf.mxu1  ;;  %14410 = vmatprep.subr.bf16.mxu0 %v16027_v51  ;;  %v16011_v45 = vcombine.high %v3182_v6, %v3186_v58  ;;  %v16010_v29 = vcombine.low %v3182_v6, %v3186_v58  ;;  %v3170_v51 = vld [vmem:[%s25320_s5 + $0x38] sm:$0xff]  ;;  %v17545_v25 = vcombine.high %v4717_v18, %v4721_v33  ;;  %v4709_v52 = vld [vmem:[%s25320_s5 + $0x3050] sm:$0xff] }
 0x74b   : > { %14366 = vmatpush1.bf16.msra.mxu1 %v17576_v28  ;;  %v23799_v19 = vadd.f32 %v14112_v14, %v14072_v38  ;;  %v3174_v14 = vld [vmem:[%s25320_s5 + $0x58] sm:$0xff]  ;;  %v4713_v20 = vld [vmem:[%s25320_s5 + $0x3070] sm:$0xff]  ;;  %v15995_v17 = vcombine.high %v3166_v61, %v3170_v51  ;;  %v15994_v35 = vcombine.low %v3166_v61, %v3170_v51 }
 0x74c   : > { %v14074_v46 = vpop.f32.mrf.mxu1  ;;  %14367 = vmatprep.subr.bf16.mxu1 %v17569_v8  ;;  %v16003_v44 = vcombine.high %v3174_v14, %v3178_v63  ;;  %v16002_v28 = vcombine.low %v3174_v14, %v3178_v63  ;;  %v17544_v8 = vcombine.low %v4717_v18, %v4721_v33  ;;  %v3286_v38 = vld [vmem:[%s25320_s5 + $0x3d8] sm:$0xff]  ;;  %v17537_v26 = vcombine.high %v4709_v52, %v4713_v20  ;;  %v4701_v24 = vld [vmem:[%s25320_s5 + $0x3010] sm:$0xff] }
 0x74d   : > { %14411 = vmatpush1.bf16.msra.mxu0 %v16026_v56  ;;  %v3290_v56 = vld [vmem:[%s25320_s5 + $0x3f8] sm:$0xff]  ;;  %v17536_v6 = vcombine.low %v4709_v52, %v4713_v20 }
 0x74e   : > { %14412 = vmatprep.subr.bf16.mxu0 %v16019_v50  ;;  %v4705_v50 = vld [vmem:[%s25320_s5 + $0x3030] sm:$0xff]  ;;  %v3278_v58 = vld [vmem:[%s25320_s5 + $0x398] sm:$0xff] }
 0x74f   : > { %14368 = vmatpush1.bf16.msra.mxu1 %v17568_v27  ;;  %v16115_v27 = vcombine.high %v3286_v38, %v3290_v56  ;;  %v3282_v46 = vld [vmem:[%s25320_s5 + $0x3b8] sm:$0xff] }
 0x750   : > { %14369 = vmatprep.subr.bf16.mxu1 %v17561_v43  ;;  %v17529_v43 = vcombine.high %v4701_v24, %v4705_v50  ;;  %v3354_v13 = vld [vmem:[%s25320_s5 + $0x5f8] sm:$0xff] }
 0x751   : > { %14413 = vmatpush1.bf16.msra.mxu0 %v16018_v32  ;;  %v16114_v32 = vcombine.low %v3286_v38, %v3290_v56  ;;  %v3270_v14 = vld [vmem:[%s25320_s5 + $0x358] sm:$0xff] }
 0x752   : > { %14414 = vmatprep.subr.bf16.mxu0 %v16011_v45  ;;  %v16107_v45 = vcombine.high %v3278_v58, %v3282_v46  ;;  %v3274_v63 = vld [vmem:[%s25320_s5 + $0x378] sm:$0xff] }
 0x753   : > { %14370 = vmatpush1.bf16.msra.mxu1 %v17560_v41  ;;  %v17528_v41 = vcombine.low %v4701_v24, %v4705_v50  ;;  %v3342_v18 = vld [vmem:[%s25320_s5 + $0x598] sm:$0xff] }
 0x754   : > { %14371 = vmatprep.subr.bf16.mxu1 %v17553_v23  ;;  %v16179_v23 = vcombine.high %v3350_v59, %v3354_v13  ;;  %v3346_v33 = vld [vmem:[%s25320_s5 + $0x5b8] sm:$0xff] }
 0x755   : > { %14415 = vmatpush1.bf16.msra.mxu0 %v16010_v29  ;;  %v16106_v29 = vcombine.low %v3278_v58, %v3282_v46  ;;  %v3262_v61 = vld [vmem:[%s25320_s5 + $0x318] sm:$0xff] }
 0x756   : > { %14416 = vmatprep.subr.bf16.mxu0 %v16003_v44  ;;  %v16099_v44 = vcombine.high %v3270_v14, %v3274_v63  ;;  %v3266_v51 = vld [vmem:[%s25320_s5 + $0x338] sm:$0xff] }
 0x757   : > { %14372 = vmatpush1.bf16.msra.mxu1 %v17552_v1  ;;  %v16178_v1 = vcombine.low %v3350_v59, %v3354_v13  ;;  %v3334_v52 = vld [vmem:[%s25320_s5 + $0x558] sm:$0xff] }
 0x758   : > { %14373 = vmatprep.subr.bf16.mxu1 %v17545_v25  ;;  %v16171_v25 = vcombine.high %v3342_v18, %v3346_v33  ;;  %v3338_v20 = vld [vmem:[%s25320_s5 + $0x578] sm:$0xff] }
 0x759   : > { %14417 = vmatpush1.bf16.msra.mxu0 %v16002_v28  ;;  %v16098_v28 = vcombine.low %v3270_v14, %v3274_v63  ;;  %v3254_v38 = vld [vmem:[%s25320_s5 + $0x2d8] sm:$0xff] }
 0x75a   : > { %14418 = vmatprep.subr.bf16.mxu0 %v15995_v17  ;;  %v16091_v17 = vcombine.high %v3262_v61, %v3266_v51  ;;  %v3258_v56 = vld [vmem:[%s25320_s5 + $0x2f8] sm:$0xff] }
 0x75b   : > { %14374 = vmatpush1.bf16.msra.mxu1 %v17544_v8  ;;  %v16170_v8 = vcombine.low %v3342_v18, %v3346_v33  ;;  %v3326_v24 = vld [vmem:[%s25320_s5 + $0x518] sm:$0xff]  ;;  %v16083_v50 = vcombine.high %v3254_v38, %v3258_v56 }
 0x75c   : > { %14375 = vmatprep.subr.bf16.mxu1 %v17537_v26  ;;  %v16163_v26 = vcombine.high %v3334_v52, %v3338_v20  ;;  %v3250_v58 = vld [vmem:[%s25320_s5 + $0x2b8] sm:$0xff] }
 0x75d   : > { %14419 = vmatpush1.bf16.msra.mxu0 %v15994_v35  ;;  %v16090_v35 = vcombine.low %v3262_v61, %v3266_v51  ;;  %v3322_v59 = vld [vmem:[%s25320_s5 + $0x4f8] sm:$0xff] }
 0x75e   : > { %14420 = vmatprep.subr.bf16.mxu0 %v16115_v27  ;;  %v16162_v27 = vcombine.low %v3334_v52, %v3338_v20  ;;  %v3242_v14 = vld [vmem:[%s25320_s5 + $0x278] sm:$0xff] }
 0x75f   : > { %14376 = vmatpush1.bf16.msra.mxu1 %v17536_v6  ;;  %v3246_v6 = vld [vmem:[%s25320_s5 + $0x298] sm:$0xff] }
 0x760   : > { %14377 = vmatprep.subr.bf16.mxu1 %v17529_v43  ;;  %v16082_v43 = vcombine.low %v3254_v38, %v3258_v56  ;;  %v16075_v13 = vcombine.high %v3246_v6, %v3250_v58  ;;  %v3314_v18 = vld [vmem:[%s25320_s5 + $0x4b8] sm:$0xff] }
 0x761   : > { %14421 = vmatpush2.bf16.msra.mxu0 %v16114_v32  ;;  %v3318_v32 = vld [vmem:[%s25320_s5 + $0x4d8] sm:$0xff] }
 0x762   : > { %14422 = vmatprep.subr.bf16.mxu0 %v16107_v45  ;;  %v16147_v63 = vcombine.high %v3318_v32, %v3322_v59  ;;  %v3234_v61 = vld [vmem:[%s25320_s5 + $0x238] sm:$0xff] }
 0x763   : > { %14378 = vmatpush1.bf16.msra.mxu1 %v17528_v41  ;;  %v3238_v41 = vld [vmem:[%s25320_s5 + $0x258] sm:$0xff] }
 0x764   : > { %14445 = vmatprep.subr.bf16.mxu1 %v16179_v23  ;;  %v16074_v23 = vcombine.low %v3246_v6, %v3250_v58  ;;  %v16067_v33 = vcombine.high %v3238_v41, %v3242_v14  ;;  %v3306_v52 = vld [vmem:[%s25320_s5 + $0x478] sm:$0xff] }
 0x765   : > { %14423 = vmatpush2.bf16.msra.mxu0 %v16106_v29  ;;  %v3310_v29 = vld [vmem:[%s25320_s5 + $0x498] sm:$0xff] }
 0x766   : > { %14396 = vmatmul.mubr.bf16.vlgmr.msra.gmra.mxu1 %v21299_v9  ;;  %14424 = vmatprep.subr.bf16.mxu0 %v16099_v44  ;;  %v16146_v44 = vcombine.low %v3318_v32, %v3322_v59  ;;  %v16139_v51 = vcombine.high %v3310_v29, %v3314_v18  ;;  %v3482_v38 = vld [vmem:[%s25320_s5 + $0x9f8] sm:$0xff] }
 0x767   : > { %14446 = vmatpush1.bf16.msra.mxu1 %v16178_v1  ;;  %14477 = vmatprep.mubr.bf16.mxu1 %v20028_v60  ;;  %v3330_v60 = vld [vmem:[%s25320_s5 + $0x538] sm:$0xff] }
 0x768   : > { %14447 = vmatprep.subr.bf16.mxu1 %v16171_v25  ;;  %v16155_v46 = vcombine.high %v3326_v24, %v3330_v60  ;;  %v16154_v45 = vcombine.low %v3326_v24, %v3330_v60  ;;  %v3230_v1 = vld [vmem:[%s25320_s5 + $0x218] sm:$0xff]  ;;  %v16066_v25 = vcombine.low %v3238_v41, %v3242_v14 }
 0x769   : > { %14425 = vmatpush2.bf16.msra.mxu0 %v16098_v28  ;;  %v3302_v28 = vld [vmem:[%s25320_s5 + $0x458] sm:$0xff]  ;;  %v16059_v20 = vcombine.high %v3230_v1, %v3234_v61 }
 0x76a   : > { %14426 = vmatprep.subr.bf16.mxu0 %v16091_v17  ;;  %v16138_v17 = vcombine.low %v3310_v29, %v3314_v18  ;;  %v16131_v56 = vcombine.high %v3302_v28, %v3306_v52  ;;  %v3298_v24 = vld [vmem:[%s25320_s5 + $0x438] sm:$0xff] }
 0x76b   : > { %14448 = vmatpush1.bf16.msra.mxu1 %v16170_v8  ;;  %v3478_v8 = vld [vmem:[%s25320_s5 + $0x9d8] sm:$0xff] }
 0x76c   : > { %14449 = vmatprep.subr.bf16.mxu1 %v16163_v26  ;;  %v16058_v26 = vcombine.low %v3230_v1, %v3234_v61  ;;  %v16307_v60 = vcombine.high %v3478_v8, %v3482_v38  ;;  %v3474_v6 = vld [vmem:[%s25320_s5 + $0x9b8] sm:$0xff] }
 0x76d   : > { %14427 = vmatpush2.bf16.msra.mxu0 %v16090_v35  ;;  %v3294_v35 = vld [vmem:[%s25320_s5 + $0x418] sm:$0xff] }
 0x76e   : > { %14428 = vmatprep.subr.bf16.mxu0 %v16083_v50  ;;  %v16130_v50 = vcombine.low %v3302_v28, %v3306_v52  ;;  %v16123_v58 = vcombine.high %v3294_v35, %v3298_v24  ;;  %v3418_v32 = vld [vmem:[%s25320_s5 + $0x7f8] sm:$0xff] }
 0x76f   : > { %14450 = vmatpush1.bf16.msra.mxu1 %v16162_v27  ;;  %v3470_v27 = vld [vmem:[%s25320_s5 + $0x998] sm:$0xff] }
 0x770   : > { %14451 = vmatprep.subr.bf16.mxu1 %v16155_v46  ;;  %v16306_v46 = vcombine.low %v3478_v8, %v3482_v38  ;;  %v16299_v59 = vcombine.high %v3470_v27, %v3474_v6  ;;  %v3466_v41 = vld [vmem:[%s25320_s5 + $0x978] sm:$0xff] }
 0x771   : > { %14429 = vmatpush2.bf16.msra.mxu0 %v16082_v43  ;;  %v3414_v43 = vld [vmem:[%s25320_s5 + $0x7d8] sm:$0xff] }
 0x772   : > { %14430 = vmatprep.subr.bf16.mxu0 %v16075_v13  ;;  %v16122_v13 = vcombine.low %v3294_v35, %v3298_v24  ;;  %v3406_v29 = vld [vmem:[%s25320_s5 + $0x798] sm:$0xff]  ;;  %v16242_v1 = vcombine.low %v3414_v43, %v3418_v32 }
 0x773   : > { %14452 = vmatpush1.bf16.msra.mxu1 %v16154_v45  ;;  %v3462_v45 = vld [vmem:[%s25320_s5 + $0x958] sm:$0xff] }
 0x774   : > { %14453 = vmatprep.subr.bf16.mxu1 %v16147_v63  ;;  %v16243_v63 = vcombine.high %v3414_v43, %v3418_v32  ;;  %v3410_v18 = vld [vmem:[%s25320_s5 + $0x7b8] sm:$0xff] }
 0x775   : > { %14431 = vmatpush2.bf16.msra.mxu0 %v16074_v23  ;;  %v16298_v23 = vcombine.low %v3470_v27, %v3474_v6  ;;  %v3398_v28 = vld [vmem:[%s25320_s5 + $0x758] sm:$0xff] }
 0x776   : > { %14432 = vmatprep.subr.bf16.mxu0 %v16067_v33  ;;  %v3402_v52 = vld [vmem:[%s25320_s5 + $0x778] sm:$0xff] }
 0x777   : > { %14454 = vmatpush1.bf16.msra.mxu1 %v16146_v44  ;;  %v16291_v44 = vcombine.high %v3462_v45, %v3466_v41  ;;  %v3450_v35 = vld [vmem:[%s25320_s5 + $0x8f8] sm:$0xff]  ;;  %v16226_v32 = vcombine.low %v3398_v28, %v3402_v52 }
 0x778   : > { %14455 = vmatprep.subr.bf16.mxu1 %v16139_v51  ;;  %v16235_v51 = vcombine.high %v3406_v29, %v3410_v18  ;;  %v3394_v6 = vld [vmem:[%s25320_s5 + $0x738] sm:$0xff] }
 0x779   : > { %14433 = vmatpush2.bf16.msra.mxu0 %v16066_v25  ;;  %v16290_v25 = vcombine.low %v3462_v45, %v3466_v41 }
 0x77a   : > { %14434 = vmatprep.subr.bf16.mxu0 %v16059_v20 }
 0x77b   : > { %14456 = vmatpush1.bf16.msra.mxu1 %v16138_v17 }
 0x77c   : > { %14457 = vmatprep.subr.bf16.mxu1 %v16131_v56  ;;  %v16234_v56 = vcombine.low %v3406_v29, %v3410_v18 }
 0x77d   : > { %14435 = vmatpush2.bf16.msra.mxu0 %v16058_v26  ;;  %v3446_v26 = vld [vmem:[%s25320_s5 + $0x8d8] sm:$0xff] }
 0x77e   : > { %14486 = vmatprep.subr.bf16.mxu0 %v16307_v60  ;;  %v16227_v60 = vcombine.high %v3398_v28, %v3402_v52  ;;  %v16275_v43 = vcombine.high %v3446_v26, %v3450_v35  ;;  %v3422_v28 = vld [vmem:[%s25320_s5 + $0x818] sm:$0xff] }
 0x77f   : > { %14458 = vmatpush1.bf16.msra.mxu1 %v16130_v50  ;;  %v3426_v52 = vld [vmem:[%s25320_s5 + $0x838] sm:$0xff] }
 0x780   : > { %v14192_v14 = vpop.f32.mrf.mxu0  ;;  %14437 = vmatmul.mubr.bf16.vlgmr.msra.gmra.mxu0 %v20055_v10  ;;  %14459 = vmatprep.subr.bf16.mxu1 %v16123_v58  ;;  %v3454_v10 = vld [vmem:[%s25320_s5 + $0x918] sm:$0xff] }
 0x781   : > { %14487 = vmatpush1.bf16.msra.mxu0 %v16306_v46  ;;  %14518 = vmatprep.mubr.bf16.mxu0 %v20076_v0  ;;  %v3458_v0 = vld [vmem:[%s25320_s5 + $0x938] sm:$0xff] }
 0x782   : > { %v14194_v33 = vpop.f32.mrf.mxu0  ;;  %14488 = vmatprep.subr.bf16.mxu0 %v16299_v59  ;;  %v16283_v8 = vcombine.high %v3454_v10, %v3458_v0  ;;  %v16282_v27 = vcombine.low %v3454_v10, %v3458_v0  ;;  %v3442_v59 = vld [vmem:[%s25320_s5 + $0x8b8] sm:$0xff] }
 0x783   : > { %14460 = vmatpush1.bf16.msra.mxu1 %v16122_v13  ;;  %v3374_v0 = vld [vmem:[%s25320_s5 + $0x698] sm:$0xff] }
 0x784   : > { %v14196_v61 = vpop.f32.mrf.mxu0  ;;  %14461 = vmatprep.subr.bf16.mxu1 %v16243_v63  ;;  %v3382_v63 = vld [vmem:[%s25320_s5 + $0x6d8] sm:$0xff] }
 0x785   : > { %14489 = vmatpush1.bf16.msra.mxu0 %v16298_v23  ;;  %v3386_v23 = vld [vmem:[%s25320_s5 + $0x6f8] sm:$0xff] }
 0x786   : > { %v14151_v20 = vpop.f32.mrf.mxu1  ;;  %v14197_v17 = vpop.f32.mrf.mxu0  ;;  %14490 = vmatprep.subr.bf16.mxu0 %v16291_v44  ;;  %v3434_v44 = vld [vmem:[%s25320_s5 + $0x878] sm:$0xff] }
 0x787   : > { %v14152_v38 = vadd.f32 %v14151_v20, %v23791_v7  ;;  %14462 = vmatpush2.bf16.msra.mxu1 %v16242_v1  ;;  %v3390_v7 = vld [vmem:[%s25320_s5 + $0x718] sm:$0xff]  ;;  %v16211_v1 = vcombine.high %v3382_v63, %v3386_v23 }
 0x788   : > { %v14153_v24 = vpop.f32.mrf.mxu1  ;;  %14463 = vmatprep.subr.bf16.mxu1 %v16235_v51  ;;  %v16219_v41 = vcombine.high %v3390_v7, %v3394_v6  ;;  %v16218_v18 = vcombine.low %v3390_v7, %v3394_v6  ;;  %v3378_v61 = vld [vmem:[%s25320_s5 + $0x6b8] sm:$0xff] }
 0x789   : > { %v14154_v50 = vadd.f32 %v14153_v24, %v23799_v19  ;;  %14491 = vmatpush1.bf16.msra.mxu0 %v16290_v25  ;;  %v23993_v58 = vadd.f32 %v14192_v14, %v14152_v38  ;;  %v3438_v19 = vld [vmem:[%s25320_s5 + $0x898] sm:$0xff]  ;;  %v16274_v14 = vcombine.low %v3446_v26, %v3450_v35  ;;  %v16210_v25 = vcombine.low %v3382_v63, %v3386_v23 }
 0x78a   : > { %v14155_v46 = vpop.f32.mrf.mxu1  ;;  %14492 = vmatprep.subr.bf16.mxu0 %v16283_v8  ;;  %v16267_v29 = vcombine.high %v3438_v19, %v3442_v59  ;;  %v16266_v10 = vcombine.low %v3438_v19, %v3442_v59  ;;  %v16203_v20 = vcombine.high %v3374_v0, %v3378_v61  ;;  %v3366_v8 = vld [vmem:[%s25320_s5 + $0x658] sm:$0xff]  ;;  %v16202_v26 = vcombine.low %v3374_v0, %v3378_v61 }
 0x78b   : > { %14464 = vmatpush2.bf16.msra.mxu1 %v16234_v56  ;;  %v24001_v13 = vadd.f32 %v14194_v33, %v14154_v50  ;;  %v3430_v33 = vld [vmem:[%s25320_s5 + $0x858] sm:$0xff]  ;;  %v16251_v56 = vcombine.high %v3422_v28, %v3426_v52  ;;  %v16250_v50 = vcombine.low %v3422_v28, %v3426_v52 }
 0x78c   : > { %v14156_v45 = vpop.f32.mrf.mxu1  ;;  %14465 = vmatprep.subr.bf16.mxu1 %v16227_v60  ;;  %v16259_v51 = vcombine.high %v3430_v33, %v3434_v44  ;;  %v16258_v17 = vcombine.low %v3430_v33, %v3434_v44  ;;  %v3370_v38 = vld [vmem:[%s25320_s5 + $0x678] sm:$0xff] }
 0x78d   : > { %14493 = vmatpush1.bf16.msra.mxu0 %v16282_v27  ;;  %v3542_v35 = vld [vmem:[%s25320_s5 + $0xbd8] sm:$0xff]  ;;  %v16195_v60 = vcombine.high %v3366_v8, %v3370_v38  ;;  %v16194_v46 = vcombine.low %v3366_v8, %v3370_v38 }
 0x78e   : > { %14494 = vmatprep.subr.bf16.mxu0 %v16275_v43  ;;  %v3546_v24 = vld [vmem:[%s25320_s5 + $0xbf8] sm:$0xff] }
 0x78f   : > { %14466 = vmatpush2.bf16.msra.mxu1 %v16226_v32  ;;  %v3358_v27 = vld [vmem:[%s25320_s5 + $0x618] sm:$0xff]  ;;  %v16371_v6 = vcombine.high %v3542_v35, %v3546_v24  ;;  %v16370_v59 = vcombine.low %v3542_v35, %v3546_v24 }
 0x790   : > { %14467 = vmatprep.subr.bf16.mxu1 %v16219_v41  ;;  %v3362_v7 = vld [vmem:[%s25320_s5 + $0x638] sm:$0xff] }
 0x791   : > { %14495 = vmatpush1.bf16.msra.mxu0 %v16274_v14  ;;  %v3534_v43 = vld [vmem:[%s25320_s5 + $0xb98] sm:$0xff]  ;;  %v16187_v19 = vcombine.high %v3358_v27, %v3362_v7  ;;  %v16186_v63 = vcombine.low %v3358_v27, %v3362_v7 }
 0x792   : > { %14496 = vmatprep.subr.bf16.mxu0 %v16267_v29  ;;  %v3538_v32 = vld [vmem:[%s25320_s5 + $0xbb8] sm:$0xff] }
 0x793   : > { %14468 = vmatpush2.bf16.msra.mxu1 %v16218_v18  ;;  %v3606_v45 = vld [vmem:[%s25320_s5 + $0xdd8] sm:$0xff]  ;;  %v16363_v14 = vcombine.high %v3534_v43, %v3538_v32  ;;  %v16362_v33 = vcombine.low %v3534_v43, %v3538_v32 }
 0x794   : > { %14469 = vmatprep.subr.bf16.mxu1 %v16211_v1  ;;  %v3610_v41 = vld [vmem:[%s25320_s5 + $0xdf8] sm:$0xff] }
 0x795   : > { %14497 = vmatpush1.bf16.msra.mxu0 %v16266_v10  ;;  %v3526_v23 = vld [vmem:[%s25320_s5 + $0xb58] sm:$0xff]  ;;  %v16435_v18 = vcombine.high %v3606_v45, %v3610_v41  ;;  %v16434_v0 = vcombine.low %v3606_v45, %v3610_v41 }
 0x796   : > { %14498 = vmatprep.subr.bf16.mxu0 %v16259_v51  ;;  %v3530_v29 = vld [vmem:[%s25320_s5 + $0xb78] sm:$0xff] }
 0x797   : > { %14470 = vmatpush2.bf16.msra.mxu1 %v16210_v25  ;;  %v3598_v44 = vld [vmem:[%s25320_s5 + $0xd98] sm:$0xff]  ;;  %v16355_v10 = vcombine.high %v3526_v23, %v3530_v29  ;;  %v16354_v28 = vcombine.low %v3526_v23, %v3530_v29 }
 0x798   : > { %14471 = vmatprep.subr.bf16.mxu1 %v16203_v20  ;;  %v3602_v1 = vld [vmem:[%s25320_s5 + $0xdb8] sm:$0xff] }
 0x799   : > { %14499 = vmatpush1.bf16.msra.mxu0 %v16258_v17  ;;  %v3518_v61 = vld [vmem:[%s25320_s5 + $0xb18] sm:$0xff]  ;;  %v16427_v25 = vcombine.high %v3598_v44, %v3602_v1  ;;  %v16426_v8 = vcombine.low %v3598_v44, %v3602_v1 }
 0x79a   : > { %14500 = vmatprep.subr.bf16.mxu0 %v16251_v56  ;;  %v3522_v51 = vld [vmem:[%s25320_s5 + $0xb38] sm:$0xff] }
 0x79b   : > { %14472 = vmatpush2.bf16.msra.mxu1 %v16202_v26  ;;  %v3590_v52 = vld [vmem:[%s25320_s5 + $0xd58] sm:$0xff]  ;;  %v16347_v17 = vcombine.high %v3518_v61, %v3522_v51  ;;  %v16346_v35 = vcombine.low %v3518_v61, %v3522_v51 }
 0x79c   : > { %14473 = vmatprep.subr.bf16.mxu1 %v16195_v60  ;;  %v3594_v20 = vld [vmem:[%s25320_s5 + $0xd78] sm:$0xff] }
 0x79d   : > { %14501 = vmatpush1.bf16.msra.mxu0 %v16250_v50  ;;  %v3510_v38 = vld [vmem:[%s25320_s5 + $0xad8] sm:$0xff]  ;;  %v16419_v26 = vcombine.high %v3590_v52, %v3594_v20  ;;  %v16418_v60 = vcombine.low %v3590_v52, %v3594_v20 }
 0x79e   : > { %14502 = vmatprep.subr.bf16.mxu0 %v16371_v6  ;;  %v3514_v56 = vld [vmem:[%s25320_s5 + $0xaf8] sm:$0xff] }
 0x79f   : > { %14474 = vmatpush2.bf16.msra.mxu1 %v16194_v46  ;;  %v16339_v24 = vcombine.high %v3510_v38, %v3514_v56  ;;  %v3502_v50 = vld [vmem:[%s25320_s5 + $0xa98] sm:$0xff]  ;;  %v16338_v6 = vcombine.low %v3510_v38, %v3514_v56 }
 0x7a0   : > { %14475 = vmatprep.subr.bf16.mxu1 %v16187_v19  ;;  %v3506_v27 = vld [vmem:[%s25320_s5 + $0xab8] sm:$0xff] }
 0x7a1   : > { %14503 = vmatpush2.bf16.msra.mxu0 %v16370_v59  ;;  %v3574_v46 = vld [vmem:[%s25320_s5 + $0xcd8] sm:$0xff]  ;;  %v16331_v32 = vcombine.high %v3502_v50, %v3506_v27 }
 0x7a2   : > { %14504 = vmatprep.subr.bf16.mxu0 %v16363_v14  ;;  %v3578_v43 = vld [vmem:[%s25320_s5 + $0xcf8] sm:$0xff]  ;;  %v16330_v14 = vcombine.low %v3502_v50, %v3506_v27 }
 0x7a3   : > { %14476 = vmatpush2.bf16.msra.mxu1 %v16186_v63  ;;  %v3494_v59 = vld [vmem:[%s25320_s5 + $0xa58] sm:$0xff]  ;;  %v16403_v41 = vcombine.high %v3574_v46, %v3578_v43 }
 0x7a4   : > { %14527 = vmatprep.subr.bf16.mxu1 %v16435_v18  ;;  %v3498_v45 = vld [vmem:[%s25320_s5 + $0xa78] sm:$0xff]  ;;  %v16402_v18 = vcombine.low %v3574_v46, %v3578_v43 }
 0x7a5   : > { %14505 = vmatpush2.bf16.msra.mxu0 %v16362_v33  ;;  %v3566_v63 = vld [vmem:[%s25320_s5 + $0xc98] sm:$0xff]  ;;  %v16323_v29 = vcombine.high %v3494_v59, %v3498_v45 }
 0x7a6   : > { %14478 = vmatmul.mubr.bf16.vlgmr.msra.gmra.mxu1 %v20023_v47  ;;  %14506 = vmatprep.subr.bf16.mxu0 %v16355_v10  ;;  %v3582_v47 = vld [vmem:[%s25320_s5 + $0xd18] sm:$0xff]  ;;  %v16322_v10 = vcombine.low %v3494_v59, %v3498_v45 }
 0x7a7   : > { %14528 = vmatpush1.bf16.msra.mxu1 %v16434_v0  ;;  %14559 = vmatprep.mubr.bf16.mxu1 %v20134_v37  ;;  %v3586_v37 = vld [vmem:[%s25320_s5 + $0xd38] sm:$0xff] }
 0x7a8   : > { %14529 = vmatprep.subr.bf16.mxu1 %v16427_v25  ;;  %v16411_v7 = vcombine.high %v3582_v47, %v3586_v37  ;;  %v16410_v19 = vcombine.low %v3582_v47, %v3586_v37  ;;  %v3570_v23 = vld [vmem:[%s25320_s5 + $0xcb8] sm:$0xff] }
 0x7a9   : > { %14507 = vmatpush2.bf16.msra.mxu0 %v16354_v28  ;;  %v3486_v33 = vld [vmem:[%s25320_s5 + $0xa18] sm:$0xff]  ;;  %v16395_v1 = vcombine.high %v3566_v63, %v3570_v23  ;;  %v16394_v25 = vcombine.low %v3566_v63, %v3570_v23 }
 0x7aa   : > { %14508 = vmatprep.subr.bf16.mxu0 %v16347_v17  ;;  %v3490_v44 = vld [vmem:[%s25320_s5 + $0xa38] sm:$0xff] }
 0x7ab   : > { %14530 = vmatpush1.bf16.msra.mxu1 %v16426_v8  ;;  %v3558_v0 = vld [vmem:[%s25320_s5 + $0xc58] sm:$0xff]  ;;  %v16315_v51 = vcombine.high %v3486_v33, %v3490_v44  ;;  %v16314_v17 = vcombine.low %v3486_v33, %v3490_v44 }
 0x7ac   : > { %14531 = vmatprep.subr.bf16.mxu1 %v16419_v26  ;;  %v3562_v61 = vld [vmem:[%s25320_s5 + $0xc78] sm:$0xff] }
 0x7ad   : > { %14509 = vmatpush2.bf16.msra.mxu0 %v16346_v35  ;;  %v3734_v28 = vld [vmem:[%s25320_s5 + $0x11d8] sm:$0xff]  ;;  %v16387_v20 = vcombine.high %v3558_v0, %v3562_v61  ;;  %v16386_v26 = vcombine.low %v3558_v0, %v3562_v61 }
 0x7ae   : > { %14510 = vmatprep.subr.bf16.mxu0 %v16339_v24  ;;  %v3738_v52 = vld [vmem:[%s25320_s5 + $0x11f8] sm:$0xff] }
 0x7af   : > { %14532 = vmatpush1.bf16.msra.mxu1 %v16418_v60  ;;  %v3550_v8 = vld [vmem:[%s25320_s5 + $0xc18] sm:$0xff]  ;;  %v16563_v56 = vcombine.high %v3734_v28, %v3738_v52  ;;  %v16562_v24 = vcombine.low %v3734_v28, %v3738_v52 }
 0x7b0   : > { %14533 = vmatprep.subr.bf16.mxu1 %v16411_v7  ;;  %v3554_v38 = vld [vmem:[%s25320_s5 + $0xc38] sm:$0xff] }
 0x7b1   : > { %14511 = vmatpush2.bf16.msra.mxu0 %v16338_v6  ;;  %v3726_v35 = vld [vmem:[%s25320_s5 + $0x1198] sm:$0xff]  ;;  %v16379_v37 = vcombine.high %v3550_v8, %v3554_v38  ;;  %v16378_v7 = vcombine.low %v3550_v8, %v3554_v38 }
 0x7b2   : > { %14512 = vmatprep.subr.bf16.mxu0 %v16331_v32  ;;  %v3730_v47 = vld [vmem:[%s25320_s5 + $0x11b8] sm:$0xff] }
 0x7b3   : > { %14534 = vmatpush1.bf16.msra.mxu1 %v16410_v19  ;;  %v3670_v60 = vld [vmem:[%s25320_s5 + $0xfd8] sm:$0xff]  ;;  %v16555_v27 = vcombine.high %v3726_v35, %v3730_v47  ;;  %v16554_v19 = vcombine.low %v3726_v35, %v3730_v47 }
 0x7b4   : > { %14535 = vmatprep.subr.bf16.mxu1 %v16403_v41  ;;  %v3674_v50 = vld [vmem:[%s25320_s5 + $0xff8] sm:$0xff] }
 0x7b5   : > { %14513 = vmatpush2.bf16.msra.mxu0 %v16330_v14  ;;  %v3718_v6 = vld [vmem:[%s25320_s5 + $0x1158] sm:$0xff]  ;;  %v16499_v32 = vcombine.high %v3670_v60, %v3674_v50  ;;  %v16498_v63 = vcombine.low %v3670_v60, %v3674_v50 }
 0x7b6   : > { %14514 = vmatprep.subr.bf16.mxu0 %v16323_v29  ;;  %v3722_v46 = vld [vmem:[%s25320_s5 + $0x1178] sm:$0xff] }
 0x7b7   : > { %14536 = vmatpush1.bf16.msra.mxu1 %v16402_v18  ;;  %v3662_v59 = vld [vmem:[%s25320_s5 + $0xf98] sm:$0xff]  ;;  %v16547_v14 = vcombine.high %v3718_v6, %v3722_v46  ;;  %v16546_v18 = vcombine.low %v3718_v6, %v3722_v46 }
 0x7b8   : > { %14537 = vmatprep.subr.bf16.mxu1 %v16395_v1  ;;  %v3666_v45 = vld [vmem:[%s25320_s5 + $0xfb8] sm:$0xff] }
 0x7b9   : > { %14515 = vmatpush2.bf16.msra.mxu0 %v16322_v10  ;;  %v16491_v29 = vcombine.high %v3662_v59, %v3666_v45  ;;  %v3654_v33 = vld [vmem:[%s25320_s5 + $0xf58] sm:$0xff] }
 0x7ba   : > { %14516 = vmatprep.subr.bf16.mxu0 %v16315_v51  ;;  %v3658_v44 = vld [vmem:[%s25320_s5 + $0xf78] sm:$0xff]  ;;  %v16490_v51 = vcombine.low %v3662_v59, %v3666_v45 }
 0x7bb   : > { %14538 = vmatpush1.bf16.msra.mxu1 %v16394_v25  ;;  %v3702_v25 = vld [vmem:[%s25320_s5 + $0x10d8] sm:$0xff]  ;;  %v16482_v47 = vcombine.low %v3654_v33, %v3658_v44 }
 0x7bc   : > { %14539 = vmatprep.subr.bf16.mxu1 %v16387_v20  ;;  %v3706_v28 = vld [vmem:[%s25320_s5 + $0x10f8] sm:$0xff]  ;;  %v16483_v20 = vcombine.high %v3654_v33, %v3658_v44 }
 0x7bd   : > { %14517 = vmatpush2.bf16.msra.mxu0 %v16314_v17  ;;  %v3650_v38 = vld [vmem:[%s25320_s5 + $0xf38] sm:$0xff]  ;;  %v16531_v35 = vcombine.high %v3702_v25, %v3706_v28 }
 0x7be   : > { %14568 = vmatprep.subr.bf16.mxu0 %v16563_v56  ;;  %v3642_v6 = vld [vmem:[%s25320_s5 + $0xef8] sm:$0xff] }
 0x7bf   : > { %14540 = vmatpush1.bf16.msra.mxu1 %v16386_v26  ;;  %v3622_v33 = vld [vmem:[%s25320_s5 + $0xe58] sm:$0xff] }
 0x7c0   : > { %v14274_v43 = vpop.f32.mrf.mxu0  ;;  %14519 = vmatmul.mubr.bf16.vlgmr.msra.gmra.mxu0 %v20344_v39  ;;  %14541 = vmatprep.subr.bf16.mxu1 %v16379_v37  ;;  %v3710_v39 = vld [vmem:[%s25320_s5 + $0x1118] sm:$0xff] }
 0x7c1   : > { %14569 = vmatpush1.bf16.msra.mxu0 %v16562_v24  ;;  %14600 = vmatprep.mubr.bf16.mxu0 %v20346_v2  ;;  %v3714_v2 = vld [vmem:[%s25320_s5 + $0x1138] sm:$0xff] }
 0x7c2   : > { %v14276_v41 = vpop.f32.mrf.mxu0  ;;  %14570 = vmatprep.subr.bf16.mxu0 %v16555_v27  ;;  %v16539_v0 = vcombine.high %v3710_v39, %v3714_v2  ;;  %v16538_v8 = vcombine.low %v3710_v39, %v3714_v2  ;;  %v3698_v37 = vld [vmem:[%s25320_s5 + $0x10b8] sm:$0xff]  ;;  %v16530_v27 = vcombine.low %v3702_v25, %v3706_v28 }
 0x7c3   : > { %14542 = vmatpush1.bf16.msra.mxu1 %v16378_v7  ;;  %v3638_v7 = vld [vmem:[%s25320_s5 + $0xed8] sm:$0xff] }
 0x7c4   : > { %v14278_v23 = vpop.f32.mrf.mxu0  ;;  %14543 = vmatprep.subr.bf16.mxu1 %v16499_v32  ;;  %v3686_v32 = vld [vmem:[%s25320_s5 + $0x1058] sm:$0xff]  ;;  %v16467_v59 = vcombine.high %v3638_v7, %v3642_v6  ;;  %v16466_v39 = vcombine.low %v3638_v7, %v3642_v6 }
 0x7c5   : > { %14571 = vmatpush1.bf16.msra.mxu0 %v16554_v19  ;;  %v3690_v19 = vld [vmem:[%s25320_s5 + $0x1078] sm:$0xff] }
 0x7c6   : > { %v14233_v1 = vpop.f32.mrf.mxu1  ;;  %v14279_v10 = vpop.f32.mrf.mxu0  ;;  %14572 = vmatprep.subr.bf16.mxu0 %v16547_v14  ;;  %v3634_v14 = vld [vmem:[%s25320_s5 + $0xeb8] sm:$0xff] }
 0x7c7   : > { %v14234_v61 = vadd.f32 %v14233_v1, %v23993_v58  ;;  %14544 = vmatpush2.bf16.msra.mxu1 %v16498_v63  ;;  %v3646_v58 = vld [vmem:[%s25320_s5 + $0xf18] sm:$0xff]  ;;  %v16515_v63 = vcombine.high %v3686_v32, %v3690_v19 }
 0x7c8   : > { %v14235_v52 = vpop.f32.mrf.mxu1  ;;  %14545 = vmatprep.subr.bf16.mxu1 %v16491_v29  ;;  %v16475_v50 = vcombine.high %v3646_v58, %v3650_v38  ;;  %v3678_v2 = vld [vmem:[%s25320_s5 + $0x1018] sm:$0xff] }
 0x7c9   : > { %v14236_v17 = vadd.f32 %v14235_v52, %v24001_v13  ;;  %14573 = vmatpush1.bf16.msra.mxu0 %v16546_v18  ;;  %v24195_v56 = vadd.f32 %v14274_v43, %v14234_v61  ;;  %v3694_v13 = vld [vmem:[%s25320_s5 + $0x1098] sm:$0xff]  ;;  %v16474_v43 = vcombine.low %v3646_v58, %v3650_v38  ;;  %v16514_v18 = vcombine.low %v3686_v32, %v3690_v19 }
 0x7ca   : > { %v14237_v26 = vpop.f32.mrf.mxu1  ;;  %14574 = vmatprep.subr.bf16.mxu0 %v16539_v0  ;;  %v16523_v46 = vcombine.high %v3694_v13, %v3698_v37  ;;  %v16522_v45 = vcombine.low %v3694_v13, %v3698_v37  ;;  %v3682_v23 = vld [vmem:[%s25320_s5 + $0x1038] sm:$0xff] }
 0x7cb   : > { %14546 = vmatpush2.bf16.msra.mxu1 %v16490_v51  ;;  %v24203_v24 = vadd.f32 %v14276_v41, %v14236_v17  ;;  %v3630_v41 = vld [vmem:[%s25320_s5 + $0xe98] sm:$0xff]  ;;  %v16507_v1 = vcombine.high %v3678_v2, %v3682_v23  ;;  %v16506_v25 = vcombine.low %v3678_v2, %v3682_v23 }
 0x7cc   : > { %v14238_v60 = vpop.f32.mrf.mxu1  ;;  %14547 = vmatprep.subr.bf16.mxu1 %v16483_v20  ;;  %v16459_v29 = vcombine.high %v3630_v41, %v3634_v14  ;;  %v3626_v44 = vld [vmem:[%s25320_s5 + $0xe78] sm:$0xff]  ;;  %v16458_v10 = vcombine.low %v3630_v41, %v3634_v14 }
 0x7cd   : > { %14575 = vmatpush1.bf16.msra.mxu0 %v16538_v8  ;;  %v3798_v0 = vld [vmem:[%s25320_s5 + $0x13d8] sm:$0xff]  ;;  %v16451_v51 = vcombine.high %v3622_v33, %v3626_v44  ;;  %v16450_v17 = vcombine.low %v3622_v33, %v3626_v44 }
 0x7ce   : > { %14576 = vmatprep.subr.bf16.mxu0 %v16531_v35  ;;  %v3802_v61 = vld [vmem:[%s25320_s5 + $0x13f8] sm:$0xff] }
 0x7cf   : > { %14548 = vmatpush2.bf16.msra.mxu1 %v16482_v47  ;;  %v3614_v28 = vld [vmem:[%s25320_s5 + $0xe18] sm:$0xff]  ;;  %v16627_v20 = vcombine.high %v3798_v0, %v3802_v61  ;;  %v16626_v26 = vcombine.low %v3798_v0, %v3802_v61 }
 0x7d0   : > { %14549 = vmatprep.subr.bf16.mxu1 %v16475_v50  ;;  %v3618_v52 = vld [vmem:[%s25320_s5 + $0xe38] sm:$0xff] }
 0x7d1   : > { %14577 = vmatpush1.bf16.msra.mxu0 %v16530_v27  ;;  %v3790_v8 = vld [vmem:[%s25320_s5 + $0x1398] sm:$0xff]  ;;  %v16443_v38 = vcombine.high %v3614_v28, %v3618_v52  ;;  %v16442_v37 = vcombine.low %v3614_v28, %v3618_v52 }
 0x7d2   : > { %14578 = vmatprep.subr.bf16.mxu0 %v16523_v46  ;;  %v3794_v58 = vld [vmem:[%s25320_s5 + $0x13b8] sm:$0xff] }
 0x7d3   : > { %14550 = vmatpush2.bf16.msra.mxu1 %v16474_v43  ;;  %v3862_v35 = vld [vmem:[%s25320_s5 + $0x15d8] sm:$0xff]  ;;  %v16619_v13 = vcombine.high %v3790_v8, %v3794_v58  ;;  %v16618_v7 = vcombine.low %v3790_v8, %v3794_v58 }
 0x7d4   : > { %14551 = vmatprep.subr.bf16.mxu1 %v16467_v59  ;;  %v3866_v47 = vld [vmem:[%s25320_s5 + $0x15f8] sm:$0xff] }
 0x7d5   : > { %14579 = vmatpush1.bf16.msra.mxu0 %v16522_v45  ;;  %v3782_v60 = vld [vmem:[%s25320_s5 + $0x1358] sm:$0xff]  ;;  %v16691_v27 = vcombine.high %v3862_v35, %v3866_v47  ;;  %v16690_v32 = vcombine.low %v3862_v35, %v3866_v47 }
 0x7d6   : > { %14580 = vmatprep.subr.bf16.mxu0 %v16515_v63  ;;  %v3786_v50 = vld [vmem:[%s25320_s5 + $0x1378] sm:$0xff] }
 0x7d7   : > { %14552 = vmatpush2.bf16.msra.mxu1 %v16466_v39  ;;  %v3854_v6 = vld [vmem:[%s25320_s5 + $0x1598] sm:$0xff]  ;;  %v16611_v43 = vcombine.high %v3782_v60, %v3786_v50  ;;  %v16610_v41 = vcombine.low %v3782_v60, %v3786_v50 }
 0x7d8   : > { %14553 = vmatprep.subr.bf16.mxu1 %v16459_v29  ;;  %v3858_v46 = vld [vmem:[%s25320_s5 + $0x15b8] sm:$0xff] }
 0x7d9   : > { %14581 = vmatpush1.bf16.msra.mxu0 %v16514_v18  ;;  %v3774_v19 = vld [vmem:[%s25320_s5 + $0x1318] sm:$0xff]  ;;  %v16683_v45 = vcombine.high %v3854_v6, %v3858_v46  ;;  %v16682_v2 = vcombine.low %v3854_v6, %v3858_v46 }
 0x7da   : > { %14582 = vmatprep.subr.bf16.mxu0 %v16507_v1  ;;  %v3778_v59 = vld [vmem:[%s25320_s5 + $0x1338] sm:$0xff] }
 0x7db   : > { %14554 = vmatpush2.bf16.msra.mxu1 %v16458_v10  ;;  %v3846_v14 = vld [vmem:[%s25320_s5 + $0x1558] sm:$0xff]  ;;  %v16603_v39 = vcombine.high %v3774_v19, %v3778_v59  ;;  %v16602_v33 = vcombine.low %v3774_v19, %v3778_v59 }
 0x7dc   : > { %14555 = vmatprep.subr.bf16.mxu1 %v16451_v51  ;;  %v3850_v63 = vld [vmem:[%s25320_s5 + $0x1578] sm:$0xff] }
 0x7dd   : > { %14583 = vmatpush1.bf16.msra.mxu0 %v16506_v25  ;;  %v3766_v23 = vld [vmem:[%s25320_s5 + $0x12d8] sm:$0xff]  ;;  %v16675_v18 = vcombine.high %v3846_v14, %v3850_v63  ;;  %v16674_v1 = vcombine.low %v3846_v14, %v3850_v63 }
 0x7de   : > { %14584 = vmatprep.subr.bf16.mxu0 %v16627_v20  ;;  %v3770_v29 = vld [vmem:[%s25320_s5 + $0x12f8] sm:$0xff] }
 0x7df   : > { %14556 = vmatpush2.bf16.msra.mxu1 %v16450_v17  ;;  %v16595_v44 = vcombine.high %v3766_v23, %v3770_v29  ;;  %v3758_v10 = vld [vmem:[%s25320_s5 + $0x1298] sm:$0xff]  ;;  %v16594_v51 = vcombine.low %v3766_v23, %v3770_v29 }
 0x7e0   : > { %14557 = vmatprep.subr.bf16.mxu1 %v16443_v38  ;;  %v3762_v0 = vld [vmem:[%s25320_s5 + $0x12b8] sm:$0xff] }
 0x7e1   : > { %14585 = vmatpush2.bf16.msra.mxu0 %v16626_v26  ;;  %v3830_v25 = vld [vmem:[%s25320_s5 + $0x14d8] sm:$0xff]  ;;  %v16587_v52 = vcombine.high %v3758_v10, %v3762_v0  ;;  %v16586_v38 = vcombine.low %v3758_v10, %v3762_v0 }
 0x7e2   : > { %14586 = vmatprep.subr.bf16.mxu0 %v16619_v13  ;;  %v3834_v28 = vld [vmem:[%s25320_s5 + $0x14f8] sm:$0xff] }
 0x7e3   : > { %14558 = vmatpush2.bf16.msra.mxu1 %v16442_v37  ;;  %v3750_v17 = vld [vmem:[%s25320_s5 + $0x1258] sm:$0xff]  ;;  %v16659_v58 = vcombine.high %v3830_v25, %v3834_v28  ;;  %v16658_v13 = vcombine.low %v3830_v25, %v3834_v28 }
 0x7e4   : > { %14609 = vmatprep.subr.bf16.mxu1 %v16691_v27  ;;  %v3754_v8 = vld [vmem:[%s25320_s5 + $0x1278] sm:$0xff] }
 0x7e5   : > { %14587 = vmatpush2.bf16.msra.mxu0 %v16618_v7  ;;  %v3822_v26 = vld [vmem:[%s25320_s5 + $0x1498] sm:$0xff]  ;;  %v16579_v47 = vcombine.high %v3750_v17, %v3754_v8  ;;  %v16578_v27 = vcombine.low %v3750_v17, %v3754_v8 }
 0x7e6   : > { %14560 = vmatmul.mubr.bf16.vlgmr.msra.gmra.mxu1 %v20315_v4  ;;  %14588 = vmatprep.subr.bf16.mxu0 %v16611_v43  ;;  %v3838_v4 = vld [vmem:[%s25320_s5 + $0x1518] sm:$0xff] }
 0x7e7   : > { %14610 = vmatpush1.bf16.msra.mxu1 %v16690_v32  ;;  %14641 = vmatprep.mubr.bf16.mxu1 %v20317_v16  ;;  %v3842_v16 = vld [vmem:[%s25320_s5 + $0x1538] sm:$0xff] }
 0x7e8   : > { %14611 = vmatprep.subr.bf16.mxu1 %v16683_v45  ;;  %v16667_v61 = vcombine.high %v3838_v4, %v3842_v16  ;;  %v16666_v20 = vcombine.low %v3838_v4, %v3842_v16  ;;  %v3826_v35 = vld [vmem:[%s25320_s5 + $0x14b8] sm:$0xff] }
 0x7e9   : > { %14589 = vmatpush2.bf16.msra.mxu0 %v16610_v41  ;;  %v3742_v37 = vld [vmem:[%s25320_s5 + $0x1218] sm:$0xff]  ;;  %v16651_v50 = vcombine.high %v3822_v26, %v3826_v35  ;;  %v16650_v43 = vcombine.low %v3822_v26, %v3826_v35 }
 0x7ea   : > { %14590 = vmatprep.subr.bf16.mxu0 %v16603_v39  ;;  %v3746_v60 = vld [vmem:[%s25320_s5 + $0x1238] sm:$0xff] }
 0x7eb   : > { %14612 = vmatpush1.bf16.msra.mxu1 %v16682_v2  ;;  %v3814_v7 = vld [vmem:[%s25320_s5 + $0x1458] sm:$0xff]  ;;  %v16571_v46 = vcombine.high %v3742_v37, %v3746_v60  ;;  %v16570_v45 = vcombine.low %v3742_v37, %v3746_v60 }
 0x7ec   : > { %14613 = vmatprep.subr.bf16.mxu1 %v16675_v18  ;;  %v3818_v6 = vld [vmem:[%s25320_s5 + $0x1478] sm:$0xff] }
 0x7ed   : > { %14591 = vmatpush2.bf16.msra.mxu0 %v16602_v33  ;;  %v3990_v32 = vld [vmem:[%s25320_s5 + $0x19d8] sm:$0xff]  ;;  %v16643_v59 = vcombine.high %v3814_v7, %v3818_v6  ;;  %v16642_v39 = vcombine.low %v3814_v7, %v3818_v6 }
 0x7ee   : > { %14592 = vmatprep.subr.bf16.mxu0 %v16595_v44  ;;  %v3994_v19 = vld [vmem:[%s25320_s5 + $0x19f8] sm:$0xff] }
 0x7ef   : > { %14614 = vmatpush1.bf16.msra.mxu1 %v16674_v1  ;;  %v3806_v41 = vld [vmem:[%s25320_s5 + $0x1418] sm:$0xff]  ;;  %v16819_v63 = vcombine.high %v3990_v32, %v3994_v19  ;;  %v16818_v18 = vcombine.low %v3990_v32, %v3994_v19 }
 0x7f0   : > { %14615 = vmatprep.subr.bf16.mxu1 %v16667_v61  ;;  %v3810_v14 = vld [vmem:[%s25320_s5 + $0x1438] sm:$0xff] }
 0x7f1   : > { %14593 = vmatpush2.bf16.msra.mxu0 %v16594_v51  ;;  %v3982_v2 = vld [vmem:[%s25320_s5 + $0x1998] sm:$0xff]  ;;  %v16635_v29 = vcombine.high %v3806_v41, %v3810_v14  ;;  %v16634_v44 = vcombine.low %v3806_v41, %v3810_v14 }
 0x7f2   : > { %14594 = vmatprep.subr.bf16.mxu0 %v16587_v52  ;;  %v3986_v23 = vld [vmem:[%s25320_s5 + $0x19b8] sm:$0xff] }
 0x7f3   : > { %14616 = vmatpush1.bf16.msra.mxu1 %v16666_v20  ;;  %v3926_v33 = vld [vmem:[%s25320_s5 + $0x17d8] sm:$0xff]  ;;  %v16811_v16 = vcombine.high %v3982_v2, %v3986_v23  ;;  %v16810_v51 = vcombine.low %v3982_v2, %v3986_v23 }
 0x7f4   : > { %14617 = vmatprep.subr.bf16.mxu1 %v16659_v58  ;;  %v3930_v4 = vld [vmem:[%s25320_s5 + $0x17f8] sm:$0xff] }
 0x7f5   : > { %14595 = vmatpush2.bf16.msra.mxu0 %v16586_v38  ;;  %v3974_v1 = vld [vmem:[%s25320_s5 + $0x1958] sm:$0xff]  ;;  %v16755_v61 = vcombine.high %v3926_v33, %v3930_v4  ;;  %v16754_v17 = vcombine.low %v3926_v33, %v3930_v4 }
 0x7f6   : > { %14596 = vmatprep.subr.bf16.mxu0 %v16579_v47  ;;  %v3978_v10 = vld [vmem:[%s25320_s5 + $0x1978] sm:$0xff] }
 0x7f7   : > { %14618 = vmatpush1.bf16.msra.mxu1 %v16658_v13  ;;  %v3918_v25 = vld [vmem:[%s25320_s5 + $0x1798] sm:$0xff]  ;;  %v16803_v20 = vcombine.high %v3974_v1, %v3978_v10  ;;  %v16802_v38 = vcombine.low %v3974_v1, %v3978_v10 }
 0x7f8   : > { %14619 = vmatprep.subr.bf16.mxu1 %v16651_v50  ;;  %v3922_v28 = vld [vmem:[%s25320_s5 + $0x17b8] sm:$0xff] }
 0x7f9   : > { %14597 = vmatpush2.bf16.msra.mxu0 %v16578_v27  ;;  %v16747_v58 = vcombine.high %v3918_v25, %v3922_v28  ;;  %v3910_v26 = vld [vmem:[%s25320_s5 + $0x1758] sm:$0xff]  ;;  %v16746_v50 = vcombine.low %v3918_v25, %v3922_v28 }
 0x7fa   : > { %14598 = vmatprep.subr.bf16.mxu0 %v16571_v46  ;;  %v3914_v35 = vld [vmem:[%s25320_s5 + $0x1778] sm:$0xff] }
 0x7fb   : > { %14620 = vmatpush1.bf16.msra.mxu1 %v16650_v43  ;;  %v3958_v27 = vld [vmem:[%s25320_s5 + $0x18d8] sm:$0xff]  ;;  %v16739_v46 = vcombine.high %v3910_v26, %v3914_v35  ;;  %v16738_v14 = vcombine.low %v3910_v26, %v3914_v35 }
 0x7fc   : > { %14621 = vmatprep.subr.bf16.mxu1 %v16643_v59  ;;  %v3962_v7 = vld [vmem:[%s25320_s5 + $0x18f8] sm:$0xff] }
 0x7fd   : > { %14599 = vmatpush2.bf16.msra.mxu0 %v16570_v45  ;;  %v3906_v19 = vld [vmem:[%s25320_s5 + $0x1738] sm:$0xff]  ;;  %v16787_v41 = vcombine.high %v3958_v27, %v3962_v7 }
 0x7fe   : > { %14650 = vmatprep.subr.bf16.mxu0 %v16819_v63  ;;  %v3954_v63 = vld [vmem:[%s25320_s5 + $0x18b8] sm:$0xff] }
 0x7ff   : > { %14622 = vmatpush1.bf16.msra.mxu1 %v16642_v39  ;;  %v3898_v33 = vld [vmem:[%s25320_s5 + $0x16f8] sm:$0xff] }
 0x800   : > { %v14356_v0 = vpop.f32.mrf.mxu0  ;;  %14601 = vmatmul.mubr.bf16.vlgmr.msra.gmra.mxu0 %v20554_v36  ;;  %14623 = vmatprep.subr.bf16.mxu1 %v16635_v29  ;;  %v3966_v36 = vld [vmem:[%s25320_s5 + $0x1918] sm:$0xff]  ;;  %v16786_v29 = vcombine.low %v3958_v27, %v3962_v7 }
 0x801   : > { %14651 = vmatpush1.bf16.msra.mxu0 %v16818_v18  ;;  %14682 = vmatprep.mubr.bf16.mxu0 %v20556_v21  ;;  %v3970_v21 = vld [vmem:[%s25320_s5 + $0x1938] sm:$0xff] }
 0x802   : > { %v14358_v52 = vpop.f32.mrf.mxu0  ;;  %14652 = vmatprep.subr.bf16.mxu0 %v16811_v16  ;;  %v16795_v37 = vcombine.high %v3966_v36, %v3970_v21  ;;  %v16794_v32 = vcombine.low %v3966_v36, %v3970_v21  ;;  %v3894_v18 = vld [vmem:[%s25320_s5 + $0x16d8] sm:$0xff] }
 0x803   : > { %14624 = vmatpush1.bf16.msra.mxu1 %v16634_v44  ;;  %v3942_v44 = vld [vmem:[%s25320_s5 + $0x1858] sm:$0xff]  ;;  %v16723_v10 = vcombine.high %v3894_v18, %v3898_v33  ;;  %v16722_v28 = vcombine.low %v3894_v18, %v3898_v33 }
 0x804   : > { %v14360_v8 = vpop.f32.mrf.mxu0  ;;  %14625 = vmatprep.subr.bf16.mxu1 %v16755_v61  ;;  %v3946_v1 = vld [vmem:[%s25320_s5 + $0x1878] sm:$0xff] }
 0x805   : > { %14653 = vmatpush1.bf16.msra.mxu0 %v16810_v51  ;;  %v3886_v61 = vld [vmem:[%s25320_s5 + $0x1698] sm:$0xff]  ;;  %v16771_v25 = vcombine.high %v3942_v44, %v3946_v1  ;;  %v16770_v36 = vcombine.low %v3942_v44, %v3946_v1 }
 0x806   : > { %v14315_v47 = vpop.f32.mrf.mxu1  ;;  %v14361_v13 = vpop.f32.mrf.mxu0  ;;  %14654 = vmatprep.subr.bf16.mxu0 %v16803_v20  ;;  %v3890_v51 = vld [vmem:[%s25320_s5 + $0x16b8] sm:$0xff] }
 0x807   : > { %v14316_v60 = vadd.f32 %v14315_v47, %v24195_v56  ;;  %14626 = vmatpush2.bf16.msra.mxu1 %v16754_v17  ;;  %v3902_v56 = vld [vmem:[%s25320_s5 + $0x1718] sm:$0xff]  ;;  %v16715_v17 = vcombine.high %v3886_v61, %v3890_v51 }
 0x808   : > { %v14317_v6 = vpop.f32.mrf.mxu1  ;;  %14627 = vmatprep.subr.bf16.mxu1 %v16747_v58  ;;  %v16731_v23 = vcombine.high %v3902_v56, %v3906_v19  ;;  %v16730_v16 = vcombine.low %v3902_v56, %v3906_v19  ;;  %v3938_v20 = vld [vmem:[%s25320_s5 + $0x1838] sm:$0xff] }
 0x809   : > { %v14318_v43 = vadd.f32 %v14317_v6, %v24203_v24  ;;  %14655 = vmatpush1.bf16.msra.mxu0 %v16802_v38  ;;  %v24397_v59 = vadd.f32 %v14356_v0, %v14316_v60  ;;  %v3950_v24 = vld [vmem:[%s25320_s5 + $0x1898] sm:$0xff]  ;;  %v16714_v38 = vcombine.low %v3886_v61, %v3890_v51 }
 0x80a   : > { %v14319_v45 = vpop.f32.mrf.mxu1  ;;  %14656 = vmatprep.subr.bf16.mxu0 %v16795_v37  ;;  %v16779_v4 = vcombine.high %v3950_v24, %v3954_v63  ;;  %v16778_v0 = vcombine.low %v3950_v24, %v3954_v63  ;;  %v3878_v21 = vld [vmem:[%s25320_s5 + $0x1658] sm:$0xff] }
 0x80b   : > { %14628 = vmatpush2.bf16.msra.mxu1 %v16746_v50  ;;  %v24405_v39 = vadd.f32 %v14358_v52, %v14318_v43  ;;  %v3934_v52 = vld [vmem:[%s25320_s5 + $0x1818] sm:$0xff] }
 0x80c   : > { %v14320_v2 = vpop.f32.mrf.mxu1  ;;  %14629 = vmatprep.subr.bf16.mxu1 %v16739_v46  ;;  %v3882_v8 = vld [vmem:[%s25320_s5 + $0x1678] sm:$0xff]  ;;  %v16763_v58 = vcombine.high %v3934_v52, %v3938_v20  ;;  %v16762_v13 = vcombine.low %v3934_v52, %v3938_v20 }
 0x80d   : > { %14657 = vmatpush1.bf16.msra.mxu0 %v16794_v32  ;;  %v4054_v26 = vld [vmem:[%s25320_s5 + $0x1bd8] sm:$0xff]  ;;  %v16707_v47 = vcombine.high %v3878_v21, %v3882_v8  ;;  %v16706_v27 = vcombine.low %v3878_v21, %v3882_v8 }
 0x80e   : > { %14658 = vmatprep.subr.bf16.mxu0 %v16787_v41  ;;  %v4058_v35 = vld [vmem:[%s25320_s5 + $0x1bf8] sm:$0xff] }
 0x80f   : > { %14630 = vmatpush2.bf16.msra.mxu1 %v16738_v14  ;;  %v3870_v37 = vld [vmem:[%s25320_s5 + $0x1618] sm:$0xff]  ;;  %v16883_v50 = vcombine.high %v4054_v26, %v4058_v35  ;;  %v16882_v43 = vcombine.low %v4054_v26, %v4058_v35 }
 0x810   : > { %14631 = vmatprep.subr.bf16.mxu1 %v16731_v23  ;;  %v3874_v60 = vld [vmem:[%s25320_s5 + $0x1638] sm:$0xff] }
 0x811   : > { %14659 = vmatpush1.bf16.msra.mxu0 %v16786_v29  ;;  %v4046_v7 = vld [vmem:[%s25320_s5 + $0x1b98] sm:$0xff]  ;;  %v16699_v46 = vcombine.high %v3870_v37, %v3874_v60  ;;  %v16698_v45 = vcombine.low %v3870_v37, %v3874_v60 }
 0x812   : > { %14660 = vmatprep.subr.bf16.mxu0 %v16779_v4  ;;  %v4050_v6 = vld [vmem:[%s25320_s5 + $0x1bb8] sm:$0xff] }
 0x813   : > { %14632 = vmatpush2.bf16.msra.mxu1 %v16730_v16  ;;  %v4118_v32 = vld [vmem:[%s25320_s5 + $0x1dd8] sm:$0xff]  ;;  %v16875_v19 = vcombine.high %v4046_v7, %v4050_v6  ;;  %v16874_v63 = vcombine.low %v4046_v7, %v4050_v6 }
 0x814   : > { %14633 = vmatprep.subr.bf16.mxu1 %v16723_v10  ;;  %v4122_v56 = vld [vmem:[%s25320_s5 + $0x1df8] sm:$0xff] }
 0x815   : > { %14661 = vmatpush1.bf16.msra.mxu0 %v16778_v0  ;;  %v4038_v41 = vld [vmem:[%s25320_s5 + $0x1b58] sm:$0xff]  ;;  %v16947_v24 = vcombine.high %v4118_v32, %v4122_v56  ;;  %v16946_v18 = vcombine.low %v4118_v32, %v4122_v56 }
 0x816   : > { %14662 = vmatprep.subr.bf16.mxu0 %v16771_v25  ;;  %v4042_v14 = vld [vmem:[%s25320_s5 + $0x1b78] sm:$0xff] }
 0x817   : > { %14634 = vmatpush2.bf16.msra.mxu1 %v16722_v28  ;;  %v4110_v2 = vld [vmem:[%s25320_s5 + $0x1d98] sm:$0xff]  ;;  %v16867_v29 = vcombine.high %v4038_v41, %v4042_v14  ;;  %v16866_v44 = vcombine.low %v4038_v41, %v4042_v14 }
 0x818   : > { %14635 = vmatprep.subr.bf16.mxu1 %v16715_v17  ;;  %v4114_v23 = vld [vmem:[%s25320_s5 + $0x1db8] sm:$0xff] }
 0x819   : > { %14663 = vmatpush1.bf16.msra.mxu0 %v16770_v36  ;;  %v4030_v33 = vld [vmem:[%s25320_s5 + $0x1b18] sm:$0xff]  ;;  %v16939_v16 = vcombine.high %v4110_v2, %v4114_v23  ;;  %v16938_v25 = vcombine.low %v4110_v2, %v4114_v23 }
 0x81a   : > { %14664 = vmatprep.subr.bf16.mxu0 %v16763_v58  ;;  %v4034_v4 = vld [vmem:[%s25320_s5 + $0x1b38] sm:$0xff] }
 0x81b   : > { %14636 = vmatpush2.bf16.msra.mxu1 %v16714_v38  ;;  %v4102_v1 = vld [vmem:[%s25320_s5 + $0x1d58] sm:$0xff]  ;;  %v16859_v61 = vcombine.high %v4030_v33, %v4034_v4 }
 0x81c   : > { %14637 = vmatprep.subr.bf16.mxu1 %v16707_v47  ;;  %v4106_v10 = vld [vmem:[%s25320_s5 + $0x1d78] sm:$0xff] }
 0x81d   : > { %14665 = vmatpush1.bf16.msra.mxu0 %v16762_v13  ;;  %v4022_v28 = vld [vmem:[%s25320_s5 + $0x1ad8] sm:$0xff]  ;;  %v16930_v58 = vcombine.low %v4102_v1, %v4106_v10 }
 0x81e   : > { %14666 = vmatprep.subr.bf16.mxu0 %v16883_v50  ;;  %v4026_v52 = vld [vmem:[%s25320_s5 + $0x1af8] sm:$0xff] }
 0x81f   : > { %14638 = vmatpush2.bf16.msra.mxu1 %v16706_v27  ;;  %v4098_v36 = vld [vmem:[%s25320_s5 + $0x1d38] sm:$0xff]  ;;  %v16851_v8 = vcombine.high %v4022_v28, %v4026_v52  ;;  %v16850_v47 = vcombine.low %v4022_v28, %v4026_v52 }
 0x820   : > { %14639 = vmatprep.subr.bf16.mxu1 %v16699_v46  ;;  %v4018_v38 = vld [vmem:[%s25320_s5 + $0x1ab8] sm:$0xff] }
 0x821   : > { %14667 = vmatpush2.bf16.msra.mxu0 %v16882_v43  ;;  %v4086_v13 = vld [vmem:[%s25320_s5 + $0x1cd8] sm:$0xff] }
 0x822   : > { %14668 = vmatprep.subr.bf16.mxu0 %v16875_v19  ;;  %v4090_v37 = vld [vmem:[%s25320_s5 + $0x1cf8] sm:$0xff] }
 0x823   : > { %14640 = vmatpush2.bf16.msra.mxu1 %v16698_v45  ;;  %v4006_v27 = vld [vmem:[%s25320_s5 + $0x1a58] sm:$0xff]  ;;  %v16915_v6 = vcombine.high %v4086_v13, %v4090_v37  ;;  %v16914_v19 = vcombine.low %v4086_v13, %v4090_v37 }
 0x824   : > { %14691 = vmatprep.subr.bf16.mxu1 %v16947_v24  ;;  %v4010_v7 = vld [vmem:[%s25320_s5 + $0x1a78] sm:$0xff] }
 0x825   : > { %14669 = vmatpush2.bf16.msra.mxu0 %v16874_v63  ;;  %v4078_v43 = vld [vmem:[%s25320_s5 + $0x1c98] sm:$0xff]  ;;  %v16835_v56 = vcombine.high %v4006_v27, %v4010_v7  ;;  %v16834_v24 = vcombine.low %v4006_v27, %v4010_v7 }
 0x826   : > { %v14397_v0 = vpop.f32.mrf.mxu1  ;;  %14642 = vmatmul.mubr.bf16.vlgmr.msra.gmra.mxu1 %v20526_v15  ;;  %14670 = vmatprep.subr.bf16.mxu0 %v16867_v29  ;;  %v16931_v15 = vcombine.high %v4102_v1, %v4106_v10  ;;  %v4082_v32 = vld [vmem:[%s25320_s5 + $0x1cb8] sm:$0xff] }
 0x827   : > { %v24487_v51 = vadd.f32 %v14397_v0, %v24397_v59  ;;  %14692 = vmatpush1.bf16.msra.mxu1 %v16946_v18  ;;  %14723 = vmatprep.mubr.bf16.mxu1 %v20530_v54  ;;  %v16858_v59 = vcombine.low %v4030_v33, %v4034_v4  ;;  %v4094_v54 = vld [vmem:[%s25320_s5 + $0x1d18] sm:$0xff]  ;;  %v16907_v14 = vcombine.high %v4078_v43, %v4082_v32 }
 0x828   : > { %v14399_v20 = vpop.f32.mrf.mxu1  ;;  %14693 = vmatprep.subr.bf16.mxu1 %v16939_v16  ;;  %v16923_v35 = vcombine.high %v4094_v54, %v4098_v36  ;;  %v16922_v50 = vcombine.low %v4094_v54, %v4098_v36  ;;  %v3998_v45 = vld [vmem:[%s25320_s5 + $0x1a18] sm:$0xff]  ;;  %v16906_v29 = vcombine.low %v4078_v43, %v4082_v32 }
 0x829   : > { %v24497_v17 = vadd.f32 %v14399_v20, %v24405_v39  ;;  %14671 = vmatpush2.bf16.msra.mxu0 %v16866_v44  ;;  %v4014_v39 = vld [vmem:[%s25320_s5 + $0x1a98] sm:$0xff] }
 0x82a   : > { %v14401_v21 = vpop.f32.mrf.mxu1  ;;  %14672 = vmatprep.subr.bf16.mxu0 %v16859_v61  ;;  %v16843_v60 = vcombine.high %v4014_v39, %v4018_v38  ;;  %v16842_v46 = vcombine.low %v4014_v39, %v4018_v38  ;;  %v4002_v41 = vld [vmem:[%s25320_s5 + $0x1a38] sm:$0xff] }
 0x82b   : > { %14694 = vmatpush1.bf16.msra.mxu1 %v16938_v25  ;;  %v4070_v63 = vld [vmem:[%s25320_s5 + $0x1c58] sm:$0xff]  ;;  %v16827_v23 = vcombine.high %v3998_v45, %v4002_v41  ;;  %v16826_v16 = vcombine.low %v3998_v45, %v4002_v41 }
 0x82c   : > { %v14402_v26 = vpop.f32.mrf.mxu1  ;;  %14695 = vmatprep.subr.bf16.mxu1 %v16931_v15  ;;  %v4074_v2 = vld [vmem:[%s25320_s5 + $0x1c78] sm:$0xff] }
 0x82d   : > { %14673 = vmatpush2.bf16.msra.mxu0 %v16858_v59  ;;  %v4246_v18 = vld [vmem:[%s25320_s5 + $0x21d8] sm:$0xff]  ;;  %v16899_v4 = vcombine.high %v4070_v63, %v4074_v2  ;;  %v16898_v0 = vcombine.low %v4070_v63, %v4074_v2 }
 0x82e   : > { %14674 = vmatprep.subr.bf16.mxu0 %v16851_v8  ;;  %v4250_v33 = vld [vmem:[%s25320_s5 + $0x21f8] sm:$0xff] }
 0x82f   : > { %14696 = vmatpush1.bf16.msra.mxu1 %v16930_v58  ;;  %v4062_v44 = vld [vmem:[%s25320_s5 + $0x1c18] sm:$0xff]  ;;  %v17075_v10 = vcombine.high %v4246_v18, %v4250_v33  ;;  %v17074_v52 = vcombine.low %v4246_v18, %v4250_v33 }
 0x830   : > { %14697 = vmatprep.subr.bf16.mxu1 %v16923_v35  ;;  %v4066_v1 = vld [vmem:[%s25320_s5 + $0x1c38] sm:$0xff] }
 0x831   : > { %14675 = vmatpush2.bf16.msra.mxu0 %v16850_v47  ;;  %v4238_v61 = vld [vmem:[%s25320_s5 + $0x2198] sm:$0xff]  ;;  %v16891_v28 = vcombine.high %v4062_v44, %v4066_v1  ;;  %v16890_v54 = vcombine.low %v4062_v44, %v4066_v1 }
 0x832   : > { %14676 = vmatprep.subr.bf16.mxu0 %v16843_v60  ;;  %v4242_v25 = vld [vmem:[%s25320_s5 + $0x21b8] sm:$0xff] }
 0x833   : > { %14698 = vmatpush1.bf16.msra.mxu1 %v16922_v50  ;;  %v4182_v20 = vld [vmem:[%s25320_s5 + $0x1fd8] sm:$0xff]  ;;  %v17067_v59 = vcombine.high %v4238_v61, %v4242_v25  ;;  %v17066_v39 = vcombine.low %v4238_v61, %v4242_v25 }
 0x834   : > { %14699 = vmatprep.subr.bf16.mxu1 %v16915_v6  ;;  %v4186_v15 = vld [vmem:[%s25320_s5 + $0x1ff8] sm:$0xff] }
 0x835   : > { %14677 = vmatpush2.bf16.msra.mxu0 %v16842_v46  ;;  %v4230_v36 = vld [vmem:[%s25320_s5 + $0x2158] sm:$0xff]  ;;  %v17011_v58 = vcombine.high %v4182_v20, %v4186_v15 }
 0x836   : > { %14678 = vmatprep.subr.bf16.mxu0 %v16835_v56  ;;  %v4234_v21 = vld [vmem:[%s25320_s5 + $0x2178] sm:$0xff] }
 0x837   : > { %14700 = vmatpush1.bf16.msra.mxu1 %v16914_v19  ;;  %v4174_v38 = vld [vmem:[%s25320_s5 + $0x1f98] sm:$0xff]  ;;  %v17059_v47 = vcombine.high %v4230_v36, %v4234_v21  ;;  %v17058_v50 = vcombine.low %v4230_v36, %v4234_v21 }
 0x838   : > { %14701 = vmatprep.subr.bf16.mxu1 %v16907_v14  ;;  %v4178_v26 = vld [vmem:[%s25320_s5 + $0x1fb8] sm:$0xff] }
 0x839   : > { %14679 = vmatpush2.bf16.msra.mxu0 %v16834_v24  ;;  %v4222_v13 = vld [vmem:[%s25320_s5 + $0x2118] sm:$0xff]  ;;  %v17003_v60 = vcombine.high %v4174_v38, %v4178_v26  ;;  %v17002_v43 = vcombine.low %v4174_v38, %v4178_v26 }
 0x83a   : > { %14680 = vmatprep.subr.bf16.mxu0 %v16827_v23  ;;  %v4166_v27 = vld [vmem:[%s25320_s5 + $0x1f58] sm:$0xff] }
 0x83b   : > { %14702 = vmatpush1.bf16.msra.mxu1 %v16906_v29  ;;  %v4170_v7 = vld [vmem:[%s25320_s5 + $0x1f78] sm:$0xff] }
 0x83c   : > { %14703 = vmatprep.subr.bf16.mxu1 %v16899_v4  ;;  %v4214_v32 = vld [vmem:[%s25320_s5 + $0x20d8] sm:$0xff]  ;;  %v16995_v19 = vcombine.high %v4166_v27, %v4170_v7  ;;  %v16994_v63 = vcombine.low %v4166_v27, %v4170_v7 }
 0x83d   : > { %14681 = vmatpush2.bf16.msra.mxu0 %v16826_v16  ;;  %v4218_v56 = vld [vmem:[%s25320_s5 + $0x20f8] sm:$0xff] }
 0x83e   : > { %14732 = vmatprep.subr.bf16.mxu0 %v17075_v10  ;;  %v4158_v41 = vld [vmem:[%s25320_s5 + $0x1f18] sm:$0xff]  ;;  %v17043_v24 = vcombine.high %v4214_v32, %v4218_v56  ;;  %v17042_v18 = vcombine.low %v4214_v32, %v4218_v56 }
 0x83f   : > { %14704 = vmatpush1.bf16.msra.mxu1 %v16898_v0  ;;  %v4162_v14 = vld [vmem:[%s25320_s5 + $0x1f38] sm:$0xff] }
 0x840   : > { %v24571_v8 = vpop.f32.mrf.mxu0  ;;  %14683 = vmatmul.mubr.bf16.vlgmr.msra.gmra.mxu0 %v20770_v22  ;;  %14705 = vmatprep.subr.bf16.mxu1 %v16891_v28  ;;  %v17010_v22 = vcombine.low %v4182_v20, %v4186_v15  ;;  %v4206_v2 = vld [vmem:[%s25320_s5 + $0x2098] sm:$0xff]  ;;  %v16987_v29 = vcombine.high %v4158_v41, %v4162_v14  ;;  %v16986_v44 = vcombine.low %v4158_v41, %v4162_v14 }
 0x841   : > { %14733 = vmatpush1.bf16.msra.mxu0 %v17074_v52  ;;  %14764 = vmatprep.mubr.bf16.mxu0 %v20772_v30  ;;  %v4226_v30 = vld [vmem:[%s25320_s5 + $0x2138] sm:$0xff] }
 0x842   : > { %v24581_v35 = vpop.f32.mrf.mxu0  ;;  %14734 = vmatprep.subr.bf16.mxu0 %v17067_v59  ;;  %v17051_v46 = vcombine.high %v4222_v13, %v4226_v30  ;;  %v17050_v45 = vcombine.low %v4222_v13, %v4226_v30  ;;  %v4210_v23 = vld [vmem:[%s25320_s5 + $0x20b8] sm:$0xff] }
 0x843   : > { %14706 = vmatpush1.bf16.msra.mxu1 %v16890_v54  ;;  %v4150_v33 = vld [vmem:[%s25320_s5 + $0x1ed8] sm:$0xff]  ;;  %v17035_v16 = vcombine.high %v4206_v2, %v4210_v23  ;;  %v17034_v61 = vcombine.low %v4206_v2, %v4210_v23  ;;  %v18511_v2 = vld [vmem:[%s25321_s6] sm:$0xff] }
 0x844   : > { %v14442_v37 = vpop.f32.mrf.mxu0  ;;  %14707 = vmatprep.subr.bf16.mxu1 %v17011_v58  ;;  %v4154_v4 = vld [vmem:[%s25320_s5 + $0x1ef8] sm:$0xff] }
 0x845   : > { %14735 = vmatpush1.bf16.msra.mxu0 %v17066_v39  ;;  %v4198_v1 = vld [vmem:[%s25320_s5 + $0x2058] sm:$0xff]  ;;  %v16979_v0 = vcombine.high %v4150_v33, %v4154_v4  ;;  %v16978_v20 = vcombine.low %v4150_v33, %v4154_v4 }
 0x846   : > { %v14443_v6 = vpop.f32.mrf.mxu0  ;;  %14736 = vmatprep.subr.bf16.mxu0 %v17059_v47  ;;  %v4202_v10 = vld [vmem:[%s25320_s5 + $0x2078] sm:$0xff] }
 0x847   : > { %14708 = vmatpush2.bf16.msra.mxu1 %v17010_v22  ;;  %v4142_v25 = vld [vmem:[%s25320_s5 + $0x1e98] sm:$0xff]  ;;  %v17027_v52 = vcombine.high %v4198_v1, %v4202_v10  ;;  %v17026_v36 = vcombine.low %v4198_v1, %v4202_v10 }
 0x848   : > { %14709 = vmatprep.subr.bf16.mxu1 %v17003_v60  ;;  %v4146_v28 = vld [vmem:[%s25320_s5 + $0x1eb8] sm:$0xff] }
 0x849   : > { %14737 = vmatpush1.bf16.msra.mxu0 %v17058_v50  ;;  %v4190_v15 = vld [vmem:[%s25320_s5 + $0x2018] sm:$0xff]  ;;  %v16971_v54 = vcombine.high %v4142_v25, %v4146_v28  ;;  %v16970_v38 = vcombine.low %v4142_v25, %v4146_v28 }
 0x84a   : > { %14738 = vmatprep.subr.bf16.mxu0 %v17051_v46  ;;  %v4194_v59 = vld [vmem:[%s25320_s5 + $0x2038] sm:$0xff]  ;;  %v12791_v46 = vsub.s32 6, %v20729_v34 }
 0x84b   : > { %14710 = vmatpush2.bf16.msra.mxu1 %v17002_v43  ;;  %v4134_v21 = vld [vmem:[%s25320_s5 + $0x1e58] sm:$0xff]  ;;  %v17019_v39 = vcombine.high %v4190_v15, %v4194_v59  ;;  %v17018_v13 = vcombine.low %v4190_v15, %v4194_v59 }
 0x84c   : > { %14711 = vmatprep.subr.bf16.mxu1 %v16995_v19  ;;  %v4138_v58 = vld [vmem:[%s25320_s5 + $0x1e78] sm:$0xff]  ;;  %v12792_v23 = vrot.slane %v18511_v2, %v12791_v46 }
 0x84d   : > { %14739 = vmatpush1.bf16.msra.mxu0 %v17050_v45  ;;  %v4310_v26 = vld [vmem:[%s25320_s5 + $0x23d8] sm:$0xff]  ;;  %v16963_v22 = vcombine.high %v4134_v21, %v4138_v58  ;;  %v16962_v50 = vcombine.low %v4134_v21, %v4138_v58  ;;  %v12795_v45 = vsub.s32 7, %v20729_v34 }
 0x84e   : > { %14740 = vmatprep.subr.bf16.mxu0 %v17043_v24  ;;  %v4314_v47 = vld [vmem:[%s25320_s5 + $0x23f8] sm:$0xff] }
 0x84f   : > { %14712 = vmatpush2.bf16.msra.mxu1 %v16994_v63  ;;  %v4126_v30 = vld [vmem:[%s25320_s5 + $0x1e18] sm:$0xff]  ;;  %v17139_v60 = vcombine.high %v4310_v26, %v4314_v47  ;;  %v17138_v43 = vcombine.low %v4310_v26, %v4314_v47  ;;  %v12796_v4 = vrot.slane %v18511_v2, %v12795_v45 }
 0x850   : > { %14713 = vmatprep.subr.bf16.mxu1 %v16987_v29  ;;  %v4130_v37 = vld [vmem:[%s25320_s5 + $0x1e38] sm:$0xff] }
 0x851   : > { %14741 = vmatpush1.bf16.msra.mxu0 %v17042_v18  ;;  %v4302_v27 = vld [vmem:[%s25320_s5 + $0x2398] sm:$0xff]  ;;  %v16955_v6 = vcombine.high %v4126_v30, %v4130_v37  ;;  %v16954_v41 = vcombine.low %v4126_v30, %v4130_v37  ;;  %v14441_v15 = vadd.f32 %v24581_v35, %v12796_v4 }
 0x852   : > { %14742 = vmatprep.subr.bf16.mxu0 %v17035_v16  ;;  %v4306_v7 = vld [vmem:[%s25320_s5 + $0x23b8] sm:$0xff] }
 0x853   : > { %14714 = vmatpush2.bf16.msra.mxu1 %v16986_v44  ;;  %v4374_v32 = vld [vmem:[%s25320_s5 + $0x25d8] sm:$0xff]  ;;  %v17131_v19 = vcombine.high %v4302_v27, %v4306_v7  ;;  %v17130_v29 = vcombine.low %v4302_v27, %v4306_v7 }
 0x854   : > { %14715 = vmatprep.subr.bf16.mxu1 %v16979_v0  ;;  %v4378_v56 = vld [vmem:[%s25320_s5 + $0x25f8] sm:$0xff]  ;;  %v14439_v0 = vadd.f32 %v24571_v8, %v12792_v23 }
 0x855   : > { %14743 = vmatpush1.bf16.msra.mxu0 %v17034_v61  ;;  %v4294_v14 = vld [vmem:[%s25320_s5 + $0x2358] sm:$0xff]  ;;  %v17203_v63 = vcombine.high %v4374_v32, %v4378_v56  ;;  %v17202_v16 = vcombine.low %v4374_v32, %v4378_v56 }
 0x856   : > { %14744 = vmatprep.subr.bf16.mxu0 %v17027_v52  ;;  %v4298_v24 = vld [vmem:[%s25320_s5 + $0x2378] sm:$0xff] }
 0x857   : > { %14716 = vmatpush2.bf16.msra.mxu1 %v16978_v20  ;;  %v4366_v34 = vld [vmem:[%s25320_s5 + $0x2598] sm:$0xff]  ;;  %v17123_v33 = vcombine.high %v4294_v14, %v4298_v24  ;;  %v17122_v61 = vcombine.low %v4294_v14, %v4298_v24 }
 0x858   : > { %14717 = vmatprep.subr.bf16.mxu1 %v16971_v54  ;;  %v4370_v18 = vld [vmem:[%s25320_s5 + $0x25b8] sm:$0xff] }
 0x859   : > { %14745 = vmatpush1.bf16.msra.mxu0 %v17026_v36  ;;  %v4286_v44 = vld [vmem:[%s25320_s5 + $0x2318] sm:$0xff]  ;;  %v17195_v10 = vcombine.high %v4366_v34, %v4370_v18  ;;  %v17194_v8 = vcombine.low %v4366_v34, %v4370_v18 }
 0x85a   : > { %14746 = vmatprep.subr.bf16.mxu0 %v17019_v39  ;;  %v4290_v1 = vld [vmem:[%s25320_s5 + $0x2338] sm:$0xff] }
 0x85b   : > { %14718 = vmatpush2.bf16.msra.mxu1 %v16970_v38  ;;  %v4358_v25 = vld [vmem:[%s25320_s5 + $0x2558] sm:$0xff]  ;;  %v17115_v20 = vcombine.high %v4286_v44, %v4290_v1  ;;  %v17114_v35 = vcombine.low %v4286_v44, %v4290_v1 }
 0x85c   : > { %14719 = vmatprep.subr.bf16.mxu1 %v16963_v22  ;;  %v4362_v28 = vld [vmem:[%s25320_s5 + $0x2578] sm:$0xff] }
 0x85d   : > { %14747 = vmatpush1.bf16.msra.mxu0 %v17018_v13  ;;  %v4278_v54 = vld [vmem:[%s25320_s5 + $0x22d8] sm:$0xff]  ;;  %v17186_v47 = vcombine.low %v4358_v25, %v4362_v28 }
 0x85e   : > { %14748 = vmatprep.subr.bf16.mxu0 %v17139_v60  ;;  %v4282_v36 = vld [vmem:[%s25320_s5 + $0x22f8] sm:$0xff] }
 0x85f   : > { %14720 = vmatpush2.bf16.msra.mxu1 %v16962_v50  ;;  %v4354_v39 = vld [vmem:[%s25320_s5 + $0x2538] sm:$0xff]  ;;  %v17107_v26 = vcombine.high %v4278_v54, %v4282_v36  ;;  %v17106_v60 = vcombine.low %v4278_v54, %v4282_v36 }
 0x860   : > { %14721 = vmatprep.subr.bf16.mxu1 %v16955_v6  ;;  %v4270_v22 = vld [vmem:[%s25320_s5 + $0x2298] sm:$0xff] }
 0x861   : > { %14749 = vmatpush2.bf16.msra.mxu0 %v17138_v43  ;;  %v4274_v13 = vld [vmem:[%s25320_s5 + $0x22b8] sm:$0xff] }
 0x862   : > { %14750 = vmatprep.subr.bf16.mxu0 %v17131_v19  ;;  %v4342_v50 = vld [vmem:[%s25320_s5 + $0x24d8] sm:$0xff]  ;;  %v17099_v7 = vcombine.high %v4270_v22, %v4274_v13  ;;  %v17098_v56 = vcombine.low %v4270_v22, %v4274_v13 }
 0x863   : > { %14722 = vmatpush2.bf16.msra.mxu1 %v16954_v41  ;;  %v4346_v27 = vld [vmem:[%s25320_s5 + $0x24f8] sm:$0xff] }
 0x864   : > { %14773 = vmatprep.subr.bf16.mxu1 %v17203_v63  ;;  %v4262_v46 = vld [vmem:[%s25320_s5 + $0x2258] sm:$0xff]  ;;  %v17171_v32 = vcombine.high %v4342_v50, %v4346_v27  ;;  %v17170_v14 = vcombine.low %v4342_v50, %v4346_v27 }
 0x865   : > { %14751 = vmatpush2.bf16.msra.mxu0 %v17130_v29  ;;  %v4266_v43 = vld [vmem:[%s25320_s5 + $0x2278] sm:$0xff] }
 0x866   : > { %v14479_v52 = vpop.f32.mrf.mxu1  ;;  %14724 = vmatmul.mubr.bf16.vlgmr.msra.gmra.mxu1 %v20740_v62  ;;  %14752 = vmatprep.subr.bf16.mxu0 %v17123_v33  ;;  %v17187_v62 = vcombine.high %v4358_v25, %v4362_v28  ;;  %v4334_v19 = vld [vmem:[%s25320_s5 + $0x2498] sm:$0xff]  ;;  %v17091_v41 = vcombine.high %v4262_v46, %v4266_v43  ;;  %v17090_v23 = vcombine.low %v4262_v46, %v4266_v43 }
 0x867   : > { %v24699_v59 = vadd.f32 %v14479_v52, %v14439_v0  ;;  %14774 = vmatpush1.bf16.msra.mxu1 %v17202_v16  ;;  %14805 = vmatprep.mubr.bf16.mxu1 %v20742_v42  ;;  %v4350_v42 = vld [vmem:[%s25320_s5 + $0x2518] sm:$0xff] }
 0x868   : > { %v14481_v21 = vpop.f32.mrf.mxu1  ;;  %14775 = vmatprep.subr.bf16.mxu1 %v17195_v10  ;;  %v17179_v37 = vcombine.high %v4350_v42, %v4354_v39  ;;  %v17178_v6 = vcombine.low %v4350_v42, %v4354_v39  ;;  %v4338_v45 = vld [vmem:[%s25320_s5 + $0x24b8] sm:$0xff] }
 0x869   : > { %v24708_v58 = vadd.f32 %v14481_v21, %v14441_v15  ;;  %14753 = vmatpush2.bf16.msra.mxu0 %v17122_v61  ;;  %v4254_v24 = vld [vmem:[%s25320_s5 + $0x2218] sm:$0xff]  ;;  %v17163_v2 = vcombine.high %v4334_v19, %v4338_v45  ;;  %v17162_v33 = vcombine.low %v4334_v19, %v4338_v45 }
 0x86a   : > { %v14483_v38 = vpop.f32.mrf.mxu1  ;;  %14754 = vmatprep.subr.bf16.mxu0 %v17115_v20  ;;  %v4258_v63 = vld [vmem:[%s25320_s5 + $0x2238] sm:$0xff] }
 0x86b   : > { %14776 = vmatpush1.bf16.msra.mxu1 %v17194_v8  ;;  %v4326_v29 = vld [vmem:[%s25320_s5 + $0x2458] sm:$0xff]  ;;  %v17083_v18 = vcombine.high %v4254_v24, %v4258_v63  ;;  %v17082_v1 = vcombine.low %v4254_v24, %v4258_v63 }
 0x86c   : > { %v14484_v30 = vpop.f32.mrf.mxu1  ;;  %14777 = vmatprep.subr.bf16.mxu1 %v17187_v62  ;;  %v4330_v34 = vld [vmem:[%s25320_s5 + $0x2478] sm:$0xff] }
 0x86d   : > { %14755 = vmatpush2.bf16.msra.mxu0 %v17114_v35  ;;  %v4502_v4 = vld [vmem:[%s25320_s5 + $0x29d8] sm:$0xff]  ;;  %v17155_v44 = vcombine.high %v4326_v29, %v4330_v34  ;;  %v17154_v25 = vcombine.low %v4326_v29, %v4330_v34 }
 0x86e   : > { %14756 = vmatprep.subr.bf16.mxu0 %v17107_v26  ;;  %v4506_v16 = vld [vmem:[%s25320_s5 + $0x29f8] sm:$0xff] }
 0x86f   : > { %14778 = vmatpush1.bf16.msra.mxu1 %v17186_v47  ;;  %v4318_v10 = vld [vmem:[%s25320_s5 + $0x2418] sm:$0xff]  ;;  %v17331_v61 = vcombine.high %v4502_v4, %v4506_v16  ;;  %v17330_v15 = vcombine.low %v4502_v4, %v4506_v16 }
 0x870   : > { %14779 = vmatprep.subr.bf16.mxu1 %v17179_v37  ;;  %v4322_v0 = vld [vmem:[%s25320_s5 + $0x2438] sm:$0xff] }
 0x871   : > { %14757 = vmatpush2.bf16.msra.mxu0 %v17106_v60  ;;  %v4494_v28 = vld [vmem:[%s25320_s5 + $0x2998] sm:$0xff]  ;;  %v17147_v20 = vcombine.high %v4318_v10, %v4322_v0  ;;  %v17146_v21 = vcombine.low %v4318_v10, %v4322_v0 }
 0x872   : > { %14758 = vmatprep.subr.bf16.mxu0 %v17099_v7  ;;  %v4498_v52 = vld [vmem:[%s25320_s5 + $0x29b8] sm:$0xff] }
 0x873   : > { %14780 = vmatpush1.bf16.msra.mxu1 %v17178_v6  ;;  %v4438_v8 = vld [vmem:[%s25320_s5 + $0x27d8] sm:$0xff]  ;;  %v17323_v36 = vcombine.high %v4494_v28, %v4498_v52  ;;  %v17322_v26 = vcombine.low %v4494_v28, %v4498_v52 }
 0x874   : > { %14781 = vmatprep.subr.bf16.mxu1 %v17171_v32  ;;  %v4442_v54 = vld [vmem:[%s25320_s5 + $0x27f8] sm:$0xff] }
 0x875   : > { %14759 = vmatpush2.bf16.msra.mxu0 %v17098_v56  ;;  %v4486_v62 = vld [vmem:[%s25320_s5 + $0x2958] sm:$0xff]  ;;  %v17267_v39 = vcombine.high %v4438_v8, %v4442_v54 }
 0x876   : > { %14760 = vmatprep.subr.bf16.mxu0 %v17091_v41  ;;  %v4490_v35 = vld [vmem:[%s25320_s5 + $0x2978] sm:$0xff] }
 0x877   : > { %14782 = vmatpush1.bf16.msra.mxu1 %v17170_v14  ;;  %v4430_v47 = vld [vmem:[%s25320_s5 + $0x2798] sm:$0xff]  ;;  %v17314_v27 = vcombine.low %v4486_v62, %v4490_v35 }
 0x878   : > { %14783 = vmatprep.subr.bf16.mxu1 %v17163_v2  ;;  %v4434_v22 = vld [vmem:[%s25320_s5 + $0x27b8] sm:$0xff] }
 0x879   : > { %14761 = vmatpush2.bf16.msra.mxu0 %v17090_v23  ;;  %v4482_v37 = vld [vmem:[%s25320_s5 + $0x2938] sm:$0xff]  ;;  %v17259_v50 = vcombine.high %v4430_v47, %v4434_v22  ;;  %v17258_v43 = vcombine.low %v4430_v47, %v4434_v22 }
 0x87a   : > { %14762 = vmatprep.subr.bf16.mxu0 %v17083_v18  ;;  %v4426_v7 = vld [vmem:[%s25320_s5 + $0x2778] sm:$0xff] }
 0x87b   : > { %14784 = vmatpush1.bf16.msra.mxu1 %v17162_v33  ;;  %v4470_v32 = vld [vmem:[%s25320_s5 + $0x28d8] sm:$0xff] }
 0x87c   : > { %14785 = vmatprep.subr.bf16.mxu1 %v17155_v44  ;;  %v4474_v56 = vld [vmem:[%s25320_s5 + $0x28f8] sm:$0xff] }
 0x87d   : > { %14763 = vmatpush2.bf16.msra.mxu0 %v17082_v1  ;;  %v4414_v41 = vld [vmem:[%s25320_s5 + $0x2718] sm:$0xff]  ;;  %v17299_v24 = vcombine.high %v4470_v32, %v4474_v56  ;;  %v17298_v34 = vcombine.low %v4470_v32, %v4474_v56 }
 0x87e   : > { %14814 = vmatprep.subr.bf16.mxu0 %v17331_v61  ;;  %v4418_v14 = vld [vmem:[%s25320_s5 + $0x2738] sm:$0xff] }
 0x87f   : > { %14786 = vmatpush1.bf16.msra.mxu1 %v17154_v25  ;;  %v4462_v2 = vld [vmem:[%s25320_s5 + $0x2898] sm:$0xff]  ;;  %v17243_v29 = vcombine.high %v4414_v41, %v4418_v14  ;;  %v17242_v16 = vcombine.low %v4414_v41, %v4418_v14 }
 0x880   : > { %v14520_v42 = vpop.f32.mrf.mxu0  ;;  %14765 = vmatmul.mubr.bf16.vlgmr.msra.gmra.mxu0 %v20982_v12  ;;  %14787 = vmatprep.subr.bf16.mxu1 %v17147_v20  ;;  %v17315_v12 = vcombine.high %v4486_v62, %v4490_v35  ;;  %v4466_v23 = vld [vmem:[%s25320_s5 + $0x28b8] sm:$0xff] }
 0x881   : > { %v24784_v38 = vadd.f32 %v14520_v42, %v24699_v59  ;;  %14815 = vmatpush1.bf16.msra.mxu0 %v17330_v15  ;;  %14846 = vmatprep.mubr.bf16.mxu0 %v20984_v55  ;;  %v17266_v59 = vcombine.low %v4438_v8, %v4442_v54  ;;  %v4478_v55 = vld [vmem:[%s25320_s5 + $0x2918] sm:$0xff]  ;;  %v17291_v4 = vcombine.high %v4462_v2, %v4466_v23 }
 0x882   : > { %v14522_v13 = vpop.f32.mrf.mxu0  ;;  %14816 = vmatprep.subr.bf16.mxu0 %v17323_v36  ;;  %v17307_v46 = vcombine.high %v4478_v55, %v4482_v37  ;;  %v17306_v45 = vcombine.low %v4478_v55, %v4482_v37  ;;  %v4406_v18 = vld [vmem:[%s25320_s5 + $0x26d8] sm:$0xff]  ;;  %v17290_v0 = vcombine.low %v4462_v2, %v4466_v23 }
 0x883   : > { %v24794_v30 = vadd.f32 %v14522_v13, %v24708_v58  ;;  %14788 = vmatpush1.bf16.msra.mxu1 %v17146_v21  ;;  %v4422_v58 = vld [vmem:[%s25320_s5 + $0x2758] sm:$0xff] }
 0x884   : > { %v14524_v60 = vpop.f32.mrf.mxu0  ;;  %14789 = vmatprep.subr.bf16.mxu1 %v17267_v39  ;;  %v17251_v19 = vcombine.high %v4422_v58, %v4426_v7  ;;  %v17250_v63 = vcombine.low %v4422_v58, %v4426_v7  ;;  %v4410_v33 = vld [vmem:[%s25320_s5 + $0x26f8] sm:$0xff] }
 0x885   : > { %14817 = vmatpush1.bf16.msra.mxu0 %v17322_v26  ;;  %v4454_v44 = vld [vmem:[%s25320_s5 + $0x2858] sm:$0xff]  ;;  %v17235_v10 = vcombine.high %v4406_v18, %v4410_v33  ;;  %v17234_v52 = vcombine.low %v4406_v18, %v4410_v33 }
 0x886   : > { %v14525_v6 = vpop.f32.mrf.mxu0  ;;  %14818 = vmatprep.subr.bf16.mxu0 %v17315_v12  ;;  %v4458_v1 = vld [vmem:[%s25320_s5 + $0x2878] sm:$0xff] }
 0x887   : > { %14790 = vmatpush2.bf16.msra.mxu1 %v17266_v59  ;;  %v4398_v61 = vld [vmem:[%s25320_s5 + $0x2698] sm:$0xff]  ;;  %v17283_v28 = vcombine.high %v4454_v44, %v4458_v1  ;;  %v17282_v54 = vcombine.low %v4454_v44, %v4458_v1 }
 0x888   : > { %14791 = vmatprep.subr.bf16.mxu1 %v17259_v50  ;;  %v4402_v25 = vld [vmem:[%s25320_s5 + $0x26b8] sm:$0xff] }
 0x889   : > { %14819 = vmatpush1.bf16.msra.mxu0 %v17314_v27  ;;  %v4446_v20 = vld [vmem:[%s25320_s5 + $0x2818] sm:$0xff]  ;;  %v17227_v8 = vcombine.high %v4398_v61, %v4402_v25  ;;  %v17226_v35 = vcombine.low %v4398_v61, %v4402_v25 }
 0x88a   : > { %14820 = vmatprep.subr.bf16.mxu0 %v17307_v46  ;;  %v4450_v15 = vld [vmem:[%s25320_s5 + $0x2838] sm:$0xff] }
 0x88b   : > { %14792 = vmatpush2.bf16.msra.mxu1 %v17258_v43  ;;  %v4390_v36 = vld [vmem:[%s25320_s5 + $0x2658] sm:$0xff]  ;;  %v17275_v62 = vcombine.high %v4446_v20, %v4450_v15  ;;  %v17274_v47 = vcombine.low %v4446_v20, %v4450_v15 }
 0x88c   : > { %14793 = vmatprep.subr.bf16.mxu1 %v17251_v19  ;;  %v4394_v21 = vld [vmem:[%s25320_s5 + $0x2678] sm:$0xff] }
 0x88d   : > { %14821 = vmatpush1.bf16.msra.mxu0 %v17306_v45  ;;  %v4566_v42 = vld [vmem:[%s25320_s5 + $0x2bd8] sm:$0xff]  ;;  %v17219_v26 = vcombine.high %v4390_v36, %v4394_v21  ;;  %v17218_v59 = vcombine.low %v4390_v36, %v4394_v21 }
 0x88e   : > { %14822 = vmatprep.subr.bf16.mxu0 %v17299_v24  ;;  %v4570_v39 = vld [vmem:[%s25320_s5 + $0x2bf8] sm:$0xff] }
 0x88f   : > { %14794 = vmatpush2.bf16.msra.mxu1 %v17250_v63  ;;  %v4382_v22 = vld [vmem:[%s25320_s5 + $0x2618] sm:$0xff]  ;;  %v17395_v12 = vcombine.high %v4566_v42, %v4570_v39  ;;  %v17394_v50 = vcombine.low %v4566_v42, %v4570_v39 }
 0x890   : > { %14795 = vmatprep.subr.bf16.mxu1 %v17243_v29  ;;  %v4386_v13 = vld [vmem:[%s25320_s5 + $0x2638] sm:$0xff] }
 0x891   : > { %14823 = vmatpush1.bf16.msra.mxu0 %v17298_v34  ;;  %v4558_v55 = vld [vmem:[%s25320_s5 + $0x2b98] sm:$0xff]  ;;  %v17211_v60 = vcombine.high %v4382_v22, %v4386_v13  ;;  %v17210_v6 = vcombine.low %v4382_v22, %v4386_v13 }
 0x892   : > { %14824 = vmatprep.subr.bf16.mxu0 %v17291_v4  ;;  %v4562_v37 = vld [vmem:[%s25320_s5 + $0x2bb8] sm:$0xff] }
 0x893   : > { %14796 = vmatpush2.bf16.msra.mxu1 %v17242_v16  ;;  %v4630_v27 = vld [vmem:[%s25320_s5 + $0x2dd8] sm:$0xff]  ;;  %v17387_v7 = vcombine.high %v4558_v55, %v4562_v37  ;;  %v17386_v56 = vcombine.low %v4558_v55, %v4562_v37 }
 0x894   : > { %14797 = vmatprep.subr.bf16.mxu1 %v17235_v10  ;;  %v4634_v58 = vld [vmem:[%s25320_s5 + $0x2df8] sm:$0xff] }
 0x895   : > { %14825 = vmatpush1.bf16.msra.mxu0 %v17290_v0  ;;  %v4550_v46 = vld [vmem:[%s25320_s5 + $0x2b58] sm:$0xff]  ;;  %v17459_v32 = vcombine.high %v4630_v27, %v4634_v58  ;;  %v17458_v14 = vcombine.low %v4630_v27, %v4634_v58 }
 0x896   : > { %14826 = vmatprep.subr.bf16.mxu0 %v17283_v28  ;;  %v4554_v43 = vld [vmem:[%s25320_s5 + $0x2b78] sm:$0xff] }
 0x897   : > { %14798 = vmatpush2.bf16.msra.mxu1 %v17234_v52  ;;  %v4622_v19 = vld [vmem:[%s25320_s5 + $0x2d98] sm:$0xff]  ;;  %v17379_v41 = vcombine.high %v4550_v46, %v4554_v43  ;;  %v17378_v23 = vcombine.low %v4550_v46, %v4554_v43 }
 0x898   : > { %14799 = vmatprep.subr.bf16.mxu1 %v17227_v8  ;;  %v4626_v45 = vld [vmem:[%s25320_s5 + $0x2db8] sm:$0xff] }
 0x899   : > { %14827 = vmatpush1.bf16.msra.mxu0 %v17282_v54  ;;  %v4542_v24 = vld [vmem:[%s25320_s5 + $0x2b18] sm:$0xff]  ;;  %v17451_v2 = vcombine.high %v4622_v19, %v4626_v45  ;;  %v17450_v16 = vcombine.low %v4622_v19, %v4626_v45 }
 0x89a   : > { %14828 = vmatprep.subr.bf16.mxu0 %v17275_v62  ;;  %v4546_v63 = vld [vmem:[%s25320_s5 + $0x2b38] sm:$0xff] }
 0x89b   : > { %14800 = vmatpush2.bf16.msra.mxu1 %v17226_v35  ;;  %v4614_v29 = vld [vmem:[%s25320_s5 + $0x2d58] sm:$0xff]  ;;  %v17371_v33 = vcombine.high %v4542_v24, %v4546_v63 }
 0x89c   : > { %14801 = vmatprep.subr.bf16.mxu1 %v17219_v26  ;;  %v4618_v34 = vld [vmem:[%s25320_s5 + $0x2d78] sm:$0xff] }
 0x89d   : > { %14829 = vmatpush1.bf16.msra.mxu0 %v17274_v47  ;;  %v4534_v44 = vld [vmem:[%s25320_s5 + $0x2ad8] sm:$0xff]  ;;  %v17442_v52 = vcombine.low %v4614_v29, %v4618_v34 }
 0x89e   : > { %14830 = vmatprep.subr.bf16.mxu0 %v17395_v12  ;;  %v4538_v1 = vld [vmem:[%s25320_s5 + $0x2af8] sm:$0xff] }
 0x89f   : > { %14802 = vmatpush2.bf16.msra.mxu1 %v17218_v59  ;;  %v4610_v61 = vld [vmem:[%s25320_s5 + $0x2d38] sm:$0xff]  ;;  %v17363_v28 = vcombine.high %v4534_v44, %v4538_v1  ;;  %v17362_v54 = vcombine.low %v4534_v44, %v4538_v1 }
 0x8a0   : > { %14803 = vmatprep.subr.bf16.mxu1 %v17211_v60  ;;  %v4530_v20 = vld [vmem:[%s25320_s5 + $0x2ab8] sm:$0xff] }
 0x8a1   : > { %14831 = vmatpush2.bf16.msra.mxu0 %v17394_v50  ;;  %v4598_v36 = vld [vmem:[%s25320_s5 + $0x2cd8] sm:$0xff] }
 0x8a2   : > { %14832 = vmatprep.subr.bf16.mxu0 %v17387_v7  ;;  %v4602_v21 = vld [vmem:[%s25320_s5 + $0x2cf8] sm:$0xff] }
 0x8a3   : > { %14804 = vmatpush2.bf16.msra.mxu1 %v17210_v6  ;;  %v4518_v42 = vld [vmem:[%s25320_s5 + $0x2a58] sm:$0xff]  ;;  %v17427_v26 = vcombine.high %v4598_v36, %v4602_v21  ;;  %v17426_v59 = vcombine.low %v4598_v36, %v4602_v21 }
 0x8a4   : > { %14855 = vmatprep.subr.bf16.mxu1 %v17459_v32  ;;  %v4522_v39 = vld [vmem:[%s25320_s5 + $0x2a78] sm:$0xff] }
 0x8a5   : > { %14833 = vmatpush2.bf16.msra.mxu0 %v17386_v56  ;;  %v4590_v22 = vld [vmem:[%s25320_s5 + $0x2c98] sm:$0xff]  ;;  %v17347_v12 = vcombine.high %v4518_v42, %v4522_v39  ;;  %v17346_v50 = vcombine.low %v4518_v42, %v4522_v39 }
 0x8a6   : > { %v14561_v18 = vpop.f32.mrf.mxu1  ;;  %14806 = vmatmul.mubr.bf16.vlgmr.msra.gmra.mxu1 %v20956_v53  ;;  %14834 = vmatprep.subr.bf16.mxu0 %v17379_v41  ;;  %v17443_v53 = vcombine.high %v4614_v29, %v4618_v34  ;;  %v4594_v13 = vld [vmem:[%s25320_s5 + $0x2cb8] sm:$0xff] }
 0x8a7   : > { %v24906_v4 = vadd.f32 %v14561_v18, %v24784_v38  ;;  %14856 = vmatpush1.bf16.msra.mxu1 %v17458_v14  ;;  %14887 = vmatprep.mubr.bf16.mxu1 %v20958_v57  ;;  %v17370_v38 = vcombine.low %v4542_v24, %v4546_v63  ;;  %v4606_v57 = vld [vmem:[%s25320_s5 + $0x2d18] sm:$0xff]  ;;  %v17419_v60 = vcombine.high %v4590_v22, %v4594_v13 }
 0x8a8   : > { %v14563_v10 = vpop.f32.mrf.mxu1  ;;  %14857 = vmatprep.subr.bf16.mxu1 %v17451_v2  ;;  %v17435_v8 = vcombine.high %v4606_v57, %v4610_v61  ;;  %v17434_v35 = vcombine.low %v4606_v57, %v4610_v61  ;;  %v4510_v55 = vld [vmem:[%s25320_s5 + $0x2a18] sm:$0xff]  ;;  %v17418_v6 = vcombine.low %v4590_v22, %v4594_v13 }
 0x8a9   : > { %v24916_v0 = vadd.f32 %v14563_v10, %v24794_v30  ;;  %14835 = vmatpush2.bf16.msra.mxu0 %v17378_v23  ;;  %v4526_v30 = vld [vmem:[%s25320_s5 + $0x2a98] sm:$0xff] }
 0x8aa   : > { %v14565_v25 = vpop.f32.mrf.mxu1  ;;  %14836 = vmatprep.subr.bf16.mxu0 %v17371_v33  ;;  %v17355_v62 = vcombine.high %v4526_v30, %v4530_v20  ;;  %v17354_v47 = vcombine.low %v4526_v30, %v4530_v20  ;;  %v4514_v37 = vld [vmem:[%s25320_s5 + $0x2a38] sm:$0xff] }
 0x8ab   : > { %14858 = vmatpush1.bf16.msra.mxu1 %v17450_v16  ;;  %v4582_v27 = vld [vmem:[%s25320_s5 + $0x2c58] sm:$0xff]  ;;  %v17339_v7 = vcombine.high %v4510_v55, %v4514_v37  ;;  %v17338_v56 = vcombine.low %v4510_v55, %v4514_v37 }
 0x8ac   : > { %v14566_v15 = vpop.f32.mrf.mxu1  ;;  %14859 = vmatprep.subr.bf16.mxu1 %v17443_v53  ;;  %v4586_v58 = vld [vmem:[%s25320_s5 + $0x2c78] sm:$0xff] }
 0x8ad   : > { %14837 = vmatpush2.bf16.msra.mxu0 %v17370_v38  ;;  %v4758_v46 = vld [vmem:[%s25320_s5 + $0x31d8] sm:$0xff]  ;;  %v17411_v32 = vcombine.high %v4582_v27, %v4586_v58  ;;  %v17410_v14 = vcombine.low %v4582_v27, %v4586_v58 }
 0x8ae   : > { %14838 = vmatprep.subr.bf16.mxu0 %v17363_v28  ;;  %v4762_v43 = vld [vmem:[%s25320_s5 + $0x31f8] sm:$0xff] }
 0x8af   : > { %14860 = vmatpush1.bf16.msra.mxu1 %v17442_v52  ;;  %v4574_v19 = vld [vmem:[%s25320_s5 + $0x2c18] sm:$0xff]  ;;  %v17587_v41 = vcombine.high %v4758_v46, %v4762_v43  ;;  %v17586_v23 = vcombine.low %v4758_v46, %v4762_v43 }
 0x8b0   : > { %14861 = vmatprep.subr.bf16.mxu1 %v17435_v8  ;;  %v4578_v45 = vld [vmem:[%s25320_s5 + $0x2c38] sm:$0xff] }
 0x8b1   : > { %14839 = vmatpush2.bf16.msra.mxu0 %v17362_v54  ;;  %v4750_v24 = vld [vmem:[%s25320_s5 + $0x3198] sm:$0xff]  ;;  %v17403_v2 = vcombine.high %v4574_v19, %v4578_v45  ;;  %v17402_v33 = vcombine.low %v4574_v19, %v4578_v45 }
 0x8b2   : > { %14840 = vmatprep.subr.bf16.mxu0 %v17355_v62  ;;  %v4754_v63 = vld [vmem:[%s25320_s5 + $0x31b8] sm:$0xff] }
 0x8b3   : > { %14862 = vmatpush1.bf16.msra.mxu1 %v17434_v35  ;;  %v4694_v29 = vld [vmem:[%s25320_s5 + $0x2fd8] sm:$0xff]  ;;  %v17579_v18 = vcombine.high %v4750_v24, %v4754_v63  ;;  %v17578_v38 = vcombine.low %v4750_v24, %v4754_v63 }
 0x8b4   : > { %14863 = vmatprep.subr.bf16.mxu1 %v17427_v26  ;;  %v4698_v34 = vld [vmem:[%s25320_s5 + $0x2ff8] sm:$0xff] }
 0x8b5   : > { %14841 = vmatpush2.bf16.msra.mxu0 %v17354_v47  ;;  %v4742_v16 = vld [vmem:[%s25320_s5 + $0x3158] sm:$0xff]  ;;  %v17523_v10 = vcombine.high %v4694_v29, %v4698_v34 }
 0x8b6   : > { %14842 = vmatprep.subr.bf16.mxu0 %v17347_v12  ;;  %v4746_v44 = vld [vmem:[%s25320_s5 + $0x3178] sm:$0xff] }
 0x8b7   : > { %14864 = vmatpush1.bf16.msra.mxu1 %v17426_v59  ;;  %v4686_v57 = vld [vmem:[%s25320_s5 + $0x2f98] sm:$0xff] }
 0x8b8   : > { %14865 = vmatprep.subr.bf16.mxu1 %v17419_v60  ;;  %v4690_v61 = vld [vmem:[%s25320_s5 + $0x2fb8] sm:$0xff] }
 0x8b9   : > { %14843 = vmatpush2.bf16.msra.mxu0 %v17346_v50  ;;  %v4734_v52 = vld [vmem:[%s25320_s5 + $0x3118] sm:$0xff]  ;;  %v17515_v15 = vcombine.high %v4686_v57, %v4690_v61  ;;  %v17514_v21 = vcombine.low %v4686_v57, %v4690_v61 }
 0x8ba   : > { %14844 = vmatprep.subr.bf16.mxu0 %v17339_v7  ;;  %v4738_v30 = vld [vmem:[%s25320_s5 + $0x3138] sm:$0xff] }
 0x8bb   : > { %14866 = vmatpush1.bf16.msra.mxu1 %v17418_v6  ;;  %v4682_v8 = vld [vmem:[%s25320_s5 + $0x2f78] sm:$0xff]  ;;  %v17563_v36 = vcombine.high %v4734_v52, %v4738_v30  ;;  %v17562_v39 = vcombine.low %v4734_v52, %v4738_v30  ;;  %v14938_v52 = vmax.f32 %v21925_v11, 0.0  ;;  %v18444_v30 = vld [vmem:[%s25322_s7 + $0xb0] sm:$0xff]  }
 0x8bc   : > { %14867 = vmatprep.subr.bf16.mxu1 %v17411_v32  ;;  %v4726_v62 = vld [vmem:[%s25320_s5 + $0x30d8] sm:$0xff]  ;;  %v18449_v11 = vld [vmem:[%s25322_s7 + $0x70] sm:$0xff]  }
 0x8bd   : > { %14845 = vmatpush2.bf16.msra.mxu0 %v17338_v56  ;;  %v4730_v35 = vld [vmem:[%s25320_s5 + $0x30f8] sm:$0xff] }
 0x8be   : > { %14896 = vmatprep.subr.bf16.mxu0 %v17587_v41  ;;  %v4670_v26 = vld [vmem:[%s25320_s5 + $0x2f18] sm:$0xff]  ;;  %v17555_v22 = vcombine.high %v4726_v62, %v4730_v35  ;;  %v17554_v37 = vcombine.low %v4726_v62, %v4730_v35  ;;  %v18453_v62 = vld [vmem:[%s25322_s7 + $0x68] sm:$0xff]   ;;  %v18452_v35 = vld [vmem:[%s25322_s7 + $0xa0] sm:$0xff]  }
 0x8bf   : > { %14868 = vmatpush1.bf16.msra.mxu1 %v17410_v14  ;;  %v4674_v47 = vld [vmem:[%s25320_s5 + $0x2f38] sm:$0xff] }
 0x8c0   : > { %v14602_v1 = vpop.f32.mrf.mxu0  ;;  %14847 = vmatmul.mubr.bf16.vlgmr.msra.gmra.mxu0 %v21192_v31  ;;  %14869 = vmatprep.subr.bf16.mxu1 %v17403_v2  ;;  %v17571_v31 = vcombine.high %v4742_v16, %v4746_v44  ;;  %v4718_v12 = vld [vmem:[%s25320_s5 + $0x3098] sm:$0xff]  ;;  %v17499_v55 = vcombine.high %v4670_v26, %v4674_v47  ;;  %v17498_v58 = vcombine.low %v4670_v26, %v4674_v47 }
 0x8c1   : > { %v24992_v53 = vadd.f32 %v14602_v1, %v24906_v4  ;;  %14897 = vmatpush1.bf16.msra.mxu0 %v17586_v23  ;;  %14928 = vmatprep.mubr.bf16.mxu0 %v18575_v5  ;;  %v17522_v4 = vcombine.low %v4694_v29, %v4698_v34  ;;  %v17570_v5 = vcombine.low %v4742_v16, %v4746_v44  ;;  %v4722_v59 = vld [vmem:[%s25320_s5 + $0x30b8] sm:$0xff] }
 0x8c2   : > { %v14604_v25 = vpop.f32.mrf.mxu0  ;;  %14898 = vmatprep.subr.bf16.mxu0 %v17579_v18  ;;  %v4662_v60 = vld [vmem:[%s25320_s5 + $0x2ed8] sm:$0xff]  ;;  %v17547_v27 = vcombine.high %v4718_v12, %v4722_v59  ;;  %v17546_v43 = vcombine.low %v4718_v12, %v4722_v59  ;;  %v18460_v59 = vld [vmem:[%s25322_s7 + $0x90] sm:$0xff]  }
 0x8c3   : > { %v25002_v28 = vadd.f32 %v14604_v25, %v24916_v0  ;;  %14870 = vmatpush1.bf16.msra.mxu1 %v17402_v33  ;;  %v4678_v0 = vld [vmem:[%s25320_s5 + $0x2f58] sm:$0xff]  ;;  %v18443_v25 = vld [vmem:[%s25322_s7 + $0xf0] sm:$0xff]  }
 0x8c4   : > { %v14606_v20 = vpop.f32.mrf.mxu0  ;;  %14871 = vmatprep.subr.bf16.mxu1 %v17523_v10  ;;  %v17507_v42 = vcombine.high %v4678_v0, %v4682_v8  ;;  %v17506_v13 = vcombine.low %v4678_v0, %v4682_v8  ;;  %v4666_v50 = vld [vmem:[%s25320_s5 + $0x2ef8] sm:$0xff]  ;;  %v14940_v10 = vmax.f32 %v23184_v3, 0.0  ;;  %v18451_v8 = vld [vmem:[%s25322_s7 + $0xe0] sm:$0xff]  }
 0x8c5   : > { %14899 = vmatpush1.bf16.msra.mxu0 %v17578_v38  ;;  %v4710_v7 = vld [vmem:[%s25320_s5 + $0x3058] sm:$0xff]  ;;  %v17491_v46 = vcombine.high %v4662_v60, %v4666_v50  ;;  %v17490_v45 = vcombine.low %v4662_v60, %v4666_v50  ;;  %v18447_v20 = vld [vmem:[%s25322_s7 + $0xe8] sm:$0xff]   ;;  %v18465_v60 = vld [vmem:[%s25322_s7 + $0x50] sm:$0xff]  }
 0x8c6   : > { %v14607_v54 = vpop.f32.mrf.mxu0  ;;  %14900 = vmatprep.subr.bf16.mxu0 %v17571_v31  ;;  %v4714_v6 = vld [vmem:[%s25320_s5 + $0x3078] sm:$0xff]  ;;  %v14948_v31 = vpack.c.bf16 %v14940_v10, %v14940_v10  ;;  %v18464_v50 = vld [vmem:[%s25322_s7 + $0x88] sm:$0xff]  }
 0x8c7   : > { %14872 = vmatpush2.bf16.msra.mxu1 %v17522_v4  ;;  %v4654_v32 = vld [vmem:[%s25320_s5 + $0x2e98] sm:$0xff]  ;;  %v17539_v19 = vcombine.high %v4710_v7, %v4714_v6  ;;  %v17538_v63 = vcombine.low %v4710_v7, %v4714_v6  ;;  %v18469_v7 = vld [vmem:[%s25322_s7 + $0x48] sm:$0xff]   ;;  %v18468_v6 = vld [vmem:[%s25322_s7 + $0x80] sm:$0xff]  }
 0x8c8   : > { %14873 = vmatprep.subr.bf16.mxu1 %v17515_v15  ;;  %v4658_v56 = vld [vmem:[%s25320_s5 + $0x2eb8] sm:$0xff]  ;;  %v14946_v15 = vpack.c.bf16 %v14938_v52, %v14938_v52  ;;  %v18477_v10 = vld [vmem:[%s25322_s7 + $0x168] sm:$0xff]  }
 0x8c9   : > { %14901 = vmatpush1.bf16.msra.mxu0 %v17570_v5  ;;  %v4702_v41 = vld [vmem:[%s25320_s5 + $0x3018] sm:$0xff]  ;;  %v17483_v24 = vcombine.high %v4654_v32, %v4658_v56  ;;  %v17482_v34 = vcombine.low %v4654_v32, %v4658_v56  ;;  %v18448_v5 = vld [vmem:[%s25322_s7 + $0xa8] sm:$0xff]   ;;  %v18471_v32 = vld [vmem:[%s25322_s7 + $0x40] sm:$0xff]  }
 0x8ca   : > { %14902 = vmatprep.subr.bf16.mxu0 %v17563_v36  ;;  %v4706_v14 = vld [vmem:[%s25320_s5 + $0x3038] sm:$0xff]  ;;  %v18450_v36 = vld [vmem:[%s25322_s7 + $0x30] sm:$0xff]  }
 0x8cb   : > { %14874 = vmatpush2.bf16.msra.mxu1 %v17514_v21  ;;  %v4646_v2 = vld [vmem:[%s25320_s5 + $0x2e58] sm:$0xff]  ;;  %v17531_v29 = vcombine.high %v4702_v41, %v4706_v14  ;;  %v17530_v33 = vcombine.low %v4702_v41, %v4706_v14  ;;  %v14942_v14 = vmax.f32 %v24497_v17, 0.0 }
 0x8cc   : > { %14875 = vmatprep.subr.bf16.mxu1 %v17507_v42  ;;  %v4650_v23 = vld [vmem:[%s25320_s5 + $0x2e78] sm:$0xff] }
 0x8cd   : > { %14903 = vmatpush1.bf16.msra.mxu0 %v17562_v39  ;;  %v17475_v18 = vcombine.high %v4646_v2, %v4650_v23  ;;  %v4638_v16 = vld [vmem:[%s25320_s5 + $0x2e18] sm:$0xff]  ;;  %v17474_v38 = vcombine.low %v4646_v2, %v4650_v23  ;;  %v18454_v39 = vld [vmem:[%s25322_s7 + $0x28] sm:$0xff]  }
 0x8ce   : > { %14904 = vmatprep.subr.bf16.mxu0 %v17555_v22  ;;  %v4642_v44 = vld [vmem:[%s25320_s5 + $0x2e38] sm:$0xff]  ;;  %v18459_v22 = vld [vmem:[%s25322_s7 + $0xd0] sm:$0xff]  }
 0x8cf   : > { %14876 = vmatpush2.bf16.msra.mxu1 %v17506_v13  ;;  %v18441_v1 = vld [vmem:[%s25322_s7 + $0xf8] sm:$0xff]   ;;  %v17467_v57 = vcombine.high %v4638_v16, %v4642_v44  ;;  %v17466_v4 = vcombine.low %v4638_v16, %v4642_v44  ;;  %v18458_v13 = vld [vmem:[%s25322_s7 + $0x20] sm:$0xff]   ;;  %v18491_v44 = vld [vmem:[%s25322_s7 + $0x1f0] sm:$0xff]  }
 0x8d0   : > { %14877 = vmatprep.subr.bf16.mxu1 %v17499_v55  ;;  %v18442_v61 = vld [vmem:[%s25322_s7 + $0xb8] sm:$0xff]   ;;  %v18463_v55 = vld [vmem:[%s25322_s7 + $0xc8] sm:$0xff]  }
 0x8d1   : > { %14905 = vmatpush1.bf16.msra.mxu0 %v17554_v37  ;;  %v18445_v3 = vld [vmem:[%s25322_s7 + $0x78] sm:$0xff]  }
 0x8d2   : > { %14906 = vmatprep.subr.bf16.mxu0 %v17547_v27  ;;  %v18455_v42 = vld [vmem:[%s25322_s7 + $0xd8] sm:$0xff]   ;;  %v18467_v27 = vld [vmem:[%s25322_s7 + $0xc0] sm:$0xff]  }
 0x8d3   : > { %14878 = vmatpush2.bf16.msra.mxu1 %v17498_v58  ;;  %v18456_v47 = vld [vmem:[%s25322_s7 + $0x98] sm:$0xff]   ;;  %v18466_v58 = vld [vmem:[%s25322_s7 + $0x10] sm:$0xff]  }
 0x8d4   : > { %14879 = vmatprep.subr.bf16.mxu1 %v17491_v46  ;;  %v18461_v12 = vld [vmem:[%s25322_s7 + $0x58] sm:$0xff]   ;;  %v14939_v46 = vmax.f32 %v23175_v49, 0.0  ;;  %v14937_v49 = vmax.f32 %v21915_v40, 0.0 }
 0x8d5   : > { %14907 = vmatpush1.bf16.msra.mxu0 %v17546_v43  ;;  %v18462_v37 = vld [vmem:[%s25322_s7 + $0x18] sm:$0xff]   ;;  %v18470_v43 = vld [vmem:[%s25322_s7 + $0x8] sm:$0xff]  }
 0x8d6   : > { %14908 = vmatprep.subr.bf16.mxu0 %v17539_v19  ;;  %v14947_v56 = vpack.c.bf16 %v14939_v46, %v14939_v46  ;;  %v18472_v19 = vld [vmem:[%s25322_s7] sm:$0xff]   ;;  %v18473_v41 = vld [vmem:[%s25322_s7 + $0x178] sm:$0xff]   ;;  %v14945_v40 = vpack.c.bf16 %v14937_v49, %v14937_v49 }
 0x8d7   : > { %14880 = vmatpush2.bf16.msra.mxu1 %v17490_v45  ;;  %v18474_v23 = vld [vmem:[%s25322_s7 + $0x138] sm:$0xff]  }
 0x8d8   : > { %14881 = vmatprep.subr.bf16.mxu1 %v17483_v24  ;;  %v18489_v17 = vld [vmem:[%s25322_s7 + $0x1f8] sm:$0xff]  }
 0x8d9   : > { %14909 = vmatpush1.bf16.msra.mxu0 %v17538_v63  ;;  %v18490_v16 = vld [vmem:[%s25322_s7 + $0x1b8] sm:$0xff]  }
 0x8da   : > { %14910 = vmatprep.subr.bf16.mxu0 %v17531_v29  ;;  %v18481_v52 = vld [vmem:[%s25322_s7 + $0x158] sm:$0xff]  }
 0x8db   : > { %14882 = vmatpush2.bf16.msra.mxu1 %v17482_v34  ;;  %v18475_v34 = vld [vmem:[%s25322_s7 + $0x170] sm:$0xff]  }
 0x8dc   : > { %14883 = vmatprep.subr.bf16.mxu1 %v17475_v18  ;;  %v14950_v18 = vpack.c.bf16 %v14942_v14, %v14942_v14 }
 0x8dd   : > { %14911 = vmatpush1.bf16.msra.mxu0 %v17530_v33 }
 0x8de   : > { %17859 = vmatprep.subr.bf16.mxu0 %v18441_v1  ;;  %v18476_v1 = vld [vmem:[%s25322_s7 + $0x130] sm:$0xff]  }
 0x8df   : > { %14884 = vmatpush2.bf16.msra.mxu1 %v17474_v38  ;;  %v18492_v38 = vld [vmem:[%s25322_s7 + $0x1b0] sm:$0xff]  }
 0x8e0   : > { %14929 = vmatmul.mubr.bf16.vlgmr.msra.gmra.mxu0 %v21299_v9  ;;  %14885 = vmatprep.subr.bf16.mxu1 %v17467_v57  ;;  %v18446_v9 = vld [vmem:[%s25322_s7 + $0x38] sm:$0xff]   ;;  %v18493_v57 = vld [vmem:[%s25322_s7 + $0x1e8] sm:$0xff]  }
 0x8e1   : > { %17860 = vmatpush3.bf16.msra.mxu0 %v18442_v61  ;;  %15538 = vmatprep.mubr.bf16.mxu0 %v14948_v31  ;;  %v18478_v61 = vld [vmem:[%s25322_s7 + $0x128] sm:$0xff]  }
 0x8e2   : > { %17861 = vmatprep.subr.bf16.mxu0 %v18443_v25  ;;  %v18479_v25 = vld [vmem:[%s25322_s7 + $0x160] sm:$0xff]   ;;  %v18494_v31 = vld [vmem:[%s25322_s7 + $0x1a8] sm:$0xff]  }
 0x8e3   : > { %14886 = vmatpush2.bf16.msra.mxu1 %v17466_v4  ;;  %v18495_v4 = vld [vmem:[%s25322_s7 + $0x1e0] sm:$0xff]  }
 0x8e4   : > { %17837 = vmatprep.subr.bf16.mxu1 %v18445_v3  ;;  %v18480_v3 = vld [vmem:[%s25322_s7 + $0x120] sm:$0xff]  }
 0x8e5   : > { %17862 = vmatpush3.bf16.msra.mxu0 %v18444_v30  ;;  %v18496_v30 = vld [vmem:[%s25322_s7 + $0x1a0] sm:$0xff]  }
 0x8e6   : > { %v14643_v0 = vpop.f32.mrf.mxu1  ;;  %14888 = vmatmul.mubr.bf16.vlgmr.msra.gmra.mxu1 %v21170_v48  ;;  %17863 = vmatprep.subr.bf16.mxu0 %v18447_v20  ;;  %v18482_v20 = vld [vmem:[%s25322_s7 + $0x118] sm:$0xff]  }
 0x8e7   : > { %v14644_v54 = vadd.f32 %v14643_v0, %v24992_v53  ;;  %17838 = vmatpush3.bf16.msra.mxu1 %v18446_v9  ;;  %15498 = vmatprep.mubr.bf16.mxu1 %v14946_v15  ;;  %v18483_v9 = vld [vmem:[%s25322_s7 + $0x150] sm:$0xff]   ;;  %v18485_v15 = vld [vmem:[%s25322_s7 + $0x148] sm:$0xff]   ;;  %v18487_v0 = vld [vmem:[%s25322_s7 + $0x140] sm:$0xff]  }
 0x8e8   : > { %v14645_v21 = vpop.f32.mrf.mxu1  ;;  %17839 = vmatprep.subr.bf16.mxu1 %v18449_v11  ;;  %v18484_v11 = vld [vmem:[%s25322_s7 + $0x110] sm:$0xff]  }
 0x8e9   : > { %v14646_v48 = vadd.f32 %v14645_v21, %v25002_v28  ;;  %17864 = vmatpush3.bf16.msra.mxu0 %v18448_v5  ;;  %v18457_v28 = vld [vmem:[%s25322_s7 + $0x60] sm:$0xff]   ;;  %v18486_v5 = vld [vmem:[%s25322_s7 + $0x108] sm:$0xff]   ;;  %v18498_v21 = vld [vmem:[%s25322_s7 + $0x198] sm:$0xff]  }
 0x8ea   : > { %v14647_v53 = vpop.f32.mrf.mxu1  ;;  %17865 = vmatprep.subr.bf16.mxu0 %v18451_v8  ;;  %v18488_v8 = vld [vmem:[%s25322_s7 + $0x100] sm:$0xff]  }
 0x8eb   : > { %17840 = vmatpush3.bf16.msra.mxu1 %v18450_v36  ;;  %v18497_v36 = vld [vmem:[%s25322_s7 + $0x1d8] sm:$0xff]  }
 0x8ec   : > { %v14648_v26 = vpop.f32.mrf.mxu1  ;;  %17841 = vmatprep.subr.bf16.mxu1 %v18453_v62 }
 0x8ed   : > { %17866 = vmatpush3.bf16.msra.mxu0 %v18452_v35  ;;  %v18499_v26 = vld [vmem:[%s25322_s7 + $0x1d0] sm:$0xff]  }
 0x8ee   : > { %17867 = vmatprep.subr.bf16.mxu0 %v18455_v42 }
 0x8ef   : > { %17842 = vmatpush3.bf16.msra.mxu1 %v18454_v39 }
 0x8f0   : > { %17843 = vmatprep.subr.bf16.mxu1 %v18457_v28  ;;  %v18500_v28 = vld [vmem:[%s25322_s7 + $0x190] sm:$0xff]  }
 0x8f1   : > { %17868 = vmatpush3.bf16.msra.mxu0 %v18456_v47  ;;  %v18501_v47 = vld [vmem:[%s25322_s7 + $0x1c8] sm:$0xff]  }
 0x8f2   : > { %17869 = vmatprep.subr.bf16.mxu0 %v18459_v22  ;;  %v18502_v22 = vld [vmem:[%s25322_s7 + $0x188] sm:$0xff]  }
 0x8f3   : > { %17844 = vmatpush3.bf16.msra.mxu1 %v18458_v13  ;;  %v18503_v13 = vld [vmem:[%s25322_s7 + $0x1c0] sm:$0xff]  }
 0x8f4   : > { %17845 = vmatprep.subr.bf16.mxu1 %v18461_v12  ;;  %v18504_v12 = vld [vmem:[%s25322_s7 + $0x180] sm:$0xff]  }
 0x8f5   : > { %17870 = vmatpush3.bf16.msra.mxu0 %v18460_v59 }
 0x8f6   : > { %17871 = vmatprep.subr.bf16.mxu0 %v18463_v55 }
 0x8f7   : > { %17846 = vmatpush3.bf16.msra.mxu1 %v18462_v37 }
 0x8f8   : > { %17847 = vmatprep.subr.bf16.mxu1 %v18465_v60 }
 0x8f9   : > { %17872 = vmatpush3.bf16.msra.mxu0 %v18464_v50 }
 0x8fa   : > { %17873 = vmatprep.subr.bf16.mxu0 %v18467_v27 }
 0x8fb   : > { %17848 = vmatpush3.bf16.msra.mxu1 %v18466_v58 }
 0x8fc   : > { %17849 = vmatprep.subr.bf16.mxu1 %v18469_v7 }
 0x8fd   : > { %17874 = vmatpush3.bf16.msra.mxu0 %v18468_v6 }
 0x8fe   : > { %17903 = vmatprep.subr.bf16.mxu0 %v18489_v17 }
 0x8ff   : > { %17850 = vmatpush3.bf16.msra.mxu1 %v18470_v43 }
 0x900   : > { %v14684_v45 = vpop.f32.mrf.mxu0  ;;  %15539 = vmatmul.mubr.bf16.vlgmr.msra.gmra.mxu0 %v14947_v56  ;;  %17851 = vmatprep.subr.bf16.mxu1 %v18471_v32 }
 0x901   : > { %v25178_v24 = vadd.f32 %v14684_v45, %v14644_v54  ;;  %17904 = vmatpush3.bf16.msra.mxu0 %v18490_v16  ;;  %v14941_v54 = vmax.f32 %v24487_v51, 0.0 }
 0x902   : > { %v14686_v63 = vpop.f32.mrf.mxu0  ;;  %17905 = vmatprep.subr.bf16.mxu0 %v18491_v44 }
 0x903   : > { %v25180_v2 = vadd.f32 %v14686_v63, %v14646_v48  ;;  %17852 = vmatpush3.bf16.msra.mxu1 %v18472_v19  ;;  %v14949_v62 = vpack.c.bf16 %v14941_v54, %v14941_v54 }
 0x904   : > { %v14688_v29 = vpop.f32.mrf.mxu0  ;;  %17881 = vmatprep.subr.bf16.mxu1 %v18473_v41 }
 0x905   : > { %17906 = vmatpush3.bf16.msra.mxu0 %v18492_v38 }
 0x906   : > { %v14689_v33 = vpop.f32.mrf.mxu0  ;;  %15499 = vmatmul.mubr.bf16.vlgmr.msra.gmra.mxu1 %v14945_v40  ;;  %17907 = vmatprep.subr.bf16.mxu0 %v18493_v57 }
 0x907   : > { %17882 = vmatpush3.bf16.msra.mxu1 %v18474_v23  ;;  %15578 = vmatprep.mubr.bf16.mxu1 %v14950_v18 }
 0x908   : > { %17883 = vmatprep.subr.bf16.mxu1 %v18475_v34 }
 0x909   : > { %17908 = vmatpush3.bf16.msra.mxu0 %v18494_v31 }
 0x90a   : > { %17909 = vmatprep.subr.bf16.mxu0 %v18495_v4 }
 0x90b   : > { %17884 = vmatpush3.bf16.msra.mxu1 %v18476_v1 }
 0x90c   : > { %17885 = vmatprep.subr.bf16.mxu1 %v18477_v10 }
 0x90d   : > { %17910 = vmatpush3.bf16.msra.mxu0 %v18496_v30  ;;  %v15081_v30 = vld [vmem:[%s25323_s8] sm:$0x1] }
 0x90e   : > { %17911 = vmatprep.subr.bf16.mxu0 %v18497_v36 }
 0x90f   : > { %17886 = vmatpush3.bf16.msra.mxu1 %v18478_v61 }
 0x910   : > { %17887 = vmatprep.subr.bf16.mxu1 %v18479_v25 }
 0x911   : > { %17912 = vmatpush3.bf16.msra.mxu0 %v18498_v21 }
 0x912   : > { %17913 = vmatprep.subr.bf16.mxu0 %v18499_v26 }
 0x913   : > { %17888 = vmatpush3.bf16.msra.mxu1 %v18480_v3 }
 0x914   : > { %17889 = vmatprep.subr.bf16.mxu1 %v18481_v52 }
 0x915   : > { %17914 = vmatpush3.bf16.msra.mxu0 %v18500_v28 }
 0x916   : > { %17915 = vmatprep.subr.bf16.mxu0 %v18501_v47 }
 0x917   : > { %17890 = vmatpush3.bf16.msra.mxu1 %v18482_v20 }
 0x918   : > { %17891 = vmatprep.subr.bf16.mxu1 %v18483_v9 }
 0x919   : > { %17916 = vmatpush3.bf16.msra.mxu0 %v18502_v22 }
 0x91a   : > { %17917 = vmatprep.subr.bf16.mxu0 %v18503_v13 }
 0x91b   : > { %17892 = vmatpush3.bf16.msra.mxu1 %v18484_v11 }
 0x91c   : > { %17893 = vmatprep.subr.bf16.mxu1 %v18485_v15 }
 0x91d   : > { %17918 = vmatpush3.bf16.msra.mxu0 %v18504_v12 }
 0x91f   : > { %17894 = vmatpush3.bf16.msra.mxu1 %v18486_v5 }
 0x920   : > { %17895 = vmatprep.subr.bf16.mxu1 %v18487_v0 }
 0x923   : > { %17896 = vmatpush3.bf16.msra.mxu1 %v18488_v8 }
 0x926   : > { %v14725_v48 = vpop.f32.mrf.mxu1  ;;  %15579 = vmatmul.mubr.bf16.vlgmr.msra.gmra.mxu1 %v14949_v62 }
 0x927   : > { %v14726_v35 = vadd.f32 %v14725_v48, %v25178_v24 }
 0x928   : > { %v14727_v53 = vpop.f32.mrf.mxu1 }
 0x929   : > { %v14728_v51 = vadd.f32 %v14727_v53, %v25180_v2 }
 0x92a   : > { %v14729_v42 = vpop.f32.mrf.mxu1 }
 0x92c   : > { %v14730_v39 = vpop.f32.mrf.mxu1 }
 0x940   : > { %v14766_v59 = vpop.f32.mrf.mxu0 }
 0x941   : > { %v14767_v55 = vadd.f32 %v14766_v59, %v14726_v35 }
 0x942   : > { %v14768_v37 = vpop.f32.mrf.mxu0 }
 0x943   : > { %v14769_v60 = vadd.f32 %v14768_v37, %v14728_v51 }
 0x944   : > { %v14770_v50 = vpop.f32.mrf.mxu0 }
 0x946   : > { %v14771_v27 = vpop.f32.mrf.mxu0 }
 0x966   : > { %v14807_v58 = vpop.f32.mrf.mxu1 }
 0x967   : > { %v14808_v41 = vadd.f32 %v14807_v58, %v14767_v55 }
 0x968   : > { %v14809_v7 = vpop.f32.mrf.mxu1 }
 0x969   : > { %v14810_v24 = vadd.f32 %v14809_v7, %v14769_v60 }
 0x96a   : > { %v14811_v6 = vpop.f32.mrf.mxu1 }
 0x96c   : > { %v14812_v46 = vpop.f32.mrf.mxu1 }
 0x980   : > { %v14848_v43 = vpop.f32.mrf.mxu0 }
 0x981   : > { %v14849_v63 = vadd.f32 %v14848_v43, %v14808_v41 }
 0x982   : > { %v14850_v32 = vpop.f32.mrf.mxu0 }
 0x983   : > { %v14851_v40 = vadd.f32 %v14850_v32, %v14810_v24 }
 0x984   : > { %v14852_v56 = vpop.f32.mrf.mxu0 }
 0x986   : > { %v14853_v19 = vpop.f32.mrf.mxu0 }
 0x9a0   : > { %v14930_v49 = vpop.f32.mrf.mxu0 }
 0x9a2   : > { %v14932_v45 = vpop.f32.mrf.mxu0 }
 0x9a4   : > { %v14934_v14 = vpop.f32.mrf.mxu0 }
 0x9a6   : > { %v14889_v2 = vpop.f32.mrf.mxu1  ;;  %v14935_v23 = vpop.f32.mrf.mxu0 }
 0x9a7   : > { %v14890_v29 = vadd.f32 %v14889_v2, %v14849_v63 }
 0x9a8   : > { %v14891_v34 = vpop.f32.mrf.mxu1 }
 0x9a9   : > { %v14931_v18 = vadd.f32 %v14930_v49, %v14890_v29  ;;  %v14892_v33 = vadd.f32 %v14891_v34, %v14851_v40 }
 0x9aa   : > { %v14893_v17 = vpop.f32.mrf.mxu1 }
 0x9ab   : > { %v14933_v16 = vadd.f32 %v14932_v45, %v14892_v33  ;;  %v14943_v44 = vmax.f32 %v14931_v18, 0.0 }
 0x9ac   : > { %v14894_v1 = vpop.f32.mrf.mxu1 }
 0x9ad   : > { %v14944_v10 = vmax.f32 %v14933_v16, 0.0  ;;  %v14951_v57 = vpack.c.bf16 %v14943_v44, %v14943_v44 }
 0x9af   : > { %v14952_v38 = vpack.c.bf16 %v14944_v10, %v14944_v10 }
 0x9b1   : > { %15618 = vmatprep.mubr.bf16.mxu0 %v14952_v38 }
 0x9b2   : > { %15619 = vmatmul.mubr.bf16.vlgmr.msra.gmra.mxu0 %v14951_v57 }
 0x9c0   : > { %v17875_v61 = vpop.f32.mrf.mxu0 }
 0x9c2   : > { %v17876_v25 = vpop.f32.mrf.mxu0 }
 0x9c3   : > { %v17877_v31 = vadd.f32 %v17876_v25, %v17875_v61 }
 0x9c4   : > { %v17878_v4 = vpop.f32.mrf.mxu0 }
 0x9c6   : > { %v17853_v3 = vpop.f32.mrf.mxu1  ;;  %v17879_v52 = vpop.f32.mrf.mxu0 }
 0x9c8   : > { %v17854_v20 = vpop.f32.mrf.mxu1 }
 0x9c9   : > { %v17855_v9 = vadd.f32 %v17854_v20, %v17853_v3 }
 0x9ca   : > { %v17856_v11 = vpop.f32.mrf.mxu1 }
 0x9cb   : > { %v15501_v15 = vadd.f32 %v17855_v9, %v15081_v30 }
 0x9cc   : > { %v17857_v5 = vpop.f32.mrf.mxu1 }
 0x9cd   : > { %v15541_v0 = vadd.f32 %v17877_v31, %v15501_v15 }
 0x9e6   : > { %v17897_v8 = vpop.f32.mrf.mxu1 }
 0x9e8   : > { %v17898_v54 = vpop.f32.mrf.mxu1 }
 0x9e9   : > { %v17899_v36 = vadd.f32 %v17898_v54, %v17897_v8 }
 0x9ea   : > { %v17900_v21 = vpop.f32.mrf.mxu1 }
 0x9eb   : > { %v15581_v62 = vadd.f32 %v17899_v36, %v15541_v0 }
 0x9ec   : > { %v17901_v48 = vpop.f32.mrf.mxu1 }
 0xa72   : > { %v17919_v35 = vpop.f32.mrf.mxu0 }
 0xa74   : > { %v17920_v53 = vpop.f32.mrf.mxu0 }
 0xa75   : > { %v17921_v51 = vadd.f32 %v17920_v53, %v17919_v35 }
 0xa76   : > { %v17922_v42 = vpop.f32.mrf.mxu0 }
 0xa77   : > { %v15621_v39 = vadd.f32 %v17921_v51, %v15581_v62 }
 0xa78   : > { %v17923_v26 = vpop.f32.mrf.mxu0 }
 0xa79   : > { %v15627_v28 = vsel %vm15626_vm1, %v15621_v39, -inf }
 0xa7a   : > { %15628 = vmax.xlane.f32.xlu0 %v15627_v28 }
 0xb03   : > { %v15629_v47 = vpop.xlane.xlu0 %15628 }
 0xb04   : > { %v15630_v22 = vsub.f32 %v15621_v39, %v15629_v47 }
 0xb06   : > { %v15631_v13 = vmul.f32 1.442695, %v15630_v22 }
 0xb08   : > { %18505 = vpow2.f32 %v15631_v13 }
 0xb15   : > { %v18506_v12 = vpop.eup %18505 }
 0xb16   : > { %v15633_v59 = vsel %vm15626_vm1, %v18506_v12, 0.0 }
 0xb17   : > { %15634 = vadd.xlane.f32.xlu0 %v15633_v59 }
 0xba0   : > { %v15635_v55 = vpop.xlane.xlu0 %15634 }
 0xba1   : > { %18507 = vrcp.f32 %v15635_v55 }
 0xbae   : > { %v18508_v37 = vpop.eup %18507 }
 0xbaf   : > { %v15637_v60 = vmul.f32 %v18508_v37, %v18506_v12 }
 0xbb1   : > { %15638 = vst [vmem:[%s324_s26] sm:$0x1] %v15637_v60 }
 0xbb2   : > { %18525 = shalt.err (!%p18522_p3)
}
 0xbb3   : > { %s18526_s23 = scalar_lea.hbm %s15650_s14, 16  ;;  %s18530_s26 = scalar_lea.hbm %s25324_s9, 32 }
 0xbb4   : > { %p18527_p4 = scmp.ne.s32.totalorder %s15650_s14, %s18526_s23  ;;  %p18531_p9 = scmp.lt.s32.totalorder %s15650_s14, %s25324_s9 }
 0xbb5   : > { %p18532_p10 = scmp.lt.s32.totalorder %s18530_s26, %s18526_s23 }
 0xbb6   : > { %p18528_p7 = pnand %p18527_p4, %p18665_p5 }
 0xbb7   : > { %p18533_p11 = por %p18532_p10, %p18531_p9 }
 0xbb8   : > { %p18529_p8 = pneg %p18528_p7 }
 0xbba   : > { %p18534_p12 = pnand %p18533_p11, %p18529_p8 }
 0xbbc   : > { %18537 = shalt.err (!%p18534_p12)
}
 0xbbd   : > { %18290 = dma.vmem_to_hbm [thread:$0]  (%p18665_p5), %s15653_s27, 16, %s15650_s14, %s15640_s16  }
 0xbbe PF: > { %p18296_p13 = scmp.ge.s32.totalorder %s18572_s12, 2  ;;  %s15664_s17 = sand.u32 1, %s18560_s30  }
 0xbbf   : > { %s15665_s21 = scalar_lea.sflag [#allocation4], %s15664_s17 }
 0xbc0   : > { %p18293_p0 = pnand %p18296_p13, %p18669_p6 }
 0xbc2   : > { %p18294_p1 = pneg %p18293_p0 }
 0xbc4   : > { %18555 = dma.done.wait (%p18294_p1), %s15665_s21, 16  }
 0xbc5   : > { %18557 = vsyncadd (%p18294_p1), %s15665_s21, 4294967280  ;;  %p19_p2 = scmp.ge.s32.totalorder %s18652_s15, 4   ;;  %s25393_s30 = smov %s18564_s10 }
 0xbc6   : > { %s25394_s10 = smov %s18568_s11  ;;  %s25395_s11 = smov %s18663_s18 }
 0xbc7   : > { %s25396_s12 = smov %s18652_s15  ;;  %21 = sbr.rel (!%p19_p2) target bundleno = 3 (0x3), region = 99 }
 0xbcc   :  { %15669 = vsyncpa [#allocation4], 1 }
 0xbcd   :  { %15671 = vsyncpa [#allocation4 + $0x1], 1 }

</bundles_post_ra>
